<compile_context>
chip_gen: v7x
topology: tpu7x:2x2x1
jax: 0.10.0
libtpu: 0.0.40
codegen_flags: <defaults>
</compile_context>

<pallas_src>
import jax
import jax.numpy as jnp
from jax import lax
from jax.experimental import pallas as pl
from jax.experimental.pallas import tpu as pltpu

# ---- small-shape configuration (architecture mirrors RoBERTEnsemble) --------
B = 16       # batch (toy)
S = 8        # sequence length
H = 32       # hidden_size      (768 in the original)
D1 = 64      # W_s1_bert output (1050 in the original)
R = 8        # W_s2_bert output (60 in the original)
FC = 128     # fc_layer output  (2000 in the original)
C = 2        # num labels
VOCAB = 100

B_TILE = 8           # batch rows per program (grid = B // B_TILE, "parallel")
BL = 2 * B_TILE      # rows per program: both ensemble branches of the batch tile
assert B % B_TILE == 0

# Set to jnp.bfloat16 at production sizes on v6e/v7x (keep f32 accumulation and keep
# the recurrent h @ W_hh matmul in f32).
MXU_DTYPE = jnp.float32


def _dot(a, b, dtype=MXU_DTYPE):
    return jnp.dot(a.astype(dtype), b.astype(dtype),
                   preferred_element_type=jnp.float32)


# ----------------------------- fused Pallas kernel ----------------------------
def fused_kernel(x_ref, wih_ref, whh_ref, bl_ref,
                 ws1_ref, bs1_ref, ws2_ref, bs2_ref,
                 wfc_ref, bfc_ref, wcls_ref, bcls_ref,
                 out_ref, lh_scr):
    """Fused LSTM + attention_net_bert + bmm + fc_layer + classifier (per batch tile).

    x_ref:    (2, B_TILE, S, H)  both ensemble branches of this batch tile
    wih_ref:  (H, 4H) W_ih^T   whh_ref: (H, 4H) W_hh^T   bl_ref: (1, 4H) b_ih+b_hh
    ws1_ref:  (H, D1)  bs1_ref: (1, D1)
    ws2_ref:  (D1, R)  bs2_ref: (1, R)
    wfc_ref:  (R*H, FC)  flat fc weight, row index = r*H + h
    bfc_ref:  (1, FC)
    wcls_ref: (FC, C)  bcls_ref: (1, C)
    out_ref:  (B_TILE, C)  averaged ensemble logits for this batch tile
    lh_scr:   (BL, S, H)   batch-major LSTM outputs (VMEM scratch)
    """
    # ---- LSTM: input projection hoisted out of the recurrence ----------------
    x2 = x_ref[...].reshape(BL * S, H)                       # rows: [branch, b, s]
    xproj = (_dot(x2, wih_ref[...]) + bl_ref[...]).reshape(BL, S, 4 * H)

    whh = whh_ref[...]
    h = jnp.zeros((BL, H), jnp.float32)
    c = jnp.zeros((BL, H), jnp.float32)
    for t in range(S):   # fully unrolled at toy S; use lax.fori_loop(unroll=4..8) at prod S
        gates = xproj[:, t, :] + _dot(h, whh, dtype=jnp.float32)  # recurrent matmul stays f32
        i = jax.nn.sigmoid(gates[:, 0 * H:1 * H])
        f = jax.nn.sigmoid(gates[:, 1 * H:2 * H])
        g = jnp.tanh(gates[:, 2 * H:3 * H])
        o = jax.nn.sigmoid(gates[:, 3 * H:4 * H])
        c = f * c + i * g
        h = o * jnp.tanh(c)
        lh_scr[:, t, :] = h                                  # batch-major store

    lh = lh_scr[...]                                         # (BL, S, H)

    # ---- attention_net: all (BL*S) rows at once, fully batched ---------------
    s1 = jnp.tanh(_dot(lh.reshape(BL * S, H), ws1_ref[...]) + bs1_ref[...])   # (BL*S, D1)
    a = (_dot(s1, ws2_ref[...]) + bs2_ref[...]).reshape(BL, S, R)             # (BL, S, R)
    a = jnp.transpose(a, (0, 2, 1))                          # ONE batched (S,R)->(R,S) transpose
    m = jnp.max(a, axis=-1, keepdims=True)                   # softmax over S = lane axis
    e = jnp.exp(a - m)
    attn = e / jnp.sum(e, axis=-1, keepdims=True)            # prod v6e/v7x: pl.reciprocal(approx=True)

    # ---- bmm: ONE batched MXU contraction (no per-batch loop) ----------------
    hm = jnp.einsum("brs,bsh->brh",
                    attn.astype(MXU_DTYPE), lh.astype(MXU_DTYPE),
                    preferred_element_type=jnp.float32)      # (BL, R, H)

    # ---- fc_layer: single flat matmul, K = R*H --------------------------------
    fc = _dot(hm.reshape(BL, R * H), wfc_ref[...]) + bfc_ref[...]             # (BL, FC)

    # ---- classifier + in-kernel ensemble average ------------------------------
    logits = _dot(fc, wcls_ref[...]) + bcls_ref[...]                          # (BL, C)
    out_ref[...] = 0.5 * (logits[:B_TILE, :] + logits[B_TILE:, :])            # (B_TILE, C)


# ------------------------------ wrappers ---------------------------------------
def _w_spec(*shape):
    nd = len(shape)
    return pl.BlockSpec(shape, lambda b, _nd=nd: (0,) * _nd)


def fused_forward(x_stacked, params):
    grid_spec = pltpu.PrefetchScalarGridSpec(
        num_scalar_prefetch=0,
        grid=(B // B_TILE,),
        in_specs=[
            pl.BlockSpec((2, B_TILE, S, H), lambda b: (0, b, 0, 0)),   # x (both branches)
            _w_spec(H, 4 * H), _w_spec(H, 4 * H), _w_spec(1, 4 * H),   # lstm
            _w_spec(H, D1), _w_spec(1, D1),                            # W_s1
            _w_spec(D1, R), _w_spec(1, R),                             # W_s2
            _w_spec(R * H, FC), _w_spec(1, FC),                        # fc_layer (flat)
            _w_spec(FC, C), _w_spec(1, C),                             # classifier
        ],
        out_specs=pl.BlockSpec((B_TILE, C), lambda b: (b, 0)),
        scratch_shapes=[pltpu.VMEM((BL, S, H), jnp.float32)],
    )
    return pl.pallas_call(
        fused_kernel,
        out_shape=jax.ShapeDtypeStruct((B, C), jnp.float32),
        grid_spec=grid_spec,
        compiler_params=pltpu.CompilerParams(
            dimension_semantics=("parallel",),        # megacore split on v7x
            vmem_limit_bytes=32 * 1024 * 1024),       # explicit budget (safe on v5e/v6e/v7x)
    )(x_stacked,
      params["wih_t"], params["whh_t"], params["b_lstm"],
      params["ws1"], params["bs1"], params["ws2"], params["bs2"],
      params["wfc"], params["bfc"], params["wcls"], params["bcls"])


def backbone_stub(input_ids, attention_mask, emb_table):
    # TODO(synk): stands in for RobertaModel / BertModel last_hidden_state.
    del attention_mask
    return emb_table[input_ids]                              # (B, S, H)


def robert_ensemble_forward(params, input_ids1, input_ids2,
                            attention_mask1, attention_mask2, labels=None):
    last_hidden1 = backbone_stub(input_ids1, attention_mask1, params["emb_roberta"])
    last_hidden2 = backbone_stub(input_ids2, attention_mask2, params["emb_bert"])
    # Both ensemble branches stacked branch-major -> one fused kernel call.
    x = jnp.stack([last_hidden1, last_hidden2], axis=0)      # (2, B, S, H)
    outputs = fused_forward(x, params)                       # (B, C), averaged in-kernel

    if labels is not None:
        logp = jax.nn.log_softmax(outputs.reshape(-1, C), axis=-1)
        return -jnp.mean(jnp.take_along_axis(logp, labels.reshape(-1, 1), axis=1))
    return outputs


# ------------------------- pure-JAX reference -----------------------------------
def reference_forward(params, input_ids1, input_ids2, m1, m2):
    def lstm_ref(x):
        def step(carry, x_t):
            h, c = carry
            gates = x_t @ params["wih_t"] + h @ params["whh_t"] + params["b_lstm"][0]
            i = jax.nn.sigmoid(gates[:, 0 * H:1 * H])
            f = jax.nn.sigmoid(gates[:, 1 * H:2 * H])
            g = jnp.tanh(gates[:, 2 * H:3 * H])
            o = jax.nn.sigmoid(gates[:, 3 * H:4 * H])
            c = f * c + i * g
            h = o * jnp.tanh(c)
            return (h, c), h
        init = (jnp.zeros((B, H), jnp.float32), jnp.zeros((B, H), jnp.float32))
        _, outs = lax.scan(step, init, jnp.transpose(x, (1, 0, 2)))
        return jnp.transpose(outs, (1, 0, 2))

    def head(lo):
        s1 = jnp.tanh(lo @ params["ws1"] + params["bs1"][0])
        a = s1 @ params["ws2"] + params["bs2"][0]                    # (B, S, R)
        attn = jax.nn.softmax(jnp.transpose(a, (0, 2, 1)), axis=2)   # (B, R, S)
        hm = jnp.einsum("brs,bsh->brh", attn, lo)                    # (B, R, H)
        fc = hm.reshape(B, R * H) @ params["wfc"] + params["bfc"][0]
        return fc @ params["wcls"] + params["bcls"][0]

    lh1 = backbone_stub(input_ids1, m1, params["emb_roberta"])
    lh2 = backbone_stub(input_ids2, m2, params["emb_bert"])
    return (head(lstm_ref(lh1)) + head(lstm_ref(lh2))) / 2.0


# ----------------------------------- main ----------------------------------------
if __name__ == "__main__":
    key = jax.random.PRNGKey(0)
    ks = jax.random.split(key, 16)

    def init(k, shape, scale=0.1):
        return jax.random.normal(k, shape, dtype=jnp.float32) * scale

    params = {
        "emb_roberta": init(ks[0], (VOCAB, H)),
        "emb_bert":    init(ks[1], (VOCAB, H)),
        "wih_t":       init(ks[2], (H, 4 * H)),
        "whh_t":       init(ks[3], (H, 4 * H)),
        "b_lstm":      init(ks[4], (1, 4 * H)),
        "ws1":         init(ks[5], (H, D1)),
        "bs1":         init(ks[6], (1, D1)),
        "ws2":         init(ks[7], (D1, R)),
        "bs2":         init(ks[8], (1, R)),
        "wfc":         init(ks[9], (R * H, FC)),   # flat (R*H, FC), row index r*H + h
        "bfc":         init(ks[10], (1, FC)),
        "wcls":        init(ks[11], (FC, C)),
        "bcls":        init(ks[12], (1, C)),
    }

    input_ids1 = jax.random.randint(ks[13], (B, S), 0, VOCAB, dtype=jnp.int32)
    input_ids2 = jax.random.randint(ks[14], (B, S), 0, VOCAB, dtype=jnp.int32)
    attention_mask1 = jnp.ones((B, S), dtype=jnp.int32)
    attention_mask2 = jnp.ones((B, S), dtype=jnp.int32)

    logits = robert_ensemble_forward(params, input_ids1, input_ids2,
                                     attention_mask1, attention_mask2)
    logits = jax.block_until_ready(logits)

    ref = reference_forward(params, input_ids1, input_ids2,
                            attention_mask1, attention_mask2)
    assert logits.shape == (B, C)
    assert jnp.allclose(logits, ref, rtol=1e-3, atol=5e-3), (logits, ref)

    print("KERNEL_OK")
</pallas_src>

<mosaic_0001>
module attributes {stable_mosaic.version = 11 : i64} {
  func.func @fused_kernel(%arg0: i32, %arg1: memref<2x8x8x32xf32, #tpu.memory_space<vmem>>, %arg2: memref<32x128xf32, #tpu.memory_space<vmem>>, %arg3: memref<32x128xf32, #tpu.memory_space<vmem>>, %arg4: memref<1x128xf32, #tpu.memory_space<vmem>>, %arg5: memref<32x64xf32, #tpu.memory_space<vmem>>, %arg6: memref<1x64xf32, #tpu.memory_space<vmem>>, %arg7: memref<64x8xf32, #tpu.memory_space<vmem>>, %arg8: memref<1x8xf32, #tpu.memory_space<vmem>>, %arg9: memref<256x128xf32, #tpu.memory_space<vmem>>, %arg10: memref<1x128xf32, #tpu.memory_space<vmem>>, %arg11: memref<128x2xf32, #tpu.memory_space<vmem>>, %arg12: memref<1x2xf32, #tpu.memory_space<vmem>>, %arg13: memref<8x2xf32, #tpu.memory_space<vmem>>, %arg14: memref<16x8x32xf32, #tpu.memory_space<vmem>>) attributes {dimension_semantics = [#tpu.dimension_semantics<parallel>], iteration_bounds = array<i64: 2>, scalar_prefetch = 0 : i64, scratch_operands = 1 : i64, tpu.core_type = #tpu.core_type<tc>, window_params = [{transform_indices = @transform_0, window_bounds = array<i64: 2, 8, 8, 32>}, {pipeline_mode = #tpu.pipeline_mode<synchronous>, transform_indices = @transform_1, window_bounds = array<i64: 32, 128>}, {pipeline_mode = #tpu.pipeline_mode<synchronous>, transform_indices = @transform_2, window_bounds = array<i64: 32, 128>}, {pipeline_mode = #tpu.pipeline_mode<synchronous>, transform_indices = @transform_3, window_bounds = array<i64: 1, 128>}, {pipeline_mode = #tpu.pipeline_mode<synchronous>, transform_indices = @transform_4, window_bounds = array<i64: 32, 64>}, {pipeline_mode = #tpu.pipeline_mode<synchronous>, transform_indices = @transform_5, window_bounds = array<i64: 1, 64>}, {pipeline_mode = #tpu.pipeline_mode<synchronous>, transform_indices = @transform_6, window_bounds = array<i64: 64, 8>}, {pipeline_mode = #tpu.pipeline_mode<synchronous>, transform_indices = @transform_7, window_bounds = array<i64: 1, 8>}, {pipeline_mode = #tpu.pipeline_mode<synchronous>, transform_indices = @transform_8, window_bounds = array<i64: 256, 128>}, {pipeline_mode = #tpu.pipeline_mode<synchronous>, transform_indices = @transform_9, window_bounds = array<i64: 1, 128>}, {pipeline_mode = #tpu.pipeline_mode<synchronous>, transform_indices = @transform_10, window_bounds = array<i64: 128, 2>}, {pipeline_mode = #tpu.pipeline_mode<synchronous>, transform_indices = @transform_11, window_bounds = array<i64: 1, 2>}, {transform_indices = @transform_12, window_bounds = array<i64: 8, 2>}]} {
    %c0 = arith.constant 0 : index
    %c0_0 = arith.constant 0 : index
    %c0_1 = arith.constant 0 : index
    %c0_2 = arith.constant 0 : index
    %0 = vector.load %arg1[%c0, %c0_0, %c0_1, %c0_2] : memref<2x8x8x32xf32, #tpu.memory_space<vmem>>, vector<2x8x8x32xf32>
    %1 = vector.shape_cast %0 : vector<2x8x8x32xf32> to vector<128x32xf32>
    %c0_3 = arith.constant 0 : index
    %c0_4 = arith.constant 0 : index
    %2 = vector.load %arg2[%c0_3, %c0_4] : memref<32x128xf32, #tpu.memory_space<vmem>>, vector<32x128xf32>
    %cst = arith.constant dense<0.000000e+00> : vector<128x128xf32>
    %3 = tpu.matmul %1, %2, %cst {dimension_numbers = #tpu.dot_dimension_numbers<[1], [0], [0], [1], [0, 0, 1, 1], [], []>} : vector<128x32xf32>, vector<32x128xf32>, vector<128x128xf32> -> vector<128x128xf32>
    %c0_5 = arith.constant 0 : index
    %c0_6 = arith.constant 0 : index
    %4 = vector.load %arg4[%c0_5, %c0_6] : memref<1x128xf32, #tpu.memory_space<vmem>>, vector<1x128xf32>
    %5 = vector.broadcast %4 : vector<1x128xf32> to vector<128x128xf32>
    %6 = arith.addf %3, %5 : vector<128x128xf32>
    %7 = vector.shape_cast %6 : vector<128x128xf32> to vector<16x8x128xf32>
    %c0_7 = arith.constant 0 : index
    %c0_8 = arith.constant 0 : index
    %8 = vector.load %arg3[%c0_7, %c0_8] : memref<32x128xf32, #tpu.memory_space<vmem>>, vector<32x128xf32>
    %cst_9 = arith.constant 0.000000e+00 : f32
    %9 = vector.broadcast %cst_9 : f32 to vector<16x32xf32>
    %cst_10 = arith.constant 0.000000e+00 : f32
    %10 = vector.broadcast %cst_10 : f32 to vector<16x32xf32>
    %11 = vector.extract_strided_slice %7 {offsets = [0, 0, 0], sizes = [16, 1, 128], strides = [1, 1, 1]} : vector<16x8x128xf32> to vector<16x1x128xf32>
    %12 = vector.shape_cast %11 : vector<16x1x128xf32> to vector<16x128xf32>
    %cst_11 = arith.constant dense<0.000000e+00> : vector<16x128xf32>
    %13 = tpu.matmul %9, %8, %cst_11 {dimension_numbers = #tpu.dot_dimension_numbers<[1], [0], [0], [1], [0, 0, 1, 1], [], []>} : vector<16x32xf32>, vector<32x128xf32>, vector<16x128xf32> -> vector<16x128xf32>
    %14 = arith.addf %12, %13 : vector<16x128xf32>
    %15 = vector.extract_strided_slice %14 {offsets = [0, 0], sizes = [16, 32], strides = [1, 1]} : vector<16x128xf32> to vector<16x32xf32>
    %16 = arith.negf %15 : vector<16x32xf32>
    %17 = math.exp %16 : vector<16x32xf32>
    %cst_12 = arith.constant 1.000000e+00 : f32
    %18 = vector.broadcast %cst_12 : f32 to vector<16x32xf32>
    %19 = arith.addf %18, %17 : vector<16x32xf32>
    %20 = arith.divf %18, %19 : vector<16x32xf32>
    %21 = vector.extract_strided_slice %14 {offsets = [0, 32], sizes = [16, 32], strides = [1, 1]} : vector<16x128xf32> to vector<16x32xf32>
    %22 = arith.negf %21 : vector<16x32xf32>
    %23 = math.exp %22 : vector<16x32xf32>
    %cst_13 = arith.constant 1.000000e+00 : f32
    %24 = vector.broadcast %cst_13 : f32 to vector<16x32xf32>
    %25 = arith.addf %24, %23 : vector<16x32xf32>
    %26 = arith.divf %24, %25 : vector<16x32xf32>
    %27 = vector.extract_strided_slice %14 {offsets = [0, 64], sizes = [16, 32], strides = [1, 1]} : vector<16x128xf32> to vector<16x32xf32>
    %28 = math.tanh %27 : vector<16x32xf32>
    %29 = vector.extract_strided_slice %14 {offsets = [0, 96], sizes = [16, 32], strides = [1, 1]} : vector<16x128xf32> to vector<16x32xf32>
    %30 = arith.negf %29 : vector<16x32xf32>
    %31 = math.exp %30 : vector<16x32xf32>
    %cst_14 = arith.constant 1.000000e+00 : f32
    %32 = vector.broadcast %cst_14 : f32 to vector<16x32xf32>
    %33 = arith.addf %32, %31 : vector<16x32xf32>
    %34 = arith.divf %32, %33 : vector<16x32xf32>
    %35 = arith.mulf %26, %10 : vector<16x32xf32>
    %36 = arith.mulf %20, %28 : vector<16x32xf32>
    %37 = arith.addf %35, %36 : vector<16x32xf32>
    %38 = math.tanh %37 : vector<16x32xf32>
    %39 = arith.mulf %34, %38 : vector<16x32xf32>
    %c0_15 = arith.constant 0 : index
    %c0_16 = arith.constant 0 : index
    %c0_17 = arith.constant 0 : index
    %40 = vector.load %arg14[%c0_15, %c0_16, %c0_17] : memref<16x8x32xf32, #tpu.memory_space<vmem>>, vector<16x1x32xf32>
    %41 = vector.shape_cast %40 : vector<16x1x32xf32> to vector<16x32xf32>
    %42 = vector.shape_cast %39 : vector<16x32xf32> to vector<16x1x32xf32>
    tpu.vector_store %arg14[%c0_15, %c0_16, %c0_17], %42 {strides = array<i32>} : memref<16x8x32xf32, #tpu.memory_space<vmem>>, vector<16x1x32xf32>,
    %43 = vector.extract_strided_slice %7 {offsets = [0, 1, 0], sizes = [16, 1, 128], strides = [1, 1, 1]} : vector<16x8x128xf32> to vector<16x1x128xf32>
    %44 = vector.shape_cast %43 : vector<16x1x128xf32> to vector<16x128xf32>
    %cst_18 = arith.constant dense<0.000000e+00> : vector<16x128xf32>
    %45 = tpu.matmul %39, %8, %cst_18 {dimension_numbers = #tpu.dot_dimension_numbers<[1], [0], [0], [1], [0, 0, 1, 1], [], []>} : vector<16x32xf32>, vector<32x128xf32>, vector<16x128xf32> -> vector<16x128xf32>
    %46 = arith.addf %44, %45 : vector<16x128xf32>
    %47 = vector.extract_strided_slice %46 {offsets = [0, 0], sizes = [16, 32], strides = [1, 1]} : vector<16x128xf32> to vector<16x32xf32>
    %48 = arith.negf %47 : vector<16x32xf32>
    %49 = math.exp %48 : vector<16x32xf32>
    %cst_19 = arith.constant 1.000000e+00 : f32
    %50 = vector.broadcast %cst_19 : f32 to vector<16x32xf32>
    %51 = arith.addf %50, %49 : vector<16x32xf32>
    %52 = arith.divf %50, %51 : vector<16x32xf32>
    %53 = vector.extract_strided_slice %46 {offsets = [0, 32], sizes = [16, 32], strides = [1, 1]} : vector<16x128xf32> to vector<16x32xf32>
    %54 = arith.negf %53 : vector<16x32xf32>
    %55 = math.exp %54 : vector<16x32xf32>
    %cst_20 = arith.constant 1.000000e+00 : f32
    %56 = vector.broadcast %cst_20 : f32 to vector<16x32xf32>
    %57 = arith.addf %56, %55 : vector<16x32xf32>
    %58 = arith.divf %56, %57 : vector<16x32xf32>
    %59 = vector.extract_strided_slice %46 {offsets = [0, 64], sizes = [16, 32], strides = [1, 1]} : vector<16x128xf32> to vector<16x32xf32>
    %60 = math.tanh %59 : vector<16x32xf32>
    %61 = vector.extract_strided_slice %46 {offsets = [0, 96], sizes = [16, 32], strides = [1, 1]} : vector<16x128xf32> to vector<16x32xf32>
    %62 = arith.negf %61 : vector<16x32xf32>
    %63 = math.exp %62 : vector<16x32xf32>
    %cst_21 = arith.constant 1.000000e+00 : f32
    %64 = vector.broadcast %cst_21 : f32 to vector<16x32xf32>
    %65 = arith.addf %64, %63 : vector<16x32xf32>
    %66 = arith.divf %64, %65 : vector<16x32xf32>
    %67 = arith.mulf %58, %37 : vector<16x32xf32>
    %68 = arith.mulf %52, %60 : vector<16x32xf32>
    %69 = arith.addf %67, %68 : vector<16x32xf32>
    %70 = math.tanh %69 : vector<16x32xf32>
    %71 = arith.mulf %66, %70 : vector<16x32xf32>
    %c0_22 = arith.constant 0 : index
    %c1 = arith.constant 1 : index
    %c0_23 = arith.constant 0 : index
    %72 = vector.load %arg14[%c0_22, %c1, %c0_23] : memref<16x8x32xf32, #tpu.memory_space<vmem>>, vector<16x1x32xf32>
    %73 = vector.shape_cast %72 : vector<16x1x32xf32> to vector<16x32xf32>
    %74 = vector.shape_cast %71 : vector<16x32xf32> to vector<16x1x32xf32>
    tpu.vector_store %arg14[%c0_22, %c1, %c0_23], %74 {strides = array<i32>} : memref<16x8x32xf32, #tpu.memory_space<vmem>>, vector<16x1x32xf32>,
    %75 = vector.extract_strided_slice %7 {offsets = [0, 2, 0], sizes = [16, 1, 128], strides = [1, 1, 1]} : vector<16x8x128xf32> to vector<16x1x128xf32>
    %76 = vector.shape_cast %75 : vector<16x1x128xf32> to vector<16x128xf32>
    %cst_24 = arith.constant dense<0.000000e+00> : vector<16x128xf32>
    %77 = tpu.matmul %71, %8, %cst_24 {dimension_numbers = #tpu.dot_dimension_numbers<[1], [0], [0], [1], [0, 0, 1, 1], [], []>} : vector<16x32xf32>, vector<32x128xf32>, vector<16x128xf32> -> vector<16x128xf32>
    %78 = arith.addf %76, %77 : vector<16x128xf32>
    %79 = vector.extract_strided_slice %78 {offsets = [0, 0], sizes = [16, 32], strides = [1, 1]} : vector<16x128xf32> to vector<16x32xf32>
    %80 = arith.negf %79 : vector<16x32xf32>
    %81 = math.exp %80 : vector<16x32xf32>
    %cst_25 = arith.constant 1.000000e+00 : f32
    %82 = vector.broadcast %cst_25 : f32 to vector<16x32xf32>
    %83 = arith.addf %82, %81 : vector<16x32xf32>
    %84 = arith.divf %82, %83 : vector<16x32xf32>
    %85 = vector.extract_strided_slice %78 {offsets = [0, 32], sizes = [16, 32], strides = [1, 1]} : vector<16x128xf32> to vector<16x32xf32>
    %86 = arith.negf %85 : vector<16x32xf32>
    %87 = math.exp %86 : vector<16x32xf32>
    %cst_26 = arith.constant 1.000000e+00 : f32
    %88 = vector.broadcast %cst_26 : f32 to vector<16x32xf32>
    %89 = arith.addf %88, %87 : vector<16x32xf32>
    %90 = arith.divf %88, %89 : vector<16x32xf32>
    %91 = vector.extract_strided_slice %78 {offsets = [0, 64], sizes = [16, 32], strides = [1, 1]} : vector<16x128xf32> to vector<16x32xf32>
    %92 = math.tanh %91 : vector<16x32xf32>
    %93 = vector.extract_strided_slice %78 {offsets = [0, 96], sizes = [16, 32], strides = [1, 1]} : vector<16x128xf32> to vector<16x32xf32>
    %94 = arith.negf %93 : vector<16x32xf32>
    %95 = math.exp %94 : vector<16x32xf32>
    %cst_27 = arith.constant 1.000000e+00 : f32
    %96 = vector.broadcast %cst_27 : f32 to vector<16x32xf32>
    %97 = arith.addf %96, %95 : vector<16x32xf32>
    %98 = arith.divf %96, %97 : vector<16x32xf32>
    %99 = arith.mulf %90, %69 : vector<16x32xf32>
    %100 = arith.mulf %84, %92 : vector<16x32xf32>
    %101 = arith.addf %99, %100 : vector<16x32xf32>
    %102 = math.tanh %101 : vector<16x32xf32>
    %103 = arith.mulf %98, %102 : vector<16x32xf32>
    %c0_28 = arith.constant 0 : index
    %c2 = arith.constant 2 : index
    %c0_29 = arith.constant 0 : index
    %104 = vector.load %arg14[%c0_28, %c2, %c0_29] : memref<16x8x32xf32, #tpu.memory_space<vmem>>, vector<16x1x32xf32>
    %105 = vector.shape_cast %104 : vector<16x1x32xf32> to vector<16x32xf32>
    %106 = vector.shape_cast %103 : vector<16x32xf32> to vector<16x1x32xf32>
    tpu.vector_store %arg14[%c0_28, %c2, %c0_29], %106 {strides = array<i32>} : memref<16x8x32xf32, #tpu.memory_space<vmem>>, vector<16x1x32xf32>,
    %107 = vector.extract_strided_slice %7 {offsets = [0, 3, 0], sizes = [16, 1, 128], strides = [1, 1, 1]} : vector<16x8x128xf32> to vector<16x1x128xf32>
    %108 = vector.shape_cast %107 : vector<16x1x128xf32> to vector<16x128xf32>
    %cst_30 = arith.constant dense<0.000000e+00> : vector<16x128xf32>
    %109 = tpu.matmul %103, %8, %cst_30 {dimension_numbers = #tpu.dot_dimension_numbers<[1], [0], [0], [1], [0, 0, 1, 1], [], []>} : vector<16x32xf32>, vector<32x128xf32>, vector<16x128xf32> -> vector<16x128xf32>
    %110 = arith.addf %108, %109 : vector<16x128xf32>
    %111 = vector.extract_strided_slice %110 {offsets = [0, 0], sizes = [16, 32], strides = [1, 1]} : vector<16x128xf32> to vector<16x32xf32>
    %112 = arith.negf %111 : vector<16x32xf32>
    %113 = math.exp %112 : vector<16x32xf32>
    %cst_31 = arith.constant 1.000000e+00 : f32
    %114 = vector.broadcast %cst_31 : f32 to vector<16x32xf32>
    %115 = arith.addf %114, %113 : vector<16x32xf32>
    %116 = arith.divf %114, %115 : vector<16x32xf32>
    %117 = vector.extract_strided_slice %110 {offsets = [0, 32], sizes = [16, 32], strides = [1, 1]} : vector<16x128xf32> to vector<16x32xf32>
    %118 = arith.negf %117 : vector<16x32xf32>
    %119 = math.exp %118 : vector<16x32xf32>
    %cst_32 = arith.constant 1.000000e+00 : f32
    %120 = vector.broadcast %cst_32 : f32 to vector<16x32xf32>
    %121 = arith.addf %120, %119 : vector<16x32xf32>
    %122 = arith.divf %120, %121 : vector<16x32xf32>
    %123 = vector.extract_strided_slice %110 {offsets = [0, 64], sizes = [16, 32], strides = [1, 1]} : vector<16x128xf32> to vector<16x32xf32>
    %124 = math.tanh %123 : vector<16x32xf32>
    %125 = vector.extract_strided_slice %110 {offsets = [0, 96], sizes = [16, 32], strides = [1, 1]} : vector<16x128xf32> to vector<16x32xf32>
    %126 = arith.negf %125 : vector<16x32xf32>
    %127 = math.exp %126 : vector<16x32xf32>
    %cst_33 = arith.constant 1.000000e+00 : f32
    %128 = vector.broadcast %cst_33 : f32 to vector<16x32xf32>
    %129 = arith.addf %128, %127 : vector<16x32xf32>
    %130 = arith.divf %128, %129 : vector<16x32xf32>
    %131 = arith.mulf %122, %101 : vector<16x32xf32>
    %132 = arith.mulf %116, %124 : vector<16x32xf32>
    %133 = arith.addf %131, %132 : vector<16x32xf32>
    %134 = math.tanh %133 : vector<16x32xf32>
    %135 = arith.mulf %130, %134 : vector<16x32xf32>
    %c0_34 = arith.constant 0 : index
    %c3 = arith.constant 3 : index
    %c0_35 = arith.constant 0 : index
    %136 = vector.load %arg14[%c0_34, %c3, %c0_35] : memref<16x8x32xf32, #tpu.memory_space<vmem>>, vector<16x1x32xf32>
    %137 = vector.shape_cast %136 : vector<16x1x32xf32> to vector<16x32xf32>
    %138 = vector.shape_cast %135 : vector<16x32xf32> to vector<16x1x32xf32>
    tpu.vector_store %arg14[%c0_34, %c3, %c0_35], %138 {strides = array<i32>} : memref<16x8x32xf32, #tpu.memory_space<vmem>>, vector<16x1x32xf32>,
    %139 = vector.extract_strided_slice %7 {offsets = [0, 4, 0], sizes = [16, 1, 128], strides = [1, 1, 1]} : vector<16x8x128xf32> to vector<16x1x128xf32>
    %140 = vector.shape_cast %139 : vector<16x1x128xf32> to vector<16x128xf32>
    %cst_36 = arith.constant dense<0.000000e+00> : vector<16x128xf32>
    %141 = tpu.matmul %135, %8, %cst_36 {dimension_numbers = #tpu.dot_dimension_numbers<[1], [0], [0], [1], [0, 0, 1, 1], [], []>} : vector<16x32xf32>, vector<32x128xf32>, vector<16x128xf32> -> vector<16x128xf32>
    %142 = arith.addf %140, %141 : vector<16x128xf32>
    %143 = vector.extract_strided_slice %142 {offsets = [0, 0], sizes = [16, 32], strides = [1, 1]} : vector<16x128xf32> to vector<16x32xf32>
    %144 = arith.negf %143 : vector<16x32xf32>
    %145 = math.exp %144 : vector<16x32xf32>
    %cst_37 = arith.constant 1.000000e+00 : f32
    %146 = vector.broadcast %cst_37 : f32 to vector<16x32xf32>
    %147 = arith.addf %146, %145 : vector<16x32xf32>
    %148 = arith.divf %146, %147 : vector<16x32xf32>
    %149 = vector.extract_strided_slice %142 {offsets = [0, 32], sizes = [16, 32], strides = [1, 1]} : vector<16x128xf32> to vector<16x32xf32>
    %150 = arith.negf %149 : vector<16x32xf32>
    %151 = math.exp %150 : vector<16x32xf32>
    %cst_38 = arith.constant 1.000000e+00 : f32
    %152 = vector.broadcast %cst_38 : f32 to vector<16x32xf32>
    %153 = arith.addf %152, %151 : vector<16x32xf32>
    %154 = arith.divf %152, %153 : vector<16x32xf32>
    %155 = vector.extract_strided_slice %142 {offsets = [0, 64], sizes = [16, 32], strides = [1, 1]} : vector<16x128xf32> to vector<16x32xf32>
    %156 = math.tanh %155 : vector<16x32xf32>
    %157 = vector.extract_strided_slice %142 {offsets = [0, 96], sizes = [16, 32], strides = [1, 1]} : vector<16x128xf32> to vector<16x32xf32>
    %158 = arith.negf %157 : vector<16x32xf32>
    %159 = math.exp %158 : vector<16x32xf32>
    %cst_39 = arith.constant 1.000000e+00 : f32
    %160 = vector.broadcast %cst_39 : f32 to vector<16x32xf32>
    %161 = arith.addf %160, %159 : vector<16x32xf32>
    %162 = arith.divf %160, %161 : vector<16x32xf32>
    %163 = arith.mulf %154, %133 : vector<16x32xf32>
    %164 = arith.mulf %148, %156 : vector<16x32xf32>
    %165 = arith.addf %163, %164 : vector<16x32xf32>
    %166 = math.tanh %165 : vector<16x32xf32>
    %167 = arith.mulf %162, %166 : vector<16x32xf32>
    %c0_40 = arith.constant 0 : index
    %c4 = arith.constant 4 : index
    %c0_41 = arith.constant 0 : index
    %168 = vector.load %arg14[%c0_40, %c4, %c0_41] : memref<16x8x32xf32, #tpu.memory_space<vmem>>, vector<16x1x32xf32>
    %169 = vector.shape_cast %168 : vector<16x1x32xf32> to vector<16x32xf32>
    %170 = vector.shape_cast %167 : vector<16x32xf32> to vector<16x1x32xf32>
    tpu.vector_store %arg14[%c0_40, %c4, %c0_41], %170 {strides = array<i32>} : memref<16x8x32xf32, #tpu.memory_space<vmem>>, vector<16x1x32xf32>,
    %171 = vector.extract_strided_slice %7 {offsets = [0, 5, 0], sizes = [16, 1, 128], strides = [1, 1, 1]} : vector<16x8x128xf32> to vector<16x1x128xf32>
    %172 = vector.shape_cast %171 : vector<16x1x128xf32> to vector<16x128xf32>
    %cst_42 = arith.constant dense<0.000000e+00> : vector<16x128xf32>
    %173 = tpu.matmul %167, %8, %cst_42 {dimension_numbers = #tpu.dot_dimension_numbers<[1], [0], [0], [1], [0, 0, 1, 1], [], []>} : vector<16x32xf32>, vector<32x128xf32>, vector<16x128xf32> -> vector<16x128xf32>
    %174 = arith.addf %172, %173 : vector<16x128xf32>
    %175 = vector.extract_strided_slice %174 {offsets = [0, 0], sizes = [16, 32], strides = [1, 1]} : vector<16x128xf32> to vector<16x32xf32>
    %176 = arith.negf %175 : vector<16x32xf32>
    %177 = math.exp %176 : vector<16x32xf32>
    %cst_43 = arith.constant 1.000000e+00 : f32
    %178 = vector.broadcast %cst_43 : f32 to vector<16x32xf32>
    %179 = arith.addf %178, %177 : vector<16x32xf32>
    %180 = arith.divf %178, %179 : vector<16x32xf32>
    %181 = vector.extract_strided_slice %174 {offsets = [0, 32], sizes = [16, 32], strides = [1, 1]} : vector<16x128xf32> to vector<16x32xf32>
    %182 = arith.negf %181 : vector<16x32xf32>
    %183 = math.exp %182 : vector<16x32xf32>
    %cst_44 = arith.constant 1.000000e+00 : f32
    %184 = vector.broadcast %cst_44 : f32 to vector<16x32xf32>
    %185 = arith.addf %184, %183 : vector<16x32xf32>
    %186 = arith.divf %184, %185 : vector<16x32xf32>
    %187 = vector.extract_strided_slice %174 {offsets = [0, 64], sizes = [16, 32], strides = [1, 1]} : vector<16x128xf32> to vector<16x32xf32>
    %188 = math.tanh %187 : vector<16x32xf32>
    %189 = vector.extract_strided_slice %174 {offsets = [0, 96], sizes = [16, 32], strides = [1, 1]} : vector<16x128xf32> to vector<16x32xf32>
    %190 = arith.negf %189 : vector<16x32xf32>
    %191 = math.exp %190 : vector<16x32xf32>
    %cst_45 = arith.constant 1.000000e+00 : f32
    %192 = vector.broadcast %cst_45 : f32 to vector<16x32xf32>
    %193 = arith.addf %192, %191 : vector<16x32xf32>
    %194 = arith.divf %192, %193 : vector<16x32xf32>
    %195 = arith.mulf %186, %165 : vector<16x32xf32>
    %196 = arith.mulf %180, %188 : vector<16x32xf32>
    %197 = arith.addf %195, %196 : vector<16x32xf32>
    %198 = math.tanh %197 : vector<16x32xf32>
    %199 = arith.mulf %194, %198 : vector<16x32xf32>
    %c0_46 = arith.constant 0 : index
    %c5 = arith.constant 5 : index
    %c0_47 = arith.constant 0 : index
    %200 = vector.load %arg14[%c0_46, %c5, %c0_47] : memref<16x8x32xf32, #tpu.memory_space<vmem>>, vector<16x1x32xf32>
    %201 = vector.shape_cast %200 : vector<16x1x32xf32> to vector<16x32xf32>
    %202 = vector.shape_cast %199 : vector<16x32xf32> to vector<16x1x32xf32>
    tpu.vector_store %arg14[%c0_46, %c5, %c0_47], %202 {strides = array<i32>} : memref<16x8x32xf32, #tpu.memory_space<vmem>>, vector<16x1x32xf32>,
    %203 = vector.extract_strided_slice %7 {offsets = [0, 6, 0], sizes = [16, 1, 128], strides = [1, 1, 1]} : vector<16x8x128xf32> to vector<16x1x128xf32>
    %204 = vector.shape_cast %203 : vector<16x1x128xf32> to vector<16x128xf32>
    %cst_48 = arith.constant dense<0.000000e+00> : vector<16x128xf32>
    %205 = tpu.matmul %199, %8, %cst_48 {dimension_numbers = #tpu.dot_dimension_numbers<[1], [0], [0], [1], [0, 0, 1, 1], [], []>} : vector<16x32xf32>, vector<32x128xf32>, vector<16x128xf32> -> vector<16x128xf32>
    %206 = arith.addf %204, %205 : vector<16x128xf32>
    %207 = vector.extract_strided_slice %206 {offsets = [0, 0], sizes = [16, 32], strides = [1, 1]} : vector<16x128xf32> to vector<16x32xf32>
    %208 = arith.negf %207 : vector<16x32xf32>
    %209 = math.exp %208 : vector<16x32xf32>
    %cst_49 = arith.constant 1.000000e+00 : f32
    %210 = vector.broadcast %cst_49 : f32 to vector<16x32xf32>
    %211 = arith.addf %210, %209 : vector<16x32xf32>
    %212 = arith.divf %210, %211 : vector<16x32xf32>
    %213 = vector.extract_strided_slice %206 {offsets = [0, 32], sizes = [16, 32], strides = [1, 1]} : vector<16x128xf32> to vector<16x32xf32>
    %214 = arith.negf %213 : vector<16x32xf32>
    %215 = math.exp %214 : vector<16x32xf32>
    %cst_50 = arith.constant 1.000000e+00 : f32
    %216 = vector.broadcast %cst_50 : f32 to vector<16x32xf32>
    %217 = arith.addf %216, %215 : vector<16x32xf32>
    %218 = arith.divf %216, %217 : vector<16x32xf32>
    %219 = vector.extract_strided_slice %206 {offsets = [0, 64], sizes = [16, 32], strides = [1, 1]} : vector<16x128xf32> to vector<16x32xf32>
    %220 = math.tanh %219 : vector<16x32xf32>
    %221 = vector.extract_strided_slice %206 {offsets = [0, 96], sizes = [16, 32], strides = [1, 1]} : vector<16x128xf32> to vector<16x32xf32>
    %222 = arith.negf %221 : vector<16x32xf32>
    %223 = math.exp %222 : vector<16x32xf32>
    %cst_51 = arith.constant 1.000000e+00 : f32
    %224 = vector.broadcast %cst_51 : f32 to vector<16x32xf32>
    %225 = arith.addf %224, %223 : vector<16x32xf32>
    %226 = arith.divf %224, %225 : vector<16x32xf32>
    %227 = arith.mulf %218, %197 : vector<16x32xf32>
    %228 = arith.mulf %212, %220 : vector<16x32xf32>
    %229 = arith.addf %227, %228 : vector<16x32xf32>
    %230 = math.tanh %229 : vector<16x32xf32>
    %231 = arith.mulf %226, %230 : vector<16x32xf32>
    %c0_52 = arith.constant 0 : index
    %c6 = arith.constant 6 : index
    %c0_53 = arith.constant 0 : index
    %232 = vector.load %arg14[%c0_52, %c6, %c0_53] : memref<16x8x32xf32, #tpu.memory_space<vmem>>, vector<16x1x32xf32>
    %233 = vector.shape_cast %232 : vector<16x1x32xf32> to vector<16x32xf32>
    %234 = vector.shape_cast %231 : vector<16x32xf32> to vector<16x1x32xf32>
    tpu.vector_store %arg14[%c0_52, %c6, %c0_53], %234 {strides = array<i32>} : memref<16x8x32xf32, #tpu.memory_space<vmem>>, vector<16x1x32xf32>,
    %235 = vector.extract_strided_slice %7 {offsets = [0, 7, 0], sizes = [16, 1, 128], strides = [1, 1, 1]} : vector<16x8x128xf32> to vector<16x1x128xf32>
    %236 = vector.shape_cast %235 : vector<16x1x128xf32> to vector<16x128xf32>
    %cst_54 = arith.constant dense<0.000000e+00> : vector<16x128xf32>
    %237 = tpu.matmul %231, %8, %cst_54 {dimension_numbers = #tpu.dot_dimension_numbers<[1], [0], [0], [1], [0, 0, 1, 1], [], []>} : vector<16x32xf32>, vector<32x128xf32>, vector<16x128xf32> -> vector<16x128xf32>
    %238 = arith.addf %236, %237 : vector<16x128xf32>
    %239 = vector.extract_strided_slice %238 {offsets = [0, 0], sizes = [16, 32], strides = [1, 1]} : vector<16x128xf32> to vector<16x32xf32>
    %240 = arith.negf %239 : vector<16x32xf32>
    %241 = math.exp %240 : vector<16x32xf32>
    %cst_55 = arith.constant 1.000000e+00 : f32
    %242 = vector.broadcast %cst_55 : f32 to vector<16x32xf32>
    %243 = arith.addf %242, %241 : vector<16x32xf32>
    %244 = arith.divf %242, %243 : vector<16x32xf32>
    %245 = vector.extract_strided_slice %238 {offsets = [0, 32], sizes = [16, 32], strides = [1, 1]} : vector<16x128xf32> to vector<16x32xf32>
    %246 = arith.negf %245 : vector<16x32xf32>
    %247 = math.exp %246 : vector<16x32xf32>
    %cst_56 = arith.constant 1.000000e+00 : f32
    %248 = vector.broadcast %cst_56 : f32 to vector<16x32xf32>
    %249 = arith.addf %248, %247 : vector<16x32xf32>
    %250 = arith.divf %248, %249 : vector<16x32xf32>
    %251 = vector.extract_strided_slice %238 {offsets = [0, 64], sizes = [16, 32], strides = [1, 1]} : vector<16x128xf32> to vector<16x32xf32>
    %252 = math.tanh %251 : vector<16x32xf32>
    %253 = vector.extract_strided_slice %238 {offsets = [0, 96], sizes = [16, 32], strides = [1, 1]} : vector<16x128xf32> to vector<16x32xf32>
    %254 = arith.negf %253 : vector<16x32xf32>
    %255 = math.exp %254 : vector<16x32xf32>
    %cst_57 = arith.constant 1.000000e+00 : f32
    %256 = vector.broadcast %cst_57 : f32 to vector<16x32xf32>
    %257 = arith.addf %256, %255 : vector<16x32xf32>
    %258 = arith.divf %256, %257 : vector<16x32xf32>
    %259 = arith.mulf %250, %229 : vector<16x32xf32>
    %260 = arith.mulf %244, %252 : vector<16x32xf32>
    %261 = arith.addf %259, %260 : vector<16x32xf32>
    %262 = math.tanh %261 : vector<16x32xf32>
    %263 = arith.mulf %258, %262 : vector<16x32xf32>
    %c0_58 = arith.constant 0 : index
    %c7 = arith.constant 7 : index
    %c0_59 = arith.constant 0 : index
    %264 = vector.load %arg14[%c0_58, %c7, %c0_59] : memref<16x8x32xf32, #tpu.memory_space<vmem>>, vector<16x1x32xf32>
    %265 = vector.shape_cast %264 : vector<16x1x32xf32> to vector<16x32xf32>
    %266 = vector.shape_cast %263 : vector<16x32xf32> to vector<16x1x32xf32>
    tpu.vector_store %arg14[%c0_58, %c7, %c0_59], %266 {strides = array<i32>} : memref<16x8x32xf32, #tpu.memory_space<vmem>>, vector<16x1x32xf32>,
    %c0_60 = arith.constant 0 : index
    %c0_61 = arith.constant 0 : index
    %c0_62 = arith.constant 0 : index
    %267 = vector.load %arg14[%c0_60, %c0_61, %c0_62] : memref<16x8x32xf32, #tpu.memory_space<vmem>>, vector<16x8x32xf32>
    %268 = vector.shape_cast %267 : vector<16x8x32xf32> to vector<128x32xf32>
    %c0_63 = arith.constant 0 : index
    %c0_64 = arith.constant 0 : index
    %269 = vector.load %arg5[%c0_63, %c0_64] : memref<32x64xf32, #tpu.memory_space<vmem>>, vector<32x64xf32>
    %cst_65 = arith.constant dense<0.000000e+00> : vector<128x64xf32>
    %270 = tpu.matmul %268, %269, %cst_65 {dimension_numbers = #tpu.dot_dimension_numbers<[1], [0], [0], [1], [0, 0, 1, 1], [], []>} : vector<128x32xf32>, vector<32x64xf32>, vector<128x64xf32> -> vector<128x64xf32>
    %c0_66 = arith.constant 0 : index
    %c0_67 = arith.constant 0 : index
    %271 = vector.load %arg6[%c0_66, %c0_67] : memref<1x64xf32, #tpu.memory_space<vmem>>, vector<1x64xf32>
    %272 = vector.broadcast %271 : vector<1x64xf32> to vector<128x64xf32>
    %273 = arith.addf %270, %272 : vector<128x64xf32>
    %274 = math.tanh %273 : vector<128x64xf32>
    %c0_68 = arith.constant 0 : index
    %c0_69 = arith.constant 0 : index
    %275 = vector.load %arg7[%c0_68, %c0_69] : memref<64x8xf32, #tpu.memory_space<vmem>>, vector<64x8xf32>
    %cst_70 = arith.constant dense<0.000000e+00> : vector<128x8xf32>
    %276 = tpu.matmul %274, %275, %cst_70 {dimension_numbers = #tpu.dot_dimension_numbers<[1], [0], [0], [1], [0, 0, 1, 1], [], []>} : vector<128x64xf32>, vector<64x8xf32>, vector<128x8xf32> -> vector<128x8xf32>
    %c0_71 = arith.constant 0 : index
    %c0_72 = arith.constant 0 : index
    %277 = vector.load %arg8[%c0_71, %c0_72] : memref<1x8xf32, #tpu.memory_space<vmem>>, vector<1x8xf32>
    %278 = vector.broadcast %277 : vector<1x8xf32> to vector<128x8xf32>
    %279 = arith.addf %276, %278 : vector<128x8xf32>
    %280 = vector.shape_cast %279 : vector<128x8xf32> to vector<16x8x8xf32>
    %281 = tpu.transpose %280, [0, 2, 1] : vector<16x8x8xf32> -> vector<16x8x8xf32>
    %cst_73 = arith.constant dense<0xFF800000> : vector<16x8xf32>
    %282 = vector.multi_reduction <maximumf>, %281, %cst_73 [2] : vector<16x8x8xf32> to vector<16x8xf32>
    %283 = vector.shape_cast %282 : vector<16x8xf32> to vector<16x8x1xf32>
    %284 = vector.broadcast %283 : vector<16x8x1xf32> to vector<16x8x8xf32>
    %285 = arith.subf %281, %284 : vector<16x8x8xf32>
    %286 = math.exp %285 : vector<16x8x8xf32>
    %cst_74 = arith.constant dense<0.000000e+00> : vector<16x8xf32>
    %287 = vector.multi_reduction <add>, %286, %cst_74 [2] : vector<16x8x8xf32> to vector<16x8xf32>
    %288 = vector.shape_cast %287 : vector<16x8xf32> to vector<16x8x1xf32>
    %289 = vector.broadcast %288 : vector<16x8x1xf32> to vector<16x8x8xf32>
    %290 = arith.divf %286, %289 : vector<16x8x8xf32>
    "tpu.trace_start"() <{level = 10 : i32, message = "brs,bsh->brh"}> : () -> ()
    %cst_75 = arith.constant dense<0.000000e+00> : vector<16x8x32xf32>
    %291 = tpu.matmul %290, %267, %cst_75 {dimension_numbers = #tpu.dot_dimension_numbers<[2], [1], [1], [2], [0, 0, 0, 1, 1, 2], [0], [0]>} : vector<16x8x8xf32>, vector<16x8x32xf32>, vector<16x8x32xf32> -> vector<16x8x32xf32>
    "tpu.trace_stop"() : () -> ()
    %292 = vector.shape_cast %291 : vector<16x8x32xf32> to vector<16x256xf32>
    %c0_76 = arith.constant 0 : index
    %c0_77 = arith.constant 0 : index
    %293 = vector.load %arg9[%c0_76, %c0_77] : memref<256x128xf32, #tpu.memory_space<vmem>>, vector<256x128xf32>
    %cst_78 = arith.constant dense<0.000000e+00> : vector<16x128xf32>
    %294 = tpu.matmul %292, %293, %cst_78 {dimension_numbers = #tpu.dot_dimension_numbers<[1], [0], [0], [1], [0, 0, 1, 1], [], []>} : vector<16x256xf32>, vector<256x128xf32>, vector<16x128xf32> -> vector<16x128xf32>
    %c0_79 = arith.constant 0 : index
    %c0_80 = arith.constant 0 : index
    %295 = vector.load %arg10[%c0_79, %c0_80] : memref<1x128xf32, #tpu.memory_space<vmem>>, vector<1x128xf32>
    %296 = vector.broadcast %295 : vector<1x128xf32> to vector<16x128xf32>
    %297 = arith.addf %294, %296 : vector<16x128xf32>
    %c0_81 = arith.constant 0 : index
    %c0_82 = arith.constant 0 : index
    %298 = vector.load %arg11[%c0_81, %c0_82] : memref<128x2xf32, #tpu.memory_space<vmem>>, vector<128x2xf32>
    %cst_83 = arith.constant dense<0.000000e+00> : vector<16x2xf32>
    %299 = tpu.matmul %297, %298, %cst_83 {dimension_numbers = #tpu.dot_dimension_numbers<[1], [0], [0], [1], [0, 0, 1, 1], [], []>} : vector<16x128xf32>, vector<128x2xf32>, vector<16x2xf32> -> vector<16x2xf32>
    %c0_84 = arith.constant 0 : index
    %c0_85 = arith.constant 0 : index
    %300 = vector.load %arg12[%c0_84, %c0_85] : memref<1x2xf32, #tpu.memory_space<vmem>>, vector<1x2xf32>
    %301 = vector.broadcast %300 : vector<1x2xf32> to vector<16x2xf32>
    %302 = arith.addf %299, %301 : vector<16x2xf32>
    %303 = vector.extract_strided_slice %302 {offsets = [0, 0], sizes = [8, 2], strides = [1, 1]} : vector<16x2xf32> to vector<8x2xf32>
    %304 = vector.extract_strided_slice %302 {offsets = [8, 0], sizes = [8, 2], strides = [1, 1]} : vector<16x2xf32> to vector<8x2xf32>
    %305 = arith.addf %303, %304 : vector<8x2xf32>
    %cst_86 = arith.constant 5.000000e-01 : f32
    %306 = vector.broadcast %cst_86 : f32 to vector<8x2xf32>
    %307 = arith.mulf %306, %305 : vector<8x2xf32>
    %c0_87 = arith.constant 0 : index
    %c0_88 = arith.constant 0 : index
    %308 = vector.load %arg13[%c0_87, %c0_88] : memref<8x2xf32, #tpu.memory_space<vmem>>, vector<8x2xf32>
    tpu.vector_store %arg13[%c0_87, %c0_88], %307 {strides = array<i32>} : memref<8x2xf32, #tpu.memory_space<vmem>>, vector<8x2xf32>,
    return
  }
  func.func @transform_0(%arg0: i32) -> (i32, i32, i32, i32) {
    %c0_i32 = arith.constant 0 : i32
    %c0_i32_0 = arith.constant 0 : i32
    %c0_i32_1 = arith.constant 0 : i32
    %c0_i32_2 = arith.constant 0 : i32
    return %c0_i32, %arg0, %c0_i32_0, %c0_i32_1 : i32, i32, i32, i32
  }
  func.func @transform_1(%arg0: i32) -> (i32, i32) {
    %c0_i32 = arith.constant 0 : i32
    %c0_i32_0 = arith.constant 0 : i32
    %c0_i32_1 = arith.constant 0 : i32
    return %c0_i32, %c0_i32_0 : i32, i32
  }
  func.func @transform_2(%arg0: i32) -> (i32, i32) {
    %c0_i32 = arith.constant 0 : i32
    %c0_i32_0 = arith.constant 0 : i32
    %c0_i32_1 = arith.constant 0 : i32
    return %c0_i32, %c0_i32_0 : i32, i32
  }
  func.func @transform_3(%arg0: i32) -> (i32, i32) {
    %c0_i32 = arith.constant 0 : i32
    %c0_i32_0 = arith.constant 0 : i32
    %c0_i32_1 = arith.constant 0 : i32
    return %c0_i32, %c0_i32_0 : i32, i32
  }
  func.func @transform_4(%arg0: i32) -> (i32, i32) {
    %c0_i32 = arith.constant 0 : i32
    %c0_i32_0 = arith.constant 0 : i32
    %c0_i32_1 = arith.constant 0 : i32
    return %c0_i32, %c0_i32_0 : i32, i32
  }
  func.func @transform_5(%arg0: i32) -> (i32, i32) {
    %c0_i32 = arith.constant 0 : i32
    %c0_i32_0 = arith.constant 0 : i32
    %c0_i32_1 = arith.constant 0 : i32
    return %c0_i32, %c0_i32_0 : i32, i32
  }
  func.func @transform_6(%arg0: i32) -> (i32, i32) {
    %c0_i32 = arith.constant 0 : i32
    %c0_i32_0 = arith.constant 0 : i32
    %c0_i32_1 = arith.constant 0 : i32
    return %c0_i32, %c0_i32_0 : i32, i32
  }
  func.func @transform_7(%arg0: i32) -> (i32, i32) {
    %c0_i32 = arith.constant 0 : i32
    %c0_i32_0 = arith.constant 0 : i32
    %c0_i32_1 = arith.constant 0 : i32
    return %c0_i32, %c0_i32_0 : i32, i32
  }
  func.func @transform_8(%arg0: i32) -> (i32, i32) {
    %c0_i32 = arith.constant 0 : i32
    %c0_i32_0 = arith.constant 0 : i32
    %c0_i32_1 = arith.constant 0 : i32
    return %c0_i32, %c0_i32_0 : i32, i32
  }
  func.func @transform_9(%arg0: i32) -> (i32, i32) {
    %c0_i32 = arith.constant 0 : i32
    %c0_i32_0 = arith.constant 0 : i32
    %c0_i32_1 = arith.constant 0 : i32
    return %c0_i32, %c0_i32_0 : i32, i32
  }
  func.func @transform_10(%arg0: i32) -> (i32, i32) {
    %c0_i32 = arith.constant 0 : i32
    %c0_i32_0 = arith.constant 0 : i32
    %c0_i32_1 = arith.constant 0 : i32
    return %c0_i32, %c0_i32_0 : i32, i32
  }
  func.func @transform_11(%arg0: i32) -> (i32, i32) {
    %c0_i32 = arith.constant 0 : i32
    %c0_i32_0 = arith.constant 0 : i32
    %c0_i32_1 = arith.constant 0 : i32
    return %c0_i32, %c0_i32_0 : i32, i32
  }
  func.func @transform_12(%arg0: i32) -> (i32, i32) {
    %c0_i32 = arith.constant 0 : i32
    %c0_i32_0 = arith.constant 0 : i32
    return %arg0, %c0_i32 : i32, i32
  }
}

</mosaic_0001>

<bundles_post_ra>
// kernel: tpu_custom_call.1
= control target key start
LH: loop header
LB: loop body
LE: loop exit
PB: predicated region body
PF: predicated region fallthrough
CT: control target
= control target key end

     0   :  { %s14990_s0 = inlined_call_operand.hbm [shape: f32[2,16,8,32], index: 0, kind: input, shape index: {}]   ;;  %s14991_s1 = inlined_call_operand.vmem [shape: f32[32,128], index: 1, kind: input, shape index: {}]   ;;  %s14992_s2 = inlined_call_operand.vmem [shape: f32[32,128], index: 2, kind: input, shape index: {}]   ;;  %s14993_s3 = inlined_call_operand.vmem [shape: f32[1,128], index: 3, kind: input, shape index: {}]   ;;  %s14994_s4 = inlined_call_operand.vmem [shape: f32[32,64], index: 4, kind: input, shape index: {}]   ;;  %s14995_s5 = inlined_call_operand.vmem [shape: f32[1,64], index: 5, kind: input, shape index: {}]   ;;  %s14996_s6 = inlined_call_operand.vmem [shape: f32[64,8], index: 6, kind: input, shape index: {}]   ;;  %s14997_s7 = inlined_call_operand.vmem [shape: f32[1,8], index: 7, kind: input, shape index: {}]   ;;  %s14998_s8 = inlined_call_operand.hbm [shape: f32[256,128], index: 8, kind: input, shape index: {}]   ;;  %s14999_s9 = inlined_call_operand.vmem [shape: f32[1,128], index: 9, kind: input, shape index: {}]   ;;  %s15000_s10 = inlined_call_operand.vmem [shape: f32[128,2], index: 10, kind: input, shape index: {}]   ;;  %s15001_s11 = inlined_call_operand.vmem [shape: f32[1,2], index: 11, kind: input, shape index: {}]   ;;  %s15002_s12 = inlined_call_operand.vmem [shape: f32[16,2], index: 12, kind: output, shape index: {}]  }
   0x1   :  { %15133 = sst [smem:[#allocation114_spill]] %s14998_s8 }
   0x2   :  { %17 = vsyncpa [#allocation4], 0 }
   0x3   :  { %19 = vsyncpa [#allocation4 + $0x1], 0 }
   0x4   :  { %20 = vsyncpa [#allocation6], 0  ;;  %s11184_s21 = smov 0   ;;  %s11186_s22 = smov 0  }
   0x5   :  { %s11188_s23 = smov 0   ;;  %s11190_s24 = smov 0  }
   0x6 LB: > { %15134 = sst [smem:[#allocation12_spill]] %s11098_s23  ;;  %s11203_s25 = sadd.s32 4294967295, %s11102_s24   ;;  %s11102_s24 = sphi %s11190_s24, %s15390_s24   ;;  %s11098_s23 = sphi %s11188_s23, %s15392_s23   ;;  %s11094_s22 = sphi %s11186_s22, %s15394_s22   ;;  %s11090_s21 = sphi %s11184_s21, %s15393_s21  }
   0x7   : > { %s11206_s26 = sadd.s32 1, %s11102_s24   ;;  %s33_s28 = sadd.s32 1, %s11098_s23 }
   0x8   : > { %15135 = sst [smem:[#allocation13_spill]] %s11206_s26  ;;  %s30_s27 = ssub.s32 %s11102_s24, %s11206_s26 }
   0x9   : > { %p31_p0 = scmp.eq.s32.totalorder %s30_s27, 0  ;;  %p40_p1 = scmp.ne.s32.totalorder %s11098_s23, %s11094_s22 }
   0xa   : > { %p41_p2 = scmp.eq.s32.totalorder %s11102_s24, 0  ;;  %p46_p3 = scmp.ne.s32.totalorder %s11094_s22, %s11090_s21 }
   0xb   : > { %s11216_s29 = scalar_select %p31_p0, %s11098_s23, %s33_s28  }
   0xc   : > { %p11218_p4 = por %p41_p2, %p40_p1  ;;  %p15003_p5 = scmp.eq.s32.totalorder %s11203_s25, 0 }
   0xd   : > { %15136 = sst [smem:[#allocation14_spill]] %s11216_s29  ;;  %p8927_p6 = scmp.ge.s32.totalorder %s11102_s24, 1 }
   0xe   : > { %s15137_s30 = scalar_select %p11218_p4, 1, 0 }
   0xf   : > { %p314_p7 = scmp.lt.s32.totalorder %s11102_s24, 3  ;;  %p11227_p8 = por %p15003_p5, %p46_p3 }
  0x10   : > { %s11104_s15 = smov [#allocation5]   ;;  %s15141_s8 = sld [smem:[#allocation114_spill]] }
  0x11   : > { %s15138_s13 = scalar_select %p11227_p8, 1, 0 }
  0x12   : > { %p11231_p9 = pnand %p8927_p6, %p314_p7  ;;  %s347_s16 = sshll.u32 %s11104_s15, 4  ;;  %s348_s16 = int_to_ptr.vmem [resolvable:$true] %s347_s16 }
  0x14   : > { %s15139_s14 = scalar_select %p11231_p9, 1, 0 }
  0x15   : > { %p9833_p10 = pneg %p11231_p9 }
  0x16   : > { %s11036_s20 = scalar_lea.hbm %s15141_s8, 4096 }
  0x17   : > { %p11239_p11 = pnand %p9833_p10, %p15003_p5  ;;  %p11037_p12 = scmp.ne.s32.totalorder %s15141_s8, %s11036_s20 }
  0x18   : > { %p11043_p2 = scmp.lt.u32.totalorder %s11036_s20, %s15141_s8 }
  0x19   : > { %p11038_p13 = pneg %p11239_p11 }
  0x1b   : > { %p11039_p0 = pnand %p11038_p13, %p11037_p12 }
  0x1d   : > { %p11040_p1 = pneg %p11039_p0 }
  0x1f   : > { %p11045_p3 = pnand %p11043_p2, %p11040_p1 }
  0x21   : > { %11048 = shalt.err (!%p11045_p3)
}
  0x22   : > { %s11049_s29 = scalar_lea.vmem %s348_s16, 4096  ;;  %p11057_p5 = scmp.lt.s32.totalorder %s348_s16, %s348_s16 }
  0x23   : > { %p11050_p6 = scmp.ne.s32.totalorder %s348_s16, %s11049_s29  ;;  %p11058_p8 = scmp.lt.s32.totalorder %s11049_s29, %s11049_s29 }
  0x25   : > { %p11052_p7 = pnand %p11050_p6, %p11038_p13  ;;  %p11059_p9 = por %p11058_p8, %p11057_p5 }
  0x27   : > { %p11053_p10 = pneg %p11052_p7 }
  0x29   : > { %p11060_p4 = pnand %p11059_p9, %p11053_p10 }
  0x2b   : > { %11063 = shalt.err (!%p11060_p4)
}
  0x2c   : > { %s11105_s18 = smov 128   ;;  %s11106_s19 = smov 8  }
  0x2d   : > { %9836 = dma.hbm_to_vmem [thread:$0]  (!%p11239_p11), %s15141_s8, 4096, %s348_s16, [#allocation6], %s11105_s18, %s11105_s18, %s11106_s19  }
  0x2e   : > { %p8929_p12 = scmp.ge.s32.totalorder %s11102_s24, 2 }
  0x30   : > { %366 = sbr.rel (%p8929_p12) target bundleno = 69 (0x45), region = 60 }
  0x37   : > { %s370_s29 = sand.u32 1, %s11098_s23   ;;  %s9152_s28 = sshll.u32 %s11102_s24, 10 }
  0x38   : > { %s8930_s20 = sshll.u32 %s370_s29, 7  ;;  %p15142_p4 = scmp.ne.s32.totalorder %s15137_s30, 0 }
  0x39   : > { %s380_s16 = scalar_lea.hbm %s14990_s0, %s9152_s28  ;;  %s374_s19 = scalar_lea.vmem [#allocation3], %s8930_s20 }
  0x3a   : > { %s9822_s17 = scalar_select %p15142_p4, [#allocation0], [#allocation9] }
  0x3b   : > { %s393_s21 = sshll.u32 %s374_s19, 4  ;;  %s11107_s27 = smov 2048   ;;  %s394_s21 = int_to_ptr.vmem [resolvable:$true] %s393_s21 }
  0x3c   : > { %s385_s18 = sld [smem:[%s9822_s17]]   ;;  %s11108_s8 = smov 1024  }
  0x3d   : > { %9823 = sst [smem:[#allocation8]] (%p15142_p4), %s11107_s27  ;;  %s11109_s23 = smov 8  }
  0x3e   : > { %9824 = sst [smem:[#allocation8 + $0x1]] (%p15142_p4), %s11108_s8  ;;  %s11110_s24 = smov 128  }
  0x3f   : > { %9825 = sst [smem:[#allocation8 + $0x2]] (%p15142_p4), %s11109_s23  ;;  %s371_s28 = scalar_lea.sflag [#allocation4], %s370_s29 }
  0x40   : > { %9826 = sst [smem:[#allocation8 + $0x3]] (%p15142_p4), %s11110_s24  ;;  %s11111_s17 = smov [#allocation7]  }
  0x41   : > { %9827 = sst [smem:[#allocation8 + $0x4]] (%p15142_p4), %s11110_s24 }
  0x42   : > { %s8933_s26 = sshll.u32 %s385_s18, 26  ;;  %9828 = sst [smem:[#allocation8 + $0x5]] (%p15142_p4), %s11109_s23 }
  0x43   : > { %s8934_s20 = sadd.s32 134217728, %s8933_s26 }
  0x44   : > { %9829 = dma.general (%p15142_p4), %s380_s16, 2048, %s394_s21, %s371_s28, %s11111_s17, [#allocation8], %s8934_s20, 0  }
  0x45 PF: > { %p15143_p5 = scmp.ne.s32.totalorder %s15139_s14, 0 }
  0x47   : > { %418 = sbr.rel (%p15143_p5) target bundleno = 7802 (0x1e7a), region = 68 }
  0x4e   : > { %s420_s8 = sand.u32 1, %s11094_s22   ;;  %p15144_p8 = scmp.ne.s32.totalorder %s15138_s13, 0 }
  0x4f   : > { %s8936_s15 = sshll.u32 %s420_s8, 7  ;;  %s421_s19 = scalar_lea.sflag [#allocation4], %s420_s8 }
  0x50   : > { %s11284_s27 = scalar_lea.vmem [#allocation3], %s8936_s15 }
  0x51   : > { %11081 = dma.done.wait (%p15144_p8), %s421_s19, 2048  }
  0x52   : > { %11083 = vsyncadd (%p15144_p8), %s421_s19, 4294965248  ;;  %p15145_p9 = scmp.eq.s32.totalorder %s11203_s25, 0 }
  0x54   : > { %11085 = dma.done.wait (%p15145_p9), [#allocation6], 4096   ;;  %p15146_p11 = pmov %p15145_p9 }
  0x55   : > { %v15010_v0 = vmov 0.0   ;;  %v489_v1 = vld [vmem:[%s14991_s1] sm:$0xff]  ;;  %v490_v2 = vld [vmem:[%s14991_s1 + $0x8] sm:$0xff]  ;;  %vm500_vm0 = vcmask 261120   ;;  %v491_v6 = vld [vmem:[%s14991_s1 + $0x10] sm:$0xff]  ;;  %s11114_s14 = smov 32  }
  0x56   : > { %11087 = vsyncadd (%p15146_p11), [#allocation6], 4294963200  ;;  %9393 = vmatprep.mubr.f32.mxu1 %v15010_v0  ;;  %v694_v3 = vld [vmem:[%s14992_s2] sm:$0xff]  ;;  %v9660_v4 = vpack.c.bf16 %v490_v2, %v489_v1  ;;  %v695_v5 = vld [vmem:[%s14992_s2 + $0x8] sm:$0xff]  ;;  %vm1290_vm1 = vcmask 1041409   ;;  %vm1293_vm2 = vcmask 1042434  }
  0x57   : > { %v492_v7 = vld [vmem:[%s14991_s1 + $0x18] sm:$0xff]  ;;  %v11313_v8 = vpack.c.bf16 %v695_v5, %v694_v3  ;;  %v696_v10 = vld [vmem:[%s14992_s2 + $0x10] sm:$0xff]  ;;  %v473_v12 = vld [vmem:[%s11284_s27] sm:$0xff]  ;;  %vm1296_vm3 = vcmask 1043459   ;;  %vm1299_vm4 = vcmask 1044484   ;;  %vm1302_vm5 = vcmask 1045509  }
  0x58   : > { %v9664_v9 = vpack.c.bf16 %v492_v7, %v491_v6  ;;  %v697_v11 = vld [vmem:[%s14992_s2 + $0x18] sm:$0xff]  ;;  %9661 = vmatprep.subr.bf16.mxu0 %v9660_v4  ;;  %9361 = vmatprep.mubr.msk.f32.mxu0 %vm500_vm0, %v473_v12  ;;  %v474_v14 = vld [vmem:[%s11284_s27 + $0x8] sm:$0xff]  ;;  %v475_v15 = vld [vmem:[%s11284_s27 + $0x10] sm:$0xff]  ;;  %vm1305_vm6 = vcmask 1046534   ;;  %vm1308_vm7 = vcmask 1047559   ;;  %vm1272_vm8 = vcmask 253952  }
  0x59   : > { %v11322_v13 = vpack.c.bf16 %v697_v11, %v696_v10  ;;  %9669 = vmatprep.subr.bf16.mxu1 %v11313_v8  ;;  %9663 = vmatpush3.bf16.msra.mxu0 %v9660_v4  ;;  %v476_v16 = vld [vmem:[%s11284_s27 + $0x18] sm:$0xff]  ;;  %v477_v17 = vld [vmem:[%s11284_s27 + $0x20] sm:$0xff]  ;;  %v478_v18 = vld [vmem:[%s11284_s27 + $0x28] sm:$0xff]  ;;  %vm1951_vm9 = vcmask 254977   ;;  %vm2623_vm10 = vcmask 256002   ;;  %vm3295_vm11 = vcmask 257027  }
  0x5a   : > { %9671 = vmatpush3.bf16.msra.mxu1 %v11313_v8  ;;  %9665 = vmatprep.subr.bf16.mxu0 %v9664_v9  ;;  %v479_v19 = vld [vmem:[%s11284_s27 + $0x30] sm:$0xff]  ;;  %v480_v20 = vld [vmem:[%s11284_s27 + $0x38] sm:$0xff]  ;;  %v481_v21 = vld [vmem:[%s11284_s27 + $0x40] sm:$0xff]  ;;  %vm3967_vm12 = vcmask 258052   ;;  %vm4639_vm13 = vcmask 259077   ;;  %vm5311_vm14 = vcmask 260102  }
  0x5b   : > { %9673 = vmatprep.subr.bf16.mxu1 %v11322_v13  ;;  %v482_v22 = vld [vmem:[%s11284_s27 + $0x48] sm:$0xff]  ;;  %v483_v23 = vld [vmem:[%s11284_s27 + $0x50] sm:$0xff]  ;;  %v484_v24 = vld [vmem:[%s11284_s27 + $0x58] sm:$0xff]  ;;  %vm5983_vm15 = vcmask 261127   ;;  %s11118_s23 = smov 96   ;;  %p469_p13 = scmp.lt.s32.totalorder %s11203_s25, 1 }
  0x5c   : > { %v485_v25 = vld [vmem:[%s11284_s27 + $0x60] sm:$0xff]  ;;  %v486_v26 = vld [vmem:[%s11284_s27 + $0x68] sm:$0xff]  ;;  %v487_v27 = vld [vmem:[%s11284_s27 + $0x70] sm:$0xff] }
  0x5d   : > { %9667 = vmatpush3.bf16.msra.mxu0 %v9664_v9  ;;  %v488_v28 = vld [vmem:[%s11284_s27 + $0x78] sm:$0xff]  ;;  %v11373_v30 = vld [vmem:[%s14993_s3] ss:$0 sm:$0xff]  ;;  %s11113_s27 = smov 64   ;;  %s15396_s25 = smov (!%p469_p13, %s11203_s25), 1 }
  0x5e   : > { %9675 = vmatpush3.bf16.msra.mxu1 %v11322_v13  ;;  %9701 = vmatprep.subr.bf16.mxu0 %v11313_v8  ;;  %s8938_s13 = sshll.u32 %s15396_s25, 3 }
  0x5f   : > { %9677 = vmatprep.subr.bf16.mxu1 %v11313_v8  ;;  %s472_s21 = scalar_lea.vmem %s15002_s12, %s8938_s13 }
  0x60   : > { %9362 = vmatmul.mubr.msk.f32.vlgmr.msra.gmra.mrb[0].mxu0 %vm500_vm0, %v474_v14 }
  0x61   : > { %9394 = vmatmul.mubr.f32.vlgmr.msra.gmra.mrb[0].mxu1 %v15010_v0  ;;  %9364 = vmatprep.mubr.msk.f32.mxu0 %vm500_vm0, %v475_v15 }
  0x62   : > { %9679 = vmatpush3.bf16.msra.mxu1 %v11313_v8  ;;  %9703 = vmatpush3.bf16.msra.mxu0 %v11313_v8 }
  0x63   : > { %9681 = vmatprep.subr.bf16.mxu1 %v11322_v13  ;;  %9705 = vmatprep.subr.bf16.mxu0 %v11322_v13 }
  0x64   : > { %9365 = vmatmul.mubr.msk.f32.gmra.mrb[2].mxu0 %vm500_vm0, %v476_v16 }
  0x65   : > { %9367 = vmatprep.mubr.msk.f32.mxu0 %vm500_vm0, %v477_v17 }
  0x66   : > { %9683 = vmatpush3.bf16.msra.mxu1 %v11322_v13  ;;  %9707 = vmatpush3.bf16.msra.mxu0 %v11322_v13 }
  0x67   : > { %9685 = vmatprep.subr.bf16.mxu1 %v11313_v8  ;;  %9717 = vmatprep.subr.bf16.mxu0 %v11313_v8 }
  0x68   : > { %9368 = vmatmul.mubr.msk.f32.gmra.mrb[4].mxu0 %vm500_vm0, %v478_v18 }
  0x69   : > { %9370 = vmatprep.mubr.msk.f32.mxu0 %vm500_vm0, %v479_v19 }
  0x6c   : > { %9371 = vmatmul.mubr.msk.f32.gmra.mrb[6].mxu0 %vm500_vm0, %v480_v20 }
  0x6d   : > { %9373 = vmatprep.mubr.msk.f32.mxu0 %vm500_vm0, %v481_v21 }
  0x70   : > { %9374 = vmatmul.mubr.msk.f32.gmra.mrb[8].mxu0 %vm500_vm0, %v482_v22 }
  0x71   : > { %9376 = vmatprep.mubr.msk.f32.mxu0 %vm500_vm0, %v483_v23 }
  0x74   : > { %9377 = vmatmul.mubr.msk.f32.gmra.mrb[10].mxu0 %vm500_vm0, %v484_v24 }
  0x75   : > { %9379 = vmatprep.mubr.msk.f32.mxu0 %vm500_vm0, %v485_v25 }
  0x78   : > { %9380 = vmatmul.mubr.msk.f32.gmra.mrb[12].mxu0 %vm500_vm0, %v486_v26 }
  0x79   : > { %9382 = vmatprep.mubr.msk.f32.mxu0 %vm500_vm0, %v487_v27 }
  0x7c   : > { %9383 = vmatmul.mubr.msk.f32.gmra.mrb[14].mxu0 %vm500_vm0, %v488_v28 }
 0x133   : > { %v9363_v29 = vpop.f32.mrb[0].mxu0 }
 0x134   : > { %v11375_v31 = vpop.f32.mrb[0].mxu1  ;;  %v615_v32 = vpop.f32.mrb[1].mxu0  ;;  %v11380_v34 = vadd.f32 %v9363_v29, %v11373_v30 }
 0x135   : > { %v11377_v33 = vpop.f32.mrb[1].mxu1  ;;  %v11383_v35 = vadd.f32 %v11373_v30, %v615_v32  ;;  %v785_v60 = vrot.slane %v11375_v31, 1  ;;  %v787_v5 = vrot.slane %v11375_v31, 3  ;;  %v789_v15 = vrot.slane %v11375_v31, 5 }
 0x136   : > { %v778_v39 = vrot.slane %v11377_v33, 1  ;;  %v780_v40 = vrot.slane %v11377_v33, 3  ;;  %v782_v45 = vrot.slane %v11377_v33, 5  ;;  %v779_v49 = vrot.slane %v11377_v33, 2 }
 0x137   : > { %v9366_v36 = vpop.f32.mrb[2].mxu0  ;;  %v11392_v41 = vadd.f32 %v11377_v33, %v11383_v35  ;;  %v781_v55 = vrot.slane %v11377_v33, 4  ;;  %v783_v57 = vrot.slane %v11377_v33, 6  ;;  %v786_v21 = vrot.slane %v11375_v31, 2 }
 0x138   : > { %v11386_v37 = vadd.f32 %v9366_v36, %v11373_v30  ;;  %v625_v38 = vpop.f32.mrb[3].mxu0  ;;  %v11395_v42 = vadd.f32 %v778_v39, %v11380_v34  ;;  %v788_v25 = vrot.slane %v11375_v31, 4  ;;  %v784_v36 = vrot.slane %v11377_v33, 7 }
 0x139   : > { %9916 = vtanh.f32 %v11392_v41  ;;  %v11403_v46 = vadd.f32 %v11373_v30, %v625_v38 }
 0x13a   : > { %v11399_v44 = vadd.f32 %v780_v40, %v11386_v37  ;;  %9918 = vtanh.f32 %v11395_v42 }
 0x13b   : > { %v9369_v43 = vpop.f32.mrb[4].mxu0  ;;  %v11418_v54 = vadd.f32 %v779_v49, %v11403_v46 }
 0x13c   : > { %v11406_v47 = vadd.f32 %v9369_v43, %v11373_v30  ;;  %v635_v48 = vpop.f32.mrb[5].mxu0  ;;  %9920 = vtanh.f32 %v11399_v44  ;;  %v790_v43 = vrot.slane %v11375_v31, 6 }
 0x13d   : > { %v11414_v51 = vadd.f32 %v11373_v30, %v635_v48  ;;  %v791_v48 = vrot.slane %v11375_v31, 7 }
 0x13e   : > { %v11411_v50 = vadd.f32 %v782_v45, %v11406_v47 }
 0x13f   : > { %v9372_v52 = vpop.f32.mrb[6].mxu0  ;;  %v11427_v59 = vadd.f32 %v781_v55, %v11414_v51 }
 0x140   : > { %v645_v53 = vpop.f32.mrb[7].mxu0  ;;  %9922 = vtanh.f32 %v11411_v50  ;;  %v11479_v26 = vadd.f32 %v9372_v52, %v11373_v30 }
 0x141   : > { %v11422_v56 = vadd.f32 %v11373_v30, %v645_v53  ;;  %9924 = vtanh.f32 %v11418_v54 }
 0x142   : > { %9926 = vtanh.f32 %v11427_v59  ;;  %v815_v33 = vadd.f32 %v784_v36, %v11479_v26 }
 0x143   : > { %v9375_v58 = vpop.f32.mrb[8].mxu0  ;;  %v11435_v63 = vadd.f32 %v783_v57, %v11422_v56  ;;  %v9917_v1 = vpop.eup %9916 }
 0x144   : > { %v11431_v61 = vadd.f32 %v9375_v58, %v11373_v30  ;;  %v655_v62 = vpop.f32.mrb[9].mxu0  ;;  %v9919_v2 = vpop.eup %9918  ;;  %968 = vrot.lane.b32.xlu1 %v9917_v1, %s11113_s27  ;;  %v8956_v1 = vmul.f32 -1.442695, %v11392_v41 }
 0x145   : > { %970 = vrot.lane.b32.xlu0 %v9919_v2, %s11113_s27  ;;  %v11445_v6 = vadd.f32 %v11373_v30, %v655_v62  ;;  %9928 = vtanh.f32 %v11435_v63  ;;  %v8957_v2 = vmul.f32 -1.442695, %v11395_v42 }
 0x146   : > { %v11439_v3 = vadd.f32 %v785_v60, %v11431_v61  ;;  %v9921_v10 = vpop.eup %9920 }
 0x147   : > { %v9378_v4 = vpop.f32.mrb[10].mxu0  ;;  %v11466_v19 = vadd.f32 %v11375_v31, %v11445_v6 }
 0x148   : > { %v11448_v7 = vadd.f32 %v9378_v4, %v11373_v30  ;;  %v665_v9 = vpop.f32.mrb[11].mxu0  ;;  %9930 = vtanh.f32 %v11439_v3  ;;  %v8959_v4 = vmul.f32 -1.442695, %v11399_v44  ;;  %v8965_v41 = vmul.f32 -1.442695, %v11439_v3 }
 0x149   : > { %974 = vrot.lane.b32.xlu0 %v9921_v10, %s11113_s27  ;;  %v11458_v16 = vadd.f32 %v11373_v30, %v665_v9  ;;  %v8961_v9 = vmul.f32 -1.442695, %v11411_v50  ;;  %v8964_v50 = vmul.f32 -1.442695, %v11466_v19 }
 0x14a   : > { %v11453_v11 = vadd.f32 %v787_v5, %v11448_v7  ;;  %v9923_v12 = vpop.eup %9922  ;;  %v8958_v5 = vmul.f32 -1.442695, %v11418_v54 }
 0x14b   : > { %v9381_v14 = vpop.f32.mrb[12].mxu0  ;;  %978 = vrot.lane.b32.xlu1 %v9923_v12, %s11113_s27  ;;  %v9925_v20 = vpop.eup %9924  ;;  %v11483_v28 = vadd.f32 %v786_v21, %v11458_v16  ;;  %v8960_v12 = vmul.f32 -1.442695, %v11427_v59 }
 0x14c   : > { %v11461_v17 = vadd.f32 %v9381_v14, %v11373_v30  ;;  %v675_v18 = vpop.f32.mrb[13].mxu0  ;;  %9932 = vtanh.f32 %v11453_v11  ;;  %v9927_v29 = vpop.eup %9926  ;;  %v8967_v44 = vmul.f32 -1.442695, %v11453_v11 }
 0x14d   : > { %v11471_v22 = vadd.f32 %v11373_v30, %v675_v18  ;;  %972 = vrot.lane.b32.xlu0 %v9925_v20, %s11113_s27  ;;  %9934 = vtanh.f32 %v11466_v19  ;;  %v8966_v21 = vmul.f32 -1.442695, %v11483_v28 }
 0x14e   : > { %v11474_v23 = vadd.f32 %v789_v15, %v11461_v17  ;;  %v8962_v15 = vmul.f32 -1.442695, %v11435_v63 }
 0x14f   : > { %v9384_v24 = vpop.f32.mrb[14].mxu0  ;;  %v9929_v32 = vpop.eup %9928  ;;  %v11491_v39 = vadd.f32 %v788_v25, %v11471_v22 }
 0x150   : > { %v685_v27 = vpop.f32.mrb[15].mxu0  ;;  %9936 = vtanh.f32 %v11474_v23  ;;  %980 = vrot.lane.b32.xlu1 %v9929_v32, %s11113_s27  ;;  %v11497_v45 = vadd.f32 %v9384_v24, %v11373_v30  ;;  %v8969_v63 = vmul.f32 -1.442695, %v11474_v23 }
 0x151   : > { %v11488_v38 = vadd.f32 %v11373_v30, %v685_v27  ;;  %976 = vrot.lane.b32.xlu0 %v9927_v29, %s11113_s27  ;;  %9938 = vtanh.f32 %v11483_v28  ;;  %v8968_v11 = vmul.f32 -1.442695, %v11491_v39  ;;  %v8963_v27 = vmul.f32 -1.442695, %v815_v33 }
 0x152   : > { %v9931_v40 = vpop.eup %9930  ;;  %9940 = vtanh.f32 %v11491_v39  ;;  %v11509_v30 = vadd.f32 %v791_v48, %v11497_v45 }
 0x153   : > { %v11504_v49 = vadd.f32 %v790_v43, %v11488_v38  ;;  %9942 = vtanh.f32 %v815_v33 }
 0x154   : > { %986 = vrot.lane.b32.xlu1 %v9931_v40, %s11113_s27  ;;  %v8971_v48 = vmul.f32 -1.442695, %v11509_v30 }
 0x155   : > { %9944 = vtanh.f32 %v11504_v49  ;;  %v8970_v23 = vmul.f32 -1.442695, %v11504_v49 }
 0x156   : > { %v9933_v52 = vpop.eup %9932  ;;  %9946 = vtanh.f32 %v11509_v30 }
 0x157   : > { %990 = vrot.lane.b32.xlu0 %v9933_v52, %s11113_s27  ;;  %v9935_v53 = vpop.eup %9934  ;;  %9948 = vpow2.f32 %v8956_v1 }
 0x158   : > { %984 = vrot.lane.b32.xlu1 %v9935_v53, %s11113_s27  ;;  %9950 = vpow2.f32 %v8957_v2 }
 0x159   : > { %9952 = vpow2.f32 %v8959_v4 }
 0x15a   : > { %v9937_v55 = vpop.eup %9936  ;;  %9954 = vpow2.f32 %v8958_v5 }
 0x15b   : > { %994 = vrot.lane.b32.xlu0 %v9937_v55, %s11113_s27  ;;  %v9939_v31 = vpop.eup %9938  ;;  %9956 = vpow2.f32 %v8961_v9 }
 0x15c   : > { %988 = vrot.lane.b32.xlu1 %v9939_v31, %s11113_s27  ;;  %v9941_v57 = vpop.eup %9940  ;;  %9958 = vpow2.f32 %v8960_v12 }
 0x15d   : > { %v9943_v58 = vpop.eup %9942  ;;  %9960 = vpow2.f32 %v8962_v15 }
 0x15f   : > { %992 = vrot.lane.b32.xlu0 %v9941_v57, %s11113_s27  ;;  %v9945_v60 = vpop.eup %9944 }
 0x160   : > { %982 = vrot.lane.b32.xlu1 %v9943_v58, %s11113_s27  ;;  %v9947_v62 = vpop.eup %9946 }
 0x161   : > { %v9949_v10 = vpop.eup %9948 }
 0x162   : > { %v9951_v14 = vpop.eup %9950  ;;  %v872_v18 = vadd.f32 1.0, %v9949_v10 }
 0x163   : > { %996 = vrot.lane.b32.xlu0 %v9945_v60, %s11113_s27  ;;  %v873_v42 = vadd.f32 1.0, %v9951_v14  ;;  %v9953_v20 = vpop.eup %9952 }
 0x164   : > { %998 = vrot.lane.b32.xlu1 %v9947_v62, %s11113_s27  ;;  %9962 = vrcp.f32 %v872_v18  ;;  %v875_v54 = vadd.f32 1.0, %v9953_v20  ;;  %v9955_v59 = vpop.eup %9954 }
 0x165   : > { %9964 = vpow2.f32 %v8965_v41  ;;  %v9957_v24 = vpop.eup %9956  ;;  %v874_v3 = vadd.f32 1.0, %v9955_v59 }
 0x166   : > { %9966 = vrcp.f32 %v873_v42  ;;  %v9959_v25 = vpop.eup %9958  ;;  %v877_v19 = vadd.f32 1.0, %v9957_v24 }
 0x167   : > { %9968 = vpow2.f32 %v8967_v44  ;;  %v9961_v29 = vpop.eup %9960  ;;  %v876_v36 = vadd.f32 1.0, %v9959_v25 }
 0x168   : > { %9970 = vpow2.f32 %v8964_v50  ;;  %v878_v55 = vadd.f32 1.0, %v9961_v29 }
 0x169   : > { %9972 = vrcp.f32 %v875_v54 }
 0x16a   : > { %9974 = vpow2.f32 %v8969_v63 }
 0x16b   : > { %9976 = vpow2.f32 %v8966_v21 }
 0x16c   : > { %9978 = vrcp.f32 %v874_v3 }
 0x16d   : > { %9980 = vpow2.f32 %v8968_v11 }
 0x16e   : > { %v11533_v32 = vpop.eup %9962  ;;  %9982 = vpow2.f32 %v8963_v27 }
 0x16f   : > { %v9965_v40 = vpop.eup %9964  ;;  %9984 = vrcp.f32 %v877_v19 }
 0x170   : > { %v11536_v43 = vpop.eup %9966  ;;  %9986 = vrcp.f32 %v876_v36  ;;  %v881_v31 = vadd.f32 1.0, %v9965_v40 }
 0x171   : > { %v9969_v33 = vpop.eup %9968  ;;  %9988 = vpow2.f32 %v8970_v23 }
 0x172   : > { %v9971_v49 = vpop.eup %9970  ;;  %9990 = vpow2.f32 %v8971_v48  ;;  %v883_v58 = vadd.f32 1.0, %v9969_v33 }
 0x173   : > { %v11543_v57 = vpop.eup %9972  ;;  %9992 = vrcp.f32 %v878_v55  ;;  %v880_v2 = vadd.f32 1.0, %v9971_v49 }
 0x174   : > { %v9975_v60 = vpop.eup %9974  ;;  %9994 = vrcp.f32 %v881_v31 }
 0x175   : > { %v9977_v4 = vpop.eup %9976  ;;  %9996 = vrcp.f32 %v883_v58  ;;  %v885_v10 = vadd.f32 1.0, %v9975_v60 }
 0x176   : > { %v11547_v5 = vpop.eup %9978  ;;  %9998 = vrcp.f32 %v880_v2  ;;  %v882_v18 = vadd.f32 1.0, %v9977_v4 }
 0x177   : > { %v9981_v12 = vpop.eup %9980  ;;  %10000 = vrcp.f32 %v885_v10 }
 0x178   : > { %v9983_v15 = vpop.eup %9982  ;;  %v884_v50 = vadd.f32 1.0, %v9981_v12  ;;  %10002 = vrcp.f32 %v882_v18 }
 0x179   : > { %v11550_v41 = vpop.eup %9984  ;;  %v879_v24 = vadd.f32 1.0, %v9983_v15 }
 0x17a   : > { %v11553_v42 = vpop.eup %9986  ;;  %10004 = vrcp.f32 %v884_v50 }
 0x17b   : > { %v9989_v54 = vpop.eup %9988  ;;  %10006 = vrcp.f32 %v879_v24 }
 0x17c   : > { %v9991_v21 = vpop.eup %9990  ;;  %v886_v27 = vadd.f32 1.0, %v9989_v54 }
 0x17d   : > { %v11557_v3 = vpop.eup %9992  ;;  %v887_v23 = vadd.f32 1.0, %v9991_v21  ;;  %v939_v21 = vmul.f32 0.0, %v11543_v57 }
 0x17e   : > { %v11561_v25 = vpop.eup %9994  ;;  %10008 = vrcp.f32 %v886_v27  ;;  %v938_v27 = vmul.f32 0.0, %v11547_v5 }
 0x17f   : > { %v11565_v40 = vpop.eup %9996  ;;  %10010 = vrcp.f32 %v887_v23  ;;  %v941_v23 = vmul.f32 0.0, %v11550_v41 }
 0x180   : > { %v11570_v48 = vpop.eup %9998 }
 0x1b6   : > { %v969_v28 = vpop.permute.xlu1 %968 }
 0x1b7   : > { %v971_v52 = vpop.permute.xlu0 %970  ;;  %v1016_v39 = vmul.f32 %v11533_v32, %v969_v28 }
 0x1b8   : > { %v1017_v53 = vmul.f32 %v11536_v43, %v971_v52 }
 0x1b9   : > { %1048 = vrot.lane.b32.xlu1 %v1016_v39, %s11114_s14 }
 0x1ba   : > { %1050 = vrot.lane.b32.xlu0 %v1017_v53, %s11114_s14  ;;  %v11573_v53 = vpop.eup %10000 }
 0x1bb   : > { %v975_v30 = vpop.permute.xlu0 %974  ;;  %v11578_v31 = vpop.eup %10002 }
 0x1bc   : > { %v1019_v62 = vmul.f32 %v11543_v57, %v975_v30  ;;  %v11581_v58 = vpop.eup %10004 }
 0x1bd   : > { %v979_v1 = vpop.permute.xlu1 %978 }
 0x1be   : > { %1054 = vrot.lane.b32.xlu0 %v1019_v62, %s11114_s14  ;;  %v1021_v59 = vmul.f32 %v11550_v41, %v979_v1  ;;  %v11586_v1 = vpop.eup %10006 }
 0x1bf   : > { %v973_v9 = vpop.permute.xlu0 %972 }
 0x1c0   : > { %v1018_v14 = vmul.f32 %v11547_v5, %v973_v9  ;;  %v11589_v9 = vpop.eup %10008 }
 0x1c2   : > { %1052 = vrot.lane.b32.xlu1 %v1018_v14, %s11114_s14  ;;  %v981_v44 = vpop.permute.xlu1 %980  ;;  %v11594_v14 = vpop.eup %10010 }
 0x1c3   : > { %v977_v20 = vpop.permute.xlu0 %976  ;;  %v1022_v29 = vmul.f32 %v11557_v3, %v981_v44  ;;  %v937_v44 = vmul.f32 0.0, %v11536_v43 }
 0x1c4   : > { %v1020_v63 = vmul.f32 %v11553_v42, %v977_v20  ;;  %v936_v20 = vmul.f32 0.0, %v11533_v32 }
 0x1c6   : > { %1056 = vrot.lane.b32.xlu0 %v1020_v63, %s11114_s14  ;;  %1058 = vrot.lane.b32.xlu1 %v1021_v59, %s11114_s14  ;;  %v987_v11 = vpop.permute.xlu1 %986 }
 0x1c7   : > { %v1025_v19 = vmul.f32 %v11561_v25, %v987_v11 }
 0x1c9   : > { %v991_v36 = vpop.permute.xlu0 %990 }
 0x1ca   : > { %v1027_v28 = vmul.f32 %v11565_v40, %v991_v36  ;;  %1066 = vrot.lane.b32.xlu0 %v1025_v19, %s11114_s14  ;;  %1060 = vrot.lane.b32.xlu1 %v1022_v29, %s11114_s14  ;;  %v985_v52 = vpop.permute.xlu1 %984  ;;  %v940_v36 = vmul.f32 0.0, %v11553_v42 }
 0x1cb   : > { %v1024_v39 = vmul.f32 %v11570_v48, %v985_v52 }
 0x1cd   : > { %v995_v33 = vpop.permute.xlu0 %994 }
 0x1ce   : > { %v1029_v55 = vmul.f32 %v11573_v53, %v995_v33  ;;  %1070 = vrot.lane.b32.xlu0 %v1027_v28, %s11114_s14  ;;  %1064 = vrot.lane.b32.xlu1 %v1024_v39, %s11114_s14  ;;  %v989_v49 = vpop.permute.xlu1 %988 }
 0x1cf   : > { %v1026_v30 = vmul.f32 %v11578_v31, %v989_v49 }
 0x1d1   : > { %v993_v60 = vpop.permute.xlu0 %992 }
 0x1d2   : > { %v1028_v62 = vmul.f32 %v11581_v58, %v993_v60  ;;  %1074 = vrot.lane.b32.xlu0 %v1029_v55, %s11114_s14  ;;  %1068 = vrot.lane.b32.xlu1 %v1026_v30, %s11114_s14  ;;  %v983_v2 = vpop.permute.xlu1 %982  ;;  %v945_v30 = vmul.f32 0.0, %v11561_v25  ;;  %v942_v60 = vmul.f32 0.0, %v11557_v3 }
 0x1d3   : > { %v1023_v4 = vmul.f32 %v11586_v1, %v983_v2 }
 0x1d5   : > { %v997_v10 = vpop.permute.xlu0 %996 }
 0x1d6   : > { %v1030_v12 = vmul.f32 %v11589_v9, %v997_v10  ;;  %1072 = vrot.lane.b32.xlu0 %v1028_v62, %s11114_s14  ;;  %1062 = vrot.lane.b32.xlu1 %v1023_v4, %s11114_s14  ;;  %v999_v15 = vpop.permute.xlu1 %998 }
 0x1d7   : > { %v1031_v18 = vmul.f32 %v11594_v14, %v999_v15  ;;  %v947_v15 = vmul.f32 0.0, %v11565_v40 }
 0x1da   : > { %1076 = vrot.lane.b32.xlu0 %v1030_v12, %s11114_s14  ;;  %1078 = vrot.lane.b32.xlu1 %v1031_v18, %s11114_s14  ;;  %v944_v18 = vmul.f32 0.0, %v11570_v48 }
 0x22b   : > { %v1049_v50 = vpop.permute.xlu1 %1048 }
 0x22c   : > { %v1051_v54 = vpop.permute.xlu0 %1050  ;;  %v11601_v59 = vadd.f32 %v1049_v50, %v936_v20 }
 0x22d   : > { %v11603_v63 = vadd.f32 %v1051_v54, %v937_v44 }
 0x22e   : > { %10012 = vtanh.f32 %v11601_v59 }
 0x22f   : > { %10014 = vtanh.f32 %v11603_v63 }
 0x230   : > { %v1055_v24 = vpop.permute.xlu0 %1054 }
 0x231   : > { %v11608_v11 = vadd.f32 %v1055_v24, %v939_v21  ;;  %v949_v24 = vmul.f32 0.0, %v11573_v53 }
 0x233   : > { %10016 = vtanh.f32 %v11608_v11 }
 0x234   : > { %v1053_v29 = vpop.permute.xlu1 %1052 }
 0x235   : > { %v11612_v19 = vadd.f32 %v1053_v29, %v938_v27  ;;  %v946_v27 = vmul.f32 0.0, %v11578_v31 }
 0x237   : > { %10018 = vtanh.f32 %v11612_v19 }
 0x238   : > { %v10013_v28 = vpop.eup %10012  ;;  %v1057_v52 = vpop.permute.xlu0 %1056 }
 0x239   : > { %v1059_v39 = vpop.permute.xlu1 %1058  ;;  %v10015_v33 = vpop.eup %10014  ;;  %v11617_v55 = vadd.f32 %v1057_v52, %v940_v36  ;;  %1144 = vrot.lane.b32.xlu1 %v10013_v28, %s11113_s27 }
 0x23a   : > { %v11619_v49 = vadd.f32 %v1059_v39, %v941_v23  ;;  %1146 = vrot.lane.b32.xlu0 %v10015_v33, %s11113_s27  ;;  %v948_v33 = vmul.f32 0.0, %v11581_v58 }
 0x23b   : > { %10020 = vtanh.f32 %v11617_v55 }
 0x23c   : > { %10022 = vtanh.f32 %v11619_v49  ;;  %v1067_v62 = vpop.permute.xlu0 %1066 }
 0x23d   : > { %v1061_v2 = vpop.permute.xlu1 %1060  ;;  %v10017_v4 = vpop.eup %10016  ;;  %v11627_v10 = vadd.f32 %v1067_v62, %v945_v30  ;;  %v943_v30 = vmul.f32 0.0, %v11586_v1 }
 0x23e   : > { %v11629_v12 = vadd.f32 %v1061_v2, %v942_v60  ;;  %1150 = vrot.lane.b32.xlu0 %v10017_v4, %s11113_s27 }
 0x23f   : > { %10024 = vtanh.f32 %v11627_v10 }
 0x240   : > { %10026 = vtanh.f32 %v11629_v12  ;;  %v1071_v20 = vpop.permute.xlu0 %1070 }
 0x241   : > { %v1065_v44 = vpop.permute.xlu1 %1064  ;;  %v10019_v50 = vpop.eup %10018  ;;  %v11636_v54 = vadd.f32 %v1071_v20, %v947_v15  ;;  %v950_v20 = vmul.f32 0.0, %v11589_v9 }
 0x242   : > { %v11638_v21 = vadd.f32 %v1065_v44, %v944_v18  ;;  %1148 = vrot.lane.b32.xlu1 %v10019_v50, %s11113_s27  ;;  %v951_v44 = vmul.f32 0.0, %v11594_v14 }
 0x243   : > { %10028 = vtanh.f32 %v11636_v54 }
 0x244   : > { %10030 = vtanh.f32 %v11638_v21  ;;  %v1075_v29 = vpop.permute.xlu0 %1074 }
 0x245   : > { %v1069_v36 = vpop.permute.xlu1 %1068  ;;  %v10021_v23 = vpop.eup %10020  ;;  %v11645_v28 = vadd.f32 %v1075_v29, %v949_v24 }
 0x246   : > { %v11647_v52 = vadd.f32 %v1069_v36, %v946_v27  ;;  %v10023_v39 = vpop.eup %10022  ;;  %1152 = vrot.lane.b32.xlu0 %v10021_v23, %s11113_s27 }
 0x247   : > { %10032 = vtanh.f32 %v11645_v28  ;;  %1154 = vrot.lane.b32.xlu1 %v10023_v39, %s11113_s27 }
 0x248   : > { %10034 = vtanh.f32 %v11647_v52  ;;  %v1073_v60 = vpop.permute.xlu0 %1072 }
 0x249   : > { %v1063_v62 = vpop.permute.xlu1 %1062  ;;  %v10025_v2 = vpop.eup %10024  ;;  %v11655_v4 = vadd.f32 %v1073_v60, %v948_v33 }
 0x24a   : > { %v11657_v15 = vadd.f32 %v1063_v62, %v943_v30  ;;  %v10027_v18 = vpop.eup %10026  ;;  %1162 = vrot.lane.b32.xlu0 %v10025_v2, %s11113_s27 }
 0x24b   : > { %10036 = vtanh.f32 %v11655_v4  ;;  %1156 = vrot.lane.b32.xlu1 %v10027_v18, %s11113_s27 }
 0x24c   : > { %15147 = vst [vmem:[#allocation15_spill] sm:$0xff] %v11657_v15  ;;  %10038 = vtanh.f32 %v11657_v15  ;;  %v1077_v50 = vpop.permute.xlu0 %1076 }
 0x24d   : > { %v1079_v24 = vpop.permute.xlu1 %1078  ;;  %v10029_v27 = vpop.eup %10028  ;;  %v11665_v29 = vadd.f32 %v1077_v50, %v950_v20 }
 0x24e   : > { %v11667_v36 = vadd.f32 %v1079_v24, %v951_v44  ;;  %v10031_v23 = vpop.eup %10030  ;;  %1166 = vrot.lane.b32.xlu0 %v10029_v27, %s11113_s27 }
 0x24f   : > { %10040 = vtanh.f32 %v11665_v29  ;;  %1160 = vrot.lane.b32.xlu1 %v10031_v23, %s11113_s27 }
 0x250   : > { %15148 = vst [vmem:[#allocation16_spill] sm:$0xff] %v11667_v36  ;;  %10042 = vtanh.f32 %v11667_v36 }
 0x251   : > { %v10033_v39 = vpop.eup %10032 }
 0x252   : > { %v10035_v33 = vpop.eup %10034  ;;  %1170 = vrot.lane.b32.xlu0 %v10033_v39, %s11113_s27 }
 0x253   : > { %1164 = vrot.lane.b32.xlu1 %v10035_v33, %s11113_s27 }
 0x255   : > { %v10037_v30 = vpop.eup %10036 }
 0x256   : > { %v10039_v60 = vpop.eup %10038  ;;  %1168 = vrot.lane.b32.xlu0 %v10037_v30, %s11113_s27 }
 0x257   : > { %1158 = vrot.lane.b32.xlu1 %v10039_v60, %s11113_s27 }
 0x259   : > { %v10041_v62 = vpop.eup %10040 }
 0x25a   : > { %v10043_v2 = vpop.eup %10042  ;;  %1172 = vrot.lane.b32.xlu0 %v10041_v62, %s11113_s27 }
 0x25b   : > { %1174 = vrot.lane.b32.xlu1 %v10043_v2, %s11113_s27 }
 0x2ab   : > { %v1145_v20 = vpop.permute.xlu1 %1144 }
 0x2ac   : > { %v1147_v18 = vpop.permute.xlu0 %1146  ;;  %v11691_v15 = vmul.f32 %v11533_v32, %v1145_v20 }
 0x2ad   : > { %v11680_v23 = vmul.f32 %v11536_v43, %v1147_v18 }
 0x2ae   : > { %15152 = vst [vmem:[#allocation20_spill] sm:$0xff] %v11691_v15 }
 0x2af   : > { %15149 = vst [vmem:[#allocation17_spill] sm:$0xff] %v11680_v23  ;;  %v1289_v60 = vrot.slane %v11680_v23, 7 }
 0x2b0   : > { %v1151_v44 = vpop.permute.xlu0 %1150 }
 0x2b1   : > { %v11694_v43 = vmul.f32 %v11543_v57, %v1151_v44  ;;  %v1291_v18 = vsel %vm1290_vm1, %v1289_v60, %v11691_v15 }
 0x2b3   : > { %15153 = vst [vmem:[#allocation21_spill] sm:$0xff] %v11694_v43  ;;  %v1295_v44 = vrot.slane %v11694_v43, 5 }
 0x2b4   : > { %v1149_v50 = vpop.permute.xlu1 %1148 }
 0x2b5   : > { %v11683_v33 = vmul.f32 %v11547_v5, %v1149_v50 }
 0x2b7   : > { %15150 = vst [vmem:[#allocation18_spill] sm:$0xff] %v11683_v33  ;;  %v1292_v62 = vrot.slane %v11683_v33, 6 }
 0x2b8   : > { %v1153_v24 = vpop.permute.xlu0 %1152 }
 0x2b9   : > { %v1155_v27 = vpop.permute.xlu1 %1154  ;;  %v11688_v2 = vmul.f32 %v11553_v42, %v1153_v24  ;;  %v1294_v24 = vsel %vm1293_vm2, %v1292_v62, %v1291_v18 }
 0x2ba   : > { %v11702_v50 = vmul.f32 %v11550_v41, %v1155_v27  ;;  %v1297_v60 = vsel %vm1296_vm3, %v1295_v44, %v1294_v24 }
 0x2bb   : > { %15151 = vst [vmem:[#allocation19_spill] sm:$0xff] %v11688_v2  ;;  %v1298_v32 = vrot.slane %v11688_v2, 4 }
 0x2bc   : > { %v1163_v39 = vpop.permute.xlu0 %1162  ;;  %15155 = vst [vmem:[#allocation23_spill] sm:$0xff] %v11702_v50 }
 0x2bd   : > { %v1157_v30 = vpop.permute.xlu1 %1156  ;;  %v11697_v5 = vmul.f32 %v11561_v25, %v1163_v39 }
 0x2be   : > { %v11707_v20 = vmul.f32 %v11557_v3, %v1157_v30  ;;  %v1301_v3 = vrot.slane %v11702_v50, 3  ;;  %v1300_v30 = vsel %vm1299_vm4, %v1298_v32, %v1297_v60 }
 0x2bf   : > { %15154 = vst [vmem:[#allocation22_spill] sm:$0xff] %v11697_v5  ;;  %v1310_v27 = vrot.slane %v11697_v5, 7 }
 0x2c0   : > { %v1167_v0 = vpop.permute.xlu0 %1166  ;;  %15156 = vst [vmem:[#allocation24_spill] sm:$0xff] %v11707_v20  ;;  %v1304_v62 = vrot.slane %v11707_v20, 2 }
 0x2c1   : > { %v1161_v36 = vpop.permute.xlu1 %1160  ;;  %v11714_v39 = vmul.f32 %v11565_v40, %v1167_v0 }
 0x2c2   : > { %v11710_v57 = vmul.f32 %v11570_v48, %v1161_v36 }
 0x2c3   : > { %15158 = vst [vmem:[#allocation26_spill] sm:$0xff] %v11714_v39  ;;  %v1314_v18 = vrot.slane %v11714_v39, 5 }
 0x2c4   : > { %v1171_v42 = vpop.permute.xlu0 %1170  ;;  %15157 = vst [vmem:[#allocation25_spill] sm:$0xff] %v11710_v57  ;;  %v1311_v0 = vsel %vm1290_vm1, %v1310_v27, %v11710_v57 }
 0x2c5   : > { %v1165_v25 = vpop.permute.xlu1 %1164  ;;  %v11732_v24 = vmul.f32 %v11573_v53, %v1171_v42 }
 0x2c6   : > { %v11717_v41 = vmul.f32 %v11578_v31, %v1165_v25 }
 0x2c7   : > { %15161 = vst [vmem:[#allocation29_spill] sm:$0xff] %v11732_v24 }
 0x2c8   : > { %15159 = vst [vmem:[#allocation27_spill] sm:$0xff] %v11717_v41  ;;  %v1312_v48 = vrot.slane %v11717_v41, 6  ;;  %v1169_v36 = vpop.permute.xlu0 %1168 }
 0x2c9   : > { %v11728_v40 = vmul.f32 %v11581_v58, %v1169_v36  ;;  %v1159_v31 = vpop.permute.xlu1 %1158  ;;  %v1303_v36 = vsel %vm1302_vm5, %v1301_v3, %v1300_v30 }
 0x2ca   : > { %v1313_v25 = vsel %vm1293_vm2, %v1312_v48, %v1311_v0  ;;  %v11736_v44 = vmul.f32 %v11586_v1, %v1159_v31  ;;  %v1306_v48 = vsel %vm1305_vm6, %v1304_v62, %v1303_v36  ;;  %v1318_v1 = vrot.slane %v11732_v24, 3 }
 0x2cb   : > { %15160 = vst [vmem:[#allocation28_spill] sm:$0xff] %v11728_v40  ;;  %v1316_v32 = vrot.slane %v11728_v40, 4  ;;  %v1315_v60 = vsel %vm1296_vm3, %v1314_v18, %v1313_v25 }
 0x2cc   : > { %15162 = vst [vmem:[#allocation30_spill] sm:$0xff] %v11736_v44  ;;  %v1307_v27 = vrot.slane %v11736_v44, 1  ;;  %v1173_v58 = vpop.permute.xlu0 %1172 }
 0x2cd   : > { %v1317_v39 = vsel %vm1299_vm4, %v1316_v32, %v1315_v60  ;;  %v11744_v53 = vmul.f32 %v11589_v9, %v1173_v58  ;;  %v1175_v42 = vpop.permute.xlu1 %1174 }
 0x2ce   : > { %v11749_v0 = vmul.f32 %v11594_v14, %v1175_v42  ;;  %v1309_v31 = vsel %vm1308_vm7, %v1307_v27, %v1306_v48  ;;  %v1319_v30 = vsel %vm1302_vm5, %v1318_v1, %v1317_v39 }
 0x2cf   : > { %15163 = vst [vmem:[#allocation31_spill] sm:$0xff] %v11744_v53  ;;  %v1320_v18 = vrot.slane %v11744_v53, 2  ;;  %1324 = vrot.lane.b32.xlu0 %v1309_v31, %s11114_s14 }
 0x2d0   : > { %15164 = vst [vmem:[#allocation32_spill] sm:$0xff] %v11749_v0  ;;  %v1322_v3 = vrot.slane %v11749_v0, 1 }
 0x2d1   : > { %v1321_v9 = vsel %vm1305_vm6, %v1320_v18, %v1319_v30 }
 0x2d2   : > { %v1323_v25 = vsel %vm1308_vm7, %v1322_v3, %v1321_v9 }
 0x2d3   : > { %1326 = vrot.lane.b32.xlu1 %v1323_v25, %s11114_s14 }
 0x341   : > { %v1325_v62 = vpop.permute.xlu0 %1324 }
 0x342   : > { %9404 = vmatprep.mubr.msk.f32.mxu1 %vm500_vm0, %v1325_v62 }
 0x345   : > { %v1327_v14 = vpop.permute.xlu1 %1326 }
 0x346   : > { %9405 = vmatmul.mubr.msk.f32.vlgmr.msra.gmra.mrb[2].mxu1 %vm500_vm0, %v1327_v14 }
 0x347   : > { %9687 = vmatpush3.bf16.msra.mxu1 %v11313_v8 }
 0x348   : > { %9689 = vmatprep.subr.bf16.mxu1 %v11322_v13 }
 0x34b   : > { %9691 = vmatpush3.bf16.msra.mxu1 %v11322_v13 }
 0x34c   : > { %9693 = vmatprep.subr.bf16.mxu1 %v11313_v8 }
 0x419   : > { %v11765_v39 = vpop.f32.mrb[2].mxu1 }
 0x41a   : > { %v1416_v32 = vrot.slane %v11765_v39, 7  ;;  %v1398_v60 = vpop.f32.mrb[3].mxu1  ;;  %v1418_v58 = vrot.slane %v11765_v39, 2  ;;  %v11775_v36 = vadd.f32 %v11765_v39, %v11431_v61  ;;  %v1419_v42 = vrot.slane %v11765_v39, 3 }
 0x41b   : > { %v1420_v31 = vrot.slane %v11765_v39, 4  ;;  %v1409_v30 = vrot.slane %v1398_v60, 7  ;;  %v1411_v62 = vrot.slane %v1398_v60, 2  ;;  %v1410_v0 = vrot.slane %v1398_v60, 1 }
 0x41c   : > { %v11769_v27 = vadd.f32 %v1416_v32, %v11445_v6  ;;  %v11779_v48 = vadd.f32 %v1418_v58, %v11448_v7  ;;  %v11784_v18 = vadd.f32 %v1419_v42, %v11471_v22  ;;  %v1417_v32 = vrot.slane %v11765_v39, 1 }
 0x41d   : > { %v11789_v3 = vadd.f32 %v1420_v31, %v11461_v17  ;;  %v11795_v14 = vadd.f32 %v1409_v30, %v11383_v35  ;;  %v11799_v58 = vadd.f32 %v1398_v60, %v11380_v34  ;;  %v11803_v31 = vadd.f32 %v1411_v62, %v11386_v37 }
 0x41e   : > { %10044 = vtanh.f32 %v11769_v27  ;;  %v1421_v53 = vrot.slane %v11765_v39, 5  ;;  %v1413_v62 = vrot.slane %v1398_v60, 4  ;;  %v11818_v24 = vadd.f32 %v1410_v0, %v11403_v46 }
 0x41f   : > { %10046 = vtanh.f32 %v11775_v36  ;;  %v1415_v0 = vrot.slane %v1398_v60, 6  ;;  %v8986_v57 = vmul.f32 -1.442695, %v11784_v18 }
 0x420   : > { %10048 = vtanh.f32 %v11779_v48  ;;  %v11826_v40 = vadd.f32 %v1413_v62, %v11406_v47  ;;  %v1422_v62 = vrot.slane %v11765_v39, 6 }
 0x421   : > { %10050 = vtanh.f32 %v11784_v18 }
 0x422   : > { %10052 = vtanh.f32 %v11789_v3 }
 0x423   : > { %10054 = vtanh.f32 %v11795_v14 }
 0x424   : > { %10056 = vtanh.f32 %v11799_v58 }
 0x425   : > { %10058 = vtanh.f32 %v11803_v31 }
 0x428   : > { %v10045_v1 = vpop.eup %10044 }
 0x429   : > { %1663 = vrot.lane.b32.xlu0 %v10045_v1, %s11113_s27  ;;  %v10047_v9 = vpop.eup %10046  ;;  %v1412_v1 = vrot.slane %v1398_v60, 3 }
 0x42a   : > { %1665 = vrot.lane.b32.xlu1 %v10047_v9, %s11113_s27  ;;  %v10049_v25 = vpop.eup %10048  ;;  %v11807_v9 = vadd.f32 %v1417_v32, %v11458_v16  ;;  %v11822_v32 = vadd.f32 %v1421_v53, %v11488_v38 }
 0x42b   : > { %v10051_v42 = vpop.eup %10050 }
 0x42c   : > { %v10053_v30 = vpop.eup %10052  ;;  %10060 = vtanh.f32 %v11807_v9  ;;  %v8984_v18 = vmul.f32 -1.442695, %v11807_v9 }
 0x42d   : > { %1669 = vrot.lane.b32.xlu0 %v10049_v25, %s11113_s27  ;;  %v11813_v25 = vadd.f32 %v1412_v1, %v11414_v51  ;;  %v10055_v1 = vpop.eup %10054 }
 0x42e   : > { %v10057_v41 = vpop.eup %10056 }
 0x42f   : > { %10062 = vtanh.f32 %v11813_v25  ;;  %1649 = vrot.lane.b32.xlu1 %v10057_v41, %s11113_s27 }
 0x430   : > { %10064 = vtanh.f32 %v11818_v24 }
 0x431   : > { %1671 = vrot.lane.b32.xlu0 %v10051_v42, %s11113_s27  ;;  %v1414_v42 = vrot.slane %v1398_v60, 5  ;;  %10066 = vtanh.f32 %v11822_v32 }
 0x432   : > { %10068 = vtanh.f32 %v11826_v40 }
 0x433   : > { %v11833_v53 = vadd.f32 %v1414_v42, %v11422_v56  ;;  %v11846_v42 = vadd.f32 %v1422_v62, %v11497_v45  ;;  %v8982_v62 = vmul.f32 -1.442695, %v11769_v27  ;;  %v8974_v27 = vmul.f32 -1.442695, %v11795_v14 }
 0x434   : > { %v8978_v14 = vmul.f32 -1.442695, %v11813_v25 }
 0x435   : > { %1673 = vrot.lane.b32.xlu0 %v10053_v30, %s11113_s27  ;;  %v10059_v30 = vpop.eup %10058  ;;  %10070 = vtanh.f32 %v11833_v53  ;;  %v8980_v25 = vmul.f32 -1.442695, %v11833_v53 }
 0x436   : > { %v10061_v5 = vpop.eup %10060 }
 0x437   : > { %1667 = vrot.lane.b32.xlu1 %v10061_v5, %s11113_s27 }
 0x439   : > { %1647 = vrot.lane.b32.xlu0 %v10055_v1, %s11113_s27  ;;  %v11840_v1 = vadd.f32 %v1415_v0, %v11479_v26  ;;  %v10063_v41 = vpop.eup %10062 }
 0x43a   : > { %v10065_v60 = vpop.eup %10064 }
 0x43b   : > { %1651 = vrot.lane.b32.xlu1 %v10065_v60, %s11113_s27  ;;  %10072 = vtanh.f32 %v11840_v1  ;;  %v8983_v60 = vmul.f32 -1.442695, %v11775_v36  ;;  %v8975_v36 = vmul.f32 -1.442695, %v11799_v58 }
 0x43c   : > { %10074 = vtanh.f32 %v11846_v42 }
 0x43d   : > { %1653 = vrot.lane.b32.xlu0 %v10059_v30, %s11113_s27  ;;  %v10067_v30 = vpop.eup %10066  ;;  %10076 = vpow2.f32 %v8982_v62 }
 0x43e   : > { %v10069_v5 = vpop.eup %10068  ;;  %10078 = vpow2.f32 %v8983_v60  ;;  %v8977_v60 = vmul.f32 -1.442695, %v11803_v31  ;;  %v8988_v31 = vmul.f32 -1.442695, %v11822_v32 }
 0x43f   : > { %1657 = vrot.lane.b32.xlu1 %v10069_v5, %s11113_s27  ;;  %v10071_v39 = vpop.eup %10070 }
 0x441   : > { %1655 = vrot.lane.b32.xlu0 %v10063_v41, %s11113_s27 }
 0x443   : > { %1659 = vrot.lane.b32.xlu1 %v10071_v39, %s11113_s27  ;;  %v8987_v39 = vmul.f32 -1.442695, %v11789_v3 }
 0x445   : > { %1675 = vrot.lane.b32.xlu0 %v10067_v30, %s11113_s27  ;;  %v10073_v0 = vpop.eup %10072  ;;  %v8985_v30 = vmul.f32 -1.442695, %v11779_v48 }
 0x446   : > { %v10075_v41 = vpop.eup %10074 }
 0x447   : > { %1661 = vrot.lane.b32.xlu1 %v10073_v0, %s11113_s27  ;;  %v10077_v5 = vpop.eup %10076  ;;  %10080 = vpow2.f32 %v8985_v30 }
 0x448   : > { %v1511_v44 = vadd.f32 1.0, %v10077_v5  ;;  %10082 = vpow2.f32 %v8986_v57  ;;  %v10079_v0 = vpop.eup %10078 }
 0x44a   : > { %10084 = vrcp.f32 %v1511_v44 }
 0x44b   : > { %1677 = vrot.lane.b32.xlu1 %v10075_v41, %s11113_s27  ;;  %10086 = vpow2.f32 %v8987_v39  ;;  %v1512_v41 = vadd.f32 1.0, %v10079_v0  ;;  %v8979_v39 = vmul.f32 -1.442695, %v11826_v40 }
 0x44d   : > { %10088 = vrcp.f32 %v1512_v41 }
 0x44e   : > { %10090 = vpow2.f32 %v8974_v27 }
 0x44f   : > { %10092 = vpow2.f32 %v8975_v36 }
 0x451   : > { %v10081_v20 = vpop.eup %10080 }
 0x452   : > { %v1514_v62 = vadd.f32 1.0, %v10081_v20  ;;  %v10083_v48 = vpop.eup %10082  ;;  %v8976_v20 = vmul.f32 -1.442695, %v11818_v24 }
 0x453   : > { %v1515_v30 = vadd.f32 1.0, %v10083_v48 }
 0x454   : > { %v11864_v57 = vpop.eup %10084  ;;  %10094 = vrcp.f32 %v1514_v62 }
 0x455   : > { %v10087_v5 = vpop.eup %10086  ;;  %10096 = vpow2.f32 %v8977_v60 }
 0x456   : > { %10098 = vpow2.f32 %v8984_v18  ;;  %v1516_v58 = vadd.f32 1.0, %v10087_v5 }
 0x457   : > { %10100 = vrcp.f32 %v1515_v30  ;;  %v11871_v9 = vpop.eup %10088 }
 0x458   : > { %10102 = vpow2.f32 %v8978_v14  ;;  %v10091_v0 = vpop.eup %10090 }
 0x459   : > { %10104 = vpow2.f32 %v8976_v20  ;;  %v10093_v41 = vpop.eup %10092  ;;  %v1503_v32 = vadd.f32 1.0, %v10091_v0 }
 0x45a   : > { %10106 = vrcp.f32 %v1516_v58  ;;  %v1504_v60 = vadd.f32 1.0, %v10093_v41 }
 0x45b   : > { %10108 = vpow2.f32 %v8988_v31  ;;  %v8989_v31 = vmul.f32 -1.442695, %v11846_v42 }
 0x45c   : > { %10110 = vpow2.f32 %v8979_v39 }
 0x45d   : > { %10112 = vpow2.f32 %v8980_v25 }
 0x45e   : > { %v11876_v36 = vpop.eup %10094  ;;  %10114 = vrcp.f32 %v1503_v32 }
 0x45f   : > { %v10097_v48 = vpop.eup %10096  ;;  %10116 = vrcp.f32 %v1504_v60 }
 0x460   : > { %v10099_v18 = vpop.eup %10098  ;;  %v1506_v30 = vadd.f32 1.0, %v10097_v48 }
 0x461   : > { %v11882_v53 = vpop.eup %10100  ;;  %v1513_v14 = vadd.f32 1.0, %v10099_v18 }
 0x462   : > { %v10103_v5 = vpop.eup %10102 }
 0x463   : > { %v10105_v58 = vpop.eup %10104  ;;  %v1507_v0 = vadd.f32 1.0, %v10103_v5 }
 0x464   : > { %v11887_v39 = vpop.eup %10106 }
 0x465   : > { %v10109_v41 = vpop.eup %10108 }
 0x49b   : > { %v1664_v3 = vpop.permute.xlu0 %1663 }
 0x49c   : > { %v1703_v44 = vmul.f32 %v11864_v57, %v1664_v3  ;;  %v1666_v27 = vpop.permute.xlu1 %1665  ;;  %v8981_v3 = vmul.f32 -1.442695, %v11840_v1 }
 0x49d   : > { %v1704_v24 = vmul.f32 %v11871_v9, %v1666_v27  ;;  %v1505_v27 = vadd.f32 1.0, %v10105_v58 }
 0x49e   : > { %1743 = vrot.lane.b32.xlu0 %v1703_v44, %s11114_s14  ;;  %10118 = vpow2.f32 %v8981_v3 }
 0x49f   : > { %v1670_v62 = vpop.permute.xlu0 %1669  ;;  %1745 = vrot.lane.b32.xlu1 %v1704_v24, %s11114_s14  ;;  %10120 = vrcp.f32 %v1506_v30  ;;  %v10111_v24 = vpop.eup %10110 }
 0x4a0   : > { %v1706_v40 = vmul.f32 %v11876_v36, %v1670_v62  ;;  %10122 = vrcp.f32 %v1513_v14  ;;  %v1517_v62 = vadd.f32 1.0, %v10109_v41  ;;  %v10113_v42 = vpop.eup %10112  ;;  %v1508_v32 = vadd.f32 1.0, %v10111_v24 }
 0x4a1   : > { %10124 = vpow2.f32 %v8989_v31  ;;  %v11891_v48 = vpop.eup %10114  ;;  %v1650_v18 = vpop.permute.xlu1 %1649  ;;  %v1509_v5 = vadd.f32 1.0, %v10113_v42 }
 0x4a2   : > { %1749 = vrot.lane.b32.xlu0 %v1706_v40, %s11114_s14  ;;  %10126 = vrcp.f32 %v1507_v0  ;;  %v11893_v40 = vpop.eup %10116 }
 0x4a3   : > { %v1672_v44 = vpop.permute.xlu0 %1671  ;;  %10128 = vrcp.f32 %v1505_v27 }
 0x4a4   : > { %v1707_v20 = vmul.f32 %v11882_v53, %v1672_v44  ;;  %v1696_v44 = vmul.f32 %v11893_v40, %v1650_v18  ;;  %10130 = vrcp.f32 %v1517_v62 }
 0x4a5   : > { %10132 = vrcp.f32 %v1508_v32 }
 0x4a6   : > { %1751 = vrot.lane.b32.xlu0 %v1707_v20, %s11114_s14  ;;  %1729 = vrot.lane.b32.xlu1 %v1696_v44, %s11114_s14  ;;  %10134 = vrcp.f32 %v1509_v5 }
 0x4a7   : > { %v1674_v1 = vpop.permute.xlu0 %1673 }
 0x4a8   : > { %v1708_v25 = vmul.f32 %v11887_v39, %v1674_v1  ;;  %v10119_v30 = vpop.eup %10118 }
 0x4a9   : > { %v11898_v14 = vpop.eup %10120  ;;  %v1668_v31 = vpop.permute.xlu1 %1667  ;;  %v1510_v27 = vadd.f32 1.0, %v10119_v30 }
 0x4aa   : > { %1753 = vrot.lane.b32.xlu0 %v1708_v25, %s11114_s14  ;;  %v11901_v58 = vpop.eup %10122 }
 0x4ab   : > { %v1648_v60 = vpop.permute.xlu0 %1647  ;;  %v1705_v0 = vmul.f32 %v11901_v58, %v1668_v31  ;;  %v10125_v41 = vpop.eup %10124  ;;  %10136 = vrcp.f32 %v1510_v27 }
 0x4ac   : > { %v1695_v3 = vmul.f32 %v11891_v48, %v1648_v60  ;;  %v11906_v25 = vpop.eup %10126  ;;  %v1518_v18 = vadd.f32 1.0, %v10125_v41 }
 0x4ad   : > { %1747 = vrot.lane.b32.xlu1 %v1705_v0, %s11114_s14  ;;  %v11909_v62 = vpop.eup %10128  ;;  %v1652_v42 = vpop.permute.xlu1 %1651 }
 0x4ae   : > { %1727 = vrot.lane.b32.xlu0 %v1695_v3, %s11114_s14  ;;  %v1697_v60 = vmul.f32 %v11909_v62, %v1652_v42  ;;  %v11914_v3 = vpop.eup %10130  ;;  %10138 = vrcp.f32 %v1518_v18 }
 0x4af   : > { %v1654_v20 = vpop.permute.xlu0 %1653  ;;  %v11917_v30 = vpop.eup %10132 }
 0x4b0   : > { %v1698_v1 = vmul.f32 %v11898_v14, %v1654_v20 }
 0x4b1   : > { %1731 = vrot.lane.b32.xlu1 %v1697_v60, %s11114_s14  ;;  %v1658_v5 = vpop.permute.xlu1 %1657 }
 0x4b2   : > { %1733 = vrot.lane.b32.xlu0 %v1698_v1, %s11114_s14  ;;  %v1700_v31 = vmul.f32 %v11917_v30, %v1658_v5  ;;  %v11923_v1 = vpop.eup %10134 }
 0x4b3   : > { %v1656_v24 = vpop.permute.xlu0 %1655 }
 0x4b4   : > { %v1699_v32 = vmul.f32 %v11906_v25, %v1656_v24 }
 0x4b5   : > { %1737 = vrot.lane.b32.xlu1 %v1700_v31, %s11114_s14  ;;  %v1660_v0 = vpop.permute.xlu1 %1659  ;;  %v11927_v27 = vpop.eup %10136 }
 0x4b6   : > { %1735 = vrot.lane.b32.xlu0 %v1699_v32, %s11114_s14  ;;  %v1701_v41 = vmul.f32 %v11923_v1, %v1660_v0  ;;  %v1592_v0 = vrot.slane %v11627_v10, 7 }
 0x4b7   : > { %v1676_v44 = vpop.permute.xlu0 %1675 }
 0x4b8   : > { %v1709_v20 = vmul.f32 %v11914_v3, %v1676_v44  ;;  %v11931_v32 = vpop.eup %10138  ;;  %v1591_v44 = vrot.slane %v11638_v21, 7  ;;  %v1595_v21 = vrot.slane %v11655_v4, 7 }
 0x4b9   : > { %1739 = vrot.lane.b32.xlu1 %v1701_v41, %s11114_s14  ;;  %v1662_v24 = vpop.permute.xlu1 %1661  ;;  %v1594_v41 = vrot.slane %v11636_v54, 7 }
 0x4ba   : > { %1755 = vrot.lane.b32.xlu0 %v1709_v20, %s11114_s14  ;;  %v1702_v42 = vmul.f32 %v11927_v27, %v1662_v24  ;;  %v1623_v5 = vmul.f32 %v11864_v57, %v1591_v44  ;;  %v1624_v24 = vmul.f32 %v11871_v9, %v1592_v0  ;;  %v1627_v10 = vmul.f32 %v11882_v53, %v1595_v21 }
 0x4bd   : > { %1741 = vrot.lane.b32.xlu1 %v1702_v42, %s11114_s14  ;;  %v1678_v60 = vpop.permute.xlu1 %1677 }
 0x4be   : > { %v1710_v18 = vmul.f32 %v11931_v32, %v1678_v60  ;;  %v1626_v60 = vmul.f32 %v11876_v36, %v1594_v41 }
 0x4c1   : > { %1757 = vrot.lane.b32.xlu1 %v1710_v18, %s11114_s14 }
 0x510   : > { %v1744_v20 = vpop.permute.xlu0 %1743 }
 0x511   : > { %v11937_v31 = vadd.f32 %v1744_v20, %v1623_v5  ;;  %v1746_v42 = vpop.permute.xlu1 %1745  ;;  %v1596_v20 = vrot.slane %v11645_v28, 7 }
 0x512   : > { %v11943_v50 = vadd.f32 %v1746_v42, %v1624_v24 }
 0x513   : > { %10140 = vtanh.f32 %v11937_v31  ;;  %v1628_v4 = vmul.f32 %v11887_v39, %v1596_v20 }
 0x514   : > { %v1750_v18 = vpop.permute.xlu0 %1749  ;;  %10142 = vtanh.f32 %v11943_v50 }
 0x515   : > { %v11948_v44 = vadd.f32 %v1750_v18, %v1626_v60  ;;  %v1583_v60 = vrot.slane %v11601_v59, 7  ;;  %v1584_v18 = vrot.slane %v11603_v63, 7  ;;  %v1593_v59 = vrot.slane %v11647_v52, 7 }
 0x516   : > { %v1585_v52 = vrot.slane %v11612_v19, 7  ;;  %v1588_v19 = vrot.slane %v11619_v49, 7 }
 0x517   : > { %10144 = vtanh.f32 %v11948_v44  ;;  %v1615_v28 = vmul.f32 %v11891_v48, %v1583_v60  ;;  %v1625_v60 = vmul.f32 %v11901_v58, %v1593_v59 }
 0x518   : > { %v1752_v54 = vpop.permute.xlu0 %1751  ;;  %v1730_v20 = vpop.permute.xlu1 %1729 }
 0x519   : > { %v11954_v0 = vadd.f32 %v1752_v54, %v1627_v10  ;;  %v1586_v54 = vrot.slane %v11608_v11, 7  ;;  %v1587_v11 = vrot.slane %v11617_v55, 7  ;;  %v1597_v55 = vrot.slane %v11665_v29, 7 }
 0x51b   : > { %10146 = vtanh.f32 %v11954_v0 }
 0x51c   : > { %v1754_v41 = vpop.permute.xlu0 %1753 }
 0x51d   : > { %v10141_v5 = vpop.eup %10140  ;;  %v11958_v24 = vadd.f32 %v1754_v41, %v1628_v4 }
 0x51e   : > { %1839 = vrot.lane.b32.xlu0 %v10141_v5, %s11113_s27  ;;  %v10143_v42 = vpop.eup %10142  ;;  %v1616_v5 = vmul.f32 %v11893_v40, %v1584_v18 }
 0x51f   : > { %10148 = vtanh.f32 %v11958_v24  ;;  %1841 = vrot.lane.b32.xlu1 %v10143_v42, %s11113_s27  ;;  %v1618_v42 = vmul.f32 %v11898_v14, %v1586_v54  ;;  %v1619_v54 = vmul.f32 %v11906_v25, %v1587_v11  ;;  %v1620_v11 = vmul.f32 %v11917_v30, %v1588_v19  ;;  %v15165_v19 = vld [vmem:[#allocation15_spill] sm:$0xff] }
 0x520   : > { %v1728_v10 = vpop.permute.xlu0 %1727  ;;  %v11971_v41 = vadd.f32 %v1730_v20, %v1616_v5  ;;  %v1617_v20 = vmul.f32 %v11909_v62, %v1585_v52 }
 0x521   : > { %v10145_v21 = vpop.eup %10144  ;;  %v11968_v4 = vadd.f32 %v1728_v10, %v1615_v28 }
 0x522   : > { %1845 = vrot.lane.b32.xlu0 %v10145_v21, %s11113_s27  ;;  %v1748_v21 = vpop.permute.xlu1 %1747 }
 0x523   : > { %10150 = vtanh.f32 %v11968_v4  ;;  %v11982_v5 = vadd.f32 %v1748_v21, %v1625_v60 }
 0x524   : > { %10152 = vtanh.f32 %v11971_v41  ;;  %v1734_v18 = vpop.permute.xlu0 %1733 }
 0x525   : > { %v10147_v63 = vpop.eup %10146  ;;  %v11979_v28 = vadd.f32 %v1734_v18, %v1618_v42  ;;  %v1629_v18 = vmul.f32 %v11914_v3, %v1597_v55 }
 0x526   : > { %1847 = vrot.lane.b32.xlu0 %v10147_v63, %s11113_s27  ;;  %v1732_v63 = vpop.permute.xlu1 %1731 }
 0x527   : > { %10154 = vtanh.f32 %v11979_v28  ;;  %v11993_v60 = vadd.f32 %v1732_v63, %v1617_v20 }
 0x528   : > { %10156 = vtanh.f32 %v11982_v5  ;;  %v1736_v59 = vpop.permute.xlu0 %1735 }
 0x529   : > { %v10149_v10 = vpop.eup %10148  ;;  %v11990_v42 = vadd.f32 %v1736_v59, %v1619_v54  ;;  %v1589_v54 = vrot.slane %v11629_v12, 7 }
 0x52a   : > { %1849 = vrot.lane.b32.xlu0 %v10149_v10, %s11113_s27  ;;  %v1738_v10 = vpop.permute.xlu1 %1737 }
 0x52b   : > { %10158 = vtanh.f32 %v11990_v42  ;;  %v12002_v59 = vadd.f32 %v1738_v10, %v1620_v11  ;;  %v1621_v49 = vmul.f32 %v11923_v1, %v1589_v54 }
 0x52c   : > { %10160 = vtanh.f32 %v11993_v60  ;;  %v1756_v21 = vpop.permute.xlu0 %1755 }
 0x52d   : > { %v10151_v52 = vpop.eup %10150  ;;  %v11999_v2 = vadd.f32 %v1756_v21, %v1629_v18  ;;  %v1590_v18 = vrot.slane %v15165_v19, 7 }
 0x52e   : > { %v10153_v29 = vpop.eup %10152  ;;  %1823 = vrot.lane.b32.xlu0 %v10151_v52, %s11113_s27  ;;  %v1740_v55 = vpop.permute.xlu1 %1739 }
 0x52f   : > { %1825 = vrot.lane.b32.xlu1 %v10153_v29, %s11113_s27  ;;  %10162 = vtanh.f32 %v11999_v2  ;;  %v12010_v21 = vadd.f32 %v1740_v55, %v1621_v49  ;;  %v1622_v12 = vmul.f32 %v11927_v27, %v1590_v18  ;;  %v15167_v29 = vld [vmem:[#allocation16_spill] sm:$0xff] }
 0x530   : > { %10164 = vtanh.f32 %v12002_v59  ;;  %v1598_v54 = vrot.slane %v15167_v29, 7 }
 0x531   : > { %v10155_v20 = vpop.eup %10154  ;;  %15166 = vst [vmem:[#allocation15_spill] sm:$0xff] %v12010_v21  ;;  %10166 = vtanh.f32 %v12010_v21 }
 0x532   : > { %v10157_v63 = vpop.eup %10156  ;;  %1829 = vrot.lane.b32.xlu0 %v10155_v20, %s11113_s27  ;;  %v1742_v52 = vpop.permute.xlu1 %1741  ;;  %v1630_v49 = vmul.f32 %v11931_v32, %v1598_v54 }
 0x533   : > { %1843 = vrot.lane.b32.xlu1 %v10157_v63, %s11113_s27  ;;  %v12017_v43 = vadd.f32 %v1742_v52, %v1622_v12 }
 0x535   : > { %v10159_v11 = vpop.eup %10158  ;;  %15168 = vst [vmem:[#allocation16_spill] sm:$0xff] %v12017_v43  ;;  %10168 = vtanh.f32 %v12017_v43 }
 0x536   : > { %v10161_v10 = vpop.eup %10160  ;;  %1831 = vrot.lane.b32.xlu0 %v10159_v11, %s11113_s27  ;;  %v1758_v55 = vpop.permute.xlu1 %1757 }
 0x537   : > { %1827 = vrot.lane.b32.xlu1 %v10161_v10, %s11113_s27  ;;  %v12023_v19 = vadd.f32 %v1758_v55, %v1630_v49 }
 0x539   : > { %v10163_v20 = vpop.eup %10162  ;;  %15169 = vst [vmem:[#allocation33_spill] sm:$0xff] %v12023_v19  ;;  %10170 = vtanh.f32 %v12023_v19 }
 0x53a   : > { %v10165_v63 = vpop.eup %10164  ;;  %1851 = vrot.lane.b32.xlu0 %v10163_v20, %s11113_s27 }
 0x53b   : > { %1833 = vrot.lane.b32.xlu1 %v10165_v63, %s11113_s27  ;;  %v10167_v18 = vpop.eup %10166 }
 0x53f   : > { %1835 = vrot.lane.b32.xlu1 %v10167_v18, %s11113_s27  ;;  %v10169_v12 = vpop.eup %10168 }
 0x543   : > { %1837 = vrot.lane.b32.xlu1 %v10169_v12, %s11113_s27  ;;  %v10171_v11 = vpop.eup %10170 }
 0x547   : > { %1853 = vrot.lane.b32.xlu1 %v10171_v11, %s11113_s27 }
 0x590   : > { %v1840_v52 = vpop.permute.xlu0 %1839 }
 0x591   : > { %v1842_v49 = vpop.permute.xlu1 %1841  ;;  %v12042_v43 = vmul.f32 %v11864_v57, %v1840_v52 }
 0x593   : > { %15173 = vst [vmem:[#allocation37_spill] sm:$0xff] %v12042_v43  ;;  %v1982_v52 = vrot.slane %v12042_v43, 1 }
 0x594   : > { %v1846_v10 = vpop.permute.xlu0 %1845 }
 0x598   : > { %v1848_v29 = vpop.permute.xlu0 %1847 }
 0x59c   : > { %v1850_v54 = vpop.permute.xlu0 %1849 }
 0x5a0   : > { %v1824_v55 = vpop.permute.xlu0 %1823 }
 0x5a1   : > { %v1826_v20 = vpop.permute.xlu1 %1825  ;;  %v12032_v63 = vmul.f32 %v11891_v48, %v1824_v55 }
 0x5a2   : > { %v12045_v21 = vmul.f32 %v11893_v40, %v1826_v20 }
 0x5a3   : > { %15170 = vst [vmem:[#allocation34_spill] sm:$0xff] %v12032_v63  ;;  %v1968_v18 = vrot.slane %v12032_v63, 1 }
 0x5a4   : > { %v1830_v33 = vpop.permute.xlu0 %1829  ;;  %15174 = vst [vmem:[#allocation38_spill] sm:$0xff] %v12045_v21 }
 0x5a5   : > { %v1844_v23 = vpop.permute.xlu1 %1843  ;;  %v12036_v15 = vmul.f32 %v11898_v14, %v1830_v33  ;;  %v1969_v33 = vsel %vm1290_vm1, %v12045_v21, %v1968_v18 }
 0x5a6   : > { %v12051_v55 = vmul.f32 %v11901_v58, %v1844_v23  ;;  %v12065_v58 = vmul.f32 %v11871_v9, %v1842_v49 }
 0x5a7   : > { %15171 = vst [vmem:[#allocation35_spill] sm:$0xff] %v12036_v15  ;;  %v1972_v14 = vrot.slane %v12036_v15, 6 }
 0x5a8   : > { %v1832_v12 = vpop.permute.xlu0 %1831  ;;  %15176 = vst [vmem:[#allocation40_spill] sm:$0xff] %v12051_v55  ;;  %15178 = vst [vmem:[#allocation42_spill] sm:$0xff] %v12065_v58 }
 0x5a9   : > { %v1828_v19 = vpop.permute.xlu1 %1827  ;;  %v12039_v11 = vmul.f32 %v11906_v25, %v1832_v12 }
 0x5aa   : > { %v12048_v48 = vmul.f32 %v11909_v62, %v1828_v19  ;;  %v1984_v62 = vrot.slane %v12051_v55, 7  ;;  %v12068_v19 = vmul.f32 %v11876_v36, %v1846_v10 }
 0x5ab   : > { %15172 = vst [vmem:[#allocation36_spill] sm:$0xff] %v12039_v11  ;;  %v1974_v57 = vrot.slane %v12039_v11, 5  ;;  %v12072_v11 = vmul.f32 %v11882_v53, %v1848_v29 }
 0x5ac   : > { %15175 = vst [vmem:[#allocation39_spill] sm:$0xff] %v12048_v48  ;;  %v1970_v25 = vrot.slane %v12048_v48, 7  ;;  %15179 = vst [vmem:[#allocation43_spill] sm:$0xff] %v12068_v19  ;;  %v1852_v18 = vpop.permute.xlu0 %1851  ;;  %v1986_v53 = vrot.slane %v12068_v19, 6 }
 0x5ad   : > { %v1834_v12 = vpop.permute.xlu1 %1833  ;;  %15180 = vst [vmem:[#allocation44_spill] sm:$0xff] %v12072_v11  ;;  %v12086_v49 = vmul.f32 %v11914_v3, %v1852_v18 }
 0x5ae   : > { %v12060_v40 = vmul.f32 %v11917_v30, %v1834_v12  ;;  %v1971_v23 = vsel %vm1293_vm2, %v1970_v25, %v1969_v33  ;;  %v1983_v12 = vsel %vm1290_vm1, %v12065_v58, %v1982_v52  ;;  %v12078_v33 = vmul.f32 %v11887_v39, %v1850_v54 }
 0x5af   : > { %v1973_v20 = vsel %vm1296_vm3, %v1972_v14, %v1971_v23  ;;  %v1985_v10 = vsel %vm1293_vm2, %v1984_v62, %v1983_v12  ;;  %15183 = vst [vmem:[#allocation47_spill] sm:$0xff] %v12086_v49  ;;  %v1988_v14 = vrot.slane %v12072_v11, 5 }
 0x5b0   : > { %15177 = vst [vmem:[#allocation41_spill] sm:$0xff] %v12060_v40  ;;  %v1975_v30 = vsel %vm1299_vm4, %v1974_v57, %v1973_v20  ;;  %15181 = vst [vmem:[#allocation45_spill] sm:$0xff] %v12078_v33  ;;  %v1976_v9 = vrot.slane %v12060_v40, 4  ;;  %v1987_v54 = vsel %vm1296_vm3, %v1986_v53, %v1985_v10  ;;  %v1990_v57 = vrot.slane %v12078_v33, 4 }
 0x5b1   : > { %v1836_v43 = vpop.permute.xlu1 %1835  ;;  %v1989_v62 = vsel %vm1299_vm4, %v1988_v14, %v1987_v54 }
 0x5b2   : > { %v12082_v36 = vmul.f32 %v11923_v1, %v1836_v43  ;;  %v1977_v29 = vsel %vm1302_vm5, %v1976_v9, %v1975_v30  ;;  %v1992_v1 = vrot.slane %v12086_v49, 3  ;;  %v1991_v30 = vsel %vm1302_vm5, %v1990_v57, %v1989_v62 }
 0x5b4   : > { %15182 = vst [vmem:[#allocation46_spill] sm:$0xff] %v12082_v36  ;;  %v1978_v25 = vrot.slane %v12082_v36, 3  ;;  %v2259_v36 = vrot.slane %v11990_v42, 7  ;;  %v2260_v42 = vrot.slane %v12002_v59, 7 }
 0x5b5   : > { %v1838_v39 = vpop.permute.xlu1 %1837 }
 0x5b6   : > { %v12095_v43 = vmul.f32 %v11927_v27, %v1838_v39  ;;  %v1979_v3 = vsel %vm1305_vm6, %v1978_v25, %v1977_v29  ;;  %v1993_v27 = vsel %vm1305_vm6, %v1992_v1, %v1991_v30 }
 0x5b8   : > { %15184 = vst [vmem:[#allocation48_spill] sm:$0xff] %v12095_v43  ;;  %v1980_v52 = vrot.slane %v12095_v43, 2 }
 0x5b9   : > { %v1854_v23 = vpop.permute.xlu1 %1853 }
 0x5ba   : > { %v12102_v20 = vmul.f32 %v11931_v32, %v1854_v23  ;;  %v1981_v18 = vsel %vm1308_vm7, %v1980_v52, %v1979_v3 }
 0x5bb   : > { %1996 = vrot.lane.b32.xlu0 %v1981_v18, %s11114_s14 }
 0x5bc   : > { %15185 = vst [vmem:[#allocation49_spill] sm:$0xff] %v12102_v20  ;;  %v1994_v12 = vrot.slane %v12102_v20, 2 }
 0x5be   : > { %v1995_v9 = vsel %vm1308_vm7, %v1994_v12, %v1993_v27 }
 0x5bf   : > { %1998 = vrot.lane.b32.xlu1 %v1995_v9, %s11114_s14 }
 0x62d   : > { %v1997_v10 = vpop.permute.xlu0 %1996 }
 0x62e   : > { %9415 = vmatprep.mubr.msk.f32.mxu1 %vm500_vm0, %v1997_v10 }
 0x631   : > { %v1999_v53 = vpop.permute.xlu1 %1998 }
 0x632   : > { %9416 = vmatmul.mubr.msk.f32.vlgmr.msra.gmra.mrb[4].mxu1 %vm500_vm0, %v1999_v53 }
 0x633   : > { %9695 = vmatpush3.bf16.msra.mxu1 %v11313_v8 }
 0x634   : > { %9697 = vmatprep.subr.bf16.mxu1 %v11322_v13 }
 0x637   : > { %9699 = vmatpush3.bf16.msra.mxu1 %v11322_v13 }
 0x638   : > { %9709 = vmatprep.subr.bf16.mxu1 %v11313_v8 }
 0x705   : > { %v12117_v32 = vpop.f32.mrb[4].mxu1 }
 0x706   : > { %v2088_v29 = vrot.slane %v12117_v32, 6  ;;  %v2070_v14 = vpop.f32.mrb[5].mxu1  ;;  %v2091_v39 = vrot.slane %v12117_v32, 2  ;;  %v12127_v54 = vadd.f32 %v12117_v32, %v11458_v16  ;;  %v2092_v57 = vrot.slane %v12117_v32, 3 }
 0x707   : > { %v2081_v62 = vrot.slane %v2070_v14, 6  ;;  %v2083_v18 = vrot.slane %v2070_v14, 1  ;;  %v2089_v12 = vrot.slane %v12117_v32, 7  ;;  %v12146_v9 = vadd.f32 %v2070_v14, %v11403_v46 }
 0x708   : > { %v12121_v25 = vadd.f32 %v2088_v29, %v11445_v6  ;;  %v12131_v1 = vadd.f32 %v2091_v39, %v11471_v22  ;;  %v12136_v52 = vadd.f32 %v2092_v57, %v11461_v17  ;;  %v2084_v10 = vrot.slane %v2070_v14, 2 }
 0x709   : > { %v12141_v30 = vadd.f32 %v2081_v62, %v11383_v35  ;;  %v12150_v53 = vadd.f32 %v2083_v18, %v11386_v37  ;;  %v2090_v39 = vrot.slane %v12117_v32, 1  ;;  %v12155_v57 = vadd.f32 %v2089_v12, %v11431_v61 }
 0x70a   : > { %10172 = vtanh.f32 %v12121_v25  ;;  %v12160_v62 = vadd.f32 %v2084_v10, %v11414_v51  ;;  %v2082_v18 = vrot.slane %v2070_v14, 7  ;;  %v2086_v10 = vrot.slane %v2070_v14, 4 }
 0x70b   : > { %10174 = vtanh.f32 %v12127_v54  ;;  %v2087_v33 = vrot.slane %v2070_v14, 5 }
 0x70c   : > { %10176 = vtanh.f32 %v12131_v1  ;;  %v12174_v20 = vadd.f32 %v2082_v18, %v11380_v34  ;;  %v12183_v11 = vadd.f32 %v2086_v10, %v11422_v56 }
 0x70d   : > { %10178 = vtanh.f32 %v12136_v52  ;;  %v12191_v19 = vadd.f32 %v2087_v33, %v11479_v26 }
 0x70e   : > { %10180 = vtanh.f32 %v12141_v30 }
 0x70f   : > { %10182 = vtanh.f32 %v12146_v9 }
 0x710   : > { %10184 = vtanh.f32 %v12150_v53 }
 0x711   : > { %10186 = vtanh.f32 %v12155_v57 }
 0x712   : > { %10188 = vtanh.f32 %v12160_v62 }
 0x714   : > { %v10173_v3 = vpop.eup %10172 }
 0x715   : > { %2335 = vrot.lane.b32.xlu0 %v10173_v3, %s11113_s27  ;;  %v10175_v23 = vpop.eup %10174  ;;  %v2085_v3 = vrot.slane %v2070_v14, 3 }
 0x716   : > { %2339 = vrot.lane.b32.xlu1 %v10175_v23, %s11113_s27  ;;  %v10177_v27 = vpop.eup %10176  ;;  %v12164_v23 = vadd.f32 %v2090_v39, %v11448_v7 }
 0x717   : > { %v10179_v29 = vpop.eup %10178  ;;  %v12169_v12 = vadd.f32 %v2085_v3, %v11406_v47 }
 0x718   : > { %10190 = vtanh.f32 %v12164_v23 }
 0x719   : > { %2343 = vrot.lane.b32.xlu0 %v10177_v27, %s11113_s27  ;;  %v2093_v27 = vrot.slane %v12117_v32, 4  ;;  %10192 = vtanh.f32 %v12169_v12 }
 0x71a   : > { %10194 = vtanh.f32 %v12174_v20 }
 0x71b   : > { %v12178_v49 = vadd.f32 %v2093_v27, %v11488_v38 }
 0x71d   : > { %2345 = vrot.lane.b32.xlu0 %v10179_v29, %s11113_s27  ;;  %v10181_v29 = vpop.eup %10180  ;;  %10196 = vtanh.f32 %v12178_v49 }
 0x71e   : > { %v10183_v39 = vpop.eup %10182  ;;  %10198 = vtanh.f32 %v12183_v11 }
 0x71f   : > { %2323 = vrot.lane.b32.xlu1 %v10183_v39, %s11113_s27  ;;  %v10185_v3 = vpop.eup %10184  ;;  %10200 = vtanh.f32 %v12191_v19 }
 0x720   : > { %v10187_v18 = vpop.eup %10186 }
 0x721   : > { %2319 = vrot.lane.b32.xlu0 %v10181_v29, %s11113_s27  ;;  %v10189_v27 = vpop.eup %10188  ;;  %v2094_v29 = vrot.slane %v12117_v32, 5 }
 0x722   : > { %v10191_v14 = vpop.eup %10190 }
 0x723   : > { %2337 = vrot.lane.b32.xlu1 %v10187_v18, %s11113_s27  ;;  %v10193_v10 = vpop.eup %10192  ;;  %v12197_v39 = vadd.f32 %v2094_v29, %v11497_v45  ;;  %v9000_v29 = vmul.f32 -1.442695, %v12121_v25  ;;  %v8994_v25 = vmul.f32 -1.442695, %v12146_v9  ;;  %v8997_v9 = vmul.f32 -1.442695, %v12169_v12 }
 0x724   : > { %v8998_v12 = vmul.f32 -1.442695, %v12183_v11 }
 0x725   : > { %2325 = vrot.lane.b32.xlu0 %v10185_v3, %s11113_s27  ;;  %v10195_v3 = vpop.eup %10194  ;;  %10202 = vtanh.f32 %v12197_v39 }
 0x726   : > { %10204 = vpow2.f32 %v9000_v29  ;;  %v8995_v29 = vmul.f32 -1.442695, %v12150_v53 }
 0x727   : > { %2341 = vrot.lane.b32.xlu1 %v10191_v14, %s11113_s27  ;;  %v10197_v33 = vpop.eup %10196  ;;  %v9002_v14 = vmul.f32 -1.442695, %v12127_v54 }
 0x728   : > { %v10199_v32 = vpop.eup %10198 }
 0x729   : > { %2327 = vrot.lane.b32.xlu0 %v10189_v27, %s11113_s27  ;;  %v10201_v18 = vpop.eup %10200  ;;  %10206 = vpow2.f32 %v9002_v14 }
 0x72b   : > { %2321 = vrot.lane.b32.xlu1 %v10195_v3, %s11113_s27 }
 0x72d   : > { %2329 = vrot.lane.b32.xlu0 %v10193_v10, %s11113_s27  ;;  %v9004_v10 = vmul.f32 -1.442695, %v12131_v1 }
 0x72f   : > { %2331 = vrot.lane.b32.xlu1 %v10199_v32, %s11113_s27  ;;  %v10203_v27 = vpop.eup %10202  ;;  %10208 = vpow2.f32 %v9004_v10 }
 0x730   : > { %v10205_v3 = vpop.eup %10204 }
 0x731   : > { %2347 = vrot.lane.b32.xlu0 %v10197_v33, %s11113_s27  ;;  %v9005_v33 = vmul.f32 -1.442695, %v12136_v52  ;;  %v2183_v55 = vadd.f32 1.0, %v10205_v3  ;;  %v9001_v52 = vmul.f32 -1.442695, %v12155_v57 }
 0x732   : > { %v8993_v57 = vmul.f32 -1.442695, %v12174_v20 }
 0x733   : > { %2333 = vrot.lane.b32.xlu1 %v10201_v18, %s11113_s27  ;;  %10210 = vpow2.f32 %v9005_v33  ;;  %v10207_v32 = vpop.eup %10206  ;;  %v8992_v18 = vmul.f32 -1.442695, %v12141_v30 }
 0x734   : > { %10212 = vrcp.f32 %v2183_v55  ;;  %v8996_v55 = vmul.f32 -1.442695, %v12160_v62 }
 0x735   : > { %10214 = vpow2.f32 %v8992_v18 }
 0x737   : > { %2349 = vrot.lane.b32.xlu1 %v10203_v27, %s11113_s27  ;;  %v2185_v27 = vadd.f32 1.0, %v10207_v32  ;;  %v9006_v32 = vmul.f32 -1.442695, %v12178_v49 }
 0x739   : > { %v10209_v58 = vpop.eup %10208  ;;  %10216 = vrcp.f32 %v2185_v27 }
 0x73a   : > { %v2187_v54 = vadd.f32 1.0, %v10209_v58  ;;  %10218 = vpow2.f32 %v8994_v25  ;;  %v9003_v58 = vmul.f32 -1.442695, %v12164_v23 }
 0x73b   : > { %10220 = vpow2.f32 %v8995_v29 }
 0x73c   : > { %10222 = vrcp.f32 %v2187_v54 }
 0x73d   : > { %v10211_v1 = vpop.eup %10210  ;;  %10224 = vpow2.f32 %v9001_v52 }
 0x73e   : > { %v12214_v14 = vpop.eup %10212  ;;  %v2188_v3 = vadd.f32 1.0, %v10211_v1  ;;  %10226 = vpow2.f32 %v8996_v55 }
 0x73f   : > { %v10215_v53 = vpop.eup %10214 }
 0x740   : > { %10228 = vrcp.f32 %v2188_v3  ;;  %v2175_v29 = vadd.f32 1.0, %v10215_v53 }
 0x741   : > { %10230 = vpow2.f32 %v9003_v58 }
 0x742   : > { %10232 = vpow2.f32 %v8997_v9 }
 0x743   : > { %v12223_v33 = vpop.eup %10216  ;;  %10234 = vpow2.f32 %v8993_v57 }
 0x744   : > { %v10219_v62 = vpop.eup %10218  ;;  %10236 = vpow2.f32 %v9006_v32 }
 0x745   : > { %v10221_v27 = vpop.eup %10220  ;;  %v2177_v1 = vadd.f32 1.0, %v10219_v62  ;;  %10238 = vrcp.f32 %v2175_v29  ;;  %v9007_v62 = vmul.f32 -1.442695, %v12197_v39 }
 0x746   : > { %v12227_v23 = vpop.eup %10222  ;;  %10240 = vpow2.f32 %v8998_v12 }
 0x747   : > { %v10225_v52 = vpop.eup %10224  ;;  %10242 = vrcp.f32 %v2177_v1 }
 0x748   : > { %v10227_v49 = vpop.eup %10226  ;;  %v2184_v11 = vadd.f32 1.0, %v10225_v52 }
 0x749   : > { %v2179_v53 = vadd.f32 1.0, %v10227_v49 }
 0x74a   : > { %v12233_v55 = vpop.eup %10228 }
 0x74b   : > { %v10231_v9 = vpop.eup %10230 }
 0x74c   : > { %v10233_v57 = vpop.eup %10232  ;;  %v2186_v32 = vadd.f32 1.0, %v10231_v9 }
 0x787   : > { %v2336_v10 = vpop.permute.xlu0 %2335 }
 0x788   : > { %v2375_v30 = vmul.f32 %v12214_v14, %v2336_v10  ;;  %v2340_v18 = vpop.permute.xlu1 %2339  ;;  %v2178_v10 = vadd.f32 1.0, %v10221_v27  ;;  %v2180_v27 = vadd.f32 1.0, %v10233_v57 }
 0x789   : > { %v2377_v25 = vmul.f32 %v12223_v33, %v2340_v18  ;;  %v10235_v18 = vpop.eup %10234 }
 0x78a   : > { %2415 = vrot.lane.b32.xlu0 %v2375_v30, %s11114_s14  ;;  %v8999_v30 = vmul.f32 -1.442695, %v12191_v19  ;;  %10244 = vrcp.f32 %v2178_v10  ;;  %v10237_v19 = vpop.eup %10236  ;;  %v2176_v12 = vadd.f32 1.0, %v10235_v18 }
 0x78b   : > { %v2344_v54 = vpop.permute.xlu0 %2343  ;;  %2419 = vrot.lane.b32.xlu1 %v2377_v25, %s11114_s14  ;;  %v12239_v25 = vpop.eup %10238  ;;  %v2189_v39 = vadd.f32 1.0, %v10237_v19 }
 0x78c   : > { %v2379_v20 = vmul.f32 %v12227_v23, %v2344_v54  ;;  %10246 = vpow2.f32 %v8999_v30  ;;  %v10241_v54 = vpop.eup %10240 }
 0x78d   : > { %10248 = vrcp.f32 %v2184_v11 }
 0x78e   : > { %2423 = vrot.lane.b32.xlu0 %v2379_v20, %s11114_s14  ;;  %10250 = vrcp.f32 %v2179_v53  ;;  %v12242_v20 = vpop.eup %10242 }
 0x78f   : > { %v2346_v3 = vpop.permute.xlu0 %2345  ;;  %10252 = vpow2.f32 %v9007_v62 }
 0x790   : > { %v2380_v58 = vmul.f32 %v12233_v55, %v2346_v3  ;;  %10254 = vrcp.f32 %v2186_v32  ;;  %v2181_v3 = vadd.f32 1.0, %v10241_v54 }
 0x791   : > { %v2324_v52 = vpop.permute.xlu1 %2323  ;;  %10256 = vrcp.f32 %v2180_v27 }
 0x792   : > { %2425 = vrot.lane.b32.xlu0 %v2380_v58, %s11114_s14  ;;  %v2369_v49 = vmul.f32 %v12242_v20, %v2324_v52  ;;  %10258 = vrcp.f32 %v2176_v12 }
 0x793   : > { %v2320_v29 = vpop.permute.xlu0 %2319  ;;  %10260 = vrcp.f32 %v2189_v39 }
 0x794   : > { %v2367_v1 = vmul.f32 %v12239_v25, %v2320_v29  ;;  %v12246_v10 = vpop.eup %10244  ;;  %2403 = vrot.lane.b32.xlu1 %v2369_v49, %s11114_s14  ;;  %10262 = vrcp.f32 %v2181_v3 }
 0x795   : > { %v2338_v53 = vpop.permute.xlu1 %2337 }
 0x796   : > { %2399 = vrot.lane.b32.xlu0 %v2367_v1, %s11114_s14  ;;  %v10247_v11 = vpop.eup %10246 }
 0x797   : > { %v2326_v30 = vpop.permute.xlu0 %2325  ;;  %v12250_v9 = vpop.eup %10248  ;;  %v2182_v18 = vadd.f32 1.0, %v10247_v11 }
 0x798   : > { %v2370_v58 = vmul.f32 %v12246_v10, %v2326_v30  ;;  %v2376_v57 = vmul.f32 %v12250_v9, %v2338_v53  ;;  %v12254_v62 = vpop.eup %10250 }
 0x799   : > { %v10253_v27 = vpop.eup %10252  ;;  %v2342_v12 = vpop.permute.xlu1 %2341  ;;  %10264 = vrcp.f32 %v2182_v18 }
 0x79a   : > { %2405 = vrot.lane.b32.xlu0 %v2370_v58, %s11114_s14  ;;  %2417 = vrot.lane.b32.xlu1 %v2376_v57, %s11114_s14  ;;  %v12258_v29 = vpop.eup %10254  ;;  %v2190_v39 = vadd.f32 1.0, %v10253_v27 }
 0x79b   : > { %v2328_v32 = vpop.permute.xlu0 %2327  ;;  %v2378_v54 = vmul.f32 %v12258_v29, %v2342_v12  ;;  %v12262_v1 = vpop.eup %10256 }
 0x79c   : > { %v2371_v19 = vmul.f32 %v12254_v62, %v2328_v32  ;;  %v12266_v30 = vpop.eup %10258  ;;  %10266 = vrcp.f32 %v2190_v39 }
 0x79d   : > { %v2322_v3 = vpop.permute.xlu1 %2321  ;;  %v12270_v58 = vpop.eup %10260 }
 0x79e   : > { %2407 = vrot.lane.b32.xlu0 %v2371_v19, %s11114_s14  ;;  %2421 = vrot.lane.b32.xlu1 %v2378_v54, %s11114_s14  ;;  %v2368_v11 = vmul.f32 %v12266_v30, %v2322_v3  ;;  %v12274_v32 = vpop.eup %10262  ;;  %v2263_v3 = vrot.slane %v11937_v31, 7 }
 0x79f   : > { %v2330_v52 = vpop.permute.xlu0 %2329 }
 0x7a0   : > { %v2372_v49 = vmul.f32 %v12262_v1, %v2330_v52 }
 0x7a1   : > { %v2332_v18 = vpop.permute.xlu1 %2331 }
 0x7a2   : > { %2409 = vrot.lane.b32.xlu0 %v2372_v49, %s11114_s14  ;;  %2401 = vrot.lane.b32.xlu1 %v2368_v11, %s11114_s14  ;;  %v2373_v27 = vmul.f32 %v12274_v32, %v2332_v18  ;;  %v2295_v11 = vmul.f32 %v12214_v14, %v2263_v3  ;;  %v2265_v18 = vrot.slane %v11982_v5, 7  ;;  %v2268_v3 = vrot.slane %v11958_v24, 7 }
 0x7a3   : > { %v2348_v53 = vpop.permute.xlu0 %2347  ;;  %v12279_v19 = vpop.eup %10264  ;;  %v2257_v24 = vrot.slane %v11993_v60, 7 }
 0x7a4   : > { %v2381_v57 = vmul.f32 %v12270_v58, %v2348_v53 }
 0x7a5   : > { %v2334_v12 = vpop.permute.xlu1 %2333 }
 0x7a6   : > { %2427 = vrot.lane.b32.xlu0 %v2381_v57, %s11114_s14  ;;  %2411 = vrot.lane.b32.xlu1 %v2373_v27, %s11114_s14  ;;  %v2374_v54 = vmul.f32 %v12279_v19, %v2334_v12  ;;  %v12283_v52 = vpop.eup %10266  ;;  %v2267_v27 = vrot.slane %v11954_v0, 7  ;;  %v2297_v12 = vmul.f32 %v12223_v33, %v2265_v18  ;;  %v2300_v0 = vmul.f32 %v12233_v55, %v2268_v3 }
 0x7a7   : > { %v2255_v18 = vrot.slane %v11968_v4, 7  ;;  %v2264_v4 = vrot.slane %v11943_v50, 7  ;;  %v2266_v50 = vrot.slane %v11948_v44, 7  ;;  %v2292_v44 = vmul.f32 %v12262_v1, %v2260_v42 }
 0x7a9   : > { %v2350_v39 = vpop.permute.xlu1 %2349 }
 0x7aa   : > { %2413 = vrot.lane.b32.xlu1 %v2374_v54, %s11114_s14  ;;  %v2382_v49 = vmul.f32 %v12283_v52, %v2350_v39  ;;  %v2299_v39 = vmul.f32 %v12227_v23, %v2267_v27 }
 0x7ae   : > { %2429 = vrot.lane.b32.xlu1 %v2382_v49, %s11114_s14 }
 0x7fc   : > { %v2416_v53 = vpop.permute.xlu0 %2415 }
 0x7fd   : > { %v12289_v57 = vadd.f32 %v2416_v53, %v2295_v11  ;;  %v2420_v54 = vpop.permute.xlu1 %2419 }
 0x7fe   : > { %v12295_v43 = vadd.f32 %v2420_v54, %v2297_v12  ;;  %v2287_v12 = vmul.f32 %v12239_v25, %v2255_v18 }
 0x7ff   : > { %10268 = vtanh.f32 %v12289_v57 }
 0x800   : > { %v2424_v49 = vpop.permute.xlu0 %2423  ;;  %10270 = vtanh.f32 %v12295_v43 }
 0x801   : > { %v12300_v11 = vadd.f32 %v2424_v49, %v2299_v39  ;;  %v2258_v49 = vrot.slane %v11979_v28, 7  ;;  %v2296_v28 = vmul.f32 %v12250_v9, %v2264_v4 }
 0x803   : > { %10272 = vtanh.f32 %v12300_v11  ;;  %v2290_v60 = vmul.f32 %v12246_v10, %v2258_v49 }
 0x804   : > { %v2426_v5 = vpop.permute.xlu0 %2425 }
 0x805   : > { %v12305_v53 = vadd.f32 %v2426_v5, %v2300_v0 }
 0x806   : > { %v2404_v0 = vpop.permute.xlu1 %2403 }
 0x807   : > { %10274 = vtanh.f32 %v12305_v53 }
 0x808   : > { %v2400_v39 = vpop.permute.xlu0 %2399 }
 0x809   : > { %v10269_v31 = vpop.eup %10268  ;;  %v12314_v3 = vadd.f32 %v2400_v39, %v2287_v12  ;;  %v2291_v39 = vmul.f32 %v12254_v62, %v2259_v36 }
 0x80a   : > { %2511 = vrot.lane.b32.xlu0 %v10269_v31, %s11113_s27  ;;  %v10271_v27 = vpop.eup %10270  ;;  %v2289_v31 = vmul.f32 %v12242_v20, %v2257_v24 }
 0x80b   : > { %2515 = vrot.lane.b32.xlu1 %v10271_v27, %s11113_s27  ;;  %10276 = vtanh.f32 %v12314_v3 }
 0x80c   : > { %v12318_v5 = vadd.f32 %v2404_v0, %v2289_v31  ;;  %v2406_v27 = vpop.permute.xlu0 %2405  ;;  %v2418_v12 = vpop.permute.xlu1 %2417  ;;  %v2298_v31 = vmul.f32 %v12258_v29, %v2266_v50 }
 0x80d   : > { %v10273_v54 = vpop.eup %10272  ;;  %v12325_v24 = vadd.f32 %v2406_v27, %v2290_v60  ;;  %v2256_v60 = vrot.slane %v11971_v41, 7 }
 0x80e   : > { %2519 = vrot.lane.b32.xlu0 %v10273_v54, %s11113_s27  ;;  %10278 = vtanh.f32 %v12318_v5  ;;  %v12329_v54 = vadd.f32 %v2418_v12, %v2296_v28  ;;  %v2269_v28 = vrot.slane %v11999_v2, 7 }
 0x80f   : > { %10280 = vtanh.f32 %v12325_v24  ;;  %v2288_v59 = vmul.f32 %v12266_v30, %v2256_v60 }
 0x810   : > { %v2408_v49 = vpop.permute.xlu0 %2407  ;;  %10282 = vtanh.f32 %v12329_v54  ;;  %v2422_v4 = vpop.permute.xlu1 %2421  ;;  %v2301_v42 = vmul.f32 %v12270_v58, %v2269_v28 }
 0x811   : > { %v10275_v18 = vpop.eup %10274  ;;  %v12336_v0 = vadd.f32 %v2408_v49, %v2291_v39  ;;  %v15186_v39 = vld [vmem:[#allocation15_spill] sm:$0xff] }
 0x812   : > { %2521 = vrot.lane.b32.xlu0 %v10275_v18, %s11113_s27  ;;  %v12339_v18 = vadd.f32 %v2422_v4, %v2298_v31  ;;  %v2261_v49 = vrot.slane %v15186_v39, 7 }
 0x813   : > { %10284 = vtanh.f32 %v12336_v0 }
 0x814   : > { %v2410_v27 = vpop.permute.xlu0 %2409  ;;  %10286 = vtanh.f32 %v12339_v18  ;;  %v2402_v50 = vpop.permute.xlu1 %2401  ;;  %v2293_v60 = vmul.f32 %v12274_v32, %v2261_v49 }
 0x815   : > { %v10277_v36 = vpop.eup %10276  ;;  %v12346_v12 = vadd.f32 %v2410_v27, %v2292_v44  ;;  %v12350_v31 = vadd.f32 %v2402_v50, %v2288_v59  ;;  %v15189_v59 = vld [vmem:[#allocation16_spill] sm:$0xff] }
 0x816   : > { %2495 = vrot.lane.b32.xlu0 %v10277_v36, %s11113_s27  ;;  %v2262_v50 = vrot.slane %v15189_v59, 7 }
 0x817   : > { %15187 = vst [vmem:[#allocation15_spill] sm:$0xff] %v12350_v31  ;;  %10288 = vtanh.f32 %v12346_v12 }
 0x818   : > { %v10279_v41 = vpop.eup %10278  ;;  %v2428_v2 = vpop.permute.xlu0 %2427  ;;  %10290 = vtanh.f32 %v12350_v31 }
 0x819   : > { %2499 = vrot.lane.b32.xlu1 %v10279_v41, %s11113_s27  ;;  %v10281_v4 = vpop.eup %10280  ;;  %v12357_v44 = vadd.f32 %v2428_v2, %v2301_v42  ;;  %v2412_v27 = vpop.permute.xlu1 %2411  ;;  %v2294_v41 = vmul.f32 %v12279_v19, %v2262_v50  ;;  %v15190_v2 = vld [vmem:[#allocation33_spill] sm:$0xff] }
 0x81a   : > { %2501 = vrot.lane.b32.xlu0 %v10281_v4, %s11113_s27  ;;  %v10283_v36 = vpop.eup %10282  ;;  %v12361_v39 = vadd.f32 %v2412_v27, %v2293_v60  ;;  %v2270_v4 = vrot.slane %v15190_v2, 7 }
 0x81b   : > { %15188 = vst [vmem:[#allocation50_spill] sm:$0xff] %v12357_v44  ;;  %10292 = vtanh.f32 %v12357_v44 }
 0x81c   : > { %10294 = vtanh.f32 %v12361_v39  ;;  %v2302_v27 = vmul.f32 %v12283_v52, %v2270_v4 }
 0x81d   : > { %2513 = vrot.lane.b32.xlu1 %v10283_v36, %s11113_s27  ;;  %v10285_v28 = vpop.eup %10284  ;;  %v2414_v49 = vpop.permute.xlu1 %2413 }
 0x81e   : > { %2503 = vrot.lane.b32.xlu0 %v10285_v28, %s11113_s27  ;;  %v10287_v42 = vpop.eup %10286  ;;  %v12369_v40 = vadd.f32 %v2414_v49, %v2294_v41 }
 0x820   : > { %15191 = vst [vmem:[#allocation16_spill] sm:$0xff] %v12369_v40  ;;  %10296 = vtanh.f32 %v12369_v40 }
 0x821   : > { %2517 = vrot.lane.b32.xlu1 %v10287_v42, %s11113_s27  ;;  %v10289_v60 = vpop.eup %10288  ;;  %v2430_v36 = vpop.permute.xlu1 %2429 }
 0x822   : > { %2505 = vrot.lane.b32.xlu0 %v10289_v60, %s11113_s27  ;;  %v10291_v59 = vpop.eup %10290  ;;  %v12375_v50 = vadd.f32 %v2430_v36, %v2302_v27 }
 0x824   : > { %15192 = vst [vmem:[#allocation33_spill] sm:$0xff] %v12375_v50  ;;  %10298 = vtanh.f32 %v12375_v50 }
 0x825   : > { %2497 = vrot.lane.b32.xlu1 %v10291_v59, %s11113_s27  ;;  %v10293_v28 = vpop.eup %10292 }
 0x826   : > { %2523 = vrot.lane.b32.xlu0 %v10293_v28, %s11113_s27  ;;  %v10295_v41 = vpop.eup %10294 }
 0x829   : > { %2507 = vrot.lane.b32.xlu1 %v10295_v41, %s11113_s27 }
 0x82a   : > { %v10297_v49 = vpop.eup %10296 }
 0x82d   : > { %2509 = vrot.lane.b32.xlu1 %v10297_v49, %s11113_s27 }
 0x82e   : > { %v10299_v42 = vpop.eup %10298 }
 0x831   : > { %2525 = vrot.lane.b32.xlu1 %v10299_v42, %s11113_s27 }
 0x87c   : > { %v2512_v2 = vpop.permute.xlu0 %2511 }
 0x87d   : > { %v2516_v27 = vpop.permute.xlu1 %2515  ;;  %v12387_v41 = vmul.f32 %v12214_v14, %v2512_v2 }
 0x87f   : > { %15194 = vst [vmem:[#allocation52_spill] sm:$0xff] %v12387_v41 }
 0x880   : > { %v2520_v4 = vpop.permute.xlu0 %2519 }
 0x884   : > { %v2522_v60 = vpop.permute.xlu0 %2521 }
 0x888   : > { %v2496_v36 = vpop.permute.xlu0 %2495 }
 0x889   : > { %v12390_v49 = vmul.f32 %v12239_v25, %v2496_v36 }
 0x88b   : > { %v2500_v59 = vpop.permute.xlu1 %2499  ;;  %15195 = vst [vmem:[#allocation53_spill] sm:$0xff] %v12390_v49  ;;  %v2640_v2 = vrot.slane %v12390_v49, 2 }
 0x88c   : > { %v2502_v15 = vpop.permute.xlu0 %2501 }
 0x88d   : > { %v12397_v44 = vmul.f32 %v12246_v10, %v2502_v15 }
 0x88f   : > { %v2514_v48 = vpop.permute.xlu1 %2513  ;;  %15197 = vst [vmem:[#allocation55_spill] sm:$0xff] %v12397_v44  ;;  %v2644_v10 = vrot.slane %v12397_v44, 7 }
 0x890   : > { %v2504_v21 = vpop.permute.xlu0 %2503  ;;  %v12384_v28 = vmul.f32 %v12250_v9, %v2514_v48  ;;  %v2654_v9 = vrot.slane %v12387_v41, 2 }
 0x891   : > { %v12400_v48 = vmul.f32 %v12254_v62, %v2504_v21  ;;  %v12415_v62 = vmul.f32 %v12223_v33, %v2516_v27 }
 0x892   : > { %15193 = vst [vmem:[#allocation51_spill] sm:$0xff] %v12384_v28  ;;  %v2655_v50 = vrot.slane %v12384_v28, 1 }
 0x893   : > { %v2518_v63 = vpop.permute.xlu1 %2517  ;;  %15198 = vst [vmem:[#allocation56_spill] sm:$0xff] %v12400_v48  ;;  %15201 = vst [vmem:[#allocation59_spill] sm:$0xff] %v12415_v62  ;;  %v2646_v36 = vrot.slane %v12400_v48, 6 }
 0x894   : > { %v2506_v42 = vpop.permute.xlu0 %2505  ;;  %v12394_v40 = vmul.f32 %v12258_v29, %v2518_v63  ;;  %v2656_v63 = vsel %vm1290_vm1, %v2655_v50, %v2654_v9 }
 0x895   : > { %v12407_v25 = vmul.f32 %v12262_v1, %v2506_v42  ;;  %v12421_v1 = vmul.f32 %v12227_v23, %v2520_v4  ;;  %v2657_v33 = vsel %vm1293_vm2, %v12415_v62, %v2656_v63  ;;  %v12437_v23 = vmul.f32 %v12233_v55, %v2522_v60 }
 0x896   : > { %15196 = vst [vmem:[#allocation54_spill] sm:$0xff] %v12394_v40  ;;  %v2658_v29 = vrot.slane %v12394_v40, 7 }
 0x897   : > { %v2498_v31 = vpop.permute.xlu1 %2497  ;;  %15200 = vst [vmem:[#allocation58_spill] sm:$0xff] %v12407_v25  ;;  %15203 = vst [vmem:[#allocation61_spill] sm:$0xff] %v12421_v1  ;;  %v2648_v9 = vrot.slane %v12407_v25, 5 }
 0x898   : > { %v12404_v14 = vmul.f32 %v12266_v30, %v2498_v31  ;;  %v2524_v21 = vpop.permute.xlu0 %2523  ;;  %v12418_v30 = vmul.f32 %v12242_v20, %v2500_v59  ;;  %15206 = vst [vmem:[#allocation64_spill] sm:$0xff] %v12437_v23  ;;  %v2659_v4 = vsel %vm1296_vm3, %v2658_v29, %v2657_v33  ;;  %v2662_v29 = vrot.slane %v12437_v23, 5 }
 0x899   : > { %v12434_v27 = vmul.f32 %v12270_v58, %v2524_v21 }
 0x89a   : > { %15199 = vst [vmem:[#allocation57_spill] sm:$0xff] %v12404_v14  ;;  %v2641_v15 = vrot.slane %v12404_v14, 1  ;;  %15202 = vst [vmem:[#allocation60_spill] sm:$0xff] %v12418_v30 }
 0x89b   : > { %v2508_v31 = vpop.permute.xlu1 %2507  ;;  %15205 = vst [vmem:[#allocation63_spill] sm:$0xff] %v12434_v27  ;;  %v2664_v21 = vrot.slane %v12434_v27, 4 }
 0x89c   : > { %v2642_v50 = vsel %vm1290_vm1, %v2641_v15, %v2640_v2  ;;  %v12426_v42 = vmul.f32 %v12274_v32, %v2508_v31  ;;  %v2660_v32 = vrot.slane %v12421_v1, 6 }
 0x89d   : > { %v2643_v20 = vsel %vm1293_vm2, %v12418_v30, %v2642_v50 }
 0x89e   : > { %15204 = vst [vmem:[#allocation62_spill] sm:$0xff] %v12426_v42  ;;  %v2645_v59 = vsel %vm1296_vm3, %v2644_v10, %v2643_v20  ;;  %v2650_v2 = vrot.slane %v12426_v42, 4  ;;  %v2661_v60 = vsel %vm1299_vm4, %v2660_v32, %v2659_v4 }
 0x89f   : > { %v2647_v15 = vsel %vm1299_vm4, %v2646_v36, %v2645_v59  ;;  %v2510_v63 = vpop.permute.xlu1 %2509 }
 0x8a0   : > { %v12445_v31 = vmul.f32 %v12279_v19, %v2510_v63  ;;  %v2649_v58 = vsel %vm1302_vm5, %v2648_v9, %v2647_v15  ;;  %v2663_v19 = vsel %vm1302_vm5, %v2662_v29, %v2661_v60 }
 0x8a1   : > { %v2651_v55 = vsel %vm1305_vm6, %v2650_v2, %v2649_v58  ;;  %v2665_v9 = vsel %vm1305_vm6, %v2664_v21, %v2663_v19 }
 0x8a2   : > { %15207 = vst [vmem:[#allocation65_spill] sm:$0xff] %v12445_v31  ;;  %v2652_v10 = vrot.slane %v12445_v31, 3 }
 0x8a3   : > { %v2526_v50 = vpop.permute.xlu1 %2525 }
 0x8a4   : > { %v12454_v33 = vmul.f32 %v12283_v52, %v2526_v50  ;;  %v2653_v36 = vsel %vm1308_vm7, %v2652_v10, %v2651_v55 }
 0x8a5   : > { %2668 = vrot.lane.b32.xlu0 %v2653_v36, %s11114_s14 }
 0x8a6   : > { %15208 = vst [vmem:[#allocation66_spill] sm:$0xff] %v12454_v33  ;;  %v2666_v20 = vrot.slane %v12454_v33, 3 }
 0x8a8   : > { %v2667_v4 = vsel %vm1308_vm7, %v2666_v20, %v2665_v9 }
 0x8a9   : > { %2670 = vrot.lane.b32.xlu1 %v2667_v4, %s11114_s14 }
 0x917   : > { %v2669_v59 = vpop.permute.xlu0 %2668 }
 0x918   : > { %9426 = vmatprep.mubr.msk.f32.mxu1 %vm500_vm0, %v2669_v59 }
 0x91b   : > { %v2671_v32 = vpop.permute.xlu1 %2670 }
 0x91c   : > { %9427 = vmatmul.mubr.msk.f32.vlgmr.msra.gmra.mrb[6].mxu1 %vm500_vm0, %v2671_v32 }
 0x91d   : > { %9711 = vmatpush3.bf16.msra.mxu1 %v11313_v8 }
 0x91e   : > { %9713 = vmatprep.subr.bf16.mxu1 %v11322_v13 }
 0x921   : > { %9715 = vmatpush3.bf16.msra.mxu1 %v11322_v13 }
 0x922   : > { %9725 = vmatprep.subr.bf16.mxu1 %v11313_v8 }
 0x9ef   : > { %v12469_v52 = vpop.f32.mrb[6].mxu1 }
 0x9f0   : > { %v2742_v2 = vpop.f32.mrb[7].mxu1  ;;  %v2761_v15 = vrot.slane %v12469_v52, 6  ;;  %v2764_v63 = vrot.slane %v12469_v52, 2  ;;  %v12478_v21 = vadd.f32 %v12469_v52, %v11448_v7  ;;  %v2760_v9 = vrot.slane %v12469_v52, 5 }
 0x9f1   : > { %v2753_v60 = vrot.slane %v2742_v2, 5  ;;  %v2755_v50 = vrot.slane %v2742_v2, 7  ;;  %v12493_v20 = vadd.f32 %v2742_v2, %v11386_v37  ;;  %v2756_v4 = vrot.slane %v2742_v2, 1 }
 0x9f2   : > { %v12474_v58 = vadd.f32 %v2761_v15, %v11431_v61  ;;  %v12481_v55 = vadd.f32 %v2764_v63, %v11461_v17  ;;  %v2762_v32 = vrot.slane %v12469_v52, 7  ;;  %v12502_v15 = vadd.f32 %v2760_v9, %v11445_v6 }
 0x9f3   : > { %v12488_v36 = vadd.f32 %v2753_v60, %v11383_v35  ;;  %v12497_v59 = vadd.f32 %v2755_v50, %v11403_v46  ;;  %v2757_v63 = vrot.slane %v2742_v2, 2  ;;  %v12506_v60 = vadd.f32 %v2756_v4, %v11414_v51 }
 0x9f4   : > { %10300 = vtanh.f32 %v12474_v58  ;;  %v2758_v50 = vrot.slane %v2742_v2, 3  ;;  %v2754_v4 = vrot.slane %v2742_v2, 6  ;;  %v2766_v62 = vrot.slane %v12469_v52, 4 }
 0x9f5   : > { %10302 = vtanh.f32 %v12478_v21 }
 0x9f6   : > { %10304 = vtanh.f32 %v12481_v55  ;;  %v12525_v27 = vadd.f32 %v2758_v50, %v11422_v56  ;;  %v12531_v1 = vadd.f32 %v2754_v4, %v11380_v34  ;;  %v12548_v4 = vadd.f32 %v2766_v62, %v11497_v45 }
 0x9f7   : > { %10306 = vtanh.f32 %v12488_v36 }
 0x9f8   : > { %10308 = vtanh.f32 %v12493_v20 }
 0x9f9   : > { %10310 = vtanh.f32 %v12497_v59 }
 0x9fa   : > { %10312 = vtanh.f32 %v12502_v15 }
 0x9fb   : > { %10314 = vtanh.f32 %v12506_v60 }
 0x9fe   : > { %v10301_v29 = vpop.eup %10300 }
 0x9ff   : > { %3009 = vrot.lane.b32.xlu0 %v10301_v29, %s11113_s27  ;;  %v10303_v10 = vpop.eup %10302  ;;  %v2763_v29 = vrot.slane %v12469_v52, 1 }
 0xa00   : > { %3013 = vrot.lane.b32.xlu1 %v10303_v10, %s11113_s27  ;;  %v10305_v19 = vpop.eup %10304  ;;  %v12511_v10 = vadd.f32 %v2762_v32, %v11458_v16  ;;  %v2765_v32 = vrot.slane %v12469_v52, 3 }
 0xa01   : > { %v10307_v9 = vpop.eup %10306  ;;  %v12519_v33 = vadd.f32 %v2763_v29, %v11471_v22  ;;  %v2759_v29 = vrot.slane %v2742_v2, 4 }
 0xa02   : > { %10316 = vtanh.f32 %v12511_v10 }
 0xa03   : > { %3017 = vrot.lane.b32.xlu0 %v10305_v19, %s11113_s27  ;;  %v12515_v19 = vadd.f32 %v2757_v63, %v11406_v47  ;;  %v10309_v63 = vpop.eup %10308 }
 0xa04   : > { %v10311_v23 = vpop.eup %10310  ;;  %2997 = vrot.lane.b32.xlu1 %v10309_v63, %s11113_s27  ;;  %v12541_v63 = vadd.f32 %v2759_v29, %v11479_v26 }
 0xa05   : > { %10318 = vtanh.f32 %v12515_v19  ;;  %v10313_v50 = vpop.eup %10312 }
 0xa06   : > { %10320 = vtanh.f32 %v12519_v33  ;;  %v10315_v40 = vpop.eup %10314 }
 0xa07   : > { %2991 = vrot.lane.b32.xlu0 %v10307_v9, %s11113_s27  ;;  %v12535_v9 = vadd.f32 %v2765_v32, %v11488_v38  ;;  %10322 = vtanh.f32 %v12525_v27 }
 0xa08   : > { %3007 = vrot.lane.b32.xlu1 %v10313_v50, %s11113_s27  ;;  %10324 = vtanh.f32 %v12531_v1 }
 0xa09   : > { %10326 = vtanh.f32 %v12535_v9 }
 0xa0a   : > { %10328 = vtanh.f32 %v12541_v63 }
 0xa0b   : > { %2995 = vrot.lane.b32.xlu0 %v10311_v23, %s11113_s27  ;;  %10330 = vtanh.f32 %v12548_v4 }
 0xa0c   : > { %v10317_v23 = vpop.eup %10316 }
 0xa0d   : > { %3011 = vrot.lane.b32.xlu1 %v10317_v23, %s11113_s27  ;;  %v9019_v23 = vmul.f32 -1.442695, %v12474_v58 }
 0xa0f   : > { %2999 = vrot.lane.b32.xlu0 %v10315_v40, %s11113_s27  ;;  %v10319_v2 = vpop.eup %10318  ;;  %10332 = vpow2.f32 %v9019_v23 }
 0xa10   : > { %v10321_v52 = vpop.eup %10320 }
 0xa11   : > { %v10323_v32 = vpop.eup %10322  ;;  %3015 = vrot.lane.b32.xlu1 %v10321_v52, %s11113_s27  ;;  %v9023_v52 = vmul.f32 -1.442695, %v12481_v55  ;;  %v9014_v55 = vmul.f32 -1.442695, %v12506_v60 }
 0xa12   : > { %v10325_v40 = vpop.eup %10324 }
 0xa13   : > { %3001 = vrot.lane.b32.xlu0 %v10319_v2, %s11113_s27  ;;  %v10327_v29 = vpop.eup %10326  ;;  %v9021_v2 = vmul.f32 -1.442695, %v12478_v21  ;;  %v9018_v21 = vmul.f32 -1.442695, %v12502_v15  ;;  %v9016_v15 = vmul.f32 -1.442695, %v12525_v27 }
 0xa14   : > { %v10329_v62 = vpop.eup %10328 }
 0xa15   : > { %2993 = vrot.lane.b32.xlu1 %v10325_v40, %s11113_s27  ;;  %v10331_v50 = vpop.eup %10330  ;;  %10334 = vpow2.f32 %v9021_v2  ;;  %v9010_v40 = vmul.f32 -1.442695, %v12488_v36  ;;  %v9020_v36 = vmul.f32 -1.442695, %v12511_v10 }
 0xa16   : > { %10336 = vpow2.f32 %v9023_v52 }
 0xa17   : > { %3003 = vrot.lane.b32.xlu0 %v10323_v32, %s11113_s27  ;;  %10338 = vpow2.f32 %v9010_v40 }
 0xa19   : > { %3005 = vrot.lane.b32.xlu1 %v10329_v62, %s11113_s27  ;;  %v10333_v32 = vpop.eup %10332  ;;  %v9013_v62 = vmul.f32 -1.442695, %v12493_v20 }
 0xa1b   : > { %3019 = vrot.lane.b32.xlu0 %v10327_v29, %s11113_s27  ;;  %v2856_v29 = vadd.f32 1.0, %v10333_v32 }
 0xa1d   : > { %3021 = vrot.lane.b32.xlu1 %v10331_v50, %s11113_s27  ;;  %v9012_v50 = vmul.f32 -1.442695, %v12497_v59  ;;  %10340 = vrcp.f32 %v2856_v29 }
 0xa1f   : > { %v10335_v28 = vpop.eup %10334 }
 0xa20   : > { %v10337_v41 = vpop.eup %10336  ;;  %v2858_v31 = vadd.f32 1.0, %v10335_v28  ;;  %v9015_v28 = vmul.f32 -1.442695, %v12515_v19  ;;  %v9024_v19 = vmul.f32 -1.442695, %v12535_v9 }
 0xa21   : > { %v2860_v58 = vadd.f32 1.0, %v10337_v41  ;;  %v10339_v20 = vpop.eup %10338  ;;  %v9022_v41 = vmul.f32 -1.442695, %v12519_v33  ;;  %v9011_v33 = vmul.f32 -1.442695, %v12531_v1 }
 0xa22   : > { %10342 = vrcp.f32 %v2858_v31  ;;  %v2847_v10 = vadd.f32 1.0, %v10339_v20 }
 0xa23   : > { %10344 = vpow2.f32 %v9013_v62 }
 0xa24   : > { %10346 = vpow2.f32 %v9012_v50 }
 0xa25   : > { %10348 = vrcp.f32 %v2860_v58 }
 0xa26   : > { %10350 = vpow2.f32 %v9018_v21 }
 0xa27   : > { %10352 = vpow2.f32 %v9014_v55  ;;  %v12569_v23 = vpop.eup %10340  ;;  %v9017_v55 = vmul.f32 -1.442695, %v12541_v63 }
 0xa28   : > { %10354 = vpow2.f32 %v9020_v36 }
 0xa29   : > { %10356 = vpow2.f32 %v9015_v28 }
 0xa2a   : > { %10358 = vpow2.f32 %v9022_v41  ;;  %v9025_v41 = vmul.f32 -1.442695, %v12548_v4 }
 0xa2b   : > { %10360 = vpow2.f32 %v9016_v15 }
 0xa2c   : > { %v12572_v59 = vpop.eup %10342  ;;  %10362 = vrcp.f32 %v2847_v10 }
 0xa2d   : > { %v10345_v2 = vpop.eup %10344  ;;  %10364 = vpow2.f32 %v9024_v19 }
 0xa2e   : > { %v10347_v32 = vpop.eup %10346  ;;  %v2850_v27 = vadd.f32 1.0, %v10345_v2  ;;  %10366 = vpow2.f32 %v9011_v33 }
 0xa2f   : > { %v12579_v29 = vpop.eup %10348  ;;  %v2849_v21 = vadd.f32 1.0, %v10347_v32 }
 0xa30   : > { %v10351_v58 = vpop.eup %10350  ;;  %10368 = vrcp.f32 %v2850_v27 }
 0xa31   : > { %v10353_v9 = vpop.eup %10352  ;;  %v2855_v36 = vadd.f32 1.0, %v10351_v58  ;;  %10370 = vrcp.f32 %v2849_v21 }
 0xa32   : > { %v10355_v1 = vpop.eup %10354  ;;  %v2851_v28 = vadd.f32 1.0, %v10353_v9  ;;  %10372 = vpow2.f32 %v9017_v55 }
 0xa33   : > { %v10357_v20 = vpop.eup %10356  ;;  %10374 = vrcp.f32 %v2855_v36 }
 0xa34   : > { %v10359_v15 = vpop.eup %10358  ;;  %10376 = vrcp.f32 %v2851_v28 }
 0xa35   : > { %v10361_v2 = vpop.eup %10360  ;;  %10378 = vpow2.f32 %v9025_v41  ;;  %v2859_v19 = vadd.f32 1.0, %v10359_v15 }
 0xa36   : > { %v2853_v33 = vadd.f32 1.0, %v10361_v2 }
 0xa71   : > { %v3010_v31 = vpop.permute.xlu0 %3009 }
 0xa72   : > { %v3048_v60 = vmul.f32 %v12569_v23, %v3010_v31  ;;  %v3014_v52 = vpop.permute.xlu1 %3013  ;;  %v2857_v31 = vadd.f32 1.0, %v10355_v1 }
 0xa73   : > { %v3050_v40 = vmul.f32 %v12572_v59, %v3014_v52  ;;  %v12587_v52 = vpop.eup %10362 }
 0xa74   : > { %3089 = vrot.lane.b32.xlu0 %v3048_v60, %s11114_s14  ;;  %v2852_v60 = vadd.f32 1.0, %v10357_v20  ;;  %v10365_v63 = vpop.eup %10364  ;;  %10380 = vrcp.f32 %v2857_v31 }
 0xa75   : > { %v3018_v62 = vpop.permute.xlu0 %3017  ;;  %3093 = vrot.lane.b32.xlu1 %v3050_v40, %s11114_s14  ;;  %v10367_v40 = vpop.eup %10366  ;;  %v2861_v36 = vadd.f32 1.0, %v10365_v63 }
 0xa76   : > { %v3052_v50 = vmul.f32 %v12579_v29, %v3018_v62  ;;  %10382 = vrcp.f32 %v2852_v60  ;;  %v12590_v4 = vpop.eup %10368  ;;  %v2998_v62 = vpop.permute.xlu1 %2997  ;;  %v2848_v9 = vadd.f32 1.0, %v10367_v40 }
 0xa77   : > { %v12593_v27 = vpop.eup %10370  ;;  %10384 = vrcp.f32 %v2859_v19 }
 0xa78   : > { %3097 = vrot.lane.b32.xlu0 %v3052_v50, %s11114_s14  ;;  %v3042_v50 = vmul.f32 %v12590_v4, %v2998_v62  ;;  %v10373_v55 = vpop.eup %10372  ;;  %10386 = vrcp.f32 %v2853_v33 }
 0xa79   : > { %v2992_v10 = vpop.permute.xlu0 %2991  ;;  %v12598_v1 = vpop.eup %10374  ;;  %10388 = vrcp.f32 %v2848_v9  ;;  %v2854_v60 = vadd.f32 1.0, %v10373_v55 }
 0xa7a   : > { %v3039_v32 = vmul.f32 %v12587_v52, %v2992_v10  ;;  %3077 = vrot.lane.b32.xlu1 %v3042_v50, %s11114_s14  ;;  %v3008_v28 = vpop.permute.xlu1 %3007  ;;  %v12601_v20 = vpop.eup %10376  ;;  %10390 = vrcp.f32 %v2861_v36 }
 0xa7b   : > { %v3047_v41 = vmul.f32 %v12598_v1, %v3008_v28  ;;  %v10379_v2 = vpop.eup %10378  ;;  %10392 = vrcp.f32 %v2854_v60 }
 0xa7c   : > { %3071 = vrot.lane.b32.xlu0 %v3039_v32, %s11114_s14  ;;  %v2862_v62 = vadd.f32 1.0, %v10379_v2 }
 0xa7d   : > { %v2996_v58 = vpop.permute.xlu0 %2995 }
 0xa7e   : > { %v3041_v21 = vmul.f32 %v12593_v27, %v2996_v58  ;;  %3087 = vrot.lane.b32.xlu1 %v3047_v41, %s11114_s14  ;;  %v12606_v10 = vpop.eup %10380  ;;  %10394 = vrcp.f32 %v2862_v62 }
 0xa7f   : > { %v3012_v63 = vpop.permute.xlu1 %3011 }
 0xa80   : > { %3075 = vrot.lane.b32.xlu0 %v3041_v21, %s11114_s14  ;;  %v12609_v32 = vpop.eup %10382  ;;  %v3049_v19 = vmul.f32 %v12606_v10, %v3012_v63 }
 0xa81   : > { %v3000_v31 = vpop.permute.xlu0 %2999  ;;  %v12614_v50 = vpop.eup %10384 }
 0xa82   : > { %v3043_v15 = vmul.f32 %v12601_v20, %v3000_v31  ;;  %3091 = vrot.lane.b32.xlu1 %v3049_v19, %s11114_s14  ;;  %v12617_v21 = vpop.eup %10386 }
 0xa83   : > { %v3016_v58 = vpop.permute.xlu1 %3015  ;;  %v12622_v28 = vpop.eup %10388 }
 0xa84   : > { %3079 = vrot.lane.b32.xlu0 %v3043_v15, %s11114_s14  ;;  %v3051_v9 = vmul.f32 %v12614_v50, %v3016_v58  ;;  %v12625_v31 = vpop.eup %10390 }
 0xa85   : > { %v3002_v40 = vpop.permute.xlu0 %3001  ;;  %v12630_v63 = vpop.eup %10392 }
 0xa86   : > { %v3044_v33 = vmul.f32 %v12609_v32, %v3002_v40  ;;  %3095 = vrot.lane.b32.xlu1 %v3051_v9, %s11114_s14  ;;  %v2936_v9 = vrot.slane %v12329_v54, 7 }
 0xa87   : > { %v2994_v41 = vpop.permute.xlu1 %2993 }
 0xa88   : > { %3081 = vrot.lane.b32.xlu0 %v3044_v33, %s11114_s14  ;;  %v3040_v15 = vmul.f32 %v12622_v28, %v2994_v41  ;;  %v12635_v33 = vpop.eup %10394 }
 0xa89   : > { %v3004_v55 = vpop.permute.xlu0 %3003 }
 0xa8a   : > { %v3045_v36 = vmul.f32 %v12617_v21, %v3004_v55  ;;  %3073 = vrot.lane.b32.xlu1 %v3040_v15, %s11114_s14  ;;  %v2938_v55 = vrot.slane %v12339_v18, 7  ;;  %v2940_v15 = vrot.slane %v12305_v53, 7  ;;  %v2927_v53 = vrot.slane %v12314_v3, 7 }
 0xa8b   : > { %v3006_v19 = vpop.permute.xlu1 %3005 }
 0xa8c   : > { %3083 = vrot.lane.b32.xlu0 %v3045_v36, %s11114_s14  ;;  %v3046_v40 = vmul.f32 %v12630_v63, %v3006_v19  ;;  %v2968_v36 = vmul.f32 %v12569_v23, %v2936_v9 }
 0xa8d   : > { %v3020_v60 = vpop.permute.xlu0 %3019 }
 0xa8e   : > { %v3053_v2 = vmul.f32 %v12625_v31, %v3020_v60  ;;  %3085 = vrot.lane.b32.xlu1 %v3046_v40, %s11114_s14  ;;  %v2970_v60 = vmul.f32 %v12572_v59, %v2938_v55  ;;  %v2959_v55 = vmul.f32 %v12587_v52, %v2927_v53 }
 0xa8f   : > { %v3022_v62 = vpop.permute.xlu1 %3021 }
 0xa90   : > { %3099 = vrot.lane.b32.xlu0 %v3053_v2, %s11114_s14  ;;  %v3054_v58 = vmul.f32 %v12635_v33, %v3022_v62  ;;  %v2972_v62 = vmul.f32 %v12579_v29, %v2940_v15 }
 0xa92   : > { %3101 = vrot.lane.b32.xlu1 %v3054_v58, %s11114_s14 }
 0xae6   : > { %v3090_v41 = vpop.permute.xlu0 %3089 }
 0xae7   : > { %v12644_v2 = vadd.f32 %v3090_v41, %v2968_v36  ;;  %v3094_v19 = vpop.permute.xlu1 %3093  ;;  %v2930_v36 = vrot.slane %v12325_v24, 7 }
 0xae8   : > { %v12646_v40 = vadd.f32 %v3094_v19, %v2970_v60  ;;  %v2929_v60 = vrot.slane %v12318_v5, 7 }
 0xae9   : > { %10396 = vtanh.f32 %v12644_v2 }
 0xaea   : > { %v3098_v58 = vpop.permute.xlu0 %3097  ;;  %10398 = vtanh.f32 %v12646_v40 }
 0xaeb   : > { %v12651_v54 = vadd.f32 %v3098_v58, %v2972_v62  ;;  %v2962_v62 = vmul.f32 %v12590_v4, %v2930_v36  ;;  %v2961_v58 = vmul.f32 %v12593_v27, %v2929_v60  ;;  %v2932_v60 = vrot.slane %v12346_v12, 7 }
 0xaec   : > { %v3078_v3 = vpop.permute.xlu1 %3077 }
 0xaed   : > { %10400 = vtanh.f32 %v12651_v54  ;;  %v12667_v24 = vadd.f32 %v3078_v3, %v2962_v62 }
 0xaee   : > { %v3072_v41 = vpop.permute.xlu0 %3071 }
 0xaef   : > { %v12660_v19 = vadd.f32 %v3072_v41, %v2959_v55  ;;  %15209 = vst [vmem:[#allocation67_spill] sm:$0xff] %v12667_v24  ;;  %v2937_v41 = vrot.slane %v12295_v43, 7 }
 0xaf0   : > { %v3088_v55 = vpop.permute.xlu1 %3087 }
 0xaf1   : > { %10402 = vtanh.f32 %v12660_v19 }
 0xaf2   : > { %v3076_v53 = vpop.permute.xlu0 %3075  ;;  %10404 = vtanh.f32 %v12667_v24 }
 0xaf3   : > { %v10397_v18 = vpop.eup %10396  ;;  %v12670_v42 = vadd.f32 %v3076_v53, %v2961_v58  ;;  %v2964_v58 = vmul.f32 %v12609_v32, %v2932_v60 }
 0xaf4   : > { %3185 = vrot.lane.b32.xlu0 %v10397_v18, %s11113_s27  ;;  %v10399_v9 = vpop.eup %10398  ;;  %v2935_v18 = vrot.slane %v12289_v57, 7  ;;  %v3092_v3 = vpop.permute.xlu1 %3091 }
 0xaf5   : > { %3189 = vrot.lane.b32.xlu1 %v10399_v9, %s11113_s27  ;;  %v2931_v9 = vrot.slane %v12336_v0, 7  ;;  %10406 = vtanh.f32 %v12670_v42  ;;  %v2969_v0 = vmul.f32 %v12606_v10, %v2937_v41 }
 0xaf6   : > { %v2967_v5 = vmul.f32 %v12598_v1, %v2935_v18  ;;  %v3080_v57 = vpop.permute.xlu0 %3079  ;;  %v2939_v18 = vrot.slane %v12300_v11, 7 }
 0xaf7   : > { %v10401_v15 = vpop.eup %10400  ;;  %v2963_v36 = vmul.f32 %v12601_v20, %v2931_v9  ;;  %v12687_v53 = vadd.f32 %v3092_v3, %v2969_v0 }
 0xaf8   : > { %3193 = vrot.lane.b32.xlu0 %v10401_v15, %s11113_s27  ;;  %v12677_v15 = vadd.f32 %v3088_v55, %v2967_v5  ;;  %v2933_v5 = vrot.slane %v12361_v39, 7  ;;  %v2971_v55 = vmul.f32 %v12614_v50, %v2939_v18 }
 0xaf9   : > { %v12680_v62 = vadd.f32 %v3080_v57, %v2963_v36  ;;  %v3096_v36 = vpop.permute.xlu1 %3095  ;;  %v15210_v57 = vld [vmem:[#allocation15_spill] sm:$0xff] }
 0xafa   : > { %10408 = vtanh.f32 %v12677_v15  ;;  %v3082_v43 = vpop.permute.xlu0 %3081  ;;  %v2965_v41 = vmul.f32 %v12617_v21, %v2933_v5  ;;  %v2928_v60 = vrot.slane %v15210_v57, 7  ;;  %v12698_v0 = vadd.f32 %v3096_v36, %v2971_v55  ;;  %v15213_v36 = vld [vmem:[#allocation16_spill] sm:$0xff] }
 0xafb   : > { %10410 = vtanh.f32 %v12680_v62  ;;  %v10403_v9 = vpop.eup %10402  ;;  %v12690_v12 = vadd.f32 %v3082_v43, %v2964_v58  ;;  %v15212_v58 = vld [vmem:[#allocation50_spill] sm:$0xff]  ;;  %v2934_v57 = vrot.slane %v15213_v36, 7 }
 0xafc   : > { %10412 = vtanh.f32 %v12687_v53  ;;  %3167 = vrot.lane.b32.xlu0 %v10403_v9, %s11113_s27  ;;  %v10405_v11 = vpop.eup %10404  ;;  %15211 = vst [vmem:[#allocation15_spill] sm:$0xff] %v12698_v0  ;;  %v2941_v43 = vrot.slane %v15212_v58, 7  ;;  %v2960_v18 = vmul.f32 %v12622_v28, %v2928_v60 }
 0xafd   : > { %10414 = vtanh.f32 %v12690_v12  ;;  %3173 = vrot.lane.b32.xlu1 %v10405_v11, %s11113_s27  ;;  %v3074_v9 = vpop.permute.xlu1 %3073  ;;  %v2966_v60 = vmul.f32 %v12630_v63, %v2934_v57 }
 0xafe   : > { %v3084_v3 = vpop.permute.xlu0 %3083  ;;  %10416 = vtanh.f32 %v12698_v0  ;;  %v2973_v5 = vmul.f32 %v12625_v31, %v2941_v43  ;;  %v12710_v48 = vadd.f32 %v3074_v9, %v2960_v18  ;;  %v15216_v43 = vld [vmem:[#allocation33_spill] sm:$0xff] }
 0xaff   : > { %v10407_v39 = vpop.eup %10406  ;;  %v12702_v25 = vadd.f32 %v3084_v3, %v2965_v41  ;;  %v2942_v36 = vrot.slane %v15216_v43, 7 }
 0xb00   : > { %3171 = vrot.lane.b32.xlu0 %v10407_v39, %s11113_s27  ;;  %15214 = vst [vmem:[#allocation50_spill] sm:$0xff] %v12710_v48 }
 0xb01   : > { %10418 = vtanh.f32 %v12702_v25  ;;  %v3086_v3 = vpop.permute.xlu1 %3085 }
 0xb02   : > { %v3100_v58 = vpop.permute.xlu0 %3099  ;;  %10420 = vtanh.f32 %v12710_v48  ;;  %v12720_v18 = vadd.f32 %v3086_v3, %v2966_v60 }
 0xb03   : > { %v12713_v41 = vadd.f32 %v3100_v58, %v2973_v5  ;;  %v2974_v5 = vmul.f32 %v12635_v33, %v2942_v36 }
 0xb04   : > { %v10409_v55 = vpop.eup %10408 }
 0xb05   : > { %v10411_v11 = vpop.eup %10410  ;;  %3183 = vrot.lane.b32.xlu1 %v10409_v55, %s11113_s27  ;;  %15215 = vst [vmem:[#allocation16_spill] sm:$0xff] %v12713_v41  ;;  %10422 = vtanh.f32 %v12713_v41  ;;  %v3102_v55 = vpop.permute.xlu1 %3101 }
 0xb06   : > { %3175 = vrot.lane.b32.xlu0 %v10411_v11, %s11113_s27  ;;  %v10413_v39 = vpop.eup %10412  ;;  %10424 = vtanh.f32 %v12720_v18  ;;  %v12726_v58 = vadd.f32 %v3102_v55, %v2974_v5 }
 0xb07   : > { %v10415_v9 = vpop.eup %10414 }
 0xb08   : > { %v10417_v57 = vpop.eup %10416  ;;  %15217 = vst [vmem:[#allocation33_spill] sm:$0xff] %v12726_v58  ;;  %10426 = vtanh.f32 %v12726_v58 }
 0xb09   : > { %3187 = vrot.lane.b32.xlu1 %v10413_v39, %s11113_s27 }
 0xb0a   : > { %3177 = vrot.lane.b32.xlu0 %v10415_v9, %s11113_s27 }
 0xb0b   : > { %v10419_v11 = vpop.eup %10418 }
 0xb0c   : > { %v10421_v60 = vpop.eup %10420 }
 0xb0d   : > { %3191 = vrot.lane.b32.xlu1 %v10417_v57, %s11113_s27 }
 0xb0e   : > { %3179 = vrot.lane.b32.xlu0 %v10419_v11, %s11113_s27 }
 0xb0f   : > { %v10423_v3 = vpop.eup %10422 }
 0xb10   : > { %v10425_v39 = vpop.eup %10424 }
 0xb11   : > { %3169 = vrot.lane.b32.xlu1 %v10421_v60, %s11113_s27 }
 0xb12   : > { %3195 = vrot.lane.b32.xlu0 %v10423_v3, %s11113_s27  ;;  %v10427_v43 = vpop.eup %10426 }
 0xb15   : > { %3181 = vrot.lane.b32.xlu1 %v10425_v39, %s11113_s27 }
 0xb19   : > { %3197 = vrot.lane.b32.xlu1 %v10427_v43, %s11113_s27 }
 0xb66   : > { %v3186_v36 = vpop.permute.xlu0 %3185 }
 0xb67   : > { %v3190_v5 = vpop.permute.xlu1 %3189  ;;  %v12742_v39 = vmul.f32 %v12569_v23, %v3186_v36 }
 0xb68   : > { %v12757_v23 = vmul.f32 %v12572_v59, %v3190_v5 }
 0xb69   : > { %15220 = vst [vmem:[#allocation70_spill] sm:$0xff] %v12742_v39  ;;  %v3327_v48 = vrot.slane %v12742_v39, 2 }
 0xb6a   : > { %v3194_v9 = vpop.permute.xlu0 %3193  ;;  %15224 = vst [vmem:[#allocation74_spill] sm:$0xff] %v12757_v23 }
 0xb6b   : > { %v12775_v59 = vmul.f32 %v12579_v29, %v3194_v9 }
 0xb6d   : > { %15229 = vst [vmem:[#allocation79_spill] sm:$0xff] %v12775_v59 }
 0xb6e   : > { %v3168_v55 = vpop.permute.xlu0 %3167 }
 0xb6f   : > { %v3174_v57 = vpop.permute.xlu1 %3173 }
 0xb72   : > { %v3172_v44 = vpop.permute.xlu0 %3171 }
 0xb77   : > { %v3184_v30 = vpop.permute.xlu1 %3183 }
 0xb78   : > { %v3176_v11 = vpop.permute.xlu0 %3175  ;;  %v12736_v49 = vmul.f32 %v12598_v1, %v3184_v30  ;;  %v12751_v30 = vmul.f32 %v12587_v52, %v3168_v55 }
 0xb79   : > { %v12761_v36 = vmul.f32 %v12601_v20, %v3176_v11 }
 0xb7a   : > { %15218 = vst [vmem:[#allocation68_spill] sm:$0xff] %v12736_v49  ;;  %v3326_v58 = vrot.slane %v12736_v49, 3  ;;  %15222 = vst [vmem:[#allocation72_spill] sm:$0xff] %v12751_v30 }
 0xb7b   : > { %v3188_v14 = vpop.permute.xlu1 %3187  ;;  %15225 = vst [vmem:[#allocation75_spill] sm:$0xff] %v12761_v36 }
 0xb7c   : > { %v3178_v60 = vpop.permute.xlu0 %3177  ;;  %v12739_v3 = vmul.f32 %v12606_v10, %v3188_v14  ;;  %v12754_v14 = vmul.f32 %v12593_v27, %v3172_v44  ;;  %v3328_v10 = vsel %vm1290_vm1, %v3327_v48, %v3326_v58  ;;  %v3312_v48 = vrot.slane %v12751_v30, 3 }
 0xb7e   : > { %15219 = vst [vmem:[#allocation69_spill] sm:$0xff] %v12739_v3  ;;  %v3329_v24 = vrot.slane %v12739_v3, 1  ;;  %15223 = vst [vmem:[#allocation73_spill] sm:$0xff] %v12754_v14  ;;  %v3315_v58 = vrot.slane %v12754_v14, 1 }
 0xb7f   : > { %v3192_v43 = vpop.permute.xlu1 %3191 }
 0xb80   : > { %v3180_v0 = vpop.permute.xlu0 %3179  ;;  %v12747_v41 = vmul.f32 %v12614_v50, %v3192_v43  ;;  %v3330_v3 = vsel %vm1293_vm2, %v3329_v24, %v3328_v10  ;;  %v12783_v24 = vmul.f32 %v12590_v4, %v3174_v57  ;;  %v3334_v57 = vrot.slane %v12775_v59, 6 }
 0xb81   : > { %v12769_v44 = vmul.f32 %v12617_v21, %v3180_v0  ;;  %v3318_v0 = vrot.slane %v12761_v36, 7 }
 0xb82   : > { %15221 = vst [vmem:[#allocation71_spill] sm:$0xff] %v12747_v41  ;;  %v3332_v52 = vrot.slane %v12747_v41, 7  ;;  %15231 = vst [vmem:[#allocation81_spill] sm:$0xff] %v12783_v24 }
 0xb83   : > { %v3170_v1 = vpop.permute.xlu1 %3169  ;;  %15227 = vst [vmem:[#allocation77_spill] sm:$0xff] %v12769_v44  ;;  %v3322_v4 = vrot.slane %v12769_v44, 5 }
 0xb84   : > { %v12764_v50 = vmul.f32 %v12622_v28, %v3170_v1  ;;  %v3196_v43 = vpop.permute.xlu0 %3195  ;;  %v12780_v28 = vmul.f32 %v12609_v32, %v3178_v60 }
 0xb85   : > { %v12772_v27 = vmul.f32 %v12625_v31, %v3196_v43  ;;  %v3331_v31 = vsel %vm1296_vm3, %v12757_v23, %v3330_v3 }
 0xb86   : > { %15226 = vst [vmem:[#allocation76_spill] sm:$0xff] %v12764_v50  ;;  %v3313_v20 = vrot.slane %v12764_v50, 2  ;;  %15230 = vst [vmem:[#allocation80_spill] sm:$0xff] %v12780_v28  ;;  %v3333_v5 = vsel %vm1299_vm4, %v3332_v52, %v3331_v31  ;;  %v3320_v11 = vrot.slane %v12780_v28, 6  ;;  %v15240_v28 = vld [vmem:[#allocation15_spill] sm:$0xff] }
 0xb87   : > { %15228 = vst [vmem:[#allocation78_spill] sm:$0xff] %v12772_v27  ;;  %v3182_v21 = vpop.permute.xlu1 %3181  ;;  %v3336_v55 = vrot.slane %v12772_v27, 5  ;;  %v3335_v52 = vsel %vm1302_vm5, %v3334_v57, %v3333_v5  ;;  %v3611_v36 = vrot.slane %v15240_v28, 7 }
 0xb88   : > { %v3314_v29 = vsel %vm1290_vm1, %v3313_v20, %v3312_v48  ;;  %v12791_v9 = vmul.f32 %v12630_v63, %v3182_v21 }
 0xb89   : > { %v3316_v32 = vsel %vm1293_vm2, %v3315_v58, %v3314_v29  ;;  %v3337_v20 = vsel %vm1305_vm6, %v3336_v55, %v3335_v52 }
 0xb8a   : > { %15232 = vst [vmem:[#allocation82_spill] sm:$0xff] %v12791_v9  ;;  %v3317_v60 = vsel %vm1296_vm3, %v12783_v24, %v3316_v32  ;;  %v3324_v63 = vrot.slane %v12791_v9, 4 }
 0xb8b   : > { %v3198_v3 = vpop.permute.xlu1 %3197  ;;  %v3319_v1 = vsel %vm1299_vm4, %v3318_v0, %v3317_v60 }
 0xb8c   : > { %v12804_v10 = vmul.f32 %v12635_v33, %v3198_v3  ;;  %v3321_v43 = vsel %vm1302_vm5, %v3320_v11, %v3319_v1 }
 0xb8d   : > { %v3323_v48 = vsel %vm1305_vm6, %v3322_v4, %v3321_v43 }
 0xb8e   : > { %15233 = vst [vmem:[#allocation83_spill] sm:$0xff] %v12804_v10  ;;  %v3338_v58 = vrot.slane %v12804_v10, 4  ;;  %v3325_v21 = vsel %vm1308_vm7, %v3324_v63, %v3323_v48 }
 0xb8f   : > { %3340 = vrot.lane.b32.xlu0 %v3325_v21, %s11114_s14 }
 0xb90   : > { %v3339_v31 = vsel %vm1308_vm7, %v3338_v58, %v3337_v20 }
 0xb91   : > { %3342 = vrot.lane.b32.xlu1 %v3339_v31, %s11114_s14 }
 0xc01   : > { %v3341_v33 = vpop.permute.xlu0 %3340 }
 0xc02   : > { %9437 = vmatprep.mubr.msk.f32.mxu0 %vm500_vm0, %v3341_v33 }
 0xc03   : > { %v3343_v0 = vpop.permute.xlu1 %3342 }
 0xc04   : > { %9438 = vmatmul.mubr.msk.f32.vlgmr.msra.gmra.mrb[16].mxu0 %vm500_vm0, %v3343_v0 }
 0xc05   : > { %9719 = vmatpush3.bf16.msra.mxu0 %v11313_v8 }
 0xc06   : > { %9721 = vmatprep.subr.bf16.mxu0 %v11322_v13 }
 0xc09   : > { %9723 = vmatpush3.bf16.msra.mxu0 %v11322_v13 }
 0xcd7   : > { %v12820_v29 = vpop.f32.mrb[16].mxu0 }
 0xcd8   : > { %v3414_v5 = vpop.f32.mrb[17].mxu0  ;;  %v3433_v32 = vrot.slane %v12820_v29, 5  ;;  %v3434_v4 = vrot.slane %v12820_v29, 6  ;;  %v3432_v43 = vrot.slane %v12820_v29, 4  ;;  %v3435_v58 = vrot.slane %v12820_v29, 7 }
 0xcd9   : > { %v3425_v11 = vrot.slane %v3414_v5, 4  ;;  %v3427_v3 = vrot.slane %v3414_v5, 6  ;;  %v3429_v48 = vrot.slane %v3414_v5, 1  ;;  %v12842_v20 = vadd.f32 %v3414_v5, %v11414_v51 }
 0xcda   : > { %v12825_v55 = vadd.f32 %v3433_v32, %v11431_v61  ;;  %v12828_v57 = vadd.f32 %v3434_v4, %v11458_v16  ;;  %v12847_v21 = vadd.f32 %v3432_v43, %v11445_v6  ;;  %v3430_v31 = vrot.slane %v3414_v5, 2 }
 0xcdb   : > { %v12834_v1 = vadd.f32 %v3425_v11, %v11383_v35  ;;  %v12838_v52 = vadd.f32 %v3427_v3, %v11403_v46  ;;  %v12851_v33 = vadd.f32 %v3429_v48, %v11406_v47  ;;  %v3436_v0 = vrot.slane %v12820_v29, 1 }
 0xcdc   : > { %10428 = vtanh.f32 %v12825_v55  ;;  %v12856_v32 = vadd.f32 %v3435_v58, %v11448_v7  ;;  %v3431_v4 = vrot.slane %v3414_v5, 3  ;;  %v12860_v11 = vadd.f32 %v3430_v31, %v11422_v56 }
 0xcdd   : > { %10430 = vtanh.f32 %v12828_v57  ;;  %v3437_v3 = vrot.slane %v12820_v29, 2  ;;  %v3426_v43 = vrot.slane %v3414_v5, 5  ;;  %v9032_v39 = vmul.f32 -1.442695, %v12842_v20 }
 0xcde   : > { %10432 = vtanh.f32 %v12834_v1  ;;  %v12870_v48 = vadd.f32 %v3431_v4, %v11479_v26 }
 0xcdf   : > { %10434 = vtanh.f32 %v12838_v52  ;;  %v12874_v10 = vadd.f32 %v3437_v3, %v11488_v38 }
 0xce0   : > { %10436 = vtanh.f32 %v12842_v20 }
 0xce1   : > { %10438 = vtanh.f32 %v12847_v21 }
 0xce2   : > { %10440 = vtanh.f32 %v12851_v33 }
 0xce3   : > { %10442 = vtanh.f32 %v12856_v32 }
 0xce4   : > { %10444 = vtanh.f32 %v12860_v11 }
 0xce6   : > { %v10429_v60 = vpop.eup %10428 }
 0xce7   : > { %3681 = vrot.lane.b32.xlu0 %v10429_v60, %s11113_s27  ;;  %v10431_v63 = vpop.eup %10430 }
 0xce8   : > { %v10433_v60 = vpop.eup %10432 }
 0xce9   : > { %v10435_v58 = vpop.eup %10434 }
 0xcea   : > { %v10437_v31 = vpop.eup %10436 }
 0xceb   : > { %3683 = vrot.lane.b32.xlu0 %v10431_v63, %s11113_s27  ;;  %v12865_v63 = vadd.f32 %v3436_v0, %v11461_v17  ;;  %3671 = vrot.lane.b32.xlu1 %v10437_v31, %s11113_s27  ;;  %v3428_v0 = vrot.slane %v3414_v5, 7  ;;  %v10439_v4 = vpop.eup %10438  ;;  %v12895_v31 = vadd.f32 %v12820_v29, %v11471_v22 }
 0xcec   : > { %v10441_v27 = vpop.eup %10440 }
 0xced   : > { %10446 = vtanh.f32 %v12865_v63  ;;  %v12887_v3 = vadd.f32 %v3428_v0, %v11386_v37 }
 0xcee   : > { %10448 = vtanh.f32 %v12870_v48 }
 0xcef   : > { %3663 = vrot.lane.b32.xlu0 %v10433_v60, %s11113_s27  ;;  %v12880_v60 = vadd.f32 %v3426_v43, %v11380_v34  ;;  %10450 = vtanh.f32 %v12874_v10  ;;  %3679 = vrot.lane.b32.xlu1 %v10439_v4, %s11113_s27  ;;  %v3438_v43 = vrot.slane %v12820_v29, 3 }
 0xcf1   : > { %10452 = vtanh.f32 %v12880_v60  ;;  %v12901_v0 = vadd.f32 %v3438_v43, %v11497_v45  ;;  %v9037_v43 = vmul.f32 -1.442695, %v12825_v55  ;;  %v9033_v55 = vmul.f32 -1.442695, %v12851_v33 }
 0xcf2   : > { %10454 = vtanh.f32 %v12887_v3 }
 0xcf3   : > { %3667 = vrot.lane.b32.xlu0 %v10435_v58, %s11113_s27  ;;  %v10443_v58 = vpop.eup %10442  ;;  %10456 = vtanh.f32 %v12895_v31 }
 0xcf4   : > { %v10445_v5 = vpop.eup %10444  ;;  %3685 = vrot.lane.b32.xlu1 %v10443_v58, %s11113_s27  ;;  %10458 = vtanh.f32 %v12901_v0 }
 0xcf5   : > { %10460 = vpow2.f32 %v9037_v43 }
 0xcf7   : > { %3673 = vrot.lane.b32.xlu0 %v10441_v27, %s11113_s27  ;;  %v10447_v27 = vpop.eup %10446 }
 0xcf8   : > { %v10449_v4 = vpop.eup %10448  ;;  %3689 = vrot.lane.b32.xlu1 %v10447_v27, %s11113_s27 }
 0xcf9   : > { %v10451_v58 = vpop.eup %10450 }
 0xcfb   : > { %3675 = vrot.lane.b32.xlu0 %v10445_v5, %s11113_s27  ;;  %v10453_v5 = vpop.eup %10452 }
 0xcfc   : > { %3665 = vrot.lane.b32.xlu1 %v10453_v5, %s11113_s27  ;;  %v10455_v29 = vpop.eup %10454 }
 0xcfd   : > { %v10457_v59 = vpop.eup %10456 }
 0xcfe   : > { %v10459_v27 = vpop.eup %10458 }
 0xcff   : > { %3677 = vrot.lane.b32.xlu0 %v10449_v4, %s11113_s27  ;;  %v9038_v4 = vmul.f32 -1.442695, %v12828_v57  ;;  %v10461_v5 = vpop.eup %10460  ;;  %v9039_v57 = vmul.f32 -1.442695, %v12856_v32  ;;  %v9042_v32 = vmul.f32 -1.442695, %v12874_v10 }
 0xd00   : > { %3669 = vrot.lane.b32.xlu1 %v10455_v29, %s11113_s27  ;;  %v3528_v41 = vadd.f32 1.0, %v10461_v5  ;;  %v9030_v29 = vmul.f32 -1.442695, %v12838_v52  ;;  %v9029_v5 = vmul.f32 -1.442695, %v12880_v60 }
 0xd01   : > { %10462 = vpow2.f32 %v9038_v4  ;;  %v9031_v10 = vmul.f32 -1.442695, %v12887_v3  ;;  %v9043_v3 = vmul.f32 -1.442695, %v12901_v0 }
 0xd03   : > { %3691 = vrot.lane.b32.xlu0 %v10451_v58, %s11113_s27  ;;  %v9028_v58 = vmul.f32 -1.442695, %v12834_v1  ;;  %v9034_v1 = vmul.f32 -1.442695, %v12860_v11 }
 0xd04   : > { %3687 = vrot.lane.b32.xlu1 %v10457_v59, %s11113_s27 }
 0xd05   : > { %10464 = vpow2.f32 %v9028_v58 }
 0xd06   : > { %10466 = vrcp.f32 %v3528_v41  ;;  %v9041_v41 = vmul.f32 -1.442695, %v12865_v63 }
 0xd07   : > { %10468 = vpow2.f32 %v9032_v39  ;;  %v9035_v39 = vmul.f32 -1.442695, %v12870_v48 }
 0xd08   : > { %3693 = vrot.lane.b32.xlu1 %v10459_v27, %s11113_s27  ;;  %v9036_v27 = vmul.f32 -1.442695, %v12847_v21  ;;  %10470 = vpow2.f32 %v9030_v29 }
 0xd0b   : > { %v10463_v23 = vpop.eup %10462 }
 0xd0c   : > { %v3529_v59 = vadd.f32 1.0, %v10463_v23 }
 0xd0e   : > { %10472 = vrcp.f32 %v3529_v59 }
 0xd0f   : > { %10474 = vpow2.f32 %v9036_v27  ;;  %v10465_v43 = vpop.eup %10464 }
 0xd10   : > { %10476 = vpow2.f32 %v9033_v55  ;;  %v12919_v20 = vpop.eup %10466  ;;  %v3519_v33 = vadd.f32 1.0, %v10465_v43  ;;  %v9040_v43 = vmul.f32 -1.442695, %v12895_v31 }
 0xd11   : > { %10478 = vpow2.f32 %v9039_v57  ;;  %v10469_v21 = vpop.eup %10468 }
 0xd12   : > { %10480 = vpow2.f32 %v9034_v1  ;;  %v10471_v4 = vpop.eup %10470  ;;  %v3523_v63 = vadd.f32 1.0, %v10469_v21 }
 0xd13   : > { %10482 = vpow2.f32 %v9041_v41  ;;  %v3521_v59 = vadd.f32 1.0, %v10471_v4 }
 0xd14   : > { %10484 = vpow2.f32 %v9035_v39 }
 0xd15   : > { %10486 = vrcp.f32 %v3519_v33 }
 0xd16   : > { %10488 = vpow2.f32 %v9042_v32 }
 0xd17   : > { %10490 = vpow2.f32 %v9029_v5 }
 0xd18   : > { %v12926_v11 = vpop.eup %10472  ;;  %10492 = vrcp.f32 %v3523_v63 }
 0xd19   : > { %v10475_v48 = vpop.eup %10474  ;;  %10494 = vrcp.f32 %v3521_v59 }
 0xd1a   : > { %v10477_v27 = vpop.eup %10476  ;;  %v3527_v55 = vadd.f32 1.0, %v10475_v48  ;;  %10496 = vpow2.f32 %v9031_v10 }
 0xd1b   : > { %v10479_v57 = vpop.eup %10478  ;;  %v3524_v60 = vadd.f32 1.0, %v10477_v27 }
 0xd1c   : > { %v10481_v1 = vpop.eup %10480  ;;  %10498 = vrcp.f32 %v3527_v55  ;;  %v3530_v41 = vadd.f32 1.0, %v10479_v57 }
 0xd1d   : > { %10500 = vrcp.f32 %v3524_v60  ;;  %v3525_v39 = vadd.f32 1.0, %v10481_v1 }
 0xd1e   : > { %10502 = vpow2.f32 %v9040_v43 }
 0xd1f   : > { %10504 = vrcp.f32 %v3530_v41 }
 0xd20   : > { %10506 = vrcp.f32 %v3525_v39 }
 0xd21   : > { %10508 = vpow2.f32 %v9043_v3 }
 0xd59   : > { %v3682_v23 = vpop.permute.xlu0 %3681 }
 0xd5a   : > { %v3720_v52 = vmul.f32 %v12919_v20, %v3682_v23  ;;  %v10483_v23 = vpop.eup %10482 }
 0xd5b   : > { %v3532_v5 = vadd.f32 1.0, %v10483_v23 }
 0xd5c   : > { %3761 = vrot.lane.b32.xlu0 %v3720_v52, %s11114_s14  ;;  %v10485_v52 = vpop.eup %10484 }
 0xd5d   : > { %v3684_v58 = vpop.permute.xlu0 %3683  ;;  %v12933_v21 = vpop.eup %10486  ;;  %v3526_v31 = vadd.f32 1.0, %v10485_v52  ;;  %10510 = vrcp.f32 %v3532_v5 }
 0xd5e   : > { %v3721_v29 = vmul.f32 %v12926_v11, %v3684_v58  ;;  %v10489_v4 = vpop.eup %10488  ;;  %v3672_v48 = vpop.permute.xlu1 %3671 }
 0xd5f   : > { %v10491_v58 = vpop.eup %10490  ;;  %10512 = vrcp.f32 %v3526_v31  ;;  %v3533_v57 = vadd.f32 1.0, %v10489_v4 }
 0xd60   : > { %3763 = vrot.lane.b32.xlu0 %v3721_v29, %s11114_s14  ;;  %v12937_v63 = vpop.eup %10492  ;;  %v3520_v10 = vadd.f32 1.0, %v10491_v58 }
 0xd61   : > { %v3664_v33 = vpop.permute.xlu0 %3663  ;;  %v12940_v29 = vpop.eup %10494  ;;  %v3715_v0 = vmul.f32 %v12937_v63, %v3672_v48 }
 0xd62   : > { %v3711_v32 = vmul.f32 %v12933_v21, %v3664_v33  ;;  %v10497_v55 = vpop.eup %10496  ;;  %v3680_v43 = vpop.permute.xlu1 %3679  ;;  %10514 = vrcp.f32 %v3520_v10 }
 0xd63   : > { %v12944_v60 = vpop.eup %10498  ;;  %3751 = vrot.lane.b32.xlu1 %v3715_v0, %s11114_s14  ;;  %v3522_v3 = vadd.f32 1.0, %v10497_v55  ;;  %10516 = vrcp.f32 %v3533_v57 }
 0xd64   : > { %3743 = vrot.lane.b32.xlu0 %v3711_v32, %s11114_s14  ;;  %v12948_v1 = vpop.eup %10500  ;;  %v3719_v23 = vmul.f32 %v12944_v60, %v3680_v43 }
 0xd65   : > { %v3668_v59 = vpop.permute.xlu0 %3667  ;;  %v10503_v52 = vpop.eup %10502  ;;  %10518 = vrcp.f32 %v3522_v3 }
 0xd66   : > { %v3713_v27 = vmul.f32 %v12940_v29, %v3668_v59  ;;  %v12952_v33 = vpop.eup %10504  ;;  %v3686_v32 = vpop.permute.xlu1 %3685  ;;  %v3531_v59 = vadd.f32 1.0, %v10503_v52 }
 0xd67   : > { %3759 = vrot.lane.b32.xlu1 %v3719_v23, %s11114_s14  ;;  %v12956_v4 = vpop.eup %10506  ;;  %v3722_v58 = vmul.f32 %v12952_v33, %v3686_v32 }
 0xd68   : > { %3747 = vrot.lane.b32.xlu0 %v3713_v27, %s11114_s14  ;;  %v10509_v48 = vpop.eup %10508  ;;  %10520 = vrcp.f32 %v3531_v59 }
 0xd69   : > { %v3674_v41 = vpop.permute.xlu0 %3673  ;;  %v12960_v0 = vpop.eup %10510 }
 0xd6a   : > { %v3716_v39 = vmul.f32 %v12948_v1, %v3674_v41  ;;  %v12964_v27 = vpop.eup %10512  ;;  %v3690_v10 = vpop.permute.xlu1 %3689  ;;  %v3534_v41 = vadd.f32 1.0, %v10509_v48 }
 0xd6b   : > { %3765 = vrot.lane.b32.xlu1 %v3722_v58, %s11114_s14  ;;  %v3724_v57 = vmul.f32 %v12960_v0, %v3690_v10 }
 0xd6c   : > { %3753 = vrot.lane.b32.xlu0 %v3716_v39, %s11114_s14  ;;  %v12968_v23 = vpop.eup %10514  ;;  %10522 = vrcp.f32 %v3534_v41 }
 0xd6d   : > { %v3676_v5 = vpop.permute.xlu0 %3675  ;;  %v12972_v39 = vpop.eup %10516 }
 0xd6e   : > { %v3717_v31 = vmul.f32 %v12956_v4, %v3676_v5  ;;  %v3666_v52 = vpop.permute.xlu1 %3665 }
 0xd6f   : > { %3769 = vrot.lane.b32.xlu1 %v3724_v57, %s11114_s14  ;;  %v3712_v32 = vmul.f32 %v12968_v23, %v3666_v52  ;;  %v12978_v58 = vpop.eup %10518  ;;  %v3608_v52 = vrot.slane %v12644_v2, 7 }
 0xd70   : > { %3755 = vrot.lane.b32.xlu0 %v3717_v31, %s11114_s14 }
 0xd71   : > { %v3678_v55 = vpop.permute.xlu0 %3677 }
 0xd72   : > { %v3718_v43 = vmul.f32 %v12964_v27, %v3678_v55  ;;  %v3670_v31 = vpop.permute.xlu1 %3669  ;;  %v12982_v59 = vpop.eup %10520 }
 0xd73   : > { %3745 = vrot.lane.b32.xlu1 %v3712_v32, %s11114_s14  ;;  %v3714_v48 = vmul.f32 %v12978_v58, %v3670_v31 }
 0xd74   : > { %3757 = vrot.lane.b32.xlu0 %v3718_v43, %s11114_s14 }
 0xd75   : > { %v3692_v3 = vpop.permute.xlu0 %3691 }
 0xd76   : > { %v3725_v5 = vmul.f32 %v12972_v39, %v3692_v3  ;;  %v3688_v10 = vpop.permute.xlu1 %3687  ;;  %v12986_v57 = vpop.eup %10522  ;;  %v3640_v3 = vmul.f32 %v12919_v20, %v3608_v52 }
 0xd77   : > { %3749 = vrot.lane.b32.xlu1 %v3714_v48, %s11114_s14  ;;  %v3723_v55 = vmul.f32 %v12982_v59, %v3688_v10 }
 0xd78   : > { %3771 = vrot.lane.b32.xlu0 %v3725_v5, %s11114_s14  ;;  %v3609_v5 = vrot.slane %v12687_v53, 7 }
 0xd7a   : > { %v3694_v43 = vpop.permute.xlu1 %3693  ;;  %v3641_v48 = vmul.f32 %v12926_v11, %v3609_v5 }
 0xd7b   : > { %3767 = vrot.lane.b32.xlu1 %v3723_v55, %s11114_s14  ;;  %v3726_v41 = vmul.f32 %v12986_v57, %v3694_v43 }
 0xd7f   : > { %3773 = vrot.lane.b32.xlu1 %v3726_v41, %s11114_s14  ;;  %v3599_v41 = vrot.slane %v12660_v19, 7 }
 0xd81   : > { %v3631_v2 = vmul.f32 %v12933_v21, %v3599_v41  ;;  %v3604_v41 = vrot.slane %v12690_v12, 7 }
 0xdce   : > { %v3762_v32 = vpop.permute.xlu0 %3761 }
 0xdcf   : > { %v12993_v31 = vadd.f32 %v3762_v32, %v3640_v3  ;;  %v3601_v3 = vrot.slane %v12670_v42, 7  ;;  %v3603_v32 = vrot.slane %v12680_v62, 7 }
 0xdd1   : > { %10524 = vtanh.f32 %v12993_v31  ;;  %v3635_v5 = vmul.f32 %v12937_v63, %v3603_v32  ;;  %v3633_v19 = vmul.f32 %v12940_v29, %v3601_v3  ;;  %v3610_v3 = vrot.slane %v12646_v40, 7 }
 0xdd2   : > { %v3764_v10 = vpop.permute.xlu0 %3763  ;;  %v3606_v40 = vrot.slane %v12720_v18, 7  ;;  %v15236_v18 = vld [vmem:[#allocation16_spill] sm:$0xff] }
 0xdd3   : > { %v12997_v55 = vadd.f32 %v3764_v10, %v3641_v48 }
 0xdd5   : > { %10526 = vtanh.f32 %v12997_v55  ;;  %v3752_v48 = vpop.permute.xlu1 %3751 }
 0xdd6   : > { %v3744_v52 = vpop.permute.xlu0 %3743  ;;  %v13013_v9 = vadd.f32 %v3752_v48, %v3635_v5  ;;  %v3642_v5 = vmul.f32 %v12952_v33, %v3610_v3 }
 0xdd7   : > { %v13005_v49 = vadd.f32 %v3744_v52, %v3631_v2  ;;  %v3636_v2 = vmul.f32 %v12948_v1, %v3604_v41  ;;  %v3612_v41 = vrot.slane %v12651_v54, 7  ;;  %v15235_v54 = vld [vmem:[#allocation50_spill] sm:$0xff] }
 0xdd8   : > { %15234 = vst [vmem:[#allocation84_spill] sm:$0xff] %v13013_v9  ;;  %v3600_v44 = vrot.slane %v15235_v54, 7 }
 0xdd9   : > { %10528 = vtanh.f32 %v13005_v49  ;;  %v3760_v52 = vpop.permute.xlu1 %3759 }
 0xdda   : > { %v3748_v10 = vpop.permute.xlu0 %3747  ;;  %10530 = vtanh.f32 %v13013_v9 }
 0xddb   : > { %v10525_v43 = vpop.eup %10524  ;;  %v13015_v42 = vadd.f32 %v3748_v10, %v3633_v19 }
 0xddc   : > { %3857 = vrot.lane.b32.xlu0 %v10525_v43, %s11113_s27  ;;  %v3607_v43 = vrot.slane %v12677_v15, 7  ;;  %v3605_v15 = vrot.slane %v12702_v25, 7 }
 0xddd   : > { %10532 = vtanh.f32 %v13015_v42  ;;  %v3766_v48 = vpop.permute.xlu1 %3765 }
 0xdde   : > { %v3639_v62 = vmul.f32 %v12944_v60, %v3607_v43  ;;  %v3637_v19 = vmul.f32 %v12956_v4, %v3605_v15  ;;  %v13033_v25 = vadd.f32 %v3766_v48, %v3642_v5  ;;  %v3613_v5 = vrot.slane %v15236_v18, 7 }
 0xddf   : > { %v10527_v53 = vpop.eup %10526 }
 0xde0   : > { %3859 = vrot.lane.b32.xlu0 %v10527_v53, %s11113_s27  ;;  %v3754_v53 = vpop.permute.xlu0 %3753  ;;  %v13023_v32 = vadd.f32 %v3760_v52, %v3639_v62  ;;  %v3638_v52 = vmul.f32 %v12964_v27, %v3606_v40 }
 0xde1   : > { %v13025_v12 = vadd.f32 %v3754_v53, %v3636_v2  ;;  %v3644_v2 = vmul.f32 %v12960_v0, %v3612_v41  ;;  %v3770_v53 = vpop.permute.xlu1 %3769  ;;  %v3645_v41 = vmul.f32 %v12972_v39, %v3613_v5 }
 0xde2   : > { %10534 = vtanh.f32 %v13023_v32 }
 0xde3   : > { %10536 = vtanh.f32 %v13025_v12  ;;  %v10529_v43 = vpop.eup %10528  ;;  %v13044_v48 = vadd.f32 %v3770_v53, %v3644_v2  ;;  %v15237_v2 = vld [vmem:[#allocation67_spill] sm:$0xff] }
 0xde4   : > { %v3756_v10 = vpop.permute.xlu0 %3755  ;;  %3839 = vrot.lane.b32.xlu0 %v10529_v43, %s11113_s27  ;;  %10538 = vtanh.f32 %v13033_v25  ;;  %v10531_v15 = vpop.eup %10530  ;;  %v3632_v43 = vmul.f32 %v12968_v23, %v3600_v44  ;;  %v3602_v53 = vrot.slane %v15237_v2, 7 }
 0xde5   : > { %v13035_v62 = vadd.f32 %v3756_v10, %v3637_v19  ;;  %3847 = vrot.lane.b32.xlu1 %v10531_v15, %s11113_s27  ;;  %v3746_v40 = vpop.permute.xlu1 %3745 }
 0xde6   : > { %v3634_v44 = vmul.f32 %v12978_v58, %v3602_v53 }
 0xde7   : > { %10540 = vtanh.f32 %v13035_v62  ;;  %v10533_v10 = vpop.eup %10532 }
 0xde8   : > { %v3758_v3 = vpop.permute.xlu0 %3757  ;;  %10542 = vtanh.f32 %v13044_v48  ;;  %3843 = vrot.lane.b32.xlu0 %v10533_v10, %s11113_s27 }
 0xde9   : > { %v13046_v19 = vadd.f32 %v3758_v3, %v3638_v52  ;;  %v13055_v52 = vadd.f32 %v3746_v40, %v3632_v43  ;;  %v3750_v5 = vpop.permute.xlu1 %3749 }
 0xdea   : > { %v13065_v2 = vadd.f32 %v3750_v5, %v3634_v44 }
 0xdeb   : > { %10544 = vtanh.f32 %v13046_v19  ;;  %15238 = vst [vmem:[#allocation50_spill] sm:$0xff] %v13055_v52 }
 0xdec   : > { %v3772_v54 = vpop.permute.xlu0 %3771  ;;  %v10535_v18 = vpop.eup %10534  ;;  %10546 = vtanh.f32 %v13055_v52  ;;  %15241 = vst [vmem:[#allocation67_spill] sm:$0xff] %v13065_v2 }
 0xded   : > { %v13057_v3 = vadd.f32 %v3772_v54, %v3645_v41  ;;  %v10537_v15 = vpop.eup %10536  ;;  %3855 = vrot.lane.b32.xlu1 %v10535_v18, %s11113_s27  ;;  %v3643_v41 = vmul.f32 %v12982_v59, %v3611_v36  ;;  %v3768_v40 = vpop.permute.xlu1 %3767  ;;  %v15242_v18 = vld [vmem:[#allocation33_spill] sm:$0xff] }
 0xdee   : > { %3849 = vrot.lane.b32.xlu0 %v10537_v15, %s11113_s27  ;;  %v10539_v10 = vpop.eup %10538  ;;  %v3614_v53 = vrot.slane %v15242_v18, 7 }
 0xdef   : > { %15239 = vst [vmem:[#allocation16_spill] sm:$0xff] %v13057_v3  ;;  %10548 = vtanh.f32 %v13057_v3  ;;  %v13072_v15 = vadd.f32 %v3768_v40, %v3643_v41 }
 0xdf0   : > { %10550 = vtanh.f32 %v13065_v2  ;;  %v3646_v28 = vmul.f32 %v12986_v57, %v3614_v53 }
 0xdf1   : > { %v10541_v43 = vpop.eup %10540  ;;  %3861 = vrot.lane.b32.xlu1 %v10539_v10, %s11113_s27  ;;  %10552 = vtanh.f32 %v13072_v15  ;;  %v3774_v44 = vpop.permute.xlu1 %3773 }
 0xdf2   : > { %3851 = vrot.lane.b32.xlu0 %v10541_v43, %s11113_s27  ;;  %v10543_v54 = vpop.eup %10542  ;;  %v13078_v36 = vadd.f32 %v3774_v44, %v3646_v28 }
 0xdf4   : > { %15243 = vst [vmem:[#allocation15_spill] sm:$0xff] %v13078_v36  ;;  %10554 = vtanh.f32 %v13078_v36 }
 0xdf5   : > { %v10545_v24 = vpop.eup %10544  ;;  %3865 = vrot.lane.b32.xlu1 %v10543_v54, %s11113_s27 }
 0xdf6   : > { %3853 = vrot.lane.b32.xlu0 %v10545_v24, %s11113_s27  ;;  %v10547_v5 = vpop.eup %10546 }
 0xdf9   : > { %v10549_v10 = vpop.eup %10548  ;;  %3841 = vrot.lane.b32.xlu1 %v10547_v5, %s11113_s27 }
 0xdfa   : > { %3867 = vrot.lane.b32.xlu0 %v10549_v10, %s11113_s27  ;;  %v10551_v43 = vpop.eup %10550 }
 0xdfb   : > { %v10553_v41 = vpop.eup %10552 }
 0xdfd   : > { %3845 = vrot.lane.b32.xlu1 %v10551_v43, %s11113_s27 }
 0xdfe   : > { %v10555_v40 = vpop.eup %10554 }
 0xe01   : > { %3863 = vrot.lane.b32.xlu1 %v10553_v41, %s11113_s27 }
 0xe05   : > { %3869 = vrot.lane.b32.xlu1 %v10555_v40, %s11113_s27 }
 0xe4e   : > { %v3858_v24 = vpop.permute.xlu0 %3857 }
 0xe4f   : > { %v13093_v41 = vmul.f32 %v12919_v20, %v3858_v24 }
 0xe51   : > { %15246 = vst [vmem:[#allocation86_spill] sm:$0xff] %v13093_v41 }
 0xe52   : > { %v3860_v54 = vpop.permute.xlu0 %3859 }
 0xe53   : > { %v13096_v40 = vmul.f32 %v12926_v11, %v3860_v54  ;;  %v3999_v11 = vrot.slane %v13093_v41, 3 }
 0xe55   : > { %15247 = vst [vmem:[#allocation87_spill] sm:$0xff] %v13096_v40  ;;  %v4001_v54 = vrot.slane %v13096_v40, 2 }
 0xe56   : > { %v3840_v18 = vpop.permute.xlu0 %3839 }
 0xe57   : > { %v3848_v53 = vpop.permute.xlu1 %3847  ;;  %v13090_v43 = vmul.f32 %v12933_v21, %v3840_v18 }
 0xe59   : > { %15245 = vst [vmem:[#allocation85_spill] sm:$0xff] %v13090_v43  ;;  %v3984_v21 = vrot.slane %v13090_v43, 4 }
 0xe5a   : > { %v3844_v28 = vpop.permute.xlu0 %3843 }
 0xe5b   : > { %v13099_v2 = vmul.f32 %v12940_v29, %v3844_v28 }
 0xe5d   : > { %15248 = vst [vmem:[#allocation88_spill] sm:$0xff] %v13099_v2 }
 0xe5f   : > { %v3856_v44 = vpop.permute.xlu1 %3855 }
 0xe60   : > { %v3850_v5 = vpop.permute.xlu0 %3849  ;;  %v13087_v36 = vmul.f32 %v12944_v60, %v3856_v44 }
 0xe61   : > { %v13113_v29 = vmul.f32 %v12948_v1, %v3850_v5 }
 0xe62   : > { %15244 = vst [vmem:[#allocation33_spill] sm:$0xff] %v13087_v36  ;;  %v3998_v3 = vrot.slane %v13087_v36, 4 }
 0xe63   : > { %v3862_v14 = vpop.permute.xlu1 %3861  ;;  %15251 = vst [vmem:[#allocation91_spill] sm:$0xff] %v13113_v29 }
 0xe64   : > { %v3852_v50 = vpop.permute.xlu0 %3851  ;;  %v13106_v60 = vmul.f32 %v12952_v33, %v3862_v14  ;;  %v4000_v28 = vsel %vm1290_vm1, %v3999_v11, %v3998_v3 }
 0xe65   : > { %v13126_v40 = vmul.f32 %v12956_v4, %v3852_v50 }
 0xe66   : > { %15250 = vst [vmem:[#allocation90_spill] sm:$0xff] %v13106_v60  ;;  %v4003_v44 = vrot.slane %v13106_v60, 1 }
 0xe67   : > { %v3866_v30 = vpop.permute.xlu1 %3865  ;;  %15254 = vst [vmem:[#allocation94_spill] sm:$0xff] %v13126_v40 }
 0xe68   : > { %v3854_v10 = vpop.permute.xlu0 %3853  ;;  %v13132_v5 = vmul.f32 %v12960_v0, %v3866_v30 }
 0xe69   : > { %v13121_v33 = vmul.f32 %v12964_v27, %v3854_v10  ;;  %v3992_v27 = vrot.slane %v13113_v29, 7 }
 0xe6a   : > { %15256 = vst [vmem:[#allocation96_spill] sm:$0xff] %v13132_v5 }
 0xe6b   : > { %v3842_v9 = vpop.permute.xlu1 %3841  ;;  %15253 = vst [vmem:[#allocation93_spill] sm:$0xff] %v13121_v33  ;;  %v3996_v30 = vrot.slane %v13121_v33, 5 }
 0xe6c   : > { %v13102_v52 = vmul.f32 %v12968_v23, %v3842_v9  ;;  %v3868_v24 = vpop.permute.xlu0 %3867  ;;  %v3987_v9 = vrot.slane %v13099_v2, 2 }
 0xe6d   : > { %v13129_v1 = vmul.f32 %v12972_v39, %v3868_v24  ;;  %v3994_v39 = vrot.slane %v13126_v40, 6  ;;  %v4006_v24 = vrot.slane %v13132_v5, 7 }
 0xe6e   : > { %15249 = vst [vmem:[#allocation89_spill] sm:$0xff] %v13102_v52  ;;  %v3985_v20 = vrot.slane %v13102_v52, 3 }
 0xe6f   : > { %v3846_v18 = vpop.permute.xlu1 %3845  ;;  %15255 = vst [vmem:[#allocation95_spill] sm:$0xff] %v13129_v1 }
 0xe70   : > { %v3986_v23 = vsel %vm1290_vm1, %v3985_v20, %v3984_v21  ;;  %v13118_v14 = vmul.f32 %v12978_v58, %v3846_v18  ;;  %v13136_v58 = vmul.f32 %v12937_v63, %v3848_v53  ;;  %v4002_v20 = vsel %vm1293_vm2, %v4001_v54, %v4000_v28 }
 0xe71   : > { %v3988_v3 = vsel %vm1293_vm2, %v3987_v9, %v3986_v23  ;;  %v4004_v0 = vsel %vm1296_vm3, %v4003_v44, %v4002_v20  ;;  %v4008_v63 = vrot.slane %v13129_v1, 6 }
 0xe72   : > { %15252 = vst [vmem:[#allocation92_spill] sm:$0xff] %v13118_v14  ;;  %v3989_v21 = vrot.slane %v13118_v14, 1  ;;  %15257 = vst [vmem:[#allocation97_spill] sm:$0xff] %v13136_v58 }
 0xe73   : > { %v3864_v10 = vpop.permute.xlu1 %3863 }
 0xe74   : > { %v3990_v50 = vsel %vm1296_vm3, %v3989_v21, %v3988_v3  ;;  %v13143_v4 = vmul.f32 %v12982_v59, %v3864_v10 }
 0xe75   : > { %v3991_v53 = vsel %vm1299_vm4, %v13136_v58, %v3990_v50 }
 0xe76   : > { %15258 = vst [vmem:[#allocation98_spill] sm:$0xff] %v13143_v4  ;;  %v4005_v11 = vsel %vm1299_vm4, %v13143_v4, %v4004_v0  ;;  %v3993_v54 = vsel %vm1302_vm5, %v3992_v27, %v3991_v53 }
 0xe77   : > { %v3870_v59 = vpop.permute.xlu1 %3869  ;;  %v3995_v18 = vsel %vm1305_vm6, %v3994_v39, %v3993_v54  ;;  %v4007_v28 = vsel %vm1302_vm5, %v4006_v24, %v4005_v11 }
 0xe78   : > { %v13157_v9 = vmul.f32 %v12986_v57, %v3870_v59  ;;  %v3997_v23 = vsel %vm1308_vm7, %v3996_v30, %v3995_v18  ;;  %v4009_v44 = vsel %vm1305_vm6, %v4008_v63, %v4007_v28 }
 0xe79   : > { %4012 = vrot.lane.b32.xlu0 %v3997_v23, %s11114_s14 }
 0xe7a   : > { %15259 = vst [vmem:[#allocation99_spill] sm:$0xff] %v13157_v9  ;;  %v4010_v21 = vrot.slane %v13157_v9, 5 }
 0xe7c   : > { %v4011_v3 = vsel %vm1308_vm7, %v4010_v21, %v4009_v44 }
 0xe7d   : > { %4014 = vrot.lane.b32.xlu1 %v4011_v3, %s11114_s14 }
 0xeeb   : > { %v4013_v27 = vpop.permute.xlu0 %4012 }
 0xeec   : > { %9448 = vmatprep.mubr.msk.f32.mxu1 %vm500_vm0, %v4013_v27 }
 0xeef   : > { %v4015_v10 = vpop.permute.xlu1 %4014 }
 0xef0   : > { %9449 = vmatmul.mubr.msk.f32.vlgmr.msra.gmra.mrb[8].mxu1 %vm500_vm0, %v4015_v10 }
 0xef1   : > { %9727 = vmatpush3.bf16.msra.mxu1 %v11313_v8 }
 0xef2   : > { %9729 = vmatprep.subr.bf16.mxu1 %v11322_v13 }
 0xef5   : > { %9731 = vmatpush3.bf16.msra.mxu1 %v11322_v13 }
 0xfc3   : > { %v13171_v57 = vpop.f32.mrb[8].mxu1 }
 0xfc4   : > { %v13173_v20 = vpop.f32.mrb[9].mxu1  ;;  %v4105_v50 = vrot.slane %v13171_v57, 4  ;;  %v4106_v30 = vrot.slane %v13171_v57, 5  ;;  %v4107_v39 = vrot.slane %v13171_v57, 6  ;;  %v4104_v23 = vrot.slane %v13171_v57, 3 }
 0xfc5   : > { %v4097_v13 = vrot.slane %v13173_v20, 3  ;;  %v4099_v24 = vrot.slane %v13173_v20, 5  ;;  %v4102_v59 = vrot.slane %v13173_v20, 1  ;;  %v13205_v28 = vadd.f32 %v13173_v20, %v11406_v47 }
 0xfc6   : > { %v13178_v0 = vadd.f32 %v4105_v50, %v11431_v61  ;;  %v13182_v63 = vadd.f32 %v4106_v30, %v11458_v16  ;;  %v13186_v8 = vadd.f32 %v4107_v39, %v11448_v7  ;;  %v4103_v21 = vrot.slane %v13173_v20, 2 }
 0xfc7   : > { %v13194_v11 = vadd.f32 %v4097_v13, %v11383_v35  ;;  %v13199_v18 = vadd.f32 %v4099_v24, %v11403_v46  ;;  %v13210_v3 = vadd.f32 %v4102_v59, %v11422_v56  ;;  %v4108_v27 = vrot.slane %v13171_v57, 7 }
 0xfc8   : > { %10556 = vtanh.f32 %v13178_v0  ;;  %v13215_v10 = vadd.f32 %v4104_v23, %v11445_v6  ;;  %v13219_v50 = vadd.f32 %v4103_v21, %v11479_v26  ;;  %v4109_v30 = vrot.slane %v13171_v57, 1 }
 0xfc9   : > { %10558 = vtanh.f32 %v13182_v63  ;;  %v13224_v39 = vadd.f32 %v4108_v27, %v11471_v22  ;;  %v9048_v4 = vmul.f32 -1.442695, %v13199_v18 }
 0xfca   : > { %10560 = vtanh.f32 %v13186_v8  ;;  %v13234_v24 = vadd.f32 %v4109_v30, %v11488_v38 }
 0xfcb   : > { %10562 = vtanh.f32 %v13194_v11 }
 0xfcc   : > { %10564 = vtanh.f32 %v13199_v18  ;;  %v9058_v18 = vmul.f32 -1.442695, %v13224_v39 }
 0xfcd   : > { %10566 = vtanh.f32 %v13205_v28 }
 0xfce   : > { %10568 = vtanh.f32 %v13210_v3 }
 0xfcf   : > { %10570 = vtanh.f32 %v13215_v10 }
 0xfd0   : > { %10572 = vtanh.f32 %v13219_v50 }
 0xfd1   : > { %10574 = vtanh.f32 %v13224_v39 }
 0xfd2   : > { %v10557_v53 = vpop.eup %10556 }
 0xfd3   : > { %4353 = vrot.lane.b32.xlu0 %v10557_v53, %s11113_s27  ;;  %v10559_v54 = vpop.eup %10558  ;;  %v13230_v53 = vadd.f32 %v13171_v57, %v11461_v17 }
 0xfd4   : > { %v10561_v44 = vpop.eup %10560 }
 0xfd5   : > { %v10563_v13 = vpop.eup %10562  ;;  %10576 = vtanh.f32 %v13230_v53 }
 0xfd6   : > { %v10565_v59 = vpop.eup %10564  ;;  %10578 = vtanh.f32 %v13234_v24 }
 0xfd7   : > { %4355 = vrot.lane.b32.xlu0 %v10559_v54, %s11113_s27  ;;  %v4098_v54 = vrot.slane %v13173_v20, 4  ;;  %v10567_v23 = vpop.eup %10566 }
 0xfd8   : > { %4345 = vrot.lane.b32.xlu1 %v10567_v23, %s11113_s27  ;;  %v10569_v27 = vpop.eup %10568 }
 0xfd9   : > { %v13244_v21 = vadd.f32 %v4098_v54, %v11380_v34  ;;  %v10571_v30 = vpop.eup %10570  ;;  %v4110_v54 = vrot.slane %v13171_v57, 2 }
 0xfda   : > { %v10573_v23 = vpop.eup %10572 }
 0xfdb   : > { %4357 = vrot.lane.b32.xlu0 %v10561_v44, %s11113_s27  ;;  %v4100_v44 = vrot.slane %v13173_v20, 6  ;;  %10580 = vtanh.f32 %v13244_v21  ;;  %v10575_v9 = vpop.eup %10574 }
 0xfdc   : > { %4351 = vrot.lane.b32.xlu1 %v10571_v30, %s11113_s27 }
 0xfdf   : > { %4335 = vrot.lane.b32.xlu0 %v10563_v13, %s11113_s27  ;;  %v4101_v13 = vrot.slane %v13173_v20, 7 }
 0xfe0   : > { %4359 = vrot.lane.b32.xlu1 %v10575_v9, %s11113_s27 }
 0xfe1   : > { %v13257_v1 = vadd.f32 %v4101_v13, %v11414_v51 }
 0xfe3   : > { %4339 = vrot.lane.b32.xlu0 %v10565_v59, %s11113_s27  ;;  %v13250_v59 = vadd.f32 %v4100_v44, %v11386_v37  ;;  %v13263_v44 = vadd.f32 %v4110_v54, %v11497_v45  ;;  %v9056_v54 = vmul.f32 -1.442695, %v13182_v63  ;;  %v9052_v63 = vmul.f32 -1.442695, %v13210_v3 }
 0xfe5   : > { %10582 = vtanh.f32 %v13250_v59 }
 0xfe6   : > { %10584 = vtanh.f32 %v13257_v1 }
 0xfe7   : > { %4347 = vrot.lane.b32.xlu0 %v10569_v27, %s11113_s27  ;;  %v10577_v27 = vpop.eup %10576  ;;  %10586 = vtanh.f32 %v13263_v44 }
 0xfe8   : > { %v10579_v20 = vpop.eup %10578 }
 0xfe9   : > { %4363 = vrot.lane.b32.xlu1 %v10579_v20, %s11113_s27  ;;  %v10581_v30 = vpop.eup %10580 }
 0xfeb   : > { %4349 = vrot.lane.b32.xlu0 %v10573_v23, %s11113_s27  ;;  %v9055_v23 = vmul.f32 -1.442695, %v13178_v0 }
 0xfed   : > { %4337 = vrot.lane.b32.xlu1 %v10581_v30, %s11113_s27  ;;  %10588 = vpow2.f32 %v9055_v23  ;;  %v9046_v30 = vmul.f32 -1.442695, %v13194_v11  ;;  %v9054_v23 = vmul.f32 -1.442695, %v13215_v10  ;;  %v9053_v11 = vmul.f32 -1.442695, %v13219_v50 }
 0xfee   : > { %10590 = vpow2.f32 %v9056_v54 }
 0xfef   : > { %4361 = vrot.lane.b32.xlu0 %v10577_v27, %s11113_s27  ;;  %v10583_v9 = vpop.eup %10582  ;;  %v9057_v27 = vmul.f32 -1.442695, %v13186_v8 }
 0xff0   : > { %v10585_v57 = vpop.eup %10584 }
 0xff1   : > { %4341 = vrot.lane.b32.xlu1 %v10583_v9, %s11113_s27  ;;  %v10587_v13 = vpop.eup %10586  ;;  %10592 = vpow2.f32 %v9057_v27 }
 0xff2   : > { %10594 = vpow2.f32 %v9046_v30 }
 0xff5   : > { %4343 = vrot.lane.b32.xlu1 %v10585_v57, %s11113_s27  ;;  %v9051_v57 = vmul.f32 -1.442695, %v13205_v28 }
 0xff7   : > { %v10589_v20 = vpop.eup %10588 }
 0xff8   : > { %v4200_v5 = vadd.f32 1.0, %v10589_v20  ;;  %v10591_v9 = vpop.eup %10590 }
 0xff9   : > { %4365 = vrot.lane.b32.xlu1 %v10587_v13, %s11113_s27  ;;  %v4201_v13 = vadd.f32 1.0, %v10591_v9  ;;  %v9047_v9 = vmul.f32 -1.442695, %v13244_v21 }
 0xffa   : > { %10596 = vrcp.f32 %v4200_v5  ;;  %v9059_v5 = vmul.f32 -1.442695, %v13230_v53 }
 0xffb   : > { %v10593_v0 = vpop.eup %10592  ;;  %10598 = vpow2.f32 %v9048_v4  ;;  %v9060_v4 = vmul.f32 -1.442695, %v13234_v24 }
 0xffc   : > { %10600 = vpow2.f32 %v9051_v57  ;;  %v4202_v8 = vadd.f32 1.0, %v10593_v0  ;;  %v10595_v54 = vpop.eup %10594 }
 0xffd   : > { %10602 = vrcp.f32 %v4201_v13  ;;  %v4191_v20 = vadd.f32 1.0, %v10595_v54 }
 0xffe   : > { %10604 = vpow2.f32 %v9054_v23 }
 0xfff   : > { %10606 = vpow2.f32 %v9052_v63 }
0x1000   : > { %10608 = vrcp.f32 %v4202_v8  ;;  %v9049_v8 = vmul.f32 -1.442695, %v13250_v59 }
0x1001   : > { %10610 = vpow2.f32 %v9053_v11 }
0x1002   : > { %10612 = vpow2.f32 %v9058_v18 }
0x1003   : > { %10614 = vpow2.f32 %v9059_v5 }
0x1004   : > { %v13281_v28 = vpop.eup %10596  ;;  %10616 = vpow2.f32 %v9060_v4 }
0x1005   : > { %v10599_v10 = vpop.eup %10598  ;;  %10618 = vrcp.f32 %v4191_v20 }
0x1006   : > { %v10601_v30 = vpop.eup %10600  ;;  %v4193_v24 = vadd.f32 1.0, %v10599_v10  ;;  %10620 = vpow2.f32 %v9047_v9 }
0x1007   : > { %v13287_v50 = vpop.eup %10602  ;;  %v4196_v0 = vadd.f32 1.0, %v10601_v30 }
0x1008   : > { %v10605_v57 = vpop.eup %10604  ;;  %10622 = vrcp.f32 %v4193_v24 }
0x1009   : > { %v10607_v13 = vpop.eup %10606  ;;  %10624 = vrcp.f32 %v4196_v0  ;;  %v4199_v54 = vadd.f32 1.0, %v10605_v57 }
0x100a   : > { %v13292_v23 = vpop.eup %10608  ;;  %v4197_v18 = vadd.f32 1.0, %v10607_v13  ;;  %10626 = vpow2.f32 %v9049_v8 }
0x100b   : > { %v10611_v21 = vpop.eup %10610 }
0x100c   : > { %v10613_v5 = vpop.eup %10612  ;;  %10628 = vrcp.f32 %v4197_v18 }
0x100d   : > { %v10615_v4 = vpop.eup %10614  ;;  %10630 = vrcp.f32 %v4199_v54  ;;  %v4203_v20 = vadd.f32 1.0, %v10613_v5 }
0x100e   : > { %v10617_v10 = vpop.eup %10616 }
0x100f   : > { %v13298_v59 = vpop.eup %10618  ;;  %v4205_v24 = vadd.f32 1.0, %v10617_v10 }
0x1010   : > { %v10621_v57 = vpop.eup %10620 }
0x1011   : > { %v4192_v18 = vadd.f32 1.0, %v10621_v57 }
0x1045   : > { %v4354_v27 = vpop.permute.xlu0 %4353 }
0x1046   : > { %v4392_v3 = vmul.f32 %v13281_v28, %v4354_v27  ;;  %v9050_v27 = vmul.f32 -1.442695, %v13257_v1  ;;  %v13303_v1 = vpop.eup %10622 }
0x1047   : > { %v13305_v0 = vpop.eup %10624 }
0x1048   : > { %4433 = vrot.lane.b32.xlu0 %v4392_v3, %s11114_s14  ;;  %v4198_v3 = vadd.f32 1.0, %v10611_v21  ;;  %10632 = vpow2.f32 %v9050_v27 }
0x1049   : > { %v4356_v39 = vpop.permute.xlu0 %4355 }
0x104a   : > { %v4393_v53 = vmul.f32 %v13287_v50, %v4356_v39  ;;  %v9061_v39 = vmul.f32 -1.442695, %v13263_v44  ;;  %10634 = vrcp.f32 %v4198_v3 }
0x104b   : > { %10636 = vrcp.f32 %v4203_v20 }
0x104c   : > { %4435 = vrot.lane.b32.xlu0 %v4393_v53, %s11114_s14  ;;  %v4204_v53 = vadd.f32 1.0, %v10615_v4  ;;  %10638 = vpow2.f32 %v9061_v39 }
0x104d   : > { %v4358_v63 = vpop.permute.xlu0 %4357 }
0x104e   : > { %v4394_v11 = vmul.f32 %v13292_v23, %v4358_v63  ;;  %v4346_v63 = vpop.permute.xlu1 %4345  ;;  %10640 = vrcp.f32 %v4204_v53 }
0x104f   : > { %v4388_v44 = vmul.f32 %v13305_v0, %v4346_v63  ;;  %10642 = vrcp.f32 %v4205_v24 }
0x1050   : > { %4437 = vrot.lane.b32.xlu0 %v4394_v11, %s11114_s14  ;;  %v10627_v11 = vpop.eup %10626  ;;  %10644 = vrcp.f32 %v4192_v18 }
0x1051   : > { %v4336_v30 = vpop.permute.xlu0 %4335  ;;  %v13310_v21 = vpop.eup %10628  ;;  %4425 = vrot.lane.b32.xlu1 %v4388_v44, %s11114_s14  ;;  %v4194_v20 = vadd.f32 1.0, %v10627_v11 }
0x1052   : > { %v4383_v9 = vmul.f32 %v13298_v59, %v4336_v30  ;;  %v13313_v5 = vpop.eup %10630  ;;  %v4352_v27 = vpop.permute.xlu1 %4351 }
0x1053   : > { %v4391_v3 = vmul.f32 %v13313_v5, %v4352_v27  ;;  %v10633_v10 = vpop.eup %10632  ;;  %10646 = vrcp.f32 %v4194_v20 }
0x1054   : > { %4415 = vrot.lane.b32.xlu0 %v4383_v9, %s11114_s14  ;;  %v13318_v30 = vpop.eup %10634  ;;  %v4195_v63 = vadd.f32 1.0, %v10633_v10 }
0x1055   : > { %v4340_v13 = vpop.permute.xlu0 %4339  ;;  %4431 = vrot.lane.b32.xlu1 %v4391_v3, %s11114_s14  ;;  %v13321_v9 = vpop.eup %10636 }
0x1056   : > { %v4385_v8 = vmul.f32 %v13303_v1, %v4340_v13  ;;  %v4360_v53 = vpop.permute.xlu1 %4359  ;;  %v10639_v13 = vpop.eup %10638  ;;  %10648 = vrcp.f32 %v4195_v63 }
0x1057   : > { %v4395_v24 = vmul.f32 %v13321_v9, %v4360_v53 }
0x1058   : > { %4419 = vrot.lane.b32.xlu0 %v4385_v8, %s11114_s14  ;;  %v13326_v8 = vpop.eup %10640 }
0x1059   : > { %v4348_v54 = vpop.permute.xlu0 %4347  ;;  %4439 = vrot.lane.b32.xlu1 %v4395_v24, %s11114_s14  ;;  %v13329_v11 = vpop.eup %10642 }
0x105a   : > { %v4389_v4 = vmul.f32 %v13310_v21, %v4348_v54  ;;  %v13335_v3 = vpop.eup %10644 }
0x105b   : > { %v4364_v18 = vpop.permute.xlu1 %4363 }
0x105c   : > { %4427 = vrot.lane.b32.xlu0 %v4389_v4, %s11114_s14  ;;  %v4397_v27 = vmul.f32 %v13329_v11, %v4364_v18  ;;  %v4206_v4 = vadd.f32 1.0, %v10639_v13 }
0x105d   : > { %v4350_v39 = vpop.permute.xlu0 %4349 }
0x105e   : > { %v4390_v57 = vmul.f32 %v13318_v30, %v4350_v39  ;;  %4443 = vrot.lane.b32.xlu1 %v4397_v27, %s11114_s14  ;;  %10650 = vrcp.f32 %v4206_v4  ;;  %v13339_v39 = vpop.eup %10646  ;;  %v4280_v27 = vrot.slane %v12993_v31, 7 }
0x105f   : > { %v4338_v10 = vpop.permute.xlu1 %4337 }
0x1060   : > { %4429 = vrot.lane.b32.xlu0 %v4390_v57, %s11114_s14  ;;  %v4384_v20 = vmul.f32 %v13335_v3, %v4338_v10  ;;  %v13343_v24 = vpop.eup %10648  ;;  %v4312_v4 = vmul.f32 %v13281_v28, %v4280_v27  ;;  %v4271_v27 = vrot.slane %v13005_v49, 7 }
0x1061   : > { %v4362_v44 = vpop.permute.xlu0 %4361 }
0x1062   : > { %v4396_v54 = vmul.f32 %v13326_v8, %v4362_v44  ;;  %4417 = vrot.lane.b32.xlu1 %v4384_v20, %s11114_s14  ;;  %v4281_v20 = vrot.slane %v12997_v55, 7 }
0x1063   : > { %v4342_v53 = vpop.permute.xlu1 %4341 }
0x1064   : > { %4441 = vrot.lane.b32.xlu0 %v4396_v54, %s11114_s14  ;;  %v4386_v57 = vmul.f32 %v13339_v39, %v4342_v53 }
0x1066   : > { %4421 = vrot.lane.b32.xlu1 %v4386_v57, %s11114_s14  ;;  %v4313_v57 = vmul.f32 %v13287_v50, %v4281_v20  ;;  %v4273_v20 = vrot.slane %v13015_v42, 7  ;;  %v4279_v42 = vrot.slane %v13023_v32, 7  ;;  %v4283_v32 = vrot.slane %v13072_v15, 7 }
0x1067   : > { %v4344_v13 = vpop.permute.xlu1 %4343 }
0x1068   : > { %v4387_v63 = vmul.f32 %v13343_v24, %v4344_v13  ;;  %v13347_v44 = vpop.eup %10650 }
0x106a   : > { %4423 = vrot.lane.b32.xlu1 %v4387_v63, %s11114_s14  ;;  %v4282_v63 = vrot.slane %v13033_v25, 7 }
0x106b   : > { %v4366_v18 = vpop.permute.xlu1 %4365 }
0x106c   : > { %v4398_v54 = vmul.f32 %v13347_v44, %v4366_v18  ;;  %v4314_v31 = vmul.f32 %v13292_v23, %v4282_v63  ;;  %v4305_v63 = vmul.f32 %v13303_v1, %v4273_v20 }
0x106e   : > { %4445 = vrot.lane.b32.xlu1 %v4398_v54, %s11114_s14 }
0x10ba   : > { %v4434_v10 = vpop.permute.xlu0 %4433 }
0x10bb   : > { %v13354_v53 = vadd.f32 %v4434_v10, %v4312_v4  ;;  %v4303_v4 = vmul.f32 %v13298_v59, %v4271_v27 }
0x10bd   : > { %10652 = vtanh.f32 %v13354_v53 }
0x10be   : > { %v4436_v13 = vpop.permute.xlu0 %4435 }
0x10bf   : > { %v13359_v60 = vadd.f32 %v4436_v13, %v4313_v57  ;;  %v4276_v13 = vrot.slane %v13025_v12, 7 }
0x10c1   : > { %10654 = vtanh.f32 %v13359_v60  ;;  %v4308_v49 = vmul.f32 %v13305_v0, %v4276_v13 }
0x10c2   : > { %v4438_v18 = vpop.permute.xlu0 %4437 }
0x10c3   : > { %v13363_v54 = vadd.f32 %v4438_v18, %v4314_v31  ;;  %v4426_v27 = vpop.permute.xlu1 %4425 }
0x10c5   : > { %10656 = vtanh.f32 %v13363_v54 }
0x10c6   : > { %v4416_v10 = vpop.permute.xlu0 %4415 }
0x10c7   : > { %v10653_v55 = vpop.eup %10652  ;;  %v13370_v57 = vadd.f32 %v4416_v10, %v4303_v4  ;;  %v13381_v4 = vadd.f32 %v4426_v27, %v4308_v49  ;;  %v4311_v10 = vmul.f32 %v13313_v5, %v4279_v42  ;;  %v4432_v20 = vpop.permute.xlu1 %4431  ;;  %v4284_v27 = vrot.slane %v13044_v48, 7 }
0x10c8   : > { %4529 = vrot.lane.b32.xlu0 %v10653_v55, %s11113_s27  ;;  %v4277_v55 = vrot.slane %v13035_v62, 7  ;;  %v4278_v62 = vrot.slane %v13046_v19, 7 }
0x10c9   : > { %10658 = vtanh.f32 %v13370_v57  ;;  %15260 = vst [vmem:[#allocation100_spill] sm:$0xff] %v13381_v4 }
0x10ca   : > { %v4420_v31 = vpop.permute.xlu0 %4419  ;;  %v4309_v12 = vmul.f32 %v13310_v21, %v4277_v55  ;;  %v4310_v49 = vmul.f32 %v13318_v30, %v4278_v62 }
0x10cb   : > { %v10655_v25 = vpop.eup %10654  ;;  %v13378_v41 = vadd.f32 %v4420_v31, %v4305_v63  ;;  %v13392_v63 = vadd.f32 %v4432_v20, %v4311_v10  ;;  %v4315_v31 = vmul.f32 %v13321_v9, %v4283_v32  ;;  %v4440_v19 = vpop.permute.xlu1 %4439  ;;  %v4316_v10 = vmul.f32 %v13326_v8, %v4284_v27 }
0x10cc   : > { %4531 = vrot.lane.b32.xlu0 %v10655_v25, %s11113_s27 }
0x10cd   : > { %10660 = vtanh.f32 %v13378_v41  ;;  %v13402_v15 = vadd.f32 %v4440_v19, %v4315_v31 }
0x10ce   : > { %10662 = vtanh.f32 %v13381_v4  ;;  %v4428_v25 = vpop.permute.xlu0 %4427 }
0x10cf   : > { %v10657_v18 = vpop.eup %10656  ;;  %v13389_v13 = vadd.f32 %v4428_v25, %v4309_v12  ;;  %v15261_v12 = vld [vmem:[#allocation16_spill] sm:$0xff] }
0x10d0   : > { %4533 = vrot.lane.b32.xlu0 %v10657_v18, %s11113_s27  ;;  %v4285_v25 = vrot.slane %v15261_v12, 7  ;;  %v4444_v48 = vpop.permute.xlu1 %4443 }
0x10d1   : > { %10664 = vtanh.f32 %v13389_v13 }
0x10d2   : > { %10666 = vtanh.f32 %v13392_v63  ;;  %v4430_v18 = vpop.permute.xlu0 %4429  ;;  %v4317_v62 = vmul.f32 %v13329_v11, %v4285_v25 }
0x10d3   : > { %v10659_v55 = vpop.eup %10658  ;;  %v13399_v42 = vadd.f32 %v4430_v18, %v4310_v49  ;;  %v15262_v18 = vld [vmem:[#allocation50_spill] sm:$0xff] }
0x10d4   : > { %4511 = vrot.lane.b32.xlu0 %v10659_v55, %s11113_s27  ;;  %v4272_v12 = vrot.slane %v15262_v18, 7  ;;  %v13412_v31 = vadd.f32 %v4444_v48, %v4317_v62  ;;  %v4418_v19 = vpop.permute.xlu1 %4417  ;;  %v15265_v18 = vld [vmem:[#allocation84_spill] sm:$0xff] }
0x10d5   : > { %10668 = vtanh.f32 %v13399_v42 }
0x10d6   : > { %10670 = vtanh.f32 %v13402_v15  ;;  %v4442_v20 = vpop.permute.xlu0 %4441  ;;  %15263 = vst [vmem:[#allocation16_spill] sm:$0xff] %v13412_v31  ;;  %v4304_v55 = vmul.f32 %v13335_v3, %v4272_v12  ;;  %v4275_v12 = vrot.slane %v15265_v18, 7 }
0x10d7   : > { %v10661_v32 = vpop.eup %10660  ;;  %v13409_v36 = vadd.f32 %v4442_v20, %v4316_v10  ;;  %v15264_v10 = vld [vmem:[#allocation67_spill] sm:$0xff] }
0x10d8   : > { %v10663_v49 = vpop.eup %10662  ;;  %4515 = vrot.lane.b32.xlu0 %v10661_v32, %s11113_s27  ;;  %v4274_v20 = vrot.slane %v15264_v10, 7  ;;  %v13420_v33 = vadd.f32 %v4418_v19, %v4304_v55  ;;  %v4422_v48 = vpop.permute.xlu1 %4421  ;;  %v4307_v55 = vmul.f32 %v13343_v24, %v4275_v12  ;;  %v15266_v10 = vld [vmem:[#allocation15_spill] sm:$0xff] }
0x10d9   : > { %4521 = vrot.lane.b32.xlu1 %v10663_v49, %s11113_s27  ;;  %10672 = vtanh.f32 %v13409_v36 }
0x10da   : > { %10674 = vtanh.f32 %v13412_v31  ;;  %v4306_v62 = vmul.f32 %v13339_v39, %v4274_v20  ;;  %v4286_v20 = vrot.slane %v15266_v10, 7 }
0x10db   : > { %v10665_v27 = vpop.eup %10664  ;;  %10676 = vtanh.f32 %v13420_v33 }
0x10dc   : > { %v10667_v25 = vpop.eup %10666  ;;  %4523 = vrot.lane.b32.xlu0 %v10665_v27, %s11113_s27  ;;  %v13427_v40 = vadd.f32 %v4422_v48, %v4306_v62  ;;  %v4424_v19 = vpop.permute.xlu1 %4423  ;;  %v4318_v62 = vmul.f32 %v13347_v44, %v4286_v20 }
0x10dd   : > { %4527 = vrot.lane.b32.xlu1 %v10667_v25, %s11113_s27  ;;  %v13434_v29 = vadd.f32 %v4424_v19, %v4307_v55 }
0x10de   : > { %10678 = vtanh.f32 %v13427_v40 }
0x10df   : > { %v10669_v32 = vpop.eup %10668  ;;  %15267 = vst [vmem:[#allocation50_spill] sm:$0xff] %v13434_v29  ;;  %10680 = vtanh.f32 %v13434_v29 }
0x10e0   : > { %v10671_v49 = vpop.eup %10670  ;;  %4525 = vrot.lane.b32.xlu0 %v10669_v32, %s11113_s27  ;;  %v4446_v32 = vpop.permute.xlu1 %4445 }
0x10e1   : > { %4535 = vrot.lane.b32.xlu1 %v10671_v49, %s11113_s27  ;;  %v13440_v49 = vadd.f32 %v4446_v32, %v4318_v62 }
0x10e3   : > { %v10673_v27 = vpop.eup %10672  ;;  %10682 = vtanh.f32 %v13440_v49 }
0x10e4   : > { %v10675_v25 = vpop.eup %10674  ;;  %4537 = vrot.lane.b32.xlu0 %v10673_v27, %s11113_s27 }
0x10e5   : > { %4539 = vrot.lane.b32.xlu1 %v10675_v25, %s11113_s27  ;;  %v10677_v48 = vpop.eup %10676 }
0x10e8   : > { %v10679_v18 = vpop.eup %10678 }
0x10e9   : > { %4513 = vrot.lane.b32.xlu1 %v10677_v48, %s11113_s27  ;;  %v10681_v12 = vpop.eup %10680 }
0x10ed   : > { %4517 = vrot.lane.b32.xlu1 %v10679_v18, %s11113_s27  ;;  %v10683_v55 = vpop.eup %10682 }
0x10f1   : > { %4519 = vrot.lane.b32.xlu1 %v10681_v12, %s11113_s27 }
0x10f5   : > { %4541 = vrot.lane.b32.xlu1 %v10683_v55, %s11113_s27 }
0x113a   : > { %v4530_v27 = vpop.permute.xlu0 %4529 }
0x113b   : > { %v13451_v18 = vmul.f32 %v13281_v28, %v4530_v27 }
0x113d   : > { %15269 = vst [vmem:[#allocation84_spill] sm:$0xff] %v13451_v18  ;;  %v4671_v4 = vrot.slane %v13451_v18, 4  ;;  %v4954_v18 = vrot.slane %v13363_v54, 7 }
0x113e   : > { %v4532_v19 = vpop.permute.xlu0 %4531 }
0x113f   : > { %v13454_v12 = vmul.f32 %v13287_v50, %v4532_v19 }
0x1141   : > { %15270 = vst [vmem:[#allocation15_spill] sm:$0xff] %v13454_v12 }
0x1142   : > { %v4534_v25 = vpop.permute.xlu0 %4533 }
0x1143   : > { %v13458_v43 = vmul.f32 %v13292_v23, %v4534_v25 }
0x1145   : > { %15271 = vst [vmem:[#allocation101_spill] sm:$0xff] %v13458_v43  ;;  %v4675_v27 = vrot.slane %v13458_v43, 2 }
0x1146   : > { %v4512_v10 = vpop.permute.xlu0 %4511 }
0x1147   : > { %v13466_v28 = vmul.f32 %v13298_v59, %v4512_v10 }
0x1149   : > { %v4656_v10 = vrot.slane %v13466_v28, 5 }
0x114a   : > { %v4516_v62 = vpop.permute.xlu0 %4515 }
0x114b   : > { %v4522_v20 = vpop.permute.xlu1 %4521  ;;  %v13471_v19 = vmul.f32 %v13303_v1, %v4516_v62 }
0x114e   : > { %v4524_v48 = vpop.permute.xlu0 %4523 }
0x114f   : > { %v4528_v32 = vpop.permute.xlu1 %4527 }
0x1150   : > { %v13448_v14 = vmul.f32 %v13313_v5, %v4528_v32  ;;  %v4673_v5 = vrot.slane %v13454_v12, 3 }
0x1152   : > { %15268 = vst [vmem:[#allocation67_spill] sm:$0xff] %v13448_v14  ;;  %v4526_v55 = vpop.permute.xlu0 %4525  ;;  %v4670_v52 = vrot.slane %v13448_v14, 5 }
0x1153   : > { %v4536_v58 = vpop.permute.xlu1 %4535 }
0x1154   : > { %v4672_v50 = vsel %vm1290_vm1, %v4671_v4, %v4670_v52  ;;  %v13474_v23 = vmul.f32 %v13321_v9, %v4536_v58  ;;  %v4659_v4 = vrot.slane %v13471_v19, 3 }
0x1155   : > { %v4674_v59 = vsel %vm1293_vm2, %v4673_v5, %v4672_v50  ;;  %v13494_v5 = vmul.f32 %v13310_v21, %v4524_v48 }
0x1156   : > { %15272 = vst [vmem:[#allocation102_spill] sm:$0xff] %v13474_v23  ;;  %v4676_v52 = vsel %vm1296_vm3, %v4675_v27, %v4674_v59  ;;  %v4677_v58 = vrot.slane %v13474_v23, 1  ;;  %v13500_v27 = vmul.f32 %v13318_v30, %v4526_v55 }
0x1157   : > { %v4540_v2 = vpop.permute.xlu1 %4539  ;;  %v4666_v30 = vrot.slane %v13494_v5, 7 }
0x1158   : > { %v13489_v9 = vmul.f32 %v13329_v11, %v4540_v2 }
0x115a   : > { %15274 = vst [vmem:[#allocation104_spill] sm:$0xff] %v13489_v9  ;;  %v4680_v21 = vrot.slane %v13489_v9, 7 }
0x115b   : > { %v4514_v31 = vpop.permute.xlu1 %4513 }
0x115c   : > { %v13462_v29 = vmul.f32 %v13335_v3, %v4514_v31  ;;  %v4538_v3 = vpop.permute.xlu0 %4537 }
0x115d   : > { %v13485_v1 = vmul.f32 %v13326_v8, %v4538_v3  ;;  %v4678_v8 = vsel %vm1299_vm4, %v4677_v58, %v4676_v52 }
0x115e   : > { %v4657_v25 = vrot.slane %v13462_v29, 4 }
0x115f   : > { %v4518_v32 = vpop.permute.xlu1 %4517  ;;  %15273 = vst [vmem:[#allocation103_spill] sm:$0xff] %v13485_v1  ;;  %v4679_v11 = vsel %vm1302_vm5, %v13485_v1, %v4678_v8 }
0x1160   : > { %v13478_v31 = vmul.f32 %v13339_v39, %v4518_v32  ;;  %v4658_v62 = vsel %vm1290_vm1, %v4657_v25, %v4656_v10  ;;  %v13508_v25 = vmul.f32 %v13305_v0, %v4522_v20  ;;  %v4668_v10 = vrot.slane %v13500_v27, 6 }
0x1161   : > { %v4660_v3 = vsel %vm1293_vm2, %v4659_v4, %v4658_v62  ;;  %v4681_v0 = vsel %vm1305_vm6, %v4680_v21, %v4679_v11 }
0x1162   : > { %v4661_v39 = vrot.slane %v13478_v31, 2 }
0x1163   : > { %v4520_v32 = vpop.permute.xlu1 %4519 }
0x1164   : > { %v13497_v50 = vmul.f32 %v13343_v24, %v4520_v32  ;;  %v4662_v24 = vsel %vm1296_vm3, %v4661_v39, %v4660_v3 }
0x1166   : > { %v4663_v2 = vrot.slane %v13497_v50, 1 }
0x1167   : > { %v4542_v48 = vpop.permute.xlu1 %4541 }
0x1168   : > { %v4664_v55 = vsel %vm1299_vm4, %v4663_v2, %v4662_v24  ;;  %v13515_v59 = vmul.f32 %v13347_v44, %v4542_v48 }
0x1169   : > { %v4665_v52 = vsel %vm1302_vm5, %v13508_v25, %v4664_v55 }
0x116a   : > { %15275 = vst [vmem:[#allocation105_spill] sm:$0xff] %v13515_v59  ;;  %v4682_v20 = vrot.slane %v13515_v59, 6  ;;  %v4667_v4 = vsel %vm1305_vm6, %v4666_v30, %v4665_v52 }
0x116b   : > { %v4669_v58 = vsel %vm1308_vm7, %v4668_v10, %v4667_v4 }
0x116c   : > { %4684 = vrot.lane.b32.xlu0 %v4669_v58, %s11114_s14  ;;  %v4683_v62 = vsel %vm1308_vm7, %v4682_v20, %v4681_v0 }
0x116d   : > { %4686 = vrot.lane.b32.xlu1 %v4683_v62, %s11114_s14 }
0x11de   : > { %v4685_v44 = vpop.permute.xlu0 %4684 }
0x11df   : > { %9459 = vmatprep.mubr.msk.f32.mxu0 %vm500_vm0, %v4685_v44  ;;  %v4687_v39 = vpop.permute.xlu1 %4686 }
0x11e0   : > { %9460 = vmatmul.mubr.msk.f32.vlgmr.msra.gmra.mrb[18].mxu0 %vm500_vm0, %v4687_v39 }
0x12b3   : > { %v13529_v32 = vpop.f32.mrb[18].mxu0 }
0x12b4   : > { %v13531_v8 = vpop.f32.mrb[19].mxu0  ;;  %v4777_v3 = vrot.slane %v13529_v32, 3  ;;  %v4778_v2 = vrot.slane %v13529_v32, 4  ;;  %v4779_v21 = vrot.slane %v13529_v32, 5  ;;  %v4780_v48 = vrot.slane %v13529_v32, 6 }
0x12b5   : > { %v4769_v10 = vrot.slane %v13531_v8, 2  ;;  %v4771_v0 = vrot.slane %v13531_v8, 4  ;;  %v4775_v58 = vrot.slane %v13531_v8, 1  ;;  %v4776_v39 = vrot.slane %v13529_v32, 2 }
0x12b6   : > { %v13536_v11 = vadd.f32 %v4777_v3, %v11431_v61  ;;  %v13540_v24 = vadd.f32 %v4778_v2, %v11458_v16  ;;  %v13545_v30 = vadd.f32 %v4779_v21, %v11448_v7  ;;  %v13549_v55 = vadd.f32 %v4780_v48, %v11471_v22 }
0x12b7   : > { %v13557_v20 = vadd.f32 %v4769_v10, %v11383_v35  ;;  %v13562_v62 = vadd.f32 %v4771_v0, %v11403_v46  ;;  %v13568_v3 = vadd.f32 %v13531_v8, %v11422_v56  ;;  %v4782_v2 = vrot.slane %v13529_v32, 1 }
0x12b8   : > { %10684 = vtanh.f32 %v13536_v11  ;;  %v13573_v21 = vadd.f32 %v4775_v58, %v11479_v26  ;;  %v4781_v10 = vrot.slane %v13529_v32, 7  ;;  %v4773_v9 = vrot.slane %v13531_v8, 6 }
0x12b9   : > { %10686 = vtanh.f32 %v13540_v24  ;;  %v13583_v0 = vadd.f32 %v4782_v2, %v11497_v45  ;;  %v4772_v2 = vrot.slane %v13531_v8, 5  ;;  %v4774_v23 = vrot.slane %v13531_v8, 7 }
0x12ba   : > { %10688 = vtanh.f32 %v13545_v30  ;;  %v13587_v58 = vadd.f32 %v4781_v10, %v11461_v17 }
0x12bb   : > { %10690 = vtanh.f32 %v13549_v55 }
0x12bc   : > { %10692 = vtanh.f32 %v13557_v20 }
0x12bd   : > { %10694 = vtanh.f32 %v13562_v62 }
0x12be   : > { %10696 = vtanh.f32 %v13568_v3 }
0x12bf   : > { %10698 = vtanh.f32 %v13573_v21 }
0x12c2   : > { %v10685_v52 = vpop.eup %10684 }
0x12c3   : > { %5025 = vrot.lane.b32.xlu0 %v10685_v52, %s11113_s27  ;;  %v10687_v4 = vpop.eup %10686  ;;  %v13578_v52 = vadd.f32 %v4776_v39, %v11445_v6 }
0x12c4   : > { %v10689_v44 = vpop.eup %10688 }
0x12c5   : > { %v10691_v48 = vpop.eup %10690  ;;  %10700 = vtanh.f32 %v13578_v52 }
0x12c6   : > { %10702 = vtanh.f32 %v13583_v0 }
0x12c7   : > { %5027 = vrot.lane.b32.xlu0 %v10687_v4, %s11113_s27  ;;  %v10693_v4 = vpop.eup %10692  ;;  %10704 = vtanh.f32 %v13587_v58 }
0x12c8   : > { %v10695_v39 = vpop.eup %10694 }
0x12c9   : > { %v10697_v10 = vpop.eup %10696 }
0x12ca   : > { %5019 = vrot.lane.b32.xlu1 %v10697_v10, %s11113_s27  ;;  %v10699_v59 = vpop.eup %10698 }
0x12cb   : > { %5029 = vrot.lane.b32.xlu0 %v10689_v44, %s11113_s27  ;;  %v4770_v44 = vrot.slane %v13531_v8, 3 }
0x12cf   : > { %5031 = vrot.lane.b32.xlu0 %v10691_v48, %s11113_s27  ;;  %v13596_v48 = vadd.f32 %v4770_v44, %v11380_v34  ;;  %v10701_v1 = vpop.eup %10700 }
0x12d0   : > { %5023 = vrot.lane.b32.xlu1 %v10701_v1, %s11113_s27  ;;  %v10703_v44 = vpop.eup %10702  ;;  %v13621_v1 = vadd.f32 %v13529_v32, %v11488_v38  ;;  %v9074_v32 = vmul.f32 -1.442695, %v13540_v24  ;;  %v9070_v24 = vmul.f32 -1.442695, %v13568_v3 }
0x12d1   : > { %10706 = vtanh.f32 %v13596_v48  ;;  %v10705_v10 = vpop.eup %10704 }
0x12d3   : > { %5007 = vrot.lane.b32.xlu0 %v10693_v4, %s11113_s27  ;;  %v13602_v4 = vadd.f32 %v4772_v2, %v11386_v37  ;;  %v13615_v2 = vadd.f32 %v4774_v23, %v11406_v47 }
0x12d4   : > { %5033 = vrot.lane.b32.xlu1 %v10705_v10, %s11113_s27  ;;  %v9073_v10 = vmul.f32 -1.442695, %v13536_v11 }
0x12d5   : > { %10708 = vtanh.f32 %v13602_v4 }
0x12d7   : > { %5011 = vrot.lane.b32.xlu0 %v10695_v39, %s11113_s27  ;;  %v13609_v39 = vadd.f32 %v4773_v9, %v11414_v51 }
0x12d9   : > { %10710 = vtanh.f32 %v13609_v39 }
0x12da   : > { %10712 = vtanh.f32 %v13615_v2 }
0x12db   : > { %5021 = vrot.lane.b32.xlu0 %v10699_v59, %s11113_s27  ;;  %v10707_v59 = vpop.eup %10706  ;;  %10714 = vtanh.f32 %v13621_v1 }
0x12dc   : > { %5009 = vrot.lane.b32.xlu1 %v10707_v59, %s11113_s27  ;;  %10716 = vpow2.f32 %v9073_v10  ;;  %v9075_v59 = vmul.f32 -1.442695, %v13545_v30  ;;  %v9071_v30 = vmul.f32 -1.442695, %v13573_v21 }
0x12dd   : > { %10718 = vpow2.f32 %v9074_v32 }
0x12de   : > { %10720 = vpow2.f32 %v9075_v59  ;;  %v9072_v59 = vmul.f32 -1.442695, %v13578_v52  ;;  %v9065_v52 = vmul.f32 -1.442695, %v13596_v48 }
0x12df   : > { %5037 = vrot.lane.b32.xlu0 %v10703_v44, %s11113_s27  ;;  %v10709_v9 = vpop.eup %10708 }
0x12e0   : > { %5013 = vrot.lane.b32.xlu1 %v10709_v9, %s11113_s27  ;;  %v9076_v9 = vmul.f32 -1.442695, %v13549_v55 }
0x12e2   : > { %10722 = vpow2.f32 %v9076_v9 }
0x12e3   : > { %v10711_v8 = vpop.eup %10710 }
0x12e4   : > { %5015 = vrot.lane.b32.xlu1 %v10711_v8, %s11113_s27  ;;  %v10713_v23 = vpop.eup %10712  ;;  %v9064_v8 = vmul.f32 -1.442695, %v13557_v20 }
0x12e5   : > { %v10715_v44 = vpop.eup %10714 }
0x12e6   : > { %v10717_v43 = vpop.eup %10716  ;;  %10724 = vpow2.f32 %v9064_v8 }
0x12e7   : > { %v4872_v12 = vadd.f32 1.0, %v10717_v43  ;;  %v9079_v43 = vmul.f32 -1.442695, %v13583_v0 }
0x12e8   : > { %5017 = vrot.lane.b32.xlu1 %v10713_v23, %s11113_s27  ;;  %v10719_v23 = vpop.eup %10718 }
0x12e9   : > { %10726 = vrcp.f32 %v4872_v12  ;;  %v4873_v11 = vadd.f32 1.0, %v10719_v23  ;;  %v10721_v10 = vpop.eup %10720  ;;  %v9077_v12 = vmul.f32 -1.442695, %v13587_v58 }
0x12ea   : > { %v4874_v32 = vadd.f32 1.0, %v10721_v10 }
0x12ec   : > { %5035 = vrot.lane.b32.xlu1 %v10715_v44, %s11113_s27  ;;  %v9066_v44 = vmul.f32 -1.442695, %v13562_v62  ;;  %v10723_v55 = vpop.eup %10722 }
0x12ed   : > { %v4875_v20 = vadd.f32 1.0, %v10723_v55 }
0x12ee   : > { %10728 = vpow2.f32 %v9066_v44 }
0x12ef   : > { %10730 = vrcp.f32 %v4873_v11 }
0x12f0   : > { %10732 = vpow2.f32 %v9070_v24  ;;  %v10725_v62 = vpop.eup %10724 }
0x12f1   : > { %10734 = vpow2.f32 %v9071_v30  ;;  %v4863_v8 = vadd.f32 1.0, %v10725_v62  ;;  %v9067_v30 = vmul.f32 -1.442695, %v13602_v4 }
0x12f2   : > { %10736 = vrcp.f32 %v4874_v32 }
0x12f3   : > { %10738 = vpow2.f32 %v9072_v59  ;;  %v13640_v9 = vpop.eup %10726 }
0x12f4   : > { %10740 = vpow2.f32 %v9079_v43 }
0x12f5   : > { %10742 = vrcp.f32 %v4875_v20 }
0x12f6   : > { %10744 = vpow2.f32 %v9077_v12  ;;  %v9068_v12 = vmul.f32 -1.442695, %v13609_v39 }
0x12f7   : > { %10746 = vrcp.f32 %v4863_v8 }
0x12f8   : > { %v10729_v23 = vpop.eup %10728  ;;  %10748 = vpow2.f32 %v9065_v52 }
0x12f9   : > { %v13645_v0 = vpop.eup %10730  ;;  %v4865_v10 = vadd.f32 1.0, %v10729_v23 }
0x12fa   : > { %v10733_v11 = vpop.eup %10732 }
0x12fb   : > { %v10735_v24 = vpop.eup %10734  ;;  %v4869_v55 = vadd.f32 1.0, %v10733_v11  ;;  %10750 = vrcp.f32 %v4865_v10 }
0x12fc   : > { %v13650_v32 = vpop.eup %10736  ;;  %v4870_v20 = vadd.f32 1.0, %v10735_v24  ;;  %10752 = vpow2.f32 %v9067_v30  ;;  %v9078_v30 = vmul.f32 -1.442695, %v13621_v1 }
0x12fd   : > { %v10739_v59 = vpop.eup %10738  ;;  %10754 = vrcp.f32 %v4869_v55 }
0x12fe   : > { %v10741_v62 = vpop.eup %10740  ;;  %v4871_v4 = vadd.f32 1.0, %v10739_v59  ;;  %10756 = vrcp.f32 %v4870_v20 }
0x12ff   : > { %v4878_v52 = vadd.f32 1.0, %v10741_v62  ;;  %10758 = vpow2.f32 %v9068_v12 }
0x1300   : > { %10760 = vrcp.f32 %v4871_v4 }
0x1301   : > { %10762 = vrcp.f32 %v4878_v52 }
0x1335   : > { %v5026_v3 = vpop.permute.xlu0 %5025 }
0x1336   : > { %v5064_v21 = vmul.f32 %v13640_v9, %v5026_v3  ;;  %v13655_v3 = vpop.eup %10742 }
0x1337   : > { %v10745_v8 = vpop.eup %10744 }
0x1338   : > { %5105 = vrot.lane.b32.xlu0 %v5064_v21, %s11114_s14  ;;  %v13660_v11 = vpop.eup %10746  ;;  %v4876_v39 = vadd.f32 1.0, %v10745_v8 }
0x1339   : > { %v5028_v44 = vpop.permute.xlu0 %5027  ;;  %v10749_v10 = vpop.eup %10748 }
0x133a   : > { %v5065_v58 = vmul.f32 %v13645_v0, %v5028_v44  ;;  %v9069_v44 = vmul.f32 -1.442695, %v13615_v2  ;;  %v13665_v55 = vpop.eup %10750  ;;  %v4864_v2 = vadd.f32 1.0, %v10749_v10 }
0x133b   : > { %v10753_v59 = vpop.eup %10752 }
0x133c   : > { %5107 = vrot.lane.b32.xlu0 %v5065_v58, %s11114_s14  ;;  %10764 = vpow2.f32 %v9069_v44  ;;  %v13668_v20 = vpop.eup %10754  ;;  %v5020_v62 = vpop.permute.xlu1 %5019  ;;  %v4866_v4 = vadd.f32 1.0, %v10753_v59 }
0x133d   : > { %v5030_v48 = vpop.permute.xlu0 %5029  ;;  %10766 = vrcp.f32 %v4876_v39  ;;  %v5061_v12 = vmul.f32 %v13668_v20, %v5020_v62  ;;  %v13672_v1 = vpop.eup %10756 }
0x133e   : > { %v5066_v43 = vmul.f32 %v13650_v32, %v5030_v48  ;;  %10768 = vpow2.f32 %v9078_v30  ;;  %v10759_v8 = vpop.eup %10758 }
0x133f   : > { %10770 = vrcp.f32 %v4864_v2  ;;  %5099 = vrot.lane.b32.xlu1 %v5061_v12, %s11114_s14  ;;  %v13676_v52 = vpop.eup %10760  ;;  %v4867_v10 = vadd.f32 1.0, %v10759_v8 }
0x1340   : > { %5109 = vrot.lane.b32.xlu0 %v5066_v43, %s11114_s14  ;;  %10772 = vrcp.f32 %v4866_v4 }
0x1341   : > { %v5032_v21 = vpop.permute.xlu0 %5031  ;;  %10774 = vrcp.f32 %v4867_v10 }
0x1342   : > { %v5067_v23 = vmul.f32 %v13655_v3, %v5032_v21  ;;  %v5024_v44 = vpop.permute.xlu1 %5023 }
0x1343   : > { %v5063_v39 = vmul.f32 %v13676_v52, %v5024_v44 }
0x1344   : > { %5111 = vrot.lane.b32.xlu0 %v5067_v23, %s11114_s14 }
0x1345   : > { %v5008_v58 = vpop.permute.xlu0 %5007  ;;  %5103 = vrot.lane.b32.xlu1 %v5063_v39, %s11114_s14 }
0x1346   : > { %v5055_v24 = vmul.f32 %v13660_v11, %v5008_v58  ;;  %v13680_v58 = vpop.eup %10762  ;;  %v5034_v59 = vpop.permute.xlu1 %5033 }
0x1347   : > { %v10765_v30 = vpop.eup %10764 }
0x1348   : > { %5087 = vrot.lane.b32.xlu0 %v5055_v24, %s11114_s14  ;;  %v4868_v62 = vadd.f32 1.0, %v10765_v30 }
0x1349   : > { %v5012_v48 = vpop.permute.xlu0 %5011 }
0x134a   : > { %v5057_v43 = vmul.f32 %v13665_v55, %v5012_v48  ;;  %v13684_v48 = vpop.eup %10766  ;;  %10776 = vrcp.f32 %v4868_v62 }
0x134b   : > { %v10769_v12 = vpop.eup %10768 }
0x134c   : > { %5091 = vrot.lane.b32.xlu0 %v5057_v43, %s11114_s14  ;;  %v5068_v43 = vmul.f32 %v13684_v48, %v5034_v59  ;;  %v13689_v4 = vpop.eup %10770 }
0x134d   : > { %v5022_v21 = vpop.permute.xlu0 %5021  ;;  %v13693_v44 = vpop.eup %10772 }
0x134e   : > { %v5062_v23 = vmul.f32 %v13672_v1, %v5022_v21  ;;  %5113 = vrot.lane.b32.xlu1 %v5068_v43, %s11114_s14  ;;  %v5010_v21 = vpop.permute.xlu1 %5009  ;;  %v13697_v10 = vpop.eup %10774 }
0x134f   : > { %v5056_v8 = vmul.f32 %v13689_v4, %v5010_v21 }
0x1350   : > { %5101 = vrot.lane.b32.xlu0 %v5062_v23, %s11114_s14  ;;  %v4877_v23 = vadd.f32 1.0, %v10769_v12 }
0x1351   : > { %v5038_v24 = vpop.permute.xlu0 %5037 }
0x1352   : > { %v5070_v2 = vmul.f32 %v13680_v58, %v5038_v24  ;;  %5089 = vrot.lane.b32.xlu1 %v5056_v8, %s11114_s14  ;;  %v5014_v39 = vpop.permute.xlu1 %5013  ;;  %10778 = vrcp.f32 %v4877_v23  ;;  %v4952_v23 = vrot.slane %v13354_v53, 7  ;;  %v4986_v53 = vmul.f32 %v13650_v32, %v4954_v18 }
0x1353   : > { %v5058_v24 = vmul.f32 %v13693_v44, %v5014_v39 }
0x1354   : > { %5117 = vrot.lane.b32.xlu0 %v5070_v2, %s11114_s14  ;;  %v13701_v59 = vpop.eup %10776  ;;  %v4984_v39 = vmul.f32 %v13640_v9, %v4952_v23 }
0x1356   : > { %5093 = vrot.lane.b32.xlu1 %v5058_v24, %s11114_s14  ;;  %v5016_v30 = vpop.permute.xlu1 %5015 }
0x1357   : > { %v5059_v2 = vmul.f32 %v13697_v10, %v5016_v30  ;;  %v4953_v30 = vrot.slane %v13359_v60, 7 }
0x135a   : > { %5095 = vrot.lane.b32.xlu1 %v5059_v2, %s11114_s14  ;;  %v5018_v43 = vpop.permute.xlu1 %5017 }
0x135b   : > { %v5060_v62 = vmul.f32 %v13701_v59, %v5018_v43  ;;  %v4985_v43 = vmul.f32 %v13645_v0, %v4953_v30  ;;  %v4943_v30 = vrot.slane %v13370_v57, 7 }
0x135c   : > { %v13705_v12 = vpop.eup %10778 }
0x135d   : > { %v4975_v18 = vmul.f32 %v13660_v11, %v4943_v30 }
0x135e   : > { %5097 = vrot.lane.b32.xlu1 %v5060_v62, %s11114_s14  ;;  %v5036_v21 = vpop.permute.xlu1 %5035 }
0x135f   : > { %v5069_v8 = vmul.f32 %v13705_v12, %v5036_v21 }
0x1362   : > { %5115 = vrot.lane.b32.xlu1 %v5069_v8, %s11114_s14  ;;  %v4955_v8 = vrot.slane %v13402_v15, 7 }
0x1364   : > { %v4987_v60 = vmul.f32 %v13655_v3, %v4955_v8 }
0x13aa   : > { %v5106_v24 = vpop.permute.xlu0 %5105 }
0x13ab   : > { %v13712_v2 = vadd.f32 %v5106_v24, %v4984_v39 }
0x13ad   : > { %15276 = vst [vmem:[#allocation106_spill] sm:$0xff] %v13712_v2  ;;  %10780 = vtanh.f32 %v13712_v2 }
0x13ae   : > { %v5108_v62 = vpop.permute.xlu0 %5107 }
0x13af   : > { %v13717_v14 = vadd.f32 %v5108_v62, %v4985_v43  ;;  %v4945_v62 = vrot.slane %v13378_v41, 7  ;;  %v4951_v41 = vrot.slane %v13392_v63, 7  ;;  %v4956_v63 = vrot.slane %v13409_v36, 7 }
0x13b1   : > { %10782 = vtanh.f32 %v13717_v14  ;;  %v4977_v57 = vmul.f32 %v13665_v55, %v4945_v62  ;;  %v4958_v62 = vrot.slane %v13440_v49, 7  ;;  %v4988_v49 = vmul.f32 %v13684_v48, %v4956_v63 }
0x13b2   : > { %v5110_v21 = vpop.permute.xlu0 %5109 }
0x13b3   : > { %v13722_v23 = vadd.f32 %v5110_v21, %v4986_v53  ;;  %v4949_v21 = vrot.slane %v13389_v13, 7 }
0x13b5   : > { %15277 = vst [vmem:[#allocation107_spill] sm:$0xff] %v13722_v23  ;;  %10784 = vtanh.f32 %v13722_v23  ;;  %v5100_v23 = vpop.permute.xlu1 %5099 }
0x13b6   : > { %v5112_v39 = vpop.permute.xlu0 %5111 }
0x13b7   : > { %v10781_v24 = vpop.eup %10780  ;;  %v13727_v54 = vadd.f32 %v5112_v39, %v4987_v60  ;;  %v4950_v39 = vrot.slane %v13399_v42, 7  ;;  %v4983_v42 = vmul.f32 %v13676_v52, %v4951_v41 }
0x13b8   : > { %5201 = vrot.lane.b32.xlu0 %v10781_v24, %s11113_s27  ;;  %v4981_v24 = vmul.f32 %v13668_v20, %v4949_v21 }
0x13b9   : > { %10786 = vtanh.f32 %v13727_v54  ;;  %v4982_v13 = vmul.f32 %v13672_v1, %v4950_v39 }
0x13ba   : > { %v5088_v43 = vpop.permute.xlu0 %5087 }
0x13bb   : > { %v10783_v15 = vpop.eup %10782  ;;  %v13733_v53 = vadd.f32 %v5088_v43, %v4975_v18  ;;  %v13745_v18 = vadd.f32 %v5100_v23, %v4981_v24 }
0x13bc   : > { %5203 = vrot.lane.b32.xlu0 %v10783_v15, %s11113_s27 }
0x13bd   : > { %15278 = vst [vmem:[#allocation108_spill] sm:$0xff] %v13733_v53  ;;  %10788 = vtanh.f32 %v13733_v53  ;;  %15280 = vst [vmem:[#allocation110_spill] sm:$0xff] %v13745_v18 }
0x13be   : > { %v5092_v8 = vpop.permute.xlu0 %5091 }
0x13bf   : > { %v10785_v60 = vpop.eup %10784  ;;  %v13741_v30 = vadd.f32 %v5092_v8, %v4977_v57  ;;  %v5104_v57 = vpop.permute.xlu1 %5103  ;;  %v4990_v8 = vmul.f32 %v13680_v58, %v4958_v62 }
0x13c0   : > { %5205 = vrot.lane.b32.xlu0 %v10785_v60, %s11113_s27  ;;  %v13756_v23 = vadd.f32 %v5104_v57, %v4983_v42  ;;  %v4946_v57 = vrot.slane %v13427_v40, 7 }
0x13c1   : > { %15279 = vst [vmem:[#allocation109_spill] sm:$0xff] %v13741_v30  ;;  %10790 = vtanh.f32 %v13741_v30 }
0x13c2   : > { %v5102_v43 = vpop.permute.xlu0 %5101  ;;  %10792 = vtanh.f32 %v13745_v18 }
0x13c3   : > { %v10787_v15 = vpop.eup %10786  ;;  %v13752_v21 = vadd.f32 %v5102_v43, %v4982_v13  ;;  %v5114_v41 = vpop.permute.xlu1 %5113  ;;  %v4944_v13 = vrot.slane %v13420_v33, 7 }
0x13c4   : > { %5207 = vrot.lane.b32.xlu0 %v10787_v15, %s11113_s27  ;;  %v13766_v36 = vadd.f32 %v5114_v41, %v4988_v49  ;;  %v15284_v49 = vld [vmem:[#allocation50_spill] sm:$0xff] }
0x13c5   : > { %15281 = vst [vmem:[#allocation111_spill] sm:$0xff] %v13752_v21  ;;  %10794 = vtanh.f32 %v13752_v21  ;;  %v4976_v15 = vmul.f32 %v13689_v4, %v4944_v13  ;;  %v4947_v41 = vrot.slane %v15284_v49, 7 }
0x13c6   : > { %v5118_v60 = vpop.permute.xlu0 %5117  ;;  %10796 = vtanh.f32 %v13756_v23  ;;  %15282 = vst [vmem:[#allocation112_spill] sm:$0xff] %v13766_v36 }
0x13c7   : > { %v10789_v39 = vpop.eup %10788  ;;  %v13762_v24 = vadd.f32 %v5118_v60, %v4990_v8  ;;  %v5090_v62 = vpop.permute.xlu1 %5089  ;;  %v4978_v8 = vmul.f32 %v13693_v44, %v4946_v57 }
0x13c8   : > { %5183 = vrot.lane.b32.xlu0 %v10789_v39, %s11113_s27  ;;  %v13773_v63 = vadd.f32 %v5090_v62, %v4976_v15 }
0x13c9   : > { %10798 = vtanh.f32 %v13762_v24 }
0x13ca   : > { %10800 = vtanh.f32 %v13766_v36  ;;  %15283 = vst [vmem:[#allocation113_spill] sm:$0xff] %v13773_v63 }
0x13cb   : > { %v10791_v43 = vpop.eup %10790  ;;  %10802 = vtanh.f32 %v13773_v63  ;;  %v5094_v60 = vpop.permute.xlu1 %5093 }
0x13cc   : > { %5187 = vrot.lane.b32.xlu0 %v10791_v43, %s11113_s27  ;;  %v10793_v42 = vpop.eup %10792  ;;  %v13780_v13 = vadd.f32 %v5094_v60, %v4978_v8  ;;  %v4979_v43 = vmul.f32 %v13697_v10, %v4947_v41 }
0x13cd   : > { %5195 = vrot.lane.b32.xlu1 %v10793_v42, %s11113_s27  ;;  %v15286_v42 = vld [vmem:[#allocation100_spill] sm:$0xff] }
0x13ce   : > { %15285 = vst [vmem:[#allocation50_spill] sm:$0xff] %v13780_v13  ;;  %10804 = vtanh.f32 %v13780_v13  ;;  %v4948_v57 = vrot.slane %v15286_v42, 7 }
0x13cf   : > { %v10795_v33 = vpop.eup %10794  ;;  %v5096_v15 = vpop.permute.xlu1 %5095 }
0x13d0   : > { %5197 = vrot.lane.b32.xlu0 %v10795_v33, %s11113_s27  ;;  %v10797_v39 = vpop.eup %10796  ;;  %v13787_v63 = vadd.f32 %v5096_v15, %v4979_v43  ;;  %v4980_v33 = vmul.f32 %v13701_v59, %v4948_v57 }
0x13d1   : > { %5199 = vrot.lane.b32.xlu1 %v10797_v39, %s11113_s27  ;;  %v15288_v39 = vld [vmem:[#allocation16_spill] sm:$0xff] }
0x13d2   : > { %15287 = vst [vmem:[#allocation100_spill] sm:$0xff] %v13787_v63  ;;  %10806 = vtanh.f32 %v13787_v63  ;;  %v4957_v49 = vrot.slane %v15288_v39, 7 }
0x13d3   : > { %v10799_v40 = vpop.eup %10798  ;;  %v5098_v8 = vpop.permute.xlu1 %5097 }
0x13d4   : > { %5213 = vrot.lane.b32.xlu0 %v10799_v40, %s11113_s27  ;;  %v10801_v62 = vpop.eup %10800  ;;  %v13793_v13 = vadd.f32 %v5098_v8, %v4980_v33  ;;  %v4989_v41 = vmul.f32 %v13705_v12, %v4957_v49 }
0x13d5   : > { %5209 = vrot.lane.b32.xlu1 %v10801_v62, %s11113_s27  ;;  %v10803_v60 = vpop.eup %10802 }
0x13d6   : > { %15289 = vst [vmem:[#allocation16_spill] sm:$0xff] %v13793_v13  ;;  %10808 = vtanh.f32 %v13793_v13 }
0x13d7   : > { %v5116_v40 = vpop.permute.xlu1 %5115 }
0x13d8   : > { %v10805_v43 = vpop.eup %10804  ;;  %v13798_v15 = vadd.f32 %v5116_v40, %v4989_v41 }
0x13d9   : > { %5185 = vrot.lane.b32.xlu1 %v10803_v60, %s11113_s27 }
0x13da   : > { %10810 = vtanh.f32 %v13798_v15 }
0x13dc   : > { %v10807_v62 = vpop.eup %10806 }
0x13dd   : > { %5189 = vrot.lane.b32.xlu1 %v10805_v43, %s11113_s27 }
0x13e0   : > { %v10809_v42 = vpop.eup %10808 }
0x13e1   : > { %5191 = vrot.lane.b32.xlu1 %v10807_v62, %s11113_s27 }
0x13e4   : > { %v10811_v57 = vpop.eup %10810 }
0x13e5   : > { %5193 = vrot.lane.b32.xlu1 %v10809_v42, %s11113_s27 }
0x13e9   : > { %5211 = vrot.lane.b32.xlu1 %v10811_v57, %s11113_s27 }
0x142a   : > { %v5202_v33 = vpop.permute.xlu0 %5201 }
0x142b   : > { %v13816_v30 = vmul.f32 %v13640_v9, %v5202_v33 }
0x142d   : > { %v5343_v33 = vrot.slane %v13816_v30, 5 }
0x142e   : > { %v5204_v8 = vpop.permute.xlu0 %5203 }
0x1432   : > { %v5206_v60 = vpop.permute.xlu0 %5205 }
0x1436   : > { %v5208_v39 = vpop.permute.xlu0 %5207 }
0x143a   : > { %v5184_v41 = vpop.permute.xlu0 %5183 }
0x143b   : > { %v5231_v36 = vmul.f32 %v13660_v11, %v5184_v41  ;;  %v13820_v11 = vmul.f32 %v13645_v0, %v5204_v8 }
0x143d   : > { %v5328_v63 = vrot.slane %v5231_v36, 6  ;;  %v5345_v8 = vrot.slane %v13820_v11, 4 }
0x143e   : > { %v5188_v43 = vpop.permute.xlu0 %5187 }
0x143f   : > { %v5196_v49 = vpop.permute.xlu1 %5195  ;;  %v13807_v62 = vmul.f32 %v13665_v55, %v5188_v43 }
0x1441   : > { %v5331_v53 = vrot.slane %v13807_v62, 4 }
0x1442   : > { %v5198_v2 = vpop.permute.xlu0 %5197 }
0x1443   : > { %v5200_v40 = vpop.permute.xlu1 %5199 }
0x1444   : > { %v13813_v57 = vmul.f32 %v13676_v52, %v5200_v40  ;;  %v13828_v52 = vmul.f32 %v13650_v32, %v5206_v60 }
0x1446   : > { %v5214_v43 = vpop.permute.xlu0 %5213 }
0x1447   : > { %v5210_v13 = vpop.permute.xlu1 %5209 }
0x144b   : > { %v5186_v18 = vpop.permute.xlu1 %5185 }
0x144c   : > { %v13810_v42 = vmul.f32 %v13689_v4, %v5186_v18  ;;  %v5342_v4 = vrot.slane %v13813_v57, 6  ;;  %v13831_v18 = vmul.f32 %v13655_v3, %v5208_v39  ;;  %v5347_v3 = vrot.slane %v13828_v52, 3 }
0x144d   : > { %v13846_v39 = vmul.f32 %v13672_v1, %v5198_v2 }
0x144e   : > { %v5329_v55 = vrot.slane %v13810_v42, 5  ;;  %v5344_v32 = vsel %vm1290_vm1, %v5343_v33, %v5342_v4  ;;  %v5349_v60 = vrot.slane %v13831_v18, 2 }
0x144f   : > { %v5190_v21 = vpop.permute.xlu1 %5189  ;;  %v5346_v4 = vsel %vm1293_vm2, %v5345_v8, %v5344_v32 }
0x1450   : > { %v13824_v41 = vmul.f32 %v13693_v44, %v5190_v21  ;;  %v5330_v9 = vsel %vm1290_vm1, %v5329_v55, %v5328_v63  ;;  %vm6251_vm1 = vcmask 523264  }
0x1451   : > { %v5332_v0 = vsel %vm1293_vm2, %v5331_v53, %v5330_v9  ;;  %v13849_v53 = vmul.f32 %v13684_v48, %v5210_v13  ;;  %v5340_v48 = vrot.slane %v13846_v39, 7  ;;  %v13862_v13 = vmul.f32 %v13668_v20, %v5196_v49 }
0x1452   : > { %v5333_v44 = vrot.slane %v13824_v41, 3  ;;  %vm6957_vm2 = vcmask 64512  }
0x1453   : > { %v5192_v40 = vpop.permute.xlu1 %5191 }
0x1454   : > { %v13839_v21 = vmul.f32 %v13697_v10, %v5192_v40  ;;  %v5334_v63 = vsel %vm1296_vm3, %v5333_v44, %v5332_v0  ;;  %v13853_v10 = vmul.f32 %v13680_v58, %v5214_v43  ;;  %v5348_v40 = vsel %vm1296_vm3, %v5347_v3, %v5346_v4  ;;  %v15294_v4 = vld [vmem:[#allocation85_spill] sm:$0xff] }
0x1455   : > { %v5350_v1 = vsel %vm1299_vm4, %v5349_v60, %v5348_v40  ;;  %v5351_v44 = vrot.slane %v13849_v53, 1  ;;  %v15295_v40 = vld [vmem:[#allocation38_spill] sm:$0xff]  ;;  %vm11115_vm3 = vmmov 0  }
0x1456   : > { %v5335_v55 = vrot.slane %v13839_v21, 2  ;;  %v5354_v43 = vrot.slane %v13853_v10, 7 }
0x1457   : > { %v5194_v9 = vpop.permute.xlu1 %5193  ;;  %v5352_v3 = vsel %vm1302_vm5, %v5351_v44, %v5350_v1  ;;  %v15297_v1 = vld [vmem:[#allocation76_spill] sm:$0xff]  ;;  %v15302_v44 = vld [vmem:[#allocation18_spill] sm:$0xff] }
0x1458   : > { %v5236_v33 = vmul.f32 %v13701_v59, %v5194_v9  ;;  %v5336_v0 = vsel %vm1299_vm4, %v5335_v55, %v5334_v63  ;;  %v15291_v63 = vld [vmem:[#allocation34_spill] sm:$0xff]  ;;  %v15292_v55 = vld [vmem:[#allocation53_spill] sm:$0xff]  ;;  %v15293_v9 = vld [vmem:[#allocation72_spill] sm:$0xff]  ;;  %vm8626_vm4 = vcmask 785408  }
0x145a   : > { %v5337_v2 = vrot.slane %v5236_v33, 1 }
0x145b   : > { %v5212_v58 = vpop.permute.xlu1 %5211 }
0x145c   : > { %v13867_v8 = vmul.f32 %v13705_v12, %v5212_v58  ;;  %v5338_v59 = vsel %vm1302_vm5, %v5337_v2, %v5336_v0  ;;  %v15290_v12 = vld [vmem:[#allocation20_spill] sm:$0xff]  ;;  %v15296_v0 = vld [vmem:[#allocation17_spill] sm:$0xff]  ;;  %v15304_v58 = vld [vmem:[#allocation35_spill] sm:$0xff] }
0x145d   : > { %v5339_v32 = vsel %vm1305_vm6, %v13862_v13, %v5338_v59  ;;  %v15298_v2 = vld [vmem:[#allocation57_spill] sm:$0xff]  ;;  %v15308_v59 = vld [vmem:[#allocation36_spill] sm:$0xff] }
0x145e   : > { %v5341_v60 = vsel %vm1308_vm7, %v5340_v48, %v5339_v32  ;;  %v5353_v20 = vsel %vm1305_vm6, %v13867_v8, %v5352_v3  ;;  %v15299_v48 = vld [vmem:[#allocation89_spill] sm:$0xff]  ;;  %v15309_v32 = vld [vmem:[#allocation55_spill] sm:$0xff] }
0x145f   : > { %5356 = vrot.lane.b32.xlu0 %v5341_v60, %s11114_s14  ;;  %v5355_v49 = vsel %vm1308_vm7, %v5354_v43, %v5353_v20  ;;  %v15305_v43 = vld [vmem:[#allocation88_spill] sm:$0xff]  ;;  %v15310_v3 = vld [vmem:[#allocation75_spill] sm:$0xff] }
0x1460   : > { %5358 = vrot.lane.b32.xlu1 %v5355_v49, %s11114_s14  ;;  %v15311_v60 = vld [vmem:[#allocation92_spill] sm:$0xff] }
0x1461   : > { %v15314_v20 = vld [vmem:[#allocation80_spill] sm:$0xff] }
0x1462   : > { %v15315_v49 = vld [vmem:[#allocation56_spill] sm:$0xff] }
0x1463   : > { %1224 = vrot.lane.b32.xlu0 %v15290_v12, %s11114_s14  ;;  %v15318_v12 = vld [vmem:[#allocation77_spill] sm:$0xff] }
0x1464   : > { %1903 = vrot.lane.b32.xlu1 %v15291_v63, %s11114_s14  ;;  %v15319_v63 = vld [vmem:[#allocation23_spill] sm:$0xff] }
0x1467   : > { %2575 = vrot.lane.b32.xlu0 %v15292_v55, %s11114_s14  ;;  %v15321_v55 = vld [vmem:[#allocation91_spill] sm:$0xff] }
0x1468   : > { %3247 = vrot.lane.b32.xlu1 %v15293_v9, %s11114_s14  ;;  %v15322_v9 = vld [vmem:[#allocation24_spill] sm:$0xff] }
0x146b   : > { %3919 = vrot.lane.b32.xlu0 %v15294_v4, %s11114_s14  ;;  %v15324_v4 = vld [vmem:[#allocation94_spill] sm:$0xff] }
0x146c   : > { %4591 = vrot.lane.b32.xlu1 %v13466_v28, %s11114_s14  ;;  %v15300_v28 = vld [vmem:[#allocation39_spill] sm:$0xff] }
0x146f   : > { %5263 = vrot.lane.b32.xlu0 %v5231_v36, %s11114_s14  ;;  %v15301_v36 = vld [vmem:[#allocation73_spill] sm:$0xff] }
0x1470   : > { %1905 = vrot.lane.b32.xlu1 %v15295_v40, %s11114_s14 }
0x1473   : > { %1226 = vrot.lane.b32.xlu0 %v15296_v0, %s11114_s14 }
0x1474   : > { %3249 = vrot.lane.b32.xlu1 %v15297_v1, %s11114_s14 }
0x1477   : > { %2577 = vrot.lane.b32.xlu0 %v15298_v2, %s11114_s14 }
0x1478   : > { %4593 = vrot.lane.b32.xlu1 %v13462_v29, %s11114_s14  ;;  %v15303_v29 = vld [vmem:[#allocation60_spill] sm:$0xff] }
0x147b   : > { %3921 = vrot.lane.b32.xlu0 %v15299_v48, %s11114_s14 }
0x147c   : > { %1907 = vrot.lane.b32.xlu1 %v15300_v28, %s11114_s14 }
0x147f   : > { %5265 = vrot.lane.b32.xlu0 %v13810_v42, %s11114_s14  ;;  %v15306_v42 = vld [vmem:[#allocation81_spill] sm:$0xff] }
0x1480   : > { %3251 = vrot.lane.b32.xlu1 %v15301_v36, %s11114_s14 }
0x1483   : > { %1228 = vrot.lane.b32.xlu0 %v15302_v44, %s11114_s14 }
0x1484   : > { %4595 = vrot.lane.b32.xlu1 %v13471_v19, %s11114_s14  ;;  %v15307_v19 = vld [vmem:[#allocation21_spill] sm:$0xff] }
0x1487   : > { %2579 = vrot.lane.b32.xlu0 %v15303_v29, %s11114_s14 }
0x1488   : > { %1909 = vrot.lane.b32.xlu1 %v15304_v58, %s11114_s14 }
0x148b   : > { %3923 = vrot.lane.b32.xlu0 %v15305_v43, %s11114_s14 }
0x148c   : > { %3253 = vrot.lane.b32.xlu1 %v15306_v42, %s11114_s14 }
0x148f   : > { %5267 = vrot.lane.b32.xlu0 %v13807_v62, %s11114_s14  ;;  %v15313_v62 = vld [vmem:[#allocation19_spill] sm:$0xff] }
0x1490   : > { %4597 = vrot.lane.b32.xlu1 %v13478_v31, %s11114_s14  ;;  %v15312_v31 = vld [vmem:[#allocation41_spill] sm:$0xff] }
0x1493   : > { %1230 = vrot.lane.b32.xlu0 %v15307_v19, %s11114_s14 }
0x1494   : > { %1911 = vrot.lane.b32.xlu1 %v15308_v59, %s11114_s14 }
0x1497   : > { %2581 = vrot.lane.b32.xlu0 %v15309_v32, %s11114_s14 }
0x1498   : > { %3255 = vrot.lane.b32.xlu1 %v15310_v3, %s11114_s14 }
0x149b   : > { %3925 = vrot.lane.b32.xlu0 %v15311_v60, %s11114_s14 }
0x149c   : > { %4599 = vrot.lane.b32.xlu1 %v13497_v50, %s11114_s14  ;;  %v15316_v50 = vld [vmem:[#allocation97_spill] sm:$0xff] }
0x149f   : > { %5269 = vrot.lane.b32.xlu0 %v13824_v41, %s11114_s14  ;;  %v15317_v41 = vld [vmem:[#allocation46_spill] sm:$0xff] }
0x14a0   : > { %1913 = vrot.lane.b32.xlu1 %v15312_v31, %s11114_s14 }
0x14a3   : > { %1232 = vrot.lane.b32.xlu0 %v15313_v62, %s11114_s14 }
0x14a4   : > { %3257 = vrot.lane.b32.xlu1 %v15314_v20, %s11114_s14 }
0x14a7   : > { %2583 = vrot.lane.b32.xlu0 %v15315_v49, %s11114_s14 }
0x14a8   : > { %4601 = vrot.lane.b32.xlu1 %v13508_v25, %s11114_s14  ;;  %v15320_v25 = vld [vmem:[#allocation58_spill] sm:$0xff] }
0x14ab   : > { %3927 = vrot.lane.b32.xlu0 %v15316_v50, %s11114_s14 }
0x14ac   : > { %1915 = vrot.lane.b32.xlu1 %v15317_v41, %s11114_s14 }
0x14af   : > { %5271 = vrot.lane.b32.xlu0 %v13839_v21, %s11114_s14  ;;  %v15323_v21 = vld [vmem:[#allocation62_spill] sm:$0xff] }
0x14b0   : > { %3259 = vrot.lane.b32.xlu1 %v15318_v12, %s11114_s14 }
0x14b3   : > { %1234 = vrot.lane.b32.xlu0 %v15319_v63, %s11114_s14 }
0x14b4   : > { %4603 = vrot.lane.b32.xlu1 %v13494_v5, %s11114_s14 }
0x14b7   : > { %2585 = vrot.lane.b32.xlu0 %v15320_v25, %s11114_s14 }
0x14bb   : > { %3929 = vrot.lane.b32.xlu0 %v15321_v55, %s11114_s14 }
0x14bf   : > { %5273 = vrot.lane.b32.xlu0 %v5236_v33, %s11114_s14 }
0x14c3   : > { %1236 = vrot.lane.b32.xlu0 %v15322_v9, %s11114_s14 }
0x14c7   : > { %2587 = vrot.lane.b32.xlu0 %v15323_v21, %s11114_s14 }
0x14cb   : > { %3931 = vrot.lane.b32.xlu0 %v15324_v4, %s11114_s14 }
0x14d1   : > { %v5357_v40 = vpop.permute.xlu0 %5356 }
0x14d2   : > { %9470 = vmatprep.mubr.msk.f32.mxu1 %vm500_vm0, %v5357_v40  ;;  %v5359_v5 = vpop.permute.xlu1 %5358 }
0x14d3   : > { %9471 = vmatmul.mubr.msk.f32.vlgmr.msra.gmra.mrb[10].mxu1 %vm500_vm0, %v5359_v5 }
0x14d5   : > { %v1225_v0 = vpop.permute.xlu0 %1224 }
0x14d6   : > { %1273 = vst.msk [vmem:[#allocation2] sm:$0x1] %vm1272_vm8, %v1225_v0  ;;  %v1904_v33 = vpop.permute.xlu1 %1903 }
0x14d7   : > { %1952 = vst.msk [vmem:[#allocation2] sm:$0x2] %vm1951_vm9, %v1904_v33 }
0x14d9   : > { %v2576_v1 = vpop.permute.xlu0 %2575 }
0x14da   : > { %2624 = vst.msk [vmem:[#allocation2] sm:$0x4] %vm2623_vm10, %v2576_v1  ;;  %v3248_v2 = vpop.permute.xlu1 %3247 }
0x14db   : > { %3296 = vst.msk [vmem:[#allocation2] sm:$0x8] %vm3295_vm11, %v3248_v2 }
0x14dd   : > { %v3920_v48 = vpop.permute.xlu0 %3919 }
0x14de   : > { %3968 = vst.msk [vmem:[#allocation2] sm:$0x10] %vm3967_vm12, %v3920_v48  ;;  %v4592_v28 = vpop.permute.xlu1 %4591 }
0x14df   : > { %4640 = vst.msk [vmem:[#allocation2] sm:$0x20] %vm4639_vm13, %v4592_v28 }
0x14e1   : > { %v5264_v36 = vpop.permute.xlu0 %5263 }
0x14e2   : > { %5312 = vst.msk [vmem:[#allocation2] sm:$0x40] %vm5311_vm14, %v5264_v36  ;;  %v1906_v44 = vpop.permute.xlu1 %1905 }
0x14e3   : > { %1953 = vst.msk [vmem:[#allocation2 + $0x8] sm:$0x2] %vm1951_vm9, %v1906_v44 }
0x14e5   : > { %v1227_v29 = vpop.permute.xlu0 %1226 }
0x14e6   : > { %1274 = vst.msk [vmem:[#allocation2 + $0x8] sm:$0x1] %vm1272_vm8, %v1227_v29  ;;  %v3250_v58 = vpop.permute.xlu1 %3249 }
0x14e7   : > { %3297 = vst.msk [vmem:[#allocation2 + $0x8] sm:$0x8] %vm3295_vm11, %v3250_v58 }
0x14e9   : > { %v2578_v43 = vpop.permute.xlu0 %2577 }
0x14ea   : > { %2625 = vst.msk [vmem:[#allocation2 + $0x8] sm:$0x4] %vm2623_vm10, %v2578_v43  ;;  %v4594_v42 = vpop.permute.xlu1 %4593 }
0x14eb   : > { %4641 = vst.msk [vmem:[#allocation2 + $0x8] sm:$0x20] %vm4639_vm13, %v4594_v42 }
0x14ed   : > { %v3922_v19 = vpop.permute.xlu0 %3921 }
0x14ee   : > { %3969 = vst.msk [vmem:[#allocation2 + $0x8] sm:$0x10] %vm3967_vm12, %v3922_v19  ;;  %v1908_v59 = vpop.permute.xlu1 %1907 }
0x14ef   : > { %1954 = vst.msk [vmem:[#allocation2 + $0x10] sm:$0x2] %vm1951_vm9, %v1908_v59 }
0x14f1   : > { %v5266_v32 = vpop.permute.xlu0 %5265 }
0x14f2   : > { %5313 = vst.msk [vmem:[#allocation2 + $0x8] sm:$0x40] %vm5311_vm14, %v5266_v32  ;;  %v3252_v3 = vpop.permute.xlu1 %3251 }
0x14f3   : > { %3298 = vst.msk [vmem:[#allocation2 + $0x10] sm:$0x8] %vm3295_vm11, %v3252_v3 }
0x14f5   : > { %v1229_v60 = vpop.permute.xlu0 %1228 }
0x14f6   : > { %1275 = vst.msk [vmem:[#allocation2 + $0x10] sm:$0x1] %vm1272_vm8, %v1229_v60  ;;  %v4596_v31 = vpop.permute.xlu1 %4595 }
0x14f7   : > { %4642 = vst.msk [vmem:[#allocation2 + $0x10] sm:$0x20] %vm4639_vm13, %v4596_v31 }
0x14f9   : > { %v2580_v62 = vpop.permute.xlu0 %2579 }
0x14fa   : > { %2626 = vst.msk [vmem:[#allocation2 + $0x10] sm:$0x4] %vm2623_vm10, %v2580_v62  ;;  %v1910_v20 = vpop.permute.xlu1 %1909 }
0x14fb   : > { %1955 = vst.msk [vmem:[#allocation2 + $0x18] sm:$0x2] %vm1951_vm9, %v1910_v20 }
0x14fd   : > { %v3924_v49 = vpop.permute.xlu0 %3923 }
0x14fe   : > { %3970 = vst.msk [vmem:[#allocation2 + $0x10] sm:$0x10] %vm3967_vm12, %v3924_v49  ;;  %v3254_v50 = vpop.permute.xlu1 %3253 }
0x14ff   : > { %3299 = vst.msk [vmem:[#allocation2 + $0x18] sm:$0x8] %vm3295_vm11, %v3254_v50 }
0x1501   : > { %v5268_v41 = vpop.permute.xlu0 %5267 }
0x1502   : > { %5314 = vst.msk [vmem:[#allocation2 + $0x10] sm:$0x40] %vm5311_vm14, %v5268_v41  ;;  %v4598_v12 = vpop.permute.xlu1 %4597 }
0x1503   : > { %4643 = vst.msk [vmem:[#allocation2 + $0x18] sm:$0x20] %vm4639_vm13, %v4598_v12 }
0x1505   : > { %v1231_v63 = vpop.permute.xlu0 %1230 }
0x1506   : > { %1276 = vst.msk [vmem:[#allocation2 + $0x18] sm:$0x1] %vm1272_vm8, %v1231_v63  ;;  %v1912_v25 = vpop.permute.xlu1 %1911 }
0x1507   : > { %1956 = vst.msk [vmem:[#allocation2 + $0x20] sm:$0x2] %vm1951_vm9, %v1912_v25 }
0x1509   : > { %v2582_v55 = vpop.permute.xlu0 %2581 }
0x150a   : > { %2627 = vst.msk [vmem:[#allocation2 + $0x18] sm:$0x4] %vm2623_vm10, %v2582_v55  ;;  %v3256_v9 = vpop.permute.xlu1 %3255 }
0x150b   : > { %3300 = vst.msk [vmem:[#allocation2 + $0x20] sm:$0x8] %vm3295_vm11, %v3256_v9 }
0x150d   : > { %v3926_v21 = vpop.permute.xlu0 %3925 }
0x150e   : > { %3971 = vst.msk [vmem:[#allocation2 + $0x18] sm:$0x10] %vm3967_vm12, %v3926_v21  ;;  %v4600_v4 = vpop.permute.xlu1 %4599 }
0x150f   : > { %4644 = vst.msk [vmem:[#allocation2 + $0x20] sm:$0x20] %vm4639_vm13, %v4600_v4 }
0x1511   : > { %v5270_v40 = vpop.permute.xlu0 %5269 }
0x1512   : > { %5315 = vst.msk [vmem:[#allocation2 + $0x18] sm:$0x40] %vm5311_vm14, %v5270_v40  ;;  %v1914_v5 = vpop.permute.xlu1 %1913 }
0x1513   : > { %1957 = vst.msk [vmem:[#allocation2 + $0x28] sm:$0x2] %vm1951_vm9, %v1914_v5 }
0x1515   : > { %v1233_v0 = vpop.permute.xlu0 %1232 }
0x1516   : > { %1277 = vst.msk [vmem:[#allocation2 + $0x20] sm:$0x1] %vm1272_vm8, %v1233_v0  ;;  %v3258_v33 = vpop.permute.xlu1 %3257 }
0x1517   : > { %3301 = vst.msk [vmem:[#allocation2 + $0x28] sm:$0x8] %vm3295_vm11, %v3258_v33 }
0x1519   : > { %v2584_v1 = vpop.permute.xlu0 %2583 }
0x151a   : > { %2628 = vst.msk [vmem:[#allocation2 + $0x20] sm:$0x4] %vm2623_vm10, %v2584_v1  ;;  %v4602_v2 = vpop.permute.xlu1 %4601 }
0x151b   : > { %4645 = vst.msk [vmem:[#allocation2 + $0x28] sm:$0x20] %vm4639_vm13, %v4602_v2 }
0x151d   : > { %v3928_v48 = vpop.permute.xlu0 %3927 }
0x151e   : > { %3972 = vst.msk [vmem:[#allocation2 + $0x20] sm:$0x10] %vm3967_vm12, %v3928_v48  ;;  %v1916_v28 = vpop.permute.xlu1 %1915 }
0x151f   : > { %1958 = vst.msk [vmem:[#allocation2 + $0x30] sm:$0x2] %vm1951_vm9, %v1916_v28 }
0x1521   : > { %v5272_v36 = vpop.permute.xlu0 %5271 }
0x1522   : > { %5316 = vst.msk [vmem:[#allocation2 + $0x20] sm:$0x40] %vm5311_vm14, %v5272_v36  ;;  %v3260_v44 = vpop.permute.xlu1 %3259 }
0x1523   : > { %3302 = vst.msk [vmem:[#allocation2 + $0x30] sm:$0x8] %vm3295_vm11, %v3260_v44 }
0x1525   : > { %v1235_v29 = vpop.permute.xlu0 %1234 }
0x1526   : > { %1278 = vst.msk [vmem:[#allocation2 + $0x28] sm:$0x1] %vm1272_vm8, %v1235_v29  ;;  %v4604_v58 = vpop.permute.xlu1 %4603 }
0x1527   : > { %4646 = vst.msk [vmem:[#allocation2 + $0x30] sm:$0x20] %vm4639_vm13, %v4604_v58 }
0x1529   : > { %v2586_v43 = vpop.permute.xlu0 %2585 }
0x152a   : > { %2629 = vst.msk [vmem:[#allocation2 + $0x28] sm:$0x4] %vm2623_vm10, %v2586_v43 }
0x152d   : > { %v3930_v42 = vpop.permute.xlu0 %3929 }
0x152e   : > { %3973 = vst.msk [vmem:[#allocation2 + $0x28] sm:$0x10] %vm3967_vm12, %v3930_v42 }
0x1531   : > { %v5274_v19 = vpop.permute.xlu0 %5273 }
0x1532   : > { %5317 = vst.msk [vmem:[#allocation2 + $0x28] sm:$0x40] %vm5311_vm14, %v5274_v19 }
0x1535   : > { %v1237_v59 = vpop.permute.xlu0 %1236 }
0x1536   : > { %1279 = vst.msk [vmem:[#allocation2 + $0x30] sm:$0x1] %vm1272_vm8, %v1237_v59 }
0x1539   : > { %v2588_v32 = vpop.permute.xlu0 %2587 }
0x153a   : > { %2630 = vst.msk [vmem:[#allocation2 + $0x30] sm:$0x4] %vm2623_vm10, %v2588_v32 }
0x153d   : > { %v3932_v3 = vpop.permute.xlu0 %3931 }
0x153e   : > { %3974 = vst.msk [vmem:[#allocation2 + $0x30] sm:$0x10] %vm3967_vm12, %v3932_v3  ;;  %v15326_v3 = vld [vmem:[#allocation65_spill] sm:$0xff] }
0x15a6   : > { %v9472_v60 = vpop.f32.mrb[10].mxu1 }
0x15a7   : > { %v5448_v31 = vrot.slane %v9472_v60, 1  ;;  %v14023_v62 = vpop.f32.mrb[11].mxu1  ;;  %v5450_v49 = vrot.slane %v9472_v60, 3  ;;  %v5452_v50 = vrot.slane %v9472_v60, 5  ;;  %v5454_v63 = vrot.slane %v9472_v60, 7 }
0x15a8   : > { %v14038_v55 = vadd.f32 %v9472_v60, %v11497_v45  ;;  %v5443_v45 = vrot.slane %v14023_v62, 3  ;;  %v5449_v40 = vrot.slane %v9472_v60, 2  ;;  %v14057_v5 = vadd.f32 %v14023_v62, %v11479_v26 }
0x15a9   : > { %v14026_v20 = vadd.f32 %v5448_v31, %v11445_v6  ;;  %v14030_v41 = vadd.f32 %v5450_v49, %v11458_v16  ;;  %v14033_v25 = vadd.f32 %v5452_v50, %v11471_v22  ;;  %v14041_v6 = vadd.f32 %v5454_v63, %v11488_v38  ;;  %v15329_v49 = vld [vmem:[#allocation25_spill] sm:$0xff]  ;;  %v15330_v50 = vld [vmem:[#allocation82_spill] sm:$0xff] }
0x15aa   : > { %v5441_v16 = vrot.slane %v14023_v62, 1  ;;  %v14061_v0 = vadd.f32 %v5443_v45, %v11403_v46  ;;  %v5451_v33 = vrot.slane %v9472_v60, 4  ;;  %v14065_v1 = vadd.f32 %v5449_v40, %v11431_v61  ;;  %v15332_v63 = vld [vmem:[#allocation37_spill] sm:$0xff] }
0x15ab   : > { %10812 = vtanh.f32 %v14026_v20  ;;  %v5447_v2 = vrot.slane %v14023_v62, 7  ;;  %v5453_v28 = vrot.slane %v9472_v60, 6  ;;  %v15327_v60 = vld [vmem:[#allocation93_spill] sm:$0xff] }
0x15ac   : > { %10814 = vtanh.f32 %v14030_v41  ;;  %v14048_v9 = vadd.f32 %v5441_v16, %v11383_v35  ;;  %v5445_v35 = vrot.slane %v14023_v62, 5  ;;  %v14074_v46 = vadd.f32 %v5451_v33, %v11448_v7 }
0x15ad   : > { %10816 = vtanh.f32 %v14033_v25  ;;  %v14079_v61 = vadd.f32 %v5447_v2, %v11422_v56  ;;  %v14083_v36 = vadd.f32 %v5453_v28, %v11461_v17  ;;  %v5444_v56 = vrot.slane %v14023_v62, 4 }
0x15ae   : > { %10818 = vtanh.f32 %v14038_v55  ;;  %v14070_v48 = vadd.f32 %v5445_v35, %v11414_v51  ;;  %v5442_v51 = vrot.slane %v14023_v62, 2  ;;  %v9090_v16 = vmul.f32 -1.442695, %v14026_v20 }
0x15af   : > { %10820 = vtanh.f32 %v14041_v6  ;;  %v14100_v43 = vadd.f32 %v5444_v56, %v11386_v37  ;;  %v15325_v37 = vld [vmem:[#allocation30_spill] sm:$0xff]  ;;  %v9082_v35 = vmul.f32 -1.442695, %v14048_v9 }
0x15b0   : > { %10822 = vtanh.f32 %v14048_v9  ;;  %v14094_v17 = vadd.f32 %v5442_v51, %v11380_v34  ;;  %v9089_v51 = vmul.f32 -1.442695, %v14057_v5  ;;  %v9086_v56 = vmul.f32 -1.442695, %v14070_v48 }
0x15b1   : > { %10824 = vtanh.f32 %v14057_v5  ;;  %v9093_v5 = vmul.f32 -1.442695, %v14074_v46 }
0x15b2   : > { %10826 = vtanh.f32 %v14061_v0 }
0x15b3   : > { %10828 = vtanh.f32 %v14065_v1 }
0x15b4   : > { %10830 = vtanh.f32 %v14070_v48 }
0x15b5   : > { %v10813_v12 = vpop.eup %10812  ;;  %10832 = vtanh.f32 %v14074_v46 }
0x15b6   : > { %5695 = vrot.lane.b32.xlu0 %v10813_v12, %s11113_s27  ;;  %v10815_v22 = vpop.eup %10814  ;;  %10834 = vtanh.f32 %v14079_v61  ;;  %v15331_v12 = vld [vmem:[#allocation52_spill] sm:$0xff] }
0x15b7   : > { %v10817_v21 = vpop.eup %10816  ;;  %10836 = vtanh.f32 %v14083_v36 }
0x15b8   : > { %v10819_v38 = vpop.eup %10818  ;;  %10838 = vtanh.f32 %v14094_v17 }
0x15b9   : > { %5709 = vrot.lane.b32.xlu1 %v10819_v38, %s11113_s27  ;;  %v10821_v4 = vpop.eup %10820  ;;  %10840 = vtanh.f32 %v14100_v43  ;;  %v9094_v38 = vmul.f32 -1.442695, %v14033_v25 }
0x15ba   : > { %5699 = vrot.lane.b32.xlu0 %v10815_v22, %s11113_s27  ;;  %v10823_v26 = vpop.eup %10822  ;;  %v9092_v22 = vmul.f32 -1.442695, %v14030_v41 }
0x15bb   : > { %v10825_v7 = vpop.eup %10824 }
0x15bc   : > { %v10827_v44 = vpop.eup %10826 }
0x15bd   : > { %5693 = vrot.lane.b32.xlu1 %v10825_v7, %s11113_s27  ;;  %v10829_v29 = vpop.eup %10828  ;;  %v9084_v7 = vmul.f32 -1.442695, %v14061_v0  ;;  %v9088_v0 = vmul.f32 -1.442695, %v14079_v61 }
0x15be   : > { %5703 = vrot.lane.b32.xlu0 %v10817_v21, %s11113_s27  ;;  %v10831_v58 = vpop.eup %10830  ;;  %v9097_v21 = vmul.f32 -1.442695, %v14038_v55 }
0x15bf   : > { %v10833_v42 = vpop.eup %10832 }
0x15c0   : > { %v10835_v19 = vpop.eup %10834 }
0x15c1   : > { %5697 = vrot.lane.b32.xlu1 %v10829_v29, %s11113_s27  ;;  %v10837_v59 = vpop.eup %10836 }
0x15c2   : > { %5707 = vrot.lane.b32.xlu0 %v10821_v4, %s11113_s27  ;;  %v10839_v32 = vpop.eup %10838 }
0x15c5   : > { %5701 = vrot.lane.b32.xlu1 %v10833_v42, %s11113_s27 }
0x15c6   : > { %5679 = vrot.lane.b32.xlu0 %v10823_v26, %s11113_s27 }
0x15c9   : > { %5705 = vrot.lane.b32.xlu1 %v10837_v59, %s11113_s27 }
0x15ca   : > { %5275 = vrot.lane.b32.xlu0 %v13862_v13, %s11114_s14  ;;  %v5446_v13 = vrot.slane %v14023_v62, 6  ;;  %v15328_v62 = vld [vmem:[#allocation48_spill] sm:$0xff] }
0x15cc   : > { %v14106_v34 = vadd.f32 %v5446_v13, %v11406_v47  ;;  %v10841_v47 = vpop.eup %10840 }
0x15cd   : > { %5681 = vrot.lane.b32.xlu1 %v10839_v32, %s11113_s27 }
0x15ce   : > { %5683 = vrot.lane.b32.xlu0 %v10827_v44, %s11113_s27  ;;  %10842 = vtanh.f32 %v14106_v34  ;;  %v9091_v44 = vmul.f32 -1.442695, %v14065_v1  ;;  %v9095_v1 = vmul.f32 -1.442695, %v14083_v36 }
0x15cf   : > { %10844 = vpow2.f32 %v9090_v16 }
0x15d0   : > { %10846 = vpow2.f32 %v9092_v22 }
0x15d1   : > { %5685 = vrot.lane.b32.xlu1 %v10841_v47, %s11113_s27  ;;  %10848 = vpow2.f32 %v9097_v21 }
0x15d2   : > { %5687 = vrot.lane.b32.xlu0 %v10831_v58, %s11113_s27  ;;  %10850 = vpow2.f32 %v9094_v38  ;;  %v9085_v38 = vmul.f32 -1.442695, %v14100_v43 }
0x15d6   : > { %5691 = vrot.lane.b32.xlu0 %v10835_v19, %s11113_s27 }
0x15d8   : > { %v10843_v31 = vpop.eup %10842 }
0x15d9   : > { %5689 = vrot.lane.b32.xlu1 %v10843_v31, %s11113_s27  ;;  %v10845_v45 = vpop.eup %10844 }
0x15da   : > { %1238 = vrot.lane.b32.xlu0 %v15325_v37, %s11114_s14  ;;  %v5543_v4 = vadd.f32 1.0, %v10845_v45  ;;  %v10847_v40 = vpop.eup %10846 }
0x15db   : > { %v10849_v20 = vpop.eup %10848  ;;  %v5545_v33 = vadd.f32 1.0, %v10847_v40 }
0x15dc   : > { %10852 = vrcp.f32 %v5543_v4  ;;  %v10851_v2 = vpop.eup %10850  ;;  %v5550_v41 = vadd.f32 1.0, %v10849_v20  ;;  %v9087_v20 = vmul.f32 -1.442695, %v14106_v34 }
0x15dd   : > { %1917 = vrot.lane.b32.xlu1 %v15328_v62, %s11114_s14  ;;  %v5547_v25 = vadd.f32 1.0, %v10851_v2 }
0x15de   : > { %2589 = vrot.lane.b32.xlu0 %v15326_v3, %s11114_s14 }
0x15e1   : > { %3261 = vrot.lane.b32.xlu1 %v15330_v50, %s11114_s14 }
0x15e2   : > { %3933 = vrot.lane.b32.xlu0 %v15327_v60, %s11114_s14 }
0x15e5   : > { %4605 = vrot.lane.b32.xlu1 %v13500_v27, %s11114_s14  ;;  %v9096_v27 = vmul.f32 -1.442695, %v14041_v6 }
0x15e6   : > { %5277 = vrot.lane.b32.xlu0 %v13846_v39, %s11114_s14  ;;  %v15333_v39 = vld [vmem:[#allocation68_spill] sm:$0xff]  ;;  %v14143_v55 = vpop.eup %10852 }
0x15e7   : > { %10854 = vpow2.f32 %v9096_v27 }
0x15e8   : > { %10856 = vpow2.f32 %v9082_v35 }
0x15e9   : > { %1919 = vrot.lane.b32.xlu1 %v15332_v63, %s11114_s14  ;;  %10858 = vrcp.f32 %v5545_v33  ;;  %v9083_v63 = vmul.f32 -1.442695, %v14094_v17 }
0x15ea   : > { %1240 = vrot.lane.b32.xlu0 %v15329_v49, %s11114_s14  ;;  %10860 = vrcp.f32 %v5550_v41 }
0x15eb   : > { %10862 = vrcp.f32 %v5547_v25 }
0x15ec   : > { %10864 = vpow2.f32 %v9089_v51 }
0x15ed   : > { %3263 = vrot.lane.b32.xlu1 %v15333_v39, %s11114_s14  ;;  %10866 = vpow2.f32 %v9084_v7 }
0x15ee   : > { %2591 = vrot.lane.b32.xlu0 %v15331_v12, %s11114_s14 }
0x15f1   : > { %v10855_v28 = vpop.eup %10854 }
0x15f2   : > { %v5549_v9 = vadd.f32 1.0, %v10855_v28  ;;  %v10857_v29 = vpop.eup %10856 }
0x15f3   : > { %v14152_v58 = vpop.eup %10858  ;;  %v5535_v19 = vadd.f32 1.0, %v10857_v29 }
0x15f4   : > { %10868 = vrcp.f32 %v5549_v9  ;;  %v14156_v59 = vpop.eup %10860 }
0x15f5   : > { %10870 = vpow2.f32 %v9091_v44  ;;  %v14160_v48 = vpop.eup %10862 }
0x15f6   : > { %10872 = vpow2.f32 %v9086_v56  ;;  %v10865_v37 = vpop.eup %10864 }
0x15f7   : > { %10874 = vpow2.f32 %v9093_v5  ;;  %v10867_v61 = vpop.eup %10866  ;;  %v5542_v36 = vadd.f32 1.0, %v10865_v37 }
0x15f8   : > { %10876 = vpow2.f32 %v9088_v0  ;;  %v5537_v50 = vadd.f32 1.0, %v10867_v61 }
0x15f9   : > { %10878 = vrcp.f32 %v5535_v19 }
0x15fa   : > { %10880 = vpow2.f32 %v9095_v1 }
0x15fb   : > { %10882 = vrcp.f32 %v5542_v36 }
0x15fc   : > { %10884 = vrcp.f32 %v5537_v50 }
0x15fd   : > { %10886 = vpow2.f32 %v9083_v63  ;;  %v15335_v63 = vld [vmem:[#allocation67_spill] sm:$0xff] }
0x15fe   : > { %v14165_v60 = vpop.eup %10868 }
0x15ff   : > { %v10871_v62 = vpop.eup %10870 }
0x1600   : > { %v10873_v12 = vpop.eup %10872  ;;  %v5544_v39 = vadd.f32 1.0, %v10871_v62 }
0x1601   : > { %v10875_v16 = vpop.eup %10874  ;;  %v5539_v22 = vadd.f32 1.0, %v10873_v12 }
0x1602   : > { %v10877_v21 = vpop.eup %10876  ;;  %10888 = vrcp.f32 %v5544_v39  ;;  %v5546_v27 = vadd.f32 1.0, %v10875_v16 }
0x1603   : > { %v14171_v45 = vpop.eup %10878  ;;  %10890 = vrcp.f32 %v5539_v22  ;;  %v5541_v17 = vadd.f32 1.0, %v10877_v21  ;;  %v15336_v22 = vld [vmem:[#allocation22_spill] sm:$0xff] }
0x1604   : > { %v10881_v35 = vpop.eup %10880  ;;  %10892 = vpow2.f32 %v9085_v38 }
0x1605   : > { %10894 = vrcp.f32 %v5546_v27  ;;  %v5548_v2 = vadd.f32 1.0, %v10881_v35  ;;  %v14178_v43 = vpop.eup %10882  ;;  %v15337_v27 = vld [vmem:[#allocation51_spill] sm:$0xff] }
0x1606   : > { %10896 = vrcp.f32 %v5541_v17  ;;  %v14182_v25 = vpop.eup %10884 }
0x1607   : > { %10898 = vpow2.f32 %v9087_v20 }
0x1608   : > { %10900 = vrcp.f32 %v5548_v2 }
0x1628   : > { %v5696_v26 = vpop.permute.xlu0 %5695 }
0x1629   : > { %v5735_v6 = vmul.f32 %v14143_v55, %v5696_v26  ;;  %v15334_v26 = vld [vmem:[#allocation33_spill] sm:$0xff] }
0x162b   : > { %5775 = vrot.lane.b32.xlu0 %v5735_v6, %s11114_s14  ;;  %v5710_v3 = vpop.permute.xlu1 %5709  ;;  %v10887_v6 = vpop.eup %10886 }
0x162c   : > { %v5700_v13 = vpop.permute.xlu0 %5699  ;;  %v5742_v47 = vmul.f32 %v14156_v59, %v5710_v3  ;;  %v14187_v7 = vpop.eup %10888  ;;  %v5536_v5 = vadd.f32 1.0, %v10887_v6  ;;  %v15340_v6 = vld [vmem:[#allocation27_spill] sm:$0xff] }
0x162d   : > { %v5737_v42 = vmul.f32 %v14152_v58, %v5700_v13  ;;  %v14190_v44 = vpop.eup %10890 }
0x162e   : > { %5789 = vrot.lane.b32.xlu1 %v5742_v47, %s11114_s14  ;;  %v10893_v13 = vpop.eup %10892  ;;  %10902 = vrcp.f32 %v5536_v5 }
0x162f   : > { %5779 = vrot.lane.b32.xlu0 %v5737_v42, %s11114_s14  ;;  %v5694_v41 = vpop.permute.xlu1 %5693  ;;  %v14195_v42 = vpop.eup %10894 }
0x1630   : > { %v5704_v46 = vpop.permute.xlu0 %5703  ;;  %v5734_v28 = vmul.f32 %v14178_v43, %v5694_v41  ;;  %v14198_v1 = vpop.eup %10896 }
0x1631   : > { %v5739_v32 = vmul.f32 %v14160_v48, %v5704_v46  ;;  %v10899_v3 = vpop.eup %10898 }
0x1632   : > { %5773 = vrot.lane.b32.xlu1 %v5734_v28, %s11114_s14  ;;  %v14203_v47 = vpop.eup %10900 }
0x1633   : > { %5783 = vrot.lane.b32.xlu0 %v5739_v32, %s11114_s14  ;;  %v5698_v9 = vpop.permute.xlu1 %5697  ;;  %v5538_v32 = vadd.f32 1.0, %v10893_v13  ;;  %v15345_v13 = vld [vmem:[#allocation40_spill] sm:$0xff] }
0x1634   : > { %v5708_v31 = vpop.permute.xlu0 %5707  ;;  %v5736_v56 = vmul.f32 %v14187_v7, %v5698_v9  ;;  %v15341_v9 = vld [vmem:[#allocation70_spill] sm:$0xff] }
0x1635   : > { %v5741_v49 = vmul.f32 %v14165_v60, %v5708_v31  ;;  %10904 = vrcp.f32 %v5538_v32 }
0x1636   : > { %5777 = vrot.lane.b32.xlu1 %v5736_v56, %s11114_s14 }
0x1637   : > { %5787 = vrot.lane.b32.xlu0 %v5741_v49, %s11114_s14  ;;  %v5702_v19 = vpop.permute.xlu1 %5701  ;;  %v5540_v49 = vadd.f32 1.0, %v10899_v3 }
0x1638   : > { %v5680_v4 = vpop.permute.xlu0 %5679  ;;  %v5738_v46 = vmul.f32 %v14195_v42, %v5702_v19  ;;  %v14214_v39 = vpop.eup %10902  ;;  %v15346_v19 = vld [vmem:[#allocation69_spill] sm:$0xff] }
0x1639   : > { %v5727_v40 = vmul.f32 %v14171_v45, %v5680_v4  ;;  %10906 = vrcp.f32 %v5540_v49  ;;  %v5627_v49 = vrot.slane %v13727_v54, 7 }
0x163a   : > { %5781 = vrot.lane.b32.xlu1 %v5738_v46, %s11114_s14  ;;  %v15347_v46 = vld [vmem:[#allocation15_spill] sm:$0xff] }
0x163b   : > { %5759 = vrot.lane.b32.xlu0 %v5727_v40, %s11114_s14  ;;  %v5706_v36 = vpop.permute.xlu1 %5705 }
0x163c   : > { %v5276_v33 = vpop.permute.xlu0 %5275  ;;  %v5740_v31 = vmul.f32 %v14203_v47, %v5706_v36  ;;  %v5625_v36 = vrot.slane %v13717_v14, 7 }
0x163d   : > { %5318 = vst.msk [vmem:[#allocation2 + $0x30] sm:$0x40] %vm5311_vm14, %v5276_v33  ;;  %v15338_v33 = vld [vmem:[#allocation86_spill] sm:$0xff] }
0x163e   : > { %5785 = vrot.lane.b32.xlu1 %v5740_v31, %s11114_s14  ;;  %v5657_v31 = vmul.f32 %v14152_v58, %v5625_v36 }
0x163f   : > { %3935 = vrot.lane.b32.xlu0 %v15334_v26, %s11114_s14  ;;  %v5682_v50 = vpop.permute.xlu1 %5681 }
0x1640   : > { %v5684_v51 = vpop.permute.xlu0 %5683  ;;  %v5728_v21 = vmul.f32 %v14214_v39, %v5682_v50 }
0x1641   : > { %v5729_v34 = vmul.f32 %v14182_v25, %v5684_v51  ;;  %v15339_v51 = vld [vmem:[#allocation42_spill] sm:$0xff] }
0x1642   : > { %4607 = vrot.lane.b32.xlu1 %v15335_v63, %s11114_s14  ;;  %v5630_v63 = vrot.slane %v13762_v24, 7  ;;  %v15348_v24 = vld [vmem:[#allocation108_spill] sm:$0xff] }
0x1643   : > { %5763 = vrot.lane.b32.xlu0 %v5729_v34, %s11114_s14  ;;  %v5686_v16 = vpop.permute.xlu1 %5685 }
0x1644   : > { %v5688_v29 = vpop.permute.xlu0 %5687 }
0x1645   : > { %v5731_v0 = vmul.f32 %v14190_v44, %v5688_v29  ;;  %v15343_v29 = vld [vmem:[#allocation84_spill] sm:$0xff] }
0x1646   : > { %5761 = vrot.lane.b32.xlu1 %v5728_v21, %s11114_s14  ;;  %v5662_v21 = vmul.f32 %v14156_v59, %v5630_v63 }
0x1647   : > { %5767 = vrot.lane.b32.xlu0 %v5731_v0, %s11114_s14  ;;  %v15344_v0 = vld [vmem:[#allocation87_spill] sm:$0xff] }
0x1648   : > { %v5692_v37 = vpop.permute.xlu0 %5691 }
0x1649   : > { %v5733_v61 = vmul.f32 %v14198_v1, %v5692_v37  ;;  %v5623_v37 = vrot.slane %v13756_v23, 7 }
0x164b   : > { %5771 = vrot.lane.b32.xlu0 %v5733_v61, %s11114_s14  ;;  %v5690_v4 = vpop.permute.xlu1 %5689  ;;  %v5655_v32 = vmul.f32 %v14143_v55, %v5623_v37  ;;  %v15352_v37 = vld [vmem:[#allocation100_spill] sm:$0xff] }
0x164c   : > { %v1239_v62 = vpop.permute.xlu0 %1238 }
0x164d   : > { %1280 = vst.msk [vmem:[#allocation2 + $0x38] sm:$0x1] %vm1272_vm8, %v1239_v62 }
0x164f   : > { %5279 = vrot.lane.b32.xlu0 %v13813_v57, %s11114_s14  ;;  %v14221_v57 = vpop.eup %10904  ;;  %v1918_v20 = vpop.permute.xlu1 %1917 }
0x1650   : > { %v2590_v12 = vpop.permute.xlu0 %2589  ;;  %v5730_v40 = vmul.f32 %v14221_v57, %v5686_v16  ;;  %v14228_v17 = vpop.eup %10906  ;;  %1959 = vst.msk [vmem:[#allocation2 + $0x38] sm:$0x2] %vm1951_vm9, %v1918_v20  ;;  %v5659_v16 = vmul.f32 %v14160_v48, %v5627_v49 }
0x1651   : > { %2631 = vst.msk [vmem:[#allocation2 + $0x38] sm:$0x4] %vm2623_vm10, %v2590_v12  ;;  %v5732_v2 = vmul.f32 %v14228_v17, %v5690_v4 }
0x1652   : > { %5765 = vrot.lane.b32.xlu1 %v5730_v40, %s11114_s14 }
0x1653   : > { %1242 = vrot.lane.b32.xlu0 %v15336_v22, %s11114_s14  ;;  %v3262_v26 = vpop.permute.xlu1 %3261  ;;  %v5629_v22 = vrot.slane %v13798_v15, 7 }
0x1654   : > { %v3934_v38 = vpop.permute.xlu0 %3933  ;;  %3303 = vst.msk [vmem:[#allocation2 + $0x38] sm:$0x8] %vm3295_vm11, %v3262_v26 }
0x1655   : > { %3975 = vst.msk [vmem:[#allocation2 + $0x38] sm:$0x10] %vm3967_vm12, %v3934_v38  ;;  %v5661_v54 = vmul.f32 %v14165_v60, %v5629_v22 }
0x1656   : > { %5769 = vrot.lane.b32.xlu1 %v5732_v2, %s11114_s14 }
0x1657   : > { %2593 = vrot.lane.b32.xlu0 %v15337_v27, %s11114_s14  ;;  %v4606_v34 = vpop.permute.xlu1 %4605 }
0x1658   : > { %v5278_v35 = vpop.permute.xlu0 %5277  ;;  %4647 = vst.msk [vmem:[#allocation2 + $0x38] sm:$0x20] %vm4639_vm13, %v4606_v34 }
0x1659   : > { %5319 = vst.msk [vmem:[#allocation2 + $0x38] sm:$0x40] %vm5311_vm14, %v5278_v35  ;;  %v5615_v35 = vrot.slane %v15348_v24, 7 }
0x165a   : > { %1921 = vrot.lane.b32.xlu1 %v15339_v51, %s11114_s14 }
0x165b   : > { %3937 = vrot.lane.b32.xlu0 %v15338_v33, %s11114_s14  ;;  %v1920_v56 = vpop.permute.xlu1 %1919  ;;  %v5647_v33 = vmul.f32 %v14171_v45, %v5615_v35 }
0x165c   : > { %v1241_v41 = vpop.permute.xlu0 %1240  ;;  %1960 = vst.msk [vmem:[#allocation2 + $0x40] sm:$0x2] %vm1951_vm9, %v1920_v56 }
0x165d   : > { %1281 = vst.msk [vmem:[#allocation2 + $0x40] sm:$0x1] %vm1272_vm8, %v1241_v41 }
0x165e   : > { %3265 = vrot.lane.b32.xlu1 %v15341_v9, %s11114_s14 }
0x165f   : > { %5281 = vrot.lane.b32.xlu0 %v13816_v30, %s11114_s14  ;;  %v15342_v30 = vld [vmem:[#allocation59_spill] sm:$0xff]  ;;  %v3264_v5 = vpop.permute.xlu1 %3263 }
0x1660   : > { %v2592_v28 = vpop.permute.xlu0 %2591  ;;  %3304 = vst.msk [vmem:[#allocation2 + $0x40] sm:$0x8] %vm3295_vm11, %v3264_v5 }
0x1661   : > { %2632 = vst.msk [vmem:[#allocation2 + $0x40] sm:$0x4] %vm2623_vm10, %v2592_v28  ;;  %v15349_v28 = vld [vmem:[#allocation111_spill] sm:$0xff] }
0x1662   : > { %4609 = vrot.lane.b32.xlu1 %v15343_v29, %s11114_s14  ;;  %v5622_v51 = vrot.slane %v15349_v28, 7 }
0x1663   : > { %1244 = vrot.lane.b32.xlu0 %v15340_v6, %s11114_s14  ;;  %v15350_v6 = vld [vmem:[#allocation109_spill] sm:$0xff] }
0x1664   : > { %v5617_v9 = vrot.slane %v15350_v6, 7 }
0x1666   : > { %1923 = vrot.lane.b32.xlu1 %v15345_v13, %s11114_s14  ;;  %v5649_v5 = vmul.f32 %v14182_v25, %v5617_v9 }
0x1667   : > { %2595 = vrot.lane.b32.xlu0 %v15342_v30, %s11114_s14  ;;  %v5654_v30 = vmul.f32 %v14178_v43, %v5622_v51  ;;  %v15356_v51 = vld [vmem:[#allocation113_spill] sm:$0xff] }
0x166a   : > { %3267 = vrot.lane.b32.xlu1 %v15346_v19, %s11114_s14 }
0x166b   : > { %3939 = vrot.lane.b32.xlu0 %v15344_v0, %s11114_s14  ;;  %v15351_v0 = vld [vmem:[#allocation106_spill] sm:$0xff] }
0x166c   : > { %v5624_v13 = vrot.slane %v15351_v0, 7 }
0x166e   : > { %4611 = vrot.lane.b32.xlu1 %v15347_v46, %s11114_s14 }
0x169d   : > { %v5776_v61 = vpop.permute.xlu0 %5775 }
0x169e   : > { %v5815_v3 = vadd.f32 %v5776_v61, %v5655_v32  ;;  %v5619_v32 = vrot.slane %v15352_v37, 7 }
0x16a0   : > { %10908 = vtanh.f32 %v5815_v3  ;;  %v5790_v38 = vpop.permute.xlu1 %5789  ;;  %v5656_v3 = vmul.f32 %v14187_v7, %v5624_v13 }
0x16a1   : > { %v5780_v62 = vpop.permute.xlu0 %5779  ;;  %v5822_v4 = vadd.f32 %v5790_v38, %v5662_v21 }
0x16a2   : > { %v5817_v50 = vadd.f32 %v5780_v62, %v5657_v31  ;;  %v5651_v31 = vmul.f32 %v14190_v44, %v5619_v32  ;;  %v15353_v62 = vld [vmem:[#allocation107_spill] sm:$0xff] }
0x16a3   : > { %v5626_v49 = vrot.slane %v15353_v62, 7 }
0x16a4   : > { %10910 = vtanh.f32 %v5817_v50  ;;  %v5774_v29 = vpop.permute.xlu1 %5773 }
0x16a5   : > { %v5784_v23 = vpop.permute.xlu0 %5783  ;;  %v5814_v19 = vadd.f32 %v5774_v29, %v5654_v30  ;;  %v5658_v21 = vmul.f32 %v14195_v42, %v5626_v49  ;;  %v15357_v29 = vld [vmem:[#allocation50_spill] sm:$0xff] }
0x16a6   : > { %v5819_v14 = vadd.f32 %v5784_v23, %v5659_v16  ;;  %v15354_v16 = vld [vmem:[#allocation110_spill] sm:$0xff] }
0x16a7   : > { %v5621_v23 = vrot.slane %v15354_v16, 7  ;;  %v15359_v49 = vld [vmem:[#allocation26_spill] sm:$0xff] }
0x16a8   : > { %10912 = vtanh.f32 %v5819_v14  ;;  %v5778_v36 = vpop.permute.xlu1 %5777  ;;  %v15360_v16 = vld [vmem:[#allocation54_spill] sm:$0xff] }
0x16a9   : > { %v5788_v27 = vpop.permute.xlu0 %5787  ;;  %10914 = vtanh.f32 %v5822_v4  ;;  %v5816_v50 = vadd.f32 %v5778_v36, %v5656_v3  ;;  %v5653_v38 = vmul.f32 %v14198_v1, %v5621_v23  ;;  %v15355_v4 = vld [vmem:[#allocation112_spill] sm:$0xff] }
0x16aa   : > { %v10909_v12 = vpop.eup %10908  ;;  %v5821_v40 = vadd.f32 %v5788_v27, %v5661_v54  ;;  %v5628_v54 = vrot.slane %v15355_v4, 7 }
0x16ab   : > { %5871 = vrot.lane.b32.xlu0 %v10909_v12, %s11113_s27 }
0x16ac   : > { %10916 = vtanh.f32 %v5821_v40  ;;  %v5782_v14 = vpop.permute.xlu1 %5781  ;;  %v5660_v35 = vmul.f32 %v14203_v47, %v5628_v54 }
0x16ad   : > { %v5760_v15 = vpop.permute.xlu0 %5759  ;;  %v5818_v27 = vadd.f32 %v5782_v14, %v5658_v21  ;;  %v15361_v14 = vld [vmem:[#allocation90_spill] sm:$0xff] }
0x16ae   : > { %v10911_v20 = vpop.eup %10910  ;;  %v5807_v2 = vadd.f32 %v5760_v15, %v5647_v33 }
0x16af   : > { %5875 = vrot.lane.b32.xlu0 %v10911_v20, %s11113_s27 }
0x16b0   : > { %10918 = vtanh.f32 %v5807_v2  ;;  %v5786_v20 = vpop.permute.xlu1 %5785 }
0x16b1   : > { %v3936_v34 = vpop.permute.xlu0 %3935  ;;  %10920 = vtanh.f32 %v5814_v19  ;;  %v5820_v15 = vadd.f32 %v5786_v20, %v5660_v35  ;;  %v15362_v35 = vld [vmem:[#allocation28_spill] sm:$0xff] }
0x16b2   : > { %v10913_v41 = vpop.eup %10912  ;;  %3976 = vst.msk [vmem:[#allocation2 + $0x40] sm:$0x10] %vm3967_vm12, %v3936_v34  ;;  %v5616_v34 = vrot.slane %v15356_v51, 7  ;;  %v15368_v51 = vld [vmem:[#allocation44_spill] sm:$0xff] }
0x16b3   : > { %5879 = vrot.lane.b32.xlu0 %v10913_v41, %s11113_s27  ;;  %v10915_v26 = vpop.eup %10914 }
0x16b4   : > { %5885 = vrot.lane.b32.xlu1 %v10915_v26, %s11113_s27  ;;  %v4608_v26 = vpop.permute.xlu1 %4607  ;;  %v5648_v9 = vmul.f32 %v14214_v39, %v5616_v34  ;;  %v15369_v34 = vld [vmem:[#allocation29_spill] sm:$0xff] }
0x16b5   : > { %v5764_v46 = vpop.permute.xlu0 %5763  ;;  %4648 = vst.msk [vmem:[#allocation2 + $0x40] sm:$0x20] %vm4639_vm13, %v4608_v26 }
0x16b6   : > { %v10917_v56 = vpop.eup %10916  ;;  %v5809_v61 = vadd.f32 %v5764_v46, %v5649_v5  ;;  %v5618_v5 = vrot.slane %v15357_v29, 7  ;;  %v15376_v29 = vld [vmem:[#allocation31_spill] sm:$0xff] }
0x16b7   : > { %5883 = vrot.lane.b32.xlu0 %v10917_v56, %s11113_s27 }
0x16b8   : > { %10922 = vtanh.f32 %v5809_v61  ;;  %v5762_v56 = vpop.permute.xlu1 %5761  ;;  %v5650_v46 = vmul.f32 %v14221_v57, %v5618_v5  ;;  %v15358_v61 = vld [vmem:[#allocation16_spill] sm:$0xff]  ;;  %v15377_v5 = vld [vmem:[#allocation103_spill] sm:$0xff] }
0x16b9   : > { %v5768_v12 = vpop.permute.xlu0 %5767  ;;  %10924 = vtanh.f32 %v5816_v50  ;;  %v5808_v0 = vadd.f32 %v5762_v56, %v5648_v9  ;;  %v5620_v3 = vrot.slane %v15358_v61, 7  ;;  %v15372_v9 = vld [vmem:[#allocation102_spill] sm:$0xff]  ;;  %v15373_v56 = vld [vmem:[#allocation96_spill] sm:$0xff]  ;;  %v15385_v61 = vld [vmem:[#allocation99_spill] sm:$0xff] }
0x16ba   : > { %v10919_v63 = vpop.eup %10918  ;;  %v5811_v22 = vadd.f32 %v5768_v12, %v5651_v31 }
0x16bb   : > { %5855 = vrot.lane.b32.xlu0 %v10919_v63, %s11113_s27  ;;  %v10921_v33 = vpop.eup %10920  ;;  %v5652_v62 = vmul.f32 %v14228_v17, %v5620_v3 }
0x16bc   : > { %10926 = vtanh.f32 %v5811_v22  ;;  %5869 = vrot.lane.b32.xlu1 %v10921_v33, %s11113_s27  ;;  %v15363_v33 = vld [vmem:[#allocation43_spill] sm:$0xff] }
0x16bd   : > { %v5772_v40 = vpop.permute.xlu0 %5771  ;;  %10928 = vtanh.f32 %v5818_v27 }
0x16be   : > { %v5813_v24 = vadd.f32 %v5772_v40, %v5653_v38 }
0x16bf   : > { %5283 = vrot.lane.b32.xlu0 %v13820_v11, %s11114_s14 }
0x16c0   : > { %10930 = vtanh.f32 %v5813_v24 }
0x16c1   : > { %v5280_v2 = vpop.permute.xlu0 %5279  ;;  %10932 = vtanh.f32 %v5820_v15 }
0x16c2   : > { %v10923_v41 = vpop.eup %10922  ;;  %5320 = vst.msk [vmem:[#allocation2 + $0x40] sm:$0x40] %vm5311_vm14, %v5280_v2  ;;  %10934 = vtanh.f32 %v5808_v0  ;;  %v15365_v2 = vld [vmem:[#allocation74_spill] sm:$0xff]  ;;  %v15378_v0 = vld [vmem:[#allocation63_spill] sm:$0xff] }
0x16c3   : > { %5859 = vrot.lane.b32.xlu0 %v10923_v41, %s11113_s27  ;;  %v10925_v28 = vpop.eup %10924  ;;  %v15366_v41 = vld [vmem:[#allocation98_spill] sm:$0xff] }
0x16c4   : > { %5873 = vrot.lane.b32.xlu1 %v10925_v28, %s11113_s27  ;;  %v5766_v37 = vpop.permute.xlu1 %5765  ;;  %v15367_v28 = vld [vmem:[#allocation101_spill] sm:$0xff] }
0x16c5   : > { %v1243_v11 = vpop.permute.xlu0 %1242  ;;  %v5810_v36 = vadd.f32 %v5766_v37, %v5650_v46  ;;  %v15382_v46 = vld [vmem:[#allocation104_spill] sm:$0xff] }
0x16c6   : > { %v10927_v6 = vpop.eup %10926  ;;  %1282 = vst.msk [vmem:[#allocation2 + $0x48] sm:$0x1] %vm1272_vm8, %v1243_v11  ;;  %v15370_v11 = vld [vmem:[#allocation71_spill] sm:$0xff]  ;;  %v15383_v37 = vld [vmem:[#allocation32_spill] sm:$0xff] }
0x16c7   : > { %5863 = vrot.lane.b32.xlu0 %v10927_v6, %s11113_s27  ;;  %v10929_v30 = vpop.eup %10928  ;;  %10936 = vtanh.f32 %v5810_v36  ;;  %v15371_v6 = vld [vmem:[#allocation64_spill] sm:$0xff] }
0x16c8   : > { %5877 = vrot.lane.b32.xlu1 %v10929_v30, %s11113_s27  ;;  %v5770_v50 = vpop.permute.xlu1 %5769  ;;  %v15375_v30 = vld [vmem:[#allocation79_spill] sm:$0xff] }
0x16c9   : > { %v2594_v13 = vpop.permute.xlu0 %2593  ;;  %v5812_v12 = vadd.f32 %v5770_v50, %v5652_v62 }
0x16ca   : > { %v10931_v19 = vpop.eup %10930  ;;  %2633 = vst.msk [vmem:[#allocation2 + $0x48] sm:$0x4] %vm2623_vm10, %v2594_v13  ;;  %v15379_v13 = vld [vmem:[#allocation47_spill] sm:$0xff] }
0x16cb   : > { %5867 = vrot.lane.b32.xlu0 %v10931_v19, %s11113_s27  ;;  %v10933_v32 = vpop.eup %10932  ;;  %10938 = vtanh.f32 %v5812_v12  ;;  %v15380_v19 = vld [vmem:[#allocation95_spill] sm:$0xff] }
0x16cc   : > { %5881 = vrot.lane.b32.xlu1 %v10933_v32, %s11113_s27  ;;  %v1922_v23 = vpop.permute.xlu1 %1921  ;;  %v10935_v22 = vpop.eup %10934  ;;  %v15384_v32 = vld [vmem:[#allocation66_spill] sm:$0xff] }
0x16cd   : > { %v3938_v31 = vpop.permute.xlu0 %3937  ;;  %1961 = vst.msk [vmem:[#allocation2 + $0x48] sm:$0x2] %vm1951_vm9, %v1922_v23 }
0x16ce   : > { %3977 = vst.msk [vmem:[#allocation2 + $0x48] sm:$0x10] %vm3967_vm12, %v3938_v31 }
0x16cf   : > { %1246 = vrot.lane.b32.xlu0 %v15359_v49, %s11114_s14 }
0x16d0   : > { %5857 = vrot.lane.b32.xlu1 %v10935_v22, %s11113_s27  ;;  %v3266_v38 = vpop.permute.xlu1 %3265 }
0x16d1   : > { %v5282_v63 = vpop.permute.xlu0 %5281  ;;  %v10937_v4 = vpop.eup %10936  ;;  %3305 = vst.msk [vmem:[#allocation2 + $0x48] sm:$0x8] %vm3295_vm11, %v3266_v38 }
0x16d2   : > { %5321 = vst.msk [vmem:[#allocation2 + $0x48] sm:$0x40] %vm5311_vm14, %v5282_v63 }
0x16d3   : > { %2597 = vrot.lane.b32.xlu0 %v15360_v16, %s11114_s14 }
0x16d4   : > { %5861 = vrot.lane.b32.xlu1 %v10937_v4, %s11113_s27  ;;  %v4610_v27 = vpop.permute.xlu1 %4609 }
0x16d5   : > { %v1245_v21 = vpop.permute.xlu0 %1244  ;;  %v10939_v40 = vpop.eup %10938  ;;  %4649 = vst.msk [vmem:[#allocation2 + $0x48] sm:$0x20] %vm4639_vm13, %v4610_v27 }
0x16d6   : > { %1283 = vst.msk [vmem:[#allocation2 + $0x50] sm:$0x1] %vm1272_vm8, %v1245_v21 }
0x16d7   : > { %3941 = vrot.lane.b32.xlu0 %v15361_v14, %s11114_s14 }
0x16d8   : > { %5865 = vrot.lane.b32.xlu1 %v10939_v40, %s11113_s27  ;;  %v1924_v20 = vpop.permute.xlu1 %1923  ;;  %v6017_v40 = vld [vmem:[%s14994_s4 + $0x8] sm:$0xff] }
0x16d9   : > { %v2596_v54 = vpop.permute.xlu0 %2595  ;;  %1962 = vst.msk [vmem:[#allocation2 + $0x50] sm:$0x2] %vm1951_vm9, %v1924_v20 }
0x16da   : > { %2634 = vst.msk [vmem:[#allocation2 + $0x50] sm:$0x4] %vm2623_vm10, %v2596_v54 }
0x16db   : > { %5285 = vrot.lane.b32.xlu0 %v13828_v52, %s11114_s14  ;;  %v15364_v52 = vld [vmem:[#allocation61_spill] sm:$0xff] }
0x16dc   : > { %1925 = vrot.lane.b32.xlu1 %v15363_v33, %s11114_s14  ;;  %v3268_v15 = vpop.permute.xlu1 %3267  ;;  %v6019_v33 = vld [vmem:[%s14994_s4 + $0x18] sm:$0xff] }
0x16dd   : > { %v3940_v24 = vpop.permute.xlu0 %3939  ;;  %3306 = vst.msk [vmem:[#allocation2 + $0x50] sm:$0x8] %vm3295_vm11, %v3268_v15 }
0x16de   : > { %3978 = vst.msk [vmem:[#allocation2 + $0x50] sm:$0x10] %vm3967_vm12, %v3940_v24 }
0x16df   : > { %1248 = vrot.lane.b32.xlu0 %v15362_v35, %s11114_s14 }
0x16e0   : > { %3269 = vrot.lane.b32.xlu1 %v15365_v2, %s11114_s14  ;;  %v4612_v26 = vpop.permute.xlu1 %4611 }
0x16e1   : > { %4650 = vst.msk [vmem:[#allocation2 + $0x50] sm:$0x20] %vm4639_vm13, %v4612_v26 }
0x16e3   : > { %2599 = vrot.lane.b32.xlu0 %v15364_v52, %s11114_s14 }
0x16e4   : > { %4613 = vrot.lane.b32.xlu1 %v15367_v28, %s11114_s14 }
0x16e7   : > { %3943 = vrot.lane.b32.xlu0 %v15366_v41, %s11114_s14  ;;  %v15386_v41 = vmov 0.0  }
0x16e8   : > { %1927 = vrot.lane.b32.xlu1 %v15368_v51, %s11114_s14 }
0x16eb   : > { %5287 = vrot.lane.b32.xlu0 %v13831_v18, %s11114_s14  ;;  %v15374_v18 = vld [vmem:[#allocation45_spill] sm:$0xff] }
0x16ec   : > { %3271 = vrot.lane.b32.xlu1 %v15370_v11, %s11114_s14 }
0x16ef   : > { %1250 = vrot.lane.b32.xlu0 %v15369_v34, %s11114_s14 }
0x16f0   : > { %4615 = vrot.lane.b32.xlu1 %v15372_v9, %s11114_s14 }
0x16f3   : > { %2601 = vrot.lane.b32.xlu0 %v15371_v6, %s11114_s14 }
0x16f4   : > { %1929 = vrot.lane.b32.xlu1 %v15374_v18, %s11114_s14 }
0x16f7   : > { %3945 = vrot.lane.b32.xlu0 %v15373_v56, %s11114_s14 }
0x16f8   : > { %3273 = vrot.lane.b32.xlu1 %v15375_v30, %s11114_s14 }
0x16fb   : > { %5289 = vrot.lane.b32.xlu0 %v13849_v53, %s11114_s14  ;;  %v15381_v53 = vld [vmem:[#allocation78_spill] sm:$0xff] }
0x16fc   : > { %4617 = vrot.lane.b32.xlu1 %v15377_v5, %s11114_s14 }
0x16ff   : > { %1252 = vrot.lane.b32.xlu0 %v15376_v29, %s11114_s14 }
0x1700   : > { %1931 = vrot.lane.b32.xlu1 %v15379_v13, %s11114_s14 }
0x1703   : > { %2603 = vrot.lane.b32.xlu0 %v15378_v0, %s11114_s14 }
0x1704   : > { %3275 = vrot.lane.b32.xlu1 %v15381_v53, %s11114_s14 }
0x1707   : > { %3947 = vrot.lane.b32.xlu0 %v15380_v19, %s11114_s14 }
0x1708   : > { %4619 = vrot.lane.b32.xlu1 %v15382_v46, %s11114_s14 }
0x170b   : > { %5291 = vrot.lane.b32.xlu0 %v13867_v8, %s11114_s14 }
0x170f   : > { %1254 = vrot.lane.b32.xlu0 %v15383_v37, %s11114_s14 }
0x1713   : > { %2605 = vrot.lane.b32.xlu0 %v15384_v32, %s11114_s14  ;;  %v15387_v32 = vld [vmem:[#allocation49_spill] sm:$0xff] }
0x1717   : > { %3949 = vrot.lane.b32.xlu0 %v15385_v61, %s11114_s14 }
0x171b   : > { %5293 = vrot.lane.b32.xlu0 %v13853_v10, %s11114_s14 }
0x171d   : > { %v5872_v3 = vpop.permute.xlu0 %5871 }
0x171e   : > { %v5911_v22 = vmul.f32 %v14143_v55, %v5872_v3  ;;  %v15388_v3 = vld [vmem:[#allocation83_spill] sm:$0xff] }
0x1721   : > { %v5876_v36 = vpop.permute.xlu0 %5875 }
0x1722   : > { %v5913_v4 = vmul.f32 %v14152_v58, %v5876_v36 }
0x1725   : > { %v5880_v31 = vpop.permute.xlu0 %5879 }
0x1726   : > { %v14393_v49 = vpop.permute.xlu1 %5885  ;;  %v5915_v35 = vmul.f32 %v14160_v48, %v5880_v31 }
0x1729   : > { %v14391_v62 = vpop.permute.xlu0 %5883 }
0x172d   : > { %v5856_v8 = vpop.permute.xlu0 %5855 }
0x172e   : > { %v5870_v12 = vpop.permute.xlu1 %5869  ;;  %v5903_v28 = vmul.f32 %v14171_v45, %v5856_v8  ;;  %v6237_v8 = vld [vmem:[%s14996_s6 + $0x8] sm:$0xff] }
0x172f   : > { %v5910_v63 = vmul.f32 %v14178_v43, %v5870_v12 }
0x1731   : > { %v5284_v50 = vpop.permute.xlu0 %5283  ;;  %5949 = vrot.lane.b32.xlu1 %v5910_v63, %s11114_s14 }
0x1732   : > { %5322 = vst.msk [vmem:[#allocation2 + $0x50] sm:$0x40] %vm5311_vm14, %v5284_v50  ;;  %v15389_v50 = vld [vmem:[#allocation105_spill] sm:$0xff] }
0x1735   : > { %v5860_v16 = vpop.permute.xlu0 %5859  ;;  %5951 = vrot.lane.b32.xlu1 %v5911_v22, %s11114_s14 }
0x1736   : > { %v5874_v23 = vpop.permute.xlu1 %5873  ;;  %v5905_v9 = vmul.f32 %v14182_v25, %v5860_v16  ;;  %v5918_v16 = vmul.f32 %v14156_v59, %v14393_v49 }
0x1737   : > { %v5912_v21 = vmul.f32 %v14187_v7, %v5874_v23  ;;  %v6016_v7 = vld [vmem:[%s14994_s4] sm:$0xff] }
0x1738   : > { %v9732_v58 = vpack.c.bf16 %v6017_v40, %v6016_v7 }
0x1739   : > { %v5864_v10 = vpop.permute.xlu0 %5863  ;;  %5953 = vrot.lane.b32.xlu1 %v5912_v21, %s11114_s14 }
0x173a   : > { %v5878_v38 = vpop.permute.xlu1 %5877  ;;  %9733 = vmatprep.subr.bf16.mxu0 %v9732_v58  ;;  %v5907_v25 = vmul.f32 %v14190_v44, %v5864_v10 }
0x173b   : > { %v5914_v55 = vmul.f32 %v14195_v42, %v5878_v38  ;;  %9735 = vmatpush3.bf16.msra.mxu0 %v9732_v58  ;;  %v6018_v42 = vld [vmem:[%s14994_s4 + $0x10] sm:$0xff] }
0x173c   : > { %v9736_v52 = vpack.c.bf16 %v6019_v33, %v6018_v42 }
0x173d   : > { %v14401_v14 = vpop.permute.xlu0 %5867  ;;  %5955 = vrot.lane.b32.xlu1 %v5913_v4, %s11114_s14 }
0x173e   : > { %v5882_v43 = vpop.permute.xlu1 %5881  ;;  %9737 = vmatprep.subr.bf16.mxu0 %v9736_v52  ;;  %v5909_v44 = vmul.f32 %v14198_v1, %v14401_v14 }
0x173f   : > { %v5916_v2 = vmul.f32 %v14203_v47, %v5882_v43  ;;  %9739 = vmatpush3.bf16.msra.mxu0 %v9736_v52 }
0x1740   : > { %9545 = vmatprep.subr.mxu0 %v15386_v41 }
0x1741   : > { %v1247_v54 = vpop.permute.xlu0 %1246  ;;  %5957 = vrot.lane.b32.xlu1 %v5914_v55, %s11114_s14 }
0x1742   : > { %1284 = vst.msk [vmem:[#allocation2 + $0x58] sm:$0x1] %vm1272_vm8, %v1247_v54  ;;  %v5858_v24 = vpop.permute.xlu1 %5857 }
0x1743   : > { %v5904_v47 = vmul.f32 %v14214_v39, %v5858_v24 }
0x1745   : > { %v2598_v27 = vpop.permute.xlu0 %2597  ;;  %5959 = vrot.lane.b32.xlu1 %v5915_v35, %s11114_s14 }
0x1746   : > { %2635 = vst.msk [vmem:[#allocation2 + $0x58] sm:$0x4] %vm2623_vm10, %v2598_v27  ;;  %v5862_v15 = vpop.permute.xlu1 %5861 }
0x1747   : > { %v5906_v39 = vmul.f32 %v14221_v57, %v5862_v15 }
0x1749   : > { %v3942_v20 = vpop.permute.xlu0 %3941  ;;  %5961 = vrot.lane.b32.xlu1 %v5916_v2, %s11114_s14 }
0x174a   : > { %3979 = vst.msk [vmem:[#allocation2 + $0x58] sm:$0x10] %vm3967_vm12, %v3942_v20  ;;  %v5866_v26 = vpop.permute.xlu1 %5865 }
0x174b   : > { %v5908_v57 = vmul.f32 %v14228_v17, %v5866_v26  ;;  %v5917_v17 = vmul.f32 %v14165_v60, %v14391_v62  ;;  %v6236_v62 = vld [vmem:[%s14996_s6] sm:$0xff] }
0x174c   : > { %v9740_v12 = vpack.c.bf16 %v6237_v8, %v6236_v62 }
0x174d   : > { %v5286_v48 = vpop.permute.xlu0 %5285  ;;  %5935 = vrot.lane.b32.xlu1 %v5903_v28, %s11114_s14 }
0x174e   : > { %5323 = vst.msk [vmem:[#allocation2 + $0x58] sm:$0x40] %vm5311_vm14, %v5286_v48  ;;  %v1926_v34 = vpop.permute.xlu1 %1925  ;;  %9741 = vmatprep.subr.bf16.mxu1 %v9740_v12 }
0x174f   : > { %1963 = vst.msk [vmem:[#allocation2 + $0x58] sm:$0x2] %vm1951_vm9, %v1926_v34  ;;  %9743 = vmatpush3.bf16.msra.mxu1 %v9740_v12 }
0x1751   : > { %v1249_v51 = vpop.permute.xlu0 %1248  ;;  %5937 = vrot.lane.b32.xlu1 %v5904_v47, %s11114_s14 }
0x1752   : > { %1285 = vst.msk [vmem:[#allocation2 + $0x60] sm:$0x1] %vm1272_vm8, %v1249_v51  ;;  %v3270_v6 = vpop.permute.xlu1 %3269 }
0x1753   : > { %3307 = vst.msk [vmem:[#allocation2 + $0x58] sm:$0x8] %vm3295_vm11, %v3270_v6 }
0x1755   : > { %v2600_v11 = vpop.permute.xlu0 %2599  ;;  %5939 = vrot.lane.b32.xlu1 %v5905_v9, %s11114_s14 }
0x1756   : > { %2636 = vst.msk [vmem:[#allocation2 + $0x60] sm:$0x4] %vm2623_vm10, %v2600_v11  ;;  %v4614_v56 = vpop.permute.xlu1 %4613 }
0x1757   : > { %4651 = vst.msk [vmem:[#allocation2 + $0x58] sm:$0x20] %vm4639_vm13, %v4614_v56 }
0x1759   : > { %v3944_v45 = vpop.permute.xlu0 %3943  ;;  %5941 = vrot.lane.b32.xlu1 %v5906_v39, %s11114_s14 }
0x175a   : > { %3980 = vst.msk [vmem:[#allocation2 + $0x60] sm:$0x10] %vm3967_vm12, %v3944_v45  ;;  %v1928_v30 = vpop.permute.xlu1 %1927 }
0x175b   : > { %1964 = vst.msk [vmem:[#allocation2 + $0x60] sm:$0x2] %vm1951_vm9, %v1928_v30 }
0x175d   : > { %v5288_v18 = vpop.permute.xlu0 %5287  ;;  %5943 = vrot.lane.b32.xlu1 %v5907_v25, %s11114_s14 }
0x175e   : > { %5324 = vst.msk [vmem:[#allocation2 + $0x60] sm:$0x40] %vm5311_vm14, %v5288_v18  ;;  %v3272_v5 = vpop.permute.xlu1 %3271 }
0x175f   : > { %3308 = vst.msk [vmem:[#allocation2 + $0x60] sm:$0x8] %vm3295_vm11, %v3272_v5 }
0x1761   : > { %v1251_v29 = vpop.permute.xlu0 %1250  ;;  %5945 = vrot.lane.b32.xlu1 %v5908_v57, %s11114_s14  ;;  %v6238_v57 = vld [vmem:[%s14996_s6 + $0x10] sm:$0xff] }
0x1762   : > { %1286 = vst.msk [vmem:[#allocation2 + $0x68] sm:$0x1] %vm1272_vm8, %v1251_v29  ;;  %v4616_v13 = vpop.permute.xlu1 %4615 }
0x1763   : > { %4652 = vst.msk [vmem:[#allocation2 + $0x60] sm:$0x20] %vm4639_vm13, %v4616_v13 }
0x1765   : > { %v2602_v0 = vpop.permute.xlu0 %2601  ;;  %5947 = vrot.lane.b32.xlu1 %v5909_v44, %s11114_s14  ;;  %v6240_v44 = vld [vmem:[%s14996_s6 + $0x20] sm:$0xff] }
0x1766   : > { %2637 = vst.msk [vmem:[#allocation2 + $0x68] sm:$0x4] %vm2623_vm10, %v2602_v0  ;;  %v1930_v53 = vpop.permute.xlu1 %1929  ;;  %v6239_v0 = vld [vmem:[%s14996_s6 + $0x18] sm:$0xff] }
0x1767   : > { %1965 = vst.msk [vmem:[#allocation2 + $0x68] sm:$0x2] %vm1951_vm9, %v1930_v53  ;;  %v9744_v13 = vpack.c.bf16 %v6239_v0, %v6238_v57 }
0x1769   : > { %v3946_v19 = vpop.permute.xlu0 %3945  ;;  %5963 = vrot.lane.b32.xlu1 %v5917_v17, %s11114_s14  ;;  %9745 = vmatprep.subr.bf16.mxu1 %v9744_v13  ;;  %v6242_v17 = vld [vmem:[%s14996_s6 + $0x30] sm:$0xff] }
0x176a   : > { %3981 = vst.msk [vmem:[#allocation2 + $0x68] sm:$0x10] %vm3967_vm12, %v3946_v19  ;;  %v3274_v37 = vpop.permute.xlu1 %3273  ;;  %v6241_v19 = vld [vmem:[%s14996_s6 + $0x28] sm:$0xff]  ;;  %9747 = vmatpush3.bf16.msra.mxu1 %v9744_v13 }
0x176b   : > { %3309 = vst.msk [vmem:[#allocation2 + $0x68] sm:$0x8] %vm3295_vm11, %v3274_v37  ;;  %v9748_v53 = vpack.c.bf16 %v6241_v19, %v6240_v44 }
0x176d   : > { %v5290_v46 = vpop.permute.xlu0 %5289  ;;  %1933 = vrot.lane.b32.xlu1 %v15387_v32, %s11114_s14  ;;  %9749 = vmatprep.subr.bf16.mxu1 %v9748_v53 }
0x176e   : > { %5325 = vst.msk [vmem:[#allocation2 + $0x68] sm:$0x40] %vm5311_vm14, %v5290_v46  ;;  %v4618_v61 = vpop.permute.xlu1 %4617  ;;  %9751 = vmatpush3.bf16.msra.mxu1 %v9748_v53  ;;  %v6243_v46 = vld [vmem:[%s14996_s6 + $0x38] sm:$0xff] }
0x176f   : > { %4653 = vst.msk [vmem:[#allocation2 + $0x68] sm:$0x20] %vm4639_vm13, %v4618_v61  ;;  %v9752_v37 = vpack.c.bf16 %v6243_v46, %v6242_v17 }
0x1771   : > { %v1253_v1 = vpop.permute.xlu0 %1252  ;;  %3277 = vrot.lane.b32.xlu1 %v15388_v3, %s11114_s14  ;;  %9753 = vmatprep.subr.bf16.mxu1 %v9752_v37 }
0x1772   : > { %1287 = vst.msk [vmem:[#allocation2 + $0x70] sm:$0x1] %vm1272_vm8, %v1253_v1  ;;  %v1932_v36 = vpop.permute.xlu1 %1931  ;;  %9755 = vmatpush3.bf16.msra.mxu1 %v9752_v37  ;;  %v14593_v1 = vld [vmem:[%s14995_s5] ss:$0 sm:$0xff] }
0x1773   : > { %1966 = vst.msk [vmem:[#allocation2 + $0x70] sm:$0x2] %vm1951_vm9, %v1932_v36  ;;  %9560 = vmatprep.subr.mxu1 %v15386_v41 }
0x1775   : > { %v2604_v60 = vpop.permute.xlu0 %2603  ;;  %4621 = vrot.lane.b32.xlu1 %v15389_v50, %s11114_s14 }
0x1776   : > { %2638 = vst.msk [vmem:[#allocation2 + $0x70] sm:$0x4] %vm2623_vm10, %v2604_v60  ;;  %v3276_v63 = vpop.permute.xlu1 %3275 }
0x1777   : > { %3310 = vst.msk [vmem:[#allocation2 + $0x70] sm:$0x8] %vm3295_vm11, %v3276_v63 }
0x1779   : > { %v3948_v31 = vpop.permute.xlu0 %3947  ;;  %5965 = vrot.lane.b32.xlu1 %v5918_v16, %s11114_s14 }
0x177a   : > { %3982 = vst.msk [vmem:[#allocation2 + $0x70] sm:$0x10] %vm3967_vm12, %v3948_v31  ;;  %v4620_v22 = vpop.permute.xlu1 %4619 }
0x177b   : > { %4654 = vst.msk [vmem:[#allocation2 + $0x70] sm:$0x20] %vm4639_vm13, %v4620_v22 }
0x177d   : > { %v5292_v23 = vpop.permute.xlu0 %5291 }
0x177e   : > { %5326 = vst.msk [vmem:[#allocation2 + $0x70] sm:$0x40] %vm5311_vm14, %v5292_v23 }
0x1781   : > { %v1255_v10 = vpop.permute.xlu0 %1254 }
0x1782   : > { %1288 = vst.msk [vmem:[#allocation2 + $0x78] sm:$0x1] %vm1272_vm8, %v1255_v10 }
0x1785   : > { %v2606_v21 = vpop.permute.xlu0 %2605 }
0x1786   : > { %2639 = vst.msk [vmem:[#allocation2 + $0x78] sm:$0x4] %vm2623_vm10, %v2606_v21 }
0x1789   : > { %v3950_v14 = vpop.permute.xlu0 %3949 }
0x178a   : > { %3983 = vst.msk [vmem:[#allocation2 + $0x78] sm:$0x10] %vm3967_vm12, %v3950_v14 }
0x178d   : > { %v5294_v59 = vpop.permute.xlu0 %5293 }
0x178e   : > { %5327 = vst.msk [vmem:[#allocation2 + $0x78] sm:$0x40] %vm5311_vm14, %v5294_v59 }
0x17a3   : > { %v5950_v49 = vpop.permute.xlu1 %5949 }
0x17a4   : > { %5991 = vst.msk [vmem:[#allocation2 + $0x38] sm:$0x80] %vm5983_vm15, %v5950_v49 }
0x17a7   : > { %v5952_v38 = vpop.permute.xlu1 %5951 }
0x17a8   : > { %5992 = vst.msk [vmem:[#allocation2 + $0x40] sm:$0x80] %vm5983_vm15, %v5952_v38 }
0x17ab   : > { %v5954_v4 = vpop.permute.xlu1 %5953  ;;  %v14532_v47 = vld [vmem:[#allocation2 + $0x38] sm:$0xff] }
0x17ac   : > { %5993 = vst.msk [vmem:[#allocation2 + $0x48] sm:$0x80] %vm5983_vm15, %v5954_v4 }
0x17af   : > { %v5956_v54 = vpop.permute.xlu1 %5955  ;;  %v14536_v11 = vld [vmem:[#allocation2 + $0x40] sm:$0xff] }
0x17b0   : > { %5994 = vst.msk [vmem:[#allocation2 + $0x50] sm:$0x80] %vm5983_vm15, %v5956_v54 }
0x17b3   : > { %v5958_v43 = vpop.permute.xlu1 %5957  ;;  %v14541_v9 = vld [vmem:[#allocation2 + $0x48] sm:$0xff] }
0x17b4   : > { %5995 = vst.msk [vmem:[#allocation2 + $0x58] sm:$0x80] %vm5983_vm15, %v5958_v43 }
0x17b7   : > { %v5960_v55 = vpop.permute.xlu1 %5959  ;;  %v14545_v45 = vld [vmem:[#allocation2 + $0x50] sm:$0xff] }
0x17b8   : > { %5996 = vst.msk [vmem:[#allocation2 + $0x60] sm:$0x80] %vm5983_vm15, %v5960_v55 }
0x17bb   : > { %v5962_v27 = vpop.permute.xlu1 %5961  ;;  %v14550_v39 = vld [vmem:[#allocation2 + $0x58] sm:$0xff] }
0x17bc   : > { %5997 = vst.msk [vmem:[#allocation2 + $0x68] sm:$0x80] %vm5983_vm15, %v5962_v27 }
0x17bf   : > { %v5936_v7 = vpop.permute.xlu1 %5935  ;;  %v14554_v18 = vld [vmem:[#allocation2 + $0x60] sm:$0xff] }
0x17c0   : > { %5984 = vst.msk [vmem:[#allocation2] sm:$0x80] %vm5983_vm15, %v5936_v7 }
0x17c3   : > { %v5938_v40 = vpop.permute.xlu1 %5937  ;;  %v14559_v25 = vld [vmem:[#allocation2 + $0x68] sm:$0xff] }
0x17c4   : > { %5985 = vst.msk [vmem:[#allocation2 + $0x8] sm:$0x80] %vm5983_vm15, %v5938_v40 }
0x17c7   : > { %v5940_v58 = vpop.permute.xlu1 %5939  ;;  %v6000_v24 = vld [vmem:[#allocation2] sm:$0xff] }
0x17c8   : > { %5986 = vst.msk [vmem:[#allocation2 + $0x10] sm:$0x80] %vm5983_vm15, %v5940_v58  ;;  %9481 = vmatprep.mubr.msk.f32.mxu0 %vm500_vm0, %v6000_v24 }
0x17cb   : > { %v5942_v35 = vpop.permute.xlu1 %5941  ;;  %v14501_v20 = vld [vmem:[#allocation2 + $0x8] sm:$0xff] }
0x17cc   : > { %5987 = vst.msk [vmem:[#allocation2 + $0x18] sm:$0x80] %vm5983_vm15, %v5942_v35  ;;  %9482 = vmatmul.mubr.msk.f32.vlgmr.msra.gmra.mrb[20].mxu0 %vm500_vm0, %v14501_v20 }
0x17cd   : > { %9546 = vmatpush3.msra.mxu0 %v6000_v24 }
0x17ce   : > { %9550 = vmatprep.subr.mxu0 %v15386_v41 }
0x17cf   : > { %v5944_v42 = vpop.permute.xlu1 %5943  ;;  %v14507_v33 = vld [vmem:[#allocation2 + $0x10] sm:$0xff] }
0x17d0   : > { %5988 = vst.msk [vmem:[#allocation2 + $0x20] sm:$0x80] %vm5983_vm15, %v5944_v42  ;;  %9484 = vmatprep.mubr.msk.f32.mxu0 %vm500_vm0, %v14507_v33 }
0x17d3   : > { %v5946_v52 = vpop.permute.xlu1 %5945  ;;  %v14512_v15 = vld [vmem:[#allocation2 + $0x18] sm:$0xff] }
0x17d4   : > { %5989 = vst.msk [vmem:[#allocation2 + $0x28] sm:$0x80] %vm5983_vm15, %v5946_v52  ;;  %9485 = vmatmul.mubr.msk.f32.gmra.mrb[22].mxu0 %vm500_vm0, %v14512_v15 }
0x17d7   : > { %v5948_v2 = vpop.permute.xlu1 %5947  ;;  %v14517_v48 = vld [vmem:[#allocation2 + $0x20] sm:$0xff] }
0x17d8   : > { %5990 = vst.msk [vmem:[#allocation2 + $0x30] sm:$0x80] %vm5983_vm15, %v5948_v2  ;;  %9487 = vmatprep.mubr.msk.f32.mxu0 %vm500_vm0, %v14517_v48 }
0x17db   : > { %v5964_v26 = vpop.permute.xlu1 %5963  ;;  %v14522_v28 = vld [vmem:[#allocation2 + $0x28] sm:$0xff] }
0x17dc   : > { %5998 = vst.msk [vmem:[#allocation2 + $0x70] sm:$0x80] %vm5983_vm15, %v5964_v26  ;;  %9488 = vmatmul.mubr.msk.f32.gmra.mrb[24].mxu0 %vm500_vm0, %v14522_v28 }
0x17df   : > { %v1934_v51 = vpop.permute.xlu1 %1933  ;;  %v14527_v34 = vld [vmem:[#allocation2 + $0x30] sm:$0xff] }
0x17e0   : > { %1967 = vst.msk [vmem:[#allocation2 + $0x78] sm:$0x2] %vm1951_vm9, %v1934_v51  ;;  %9490 = vmatprep.mubr.msk.f32.mxu0 %vm500_vm0, %v14527_v34 }
0x17e1   : > { %9491 = vmatmul.mubr.msk.f32.gmra.mrb[26].mxu0 %vm500_vm0, %v14532_v47 }
0x17e2   : > { %9493 = vmatprep.mubr.msk.f32.mxu0 %vm500_vm0, %v14536_v11 }
0x17e3   : > { %v3278_v6 = vpop.permute.xlu1 %3277  ;;  %v14563_v29 = vld [vmem:[#allocation2 + $0x70] sm:$0xff] }
0x17e4   : > { %3311 = vst.msk [vmem:[#allocation2 + $0x78] sm:$0x8] %vm3295_vm11, %v3278_v6 }
0x17e5   : > { %9494 = vmatmul.mubr.msk.f32.gmra.mrb[28].mxu0 %vm500_vm0, %v14541_v9 }
0x17e6   : > { %9496 = vmatprep.mubr.msk.f32.mxu0 %vm500_vm0, %v14545_v45 }
0x17e7   : > { %v4622_v56 = vpop.permute.xlu1 %4621 }
0x17e8   : > { %4655 = vst.msk [vmem:[#allocation2 + $0x78] sm:$0x20] %vm4639_vm13, %v4622_v56 }
0x17e9   : > { %9497 = vmatmul.mubr.msk.f32.gmra.mrb[30].mxu0 %vm500_vm0, %v14550_v39 }
0x17ea   : > { %9499 = vmatprep.mubr.msk.f32.mxu0 %vm500_vm0, %v14554_v18 }
0x17eb   : > { %v5966_v30 = vpop.permute.xlu1 %5965 }
0x17ec   : > { %5999 = vst.msk [vmem:[#allocation2 + $0x78] sm:$0x80] %vm5983_vm15, %v5966_v30 }
0x17ed   : > { %9500 = vmatmul.mubr.msk.f32.gmra.mrb[32].mxu0 %vm500_vm0, %v14559_v25 }
0x17ee   : > { %9502 = vmatprep.mubr.msk.f32.mxu0 %vm500_vm0, %v14563_v29 }
0x17f3   : > { %v14567_v5 = vld [vmem:[#allocation2 + $0x78] sm:$0xff] }
0x17f4   : > { %9503 = vmatmul.mubr.msk.f32.gmra.mrb[34].mxu0 %vm500_vm0, %v14567_v5 }
0x17f5   : > { %9547 = vmatprep.mubr.msk.f32.mxu0 %vm11115_vm3, %v15386_v41 }
0x189f   : > { %v9483_v32 = vpop.f32.mrb[20].mxu0 }
0x18a0   : > { %v6147_v61 = vadd.f32 %v9483_v32, %v14593_v1  ;;  %v6141_v60 = vpop.f32.mrb[21].mxu0 }
0x18a1   : > { %v6142_v3 = vadd.f32 %v14593_v1, %v6141_v60 }
0x18a3   : > { %10940 = vtanh.f32 %v6142_v3 }
0x18a4   : > { %10942 = vtanh.f32 %v6147_v61 }
0x18a7   : > { %v9486_v36 = vpop.f32.mrb[22].mxu0 }
0x18a8   : > { %v6157_v31 = vadd.f32 %v9486_v36, %v14593_v1  ;;  %v6151_v62 = vpop.f32.mrb[23].mxu0 }
0x18a9   : > { %v6152_v8 = vadd.f32 %v14593_v1, %v6151_v62 }
0x18ab   : > { %10944 = vtanh.f32 %v6152_v8 }
0x18ac   : > { %10946 = vtanh.f32 %v6157_v31 }
0x18ad   : > { %v10941_v50 = vpop.eup %10940 }
0x18ae   : > { %v10943_v12 = vpop.eup %10942  ;;  %9521 = vmatprep.mubr.msk.f32.mxu1 %vm6251_vm1, %v10941_v50 }
0x18af   : > { %v9489_v63 = vpop.f32.mrb[24].mxu0  ;;  %9522 = vmatmul.mubr.msk.f32.vlgmr.msra.gmra.mrb[12].mxu1 %vm6251_vm1, %v10943_v12 }
0x18b0   : > { %v6167_v16 = vadd.f32 %v9489_v63, %v14593_v1  ;;  %9561 = vmatpush3.msra.mxu1 %v14512_v15  ;;  %v6161_v23 = vpop.f32.mrb[25].mxu0 }
0x18b1   : > { %v6162_v22 = vadd.f32 %v14593_v1, %v6161_v23  ;;  %9570 = vmatprep.subr.mxu1 %v15386_v41 }
0x18b3   : > { %10948 = vtanh.f32 %v6162_v22 }
0x18b4   : > { %10950 = vtanh.f32 %v6167_v16  ;;  %v9492_v10 = vpop.f32.mrb[26].mxu0 }
0x18b5   : > { %v10945_v21 = vpop.eup %10944  ;;  %v6177_v14 = vadd.f32 %v9492_v10, %v14593_v1  ;;  %v6171_v59 = vpop.f32.mrb[27].mxu0 }
0x18b6   : > { %v10947_v49 = vpop.eup %10946  ;;  %v6172_v38 = vadd.f32 %v14593_v1, %v6171_v59  ;;  %9524 = vmatprep.mubr.msk.f32.mxu1 %vm6251_vm1, %v10945_v21 }
0x18b7   : > { %9525 = vmatmul.mubr.msk.f32.gmra.mrb[14].mxu1 %vm6251_vm1, %v10947_v49 }
0x18b8   : > { %10952 = vtanh.f32 %v6172_v38  ;;  %v9495_v4 = vpop.f32.mrb[28].mxu0 }
0x18b9   : > { %10954 = vtanh.f32 %v6177_v14  ;;  %v6187_v54 = vadd.f32 %v9495_v4, %v14593_v1  ;;  %v6181_v43 = vpop.f32.mrb[29].mxu0 }
0x18ba   : > { %v6182_v55 = vadd.f32 %v14593_v1, %v6181_v43 }
0x18bc   : > { %10956 = vtanh.f32 %v6182_v55  ;;  %v9498_v27 = vpop.f32.mrb[30].mxu0 }
0x18bd   : > { %v10949_v7 = vpop.eup %10948  ;;  %10958 = vtanh.f32 %v6187_v54  ;;  %v6197_v40 = vadd.f32 %v9498_v27, %v14593_v1  ;;  %v6191_v58 = vpop.f32.mrb[31].mxu0 }
0x18be   : > { %v10951_v24 = vpop.eup %10950  ;;  %v6192_v35 = vadd.f32 %v14593_v1, %v6191_v58  ;;  %9527 = vmatprep.mubr.msk.f32.mxu1 %vm6251_vm1, %v10949_v7 }
0x18bf   : > { %9528 = vmatmul.mubr.msk.f32.gmra.mrb[16].mxu1 %vm6251_vm1, %v10951_v24 }
0x18c0   : > { %10960 = vtanh.f32 %v6192_v35  ;;  %v9501_v42 = vpop.f32.mrb[32].mxu0 }
0x18c1   : > { %10962 = vtanh.f32 %v6197_v40  ;;  %v6207_v52 = vadd.f32 %v9501_v42, %v14593_v1  ;;  %v6201_v15 = vpop.f32.mrb[33].mxu0 }
0x18c2   : > { %v10953_v2 = vpop.eup %10952  ;;  %v6202_v26 = vadd.f32 %v14593_v1, %v6201_v15 }
0x18c3   : > { %v10955_v51 = vpop.eup %10954  ;;  %9530 = vmatprep.mubr.msk.f32.mxu1 %vm6251_vm1, %v10953_v2 }
0x18c4   : > { %10964 = vtanh.f32 %v6202_v26  ;;  %9531 = vmatmul.mubr.msk.f32.gmra.mrb[18].mxu1 %vm6251_vm1, %v10955_v51 }
0x18c5   : > { %10966 = vtanh.f32 %v6207_v52 }
0x18c6   : > { %v10957_v6 = vpop.eup %10956 }
0x18c7   : > { %v10959_v56 = vpop.eup %10958  ;;  %v9504_v30 = vpop.f32.mrb[34].mxu0  ;;  %9533 = vmatprep.mubr.msk.f32.mxu1 %vm6251_vm1, %v10957_v6 }
0x18c8   : > { %v6217_v57 = vadd.f32 %v9504_v30, %v14593_v1  ;;  %v6211_v0 = vpop.f32.mrb[35].mxu0  ;;  %9534 = vmatmul.mubr.msk.f32.gmra.mrb[20].mxu1 %vm6251_vm1, %v10959_v56 }
0x18c9   : > { %v6212_v13 = vadd.f32 %v14593_v1, %v6211_v0  ;;  %v9115_v1 = vld [vmem:[%s14997_s7] ss:$0 sm:$0xff] }
0x18ca   : > { %v10961_v44 = vpop.eup %10960 }
0x18cb   : > { %v10963_v19 = vpop.eup %10962  ;;  %10968 = vtanh.f32 %v6212_v13  ;;  %9536 = vmatprep.mubr.msk.f32.mxu1 %vm6251_vm1, %v10961_v44 }
0x18cc   : > { %10970 = vtanh.f32 %v6217_v57  ;;  %9537 = vmatmul.mubr.msk.f32.gmra.mrb[22].mxu1 %vm6251_vm1, %v10963_v19 }
0x18ce   : > { %v10965_v53 = vpop.eup %10964 }
0x18cf   : > { %v10967_v17 = vpop.eup %10966  ;;  %9539 = vmatprep.mubr.msk.f32.mxu1 %vm6251_vm1, %v10965_v53 }
0x18d0   : > { %9540 = vmatmul.mubr.msk.f32.gmra.mrb[24].mxu1 %vm6251_vm1, %v10967_v17 }
0x18d5   : > { %v10969_v46 = vpop.eup %10968 }
0x18d6   : > { %v10971_v37 = vpop.eup %10970  ;;  %9542 = vmatprep.mubr.msk.f32.mxu1 %vm6251_vm1, %v10969_v46 }
0x18d7   : > { %9543 = vmatmul.mubr.msk.f32.gmra.mrb[26].mxu1 %vm6251_vm1, %v10971_v37 }
0x18d8   : > { %9562 = vmatprep.mubr.msk.f32.mxu1 %vm11115_vm3, %v15386_v41 }
0x1982   : > { %v9523_v32 = vpop.f32.mrb[12].mxu1 }
0x1983   : > { %v6372_v61 = vadd.f32 %v9523_v32, %v9115_v1  ;;  %v6366_v60 = vpop.f32.mrb[13].mxu1 }
0x1984   : > { %v6367_v3 = vadd.f32 %v9115_v1, %v6366_v60 }
0x1985   : > { %6477 = vxpose.xlu1.b32.start.end [1/1] (short) (narrow) %v6372_v61, 8 }
0x1986   : > { %6445 = vxpose.xlu0.b32.start.end [1/1] (short) (narrow) %v6367_v3, 8 }
0x198a   : > { %v9526_v36 = vpop.f32.mrb[14].mxu1 }
0x198b   : > { %v6382_v31 = vadd.f32 %v9526_v36, %v9115_v1  ;;  %v6376_v62 = vpop.f32.mrb[15].mxu1 }
0x198c   : > { %v6377_v8 = vadd.f32 %v9115_v1, %v6376_v62 }
0x198d   : > { %6541 = vxpose.xlu0.b32.start.end [1/1] (short) (narrow) %v6382_v31, 8 }
0x1991   : > { %6509 = vxpose.xlu0.b32.start.end [1/1] (short) (narrow) %v6377_v8, 8 }
0x1992   : > { %v9529_v50 = vpop.f32.mrb[16].mxu1 }
0x1993   : > { %v6392_v12 = vadd.f32 %v9529_v50, %v9115_v1  ;;  %v6386_v63 = vpop.f32.mrb[17].mxu1 }
0x1994   : > { %v6387_v16 = vadd.f32 %v9115_v1, %v6386_v63 }
0x1995   : > { %6605 = vxpose.xlu1.b32.start.end [1/1] (short) (narrow) %v6392_v12, 8 }
0x1996   : > { %6573 = vxpose.xlu0.b32.start.end [1/1] (short) (narrow) %v6387_v16, 8 }
0x1997   : > { %v9532_v23 = vpop.f32.mrb[18].mxu1 }
0x1998   : > { %v6402_v22 = vadd.f32 %v9532_v23, %v9115_v1  ;;  %v6396_v10 = vpop.f32.mrb[19].mxu1 }
0x1999   : > { %v6397_v21 = vadd.f32 %v9115_v1, %v6396_v10 }
0x199a   : > { %6669 = vxpose.xlu1.b32.start.end [1/1] (short) (narrow) %v6402_v22, 8 }
0x199b   : > { %v9535_v14 = vpop.f32.mrb[20].mxu1  ;;  %6637 = vxpose.xlu0.b32.start.end [1/1] (short) (narrow) %v6397_v21, 8 }
0x199c   : > { %v6412_v59 = vadd.f32 %v9535_v14, %v9115_v1  ;;  %v6406_v49 = vpop.f32.mrb[21].mxu1 }
0x199d   : > { %v6407_v38 = vadd.f32 %v9115_v1, %v6406_v49 }
0x199e   : > { %6733 = vxpose.xlu1.b32.start.end [1/1] (short) (narrow) %v6412_v59, 8 }
0x199f   : > { %6701 = vxpose.xlu0.b32.start.end [1/1] (short) (narrow) %v6407_v38, 8  ;;  %v9538_v4 = vpop.f32.mrb[22].mxu1 }
0x19a0   : > { %v6422_v54 = vadd.f32 %v9538_v4, %v9115_v1  ;;  %v6416_v43 = vpop.f32.mrb[23].mxu1 }
0x19a1   : > { %v6417_v55 = vadd.f32 %v9115_v1, %v6416_v43 }
0x19a2   : > { %6797 = vxpose.xlu1.b32.start.end [1/1] (short) (narrow) %v6422_v54, 8 }
0x19a3   : > { %6765 = vxpose.xlu0.b32.start.end [1/1] (short) (narrow) %v6417_v55, 8  ;;  %v9541_v27 = vpop.f32.mrb[24].mxu1 }
0x19a4   : > { %v6432_v7 = vadd.f32 %v9541_v27, %v9115_v1  ;;  %v6426_v40 = vpop.f32.mrb[25].mxu1 }
0x19a5   : > { %v6427_v58 = vadd.f32 %v9115_v1, %v6426_v40 }
0x19a6   : > { %6861 = vxpose.xlu1.b32.start.end [1/1] (short) (narrow) %v6432_v7, 8 }
0x19a7   : > { %6829 = vxpose.xlu0.b32.start.end [1/1] (short) (narrow) %v6427_v58, 8 }
0x19aa   : > { %v9544_v24 = vpop.f32.mrb[26].mxu1 }
0x19ab   : > { %v6442_v35 = vadd.f32 %v9544_v24, %v9115_v1  ;;  %v6436_v42 = vpop.f32.mrb[27].mxu1 }
0x19ac   : > { %v6437_v52 = vadd.f32 %v9115_v1, %v6436_v42 }
0x19ad   : > { %6925 = vxpose.xlu1.b32.start.end [1/1] (short) (narrow) %v6442_v35, 8 }
0x19ae   : > { %6893 = vxpose.xlu0.b32.start.end [1/1] (short) (narrow) %v6437_v52, 8 }
0x1a05   : > { %v6493_v15 = vpop.trf.xlu1 }
0x1a06   : > { %v6461_v2 = vpop.trf.xlu0  ;;  %v6961_v26 = vsel %vm6957_vm2, %v6493_v15, -inf }
0x1a07   : > { %6962 = vmax.xlane.f32.xlu1 %v6961_v26  ;;  %v6958_v51 = vsel %vm6957_vm2, %v6461_v2, -inf }
0x1a08   : > { %6959 = vmax.xlane.f32.xlu0 %v6958_v51 }
0x1a0d   : > { %v6557_v6 = vpop.trf.xlu0 }
0x1a0e   : > { %v6967_v56 = vsel %vm6957_vm2, %v6557_v6, -inf }
0x1a0f   : > { %6968 = vmax.xlane.f32.xlu0 %v6967_v56 }
0x1a11   : > { %v6525_v30 = vpop.trf.xlu0 }
0x1a12   : > { %v6964_v57 = vsel %vm6957_vm2, %v6525_v30, -inf }
0x1a13   : > { %6965 = vmax.xlane.f32.xlu1 %v6964_v57 }
0x1a15   : > { %v6621_v0 = vpop.trf.xlu1 }
0x1a16   : > { %v6589_v13 = vpop.trf.xlu0  ;;  %v6973_v44 = vsel %vm6957_vm2, %v6621_v0, -inf }
0x1a17   : > { %6974 = vmax.xlane.f32.xlu0 %v6973_v44  ;;  %v6970_v19 = vsel %vm6957_vm2, %v6589_v13, -inf }
0x1a18   : > { %6971 = vmax.xlane.f32.xlu1 %v6970_v19 }
0x1a1a   : > { %v14638_v53 = vpop.trf.xlu1 }
0x1a1b   : > { %v14640_v17 = vpop.trf.xlu0  ;;  %v6979_v46 = vsel %vm6957_vm2, %v14638_v53, -inf }
0x1a1c   : > { %6980 = vmax.xlane.f32.xlu0 %v6979_v46  ;;  %v6976_v37 = vsel %vm6957_vm2, %v14640_v17, -inf }
0x1a1d   : > { %6977 = vmax.xlane.f32.xlu1 %v6976_v37 }
0x1a1e   : > { %v14646_v1 = vpop.trf.xlu1 }
0x1a1f   : > { %v14648_v32 = vpop.trf.xlu0  ;;  %v6985_v61 = vsel %vm6957_vm2, %v14646_v1, -inf }
0x1a20   : > { %6986 = vmax.xlane.f32.xlu0 %v6985_v61  ;;  %v6982_v60 = vsel %vm6957_vm2, %v14648_v32, -inf }
0x1a21   : > { %6983 = vmax.xlane.f32.xlu1 %v6982_v60 }
0x1a22   : > { %v14654_v3 = vpop.trf.xlu1 }
0x1a23   : > { %v14656_v36 = vpop.trf.xlu0  ;;  %v6991_v31 = vsel %vm6957_vm2, %v14654_v3, -inf }
0x1a24   : > { %6992 = vmax.xlane.f32.xlu0 %v6991_v31  ;;  %v6988_v62 = vsel %vm6957_vm2, %v14656_v36, -inf }
0x1a25   : > { %6989 = vmax.xlane.f32.xlu1 %v6988_v62 }
0x1a26   : > { %v14662_v8 = vpop.trf.xlu1 }
0x1a27   : > { %v14664_v50 = vpop.trf.xlu0  ;;  %v6997_v12 = vsel %vm6957_vm2, %v14662_v8, -inf }
0x1a28   : > { %6998 = vmax.xlane.f32.xlu0 %v6997_v12  ;;  %v6994_v63 = vsel %vm6957_vm2, %v14664_v50, -inf }
0x1a29   : > { %6995 = vmax.xlane.f32.xlu1 %v6994_v63 }
0x1a2d   : > { %v14670_v16 = vpop.trf.xlu1 }
0x1a2e   : > { %v14672_v23 = vpop.trf.xlu0  ;;  %v7003_v22 = vsel %vm6957_vm2, %v14670_v16, -inf }
0x1a2f   : > { %7004 = vmax.xlane.f32.xlu0 %v7003_v22  ;;  %v7000_v10 = vsel %vm6957_vm2, %v14672_v23, -inf }
0x1a30   : > { %7001 = vmax.xlane.f32.xlu1 %v7000_v10 }
0x1a94   : > { %v6963_v21 = vpop.xlane.xlu1 %6962 }
0x1a95   : > { %v7007_v14 = vsub.f32 %v6493_v15, %v6963_v21  ;;  %v6960_v59 = vpop.xlane.xlu0 %6959 }
0x1a96   : > { %v7006_v49 = vsub.f32 %v6461_v2, %v6960_v59 }
0x1a97   : > { %v7024_v38 = vmul.f32 1.442695, %v7007_v14 }
0x1a98   : > { %v7022_v4 = vmul.f32 1.442695, %v7006_v49 }
0x1a99   : > { %10972 = vpow2.f32 %v7024_v38 }
0x1a9a   : > { %10974 = vpow2.f32 %v7022_v4 }
0x1a9c   : > { %v6969_v54 = vpop.xlane.xlu0 %6968 }
0x1a9d   : > { %v7009_v43 = vsub.f32 %v6557_v6, %v6969_v54 }
0x1a9f   : > { %v7028_v55 = vmul.f32 1.442695, %v7009_v43 }
0x1aa0   : > { %v6966_v27 = vpop.xlane.xlu1 %6965 }
0x1aa1   : > { %10976 = vpow2.f32 %v7028_v55  ;;  %v7008_v7 = vsub.f32 %v6525_v30, %v6966_v27 }
0x1aa3   : > { %v14678_v40 = vpop.eup %10972  ;;  %v7026_v58 = vmul.f32 1.442695, %v7008_v7 }
0x1aa4   : > { %v14680_v24 = vpop.eup %10974  ;;  %v6975_v35 = vpop.xlane.xlu0 %6974  ;;  %v7057_v42 = vsel %vm6957_vm2, %v14678_v40, 0.0 }
0x1aa5   : > { %10978 = vpow2.f32 %v7026_v58  ;;  %v7011_v52 = vsub.f32 %v6621_v0, %v6975_v35  ;;  %7058 = vadd.xlane.f32.xlu0 %v7057_v42  ;;  %v6972_v15 = vpop.xlane.xlu1 %6971  ;;  %v7054_v2 = vsel %vm6957_vm2, %v14680_v24, 0.0 }
0x1aa6   : > { %v7010_v26 = vsub.f32 %v6589_v13, %v6972_v15  ;;  %7055 = vadd.xlane.f32.xlu1 %v7054_v2 }
0x1aa7   : > { %v7032_v51 = vmul.f32 1.442695, %v7011_v52 }
0x1aa8   : > { %v7030_v6 = vmul.f32 1.442695, %v7010_v26 }
0x1aa9   : > { %10980 = vpow2.f32 %v7032_v51  ;;  %v6981_v56 = vpop.xlane.xlu0 %6980 }
0x1aaa   : > { %10982 = vpow2.f32 %v7030_v6  ;;  %v7013_v30 = vsub.f32 %v14638_v53, %v6981_v56  ;;  %v6978_v57 = vpop.xlane.xlu1 %6977 }
0x1aab   : > { %v14687_v44 = vpop.eup %10976  ;;  %v7012_v19 = vsub.f32 %v14640_v17, %v6978_v57 }
0x1aac   : > { %v7036_v0 = vmul.f32 1.442695, %v7013_v30  ;;  %v7063_v46 = vsel %vm6957_vm2, %v14687_v44, 0.0 }
0x1aad   : > { %v7034_v37 = vmul.f32 1.442695, %v7012_v19  ;;  %7064 = vadd.xlane.f32.xlu0 %v7063_v46  ;;  %v6987_v13 = vpop.xlane.xlu0 %6986 }
0x1aae   : > { %10984 = vpow2.f32 %v7036_v0  ;;  %v7015_v61 = vsub.f32 %v14646_v1, %v6987_v13  ;;  %v6984_v60 = vpop.xlane.xlu1 %6983 }
0x1aaf   : > { %v14693_v31 = vpop.eup %10978  ;;  %10986 = vpow2.f32 %v7034_v37  ;;  %v7014_v53 = vsub.f32 %v14648_v32, %v6984_v60 }
0x1ab0   : > { %v7040_v62 = vmul.f32 1.442695, %v7015_v61  ;;  %v7060_v17 = vsel %vm6957_vm2, %v14693_v31, 0.0 }
0x1ab1   : > { %v7038_v12 = vmul.f32 1.442695, %v7014_v53  ;;  %7061 = vadd.xlane.f32.xlu1 %v7060_v17  ;;  %v6993_v63 = vpop.xlane.xlu0 %6992 }
0x1ab2   : > { %10988 = vpow2.f32 %v7040_v62  ;;  %v7017_v22 = vsub.f32 %v14654_v3, %v6993_v63  ;;  %v6990_v10 = vpop.xlane.xlu1 %6989 }
0x1ab3   : > { %v14699_v21 = vpop.eup %10980  ;;  %10990 = vpow2.f32 %v7038_v12  ;;  %v7016_v1 = vsub.f32 %v14656_v36, %v6990_v10 }
0x1ab4   : > { %v14702_v14 = vpop.eup %10982  ;;  %v7044_v59 = vmul.f32 1.442695, %v7017_v22  ;;  %v7069_v32 = vsel %vm6957_vm2, %v14699_v21, 0.0 }
0x1ab5   : > { %v7042_v49 = vmul.f32 1.442695, %v7016_v1  ;;  %7070 = vadd.xlane.f32.xlu0 %v7069_v32  ;;  %v6999_v38 = vpop.xlane.xlu0 %6998  ;;  %v7066_v4 = vsel %vm6957_vm2, %v14702_v14, 0.0 }
0x1ab6   : > { %10992 = vpow2.f32 %v7044_v59  ;;  %v7019_v3 = vsub.f32 %v14662_v8, %v6999_v38  ;;  %v6996_v54 = vpop.xlane.xlu1 %6995  ;;  %7067 = vadd.xlane.f32.xlu1 %v7066_v4 }
0x1ab7   : > { %10994 = vpow2.f32 %v7042_v49  ;;  %v7018_v36 = vsub.f32 %v14664_v50, %v6996_v54 }
0x1ab8   : > { %v14710_v43 = vpop.eup %10984  ;;  %v7048_v55 = vmul.f32 1.442695, %v7019_v3 }
0x1ab9   : > { %v14712_v27 = vpop.eup %10986  ;;  %v7046_v7 = vmul.f32 1.442695, %v7018_v36  ;;  %v7075_v58 = vsel %vm6957_vm2, %v14710_v43, 0.0 }
0x1aba   : > { %10996 = vpow2.f32 %v7048_v55  ;;  %7076 = vadd.xlane.f32.xlu0 %v7075_v58  ;;  %v7072_v35 = vsel %vm6957_vm2, %v14712_v27, 0.0 }
0x1abb   : > { %10998 = vpow2.f32 %v7046_v7  ;;  %7073 = vadd.xlane.f32.xlu1 %v7072_v35 }
0x1abc   : > { %v14718_v8 = vpop.eup %10988  ;;  %v7005_v42 = vpop.xlane.xlu0 %7004 }
0x1abd   : > { %v14720_v50 = vpop.eup %10990  ;;  %v7021_v52 = vsub.f32 %v14670_v16, %v7005_v42  ;;  %v7002_v15 = vpop.xlane.xlu1 %7001  ;;  %v7081_v2 = vsel %vm6957_vm2, %v14718_v8, 0.0 }
0x1abe   : > { %v7020_v26 = vsub.f32 %v14672_v23, %v7002_v15  ;;  %7082 = vadd.xlane.f32.xlu0 %v7081_v2  ;;  %v7078_v51 = vsel %vm6957_vm2, %v14720_v50, 0.0 }
0x1abf   : > { %v7052_v6 = vmul.f32 1.442695, %v7021_v52  ;;  %7079 = vadd.xlane.f32.xlu1 %v7078_v51 }
0x1ac0   : > { %v14728_v56 = vpop.eup %10992  ;;  %v7050_v30 = vmul.f32 1.442695, %v7020_v26 }
0x1ac1   : > { %v14730_v57 = vpop.eup %10994  ;;  %11000 = vpow2.f32 %v7052_v6  ;;  %v7087_v16 = vsel %vm6957_vm2, %v14728_v56, 0.0 }
0x1ac2   : > { %11002 = vpow2.f32 %v7050_v30  ;;  %7088 = vadd.xlane.f32.xlu0 %v7087_v16  ;;  %v7084_v23 = vsel %vm6957_vm2, %v14730_v57, 0.0  ;;  %v8635_v30 = vld [vmem:[#allocation5] sm:$0xff]  ;;  %v8653_v16 = vld [vmem:[#allocation5 + $0x90] sm:$0xff] }
0x1ac3   : > { %7085 = vadd.xlane.f32.xlu1 %v7084_v23  ;;  %v8654_v23 = vld [vmem:[#allocation5 + $0x98] sm:$0xff] }
0x1ac4   : > { %v14738_v19 = vpop.eup %10996 }
0x1ac5   : > { %v14742_v0 = vpop.eup %10998  ;;  %v7093_v46 = vsel %vm6957_vm2, %v14738_v19, 0.0 }
0x1ac6   : > { %7094 = vadd.xlane.f32.xlu0 %v7093_v46  ;;  %v7090_v37 = vsel %vm6957_vm2, %v14742_v0, 0.0  ;;  %v8638_v46 = vld [vmem:[#allocation5 + $0x18] sm:$0xff] }
0x1ac7   : > { %7091 = vadd.xlane.f32.xlu1 %v7090_v37  ;;  %v8655_v37 = vld [vmem:[#allocation5 + $0xa0] sm:$0xff] }
0x1acb   : > { %v14748_v13 = vpop.eup %11000 }
0x1acc   : > { %v14750_v61 = vpop.eup %11002  ;;  %v7099_v60 = vsel %vm6957_vm2, %v14748_v13, 0.0 }
0x1acd   : > { %7100 = vadd.xlane.f32.xlu0 %v7099_v60  ;;  %v7096_v53 = vsel %vm6957_vm2, %v14750_v61, 0.0 }
0x1ace   : > { %7097 = vadd.xlane.f32.xlu1 %v7096_v53  ;;  %v8639_v53 = vld [vmem:[#allocation5 + $0x20] sm:$0xff] }
0x1b32   : > { %v7059_v62 = vpop.xlane.xlu0 %7058 }
0x1b33   : > { %v7056_v17 = vpop.xlane.xlu1 %7055 }
0x1b34   : > { %11004 = vrcp.f32 %v7056_v17  ;;  %v8657_v17 = vld [vmem:[#allocation5 + $0xb0] sm:$0xff] }
0x1b35   : > { %11006 = vrcp.f32 %v7059_v62  ;;  %v8640_v62 = vld [vmem:[#allocation5 + $0x28] sm:$0xff] }
0x1b3a   : > { %v7065_v12 = vpop.xlane.xlu0 %7064 }
0x1b3b   : > { %11008 = vrcp.f32 %v7065_v12  ;;  %v8658_v12 = vld [vmem:[#allocation5 + $0xb8] sm:$0xff] }
0x1b3e   : > { %v11005_v63 = vpop.eup %11004  ;;  %v7062_v22 = vpop.xlane.xlu1 %7061 }
0x1b3f   : > { %v7103_v10 = vmul.f32 %v11005_v63, %v14680_v24  ;;  %11010 = vrcp.f32 %v7062_v22  ;;  %v11007_v1 = vpop.eup %11006  ;;  %v9766_v63 = vpack.c.bf16 %v8640_v62, %v8639_v53  ;;  %v9768_v22 = vpack.c.bf16 %v8658_v12, %v8657_v17  ;;  %v8647_v62 = vld [vmem:[#allocation5 + $0x60] sm:$0xff]  ;;  %v8648_v17 = vld [vmem:[#allocation5 + $0x68] sm:$0xff] }
0x1b40   : > { %v7105_v32 = vmul.f32 %v11007_v1, %v14678_v40  ;;  %v8642_v1 = vld [vmem:[#allocation5 + $0x38] sm:$0xff] }
0x1b41   : > { %9548 = vmatmul.mubr.msk.f32.vlgmr.msra.gmra.mrb[36].mxu0 %vm6957_vm2, %v7103_v10  ;;  %v8641_v10 = vld [vmem:[#allocation5 + $0x30] sm:$0xff] }
0x1b42   : > { %9551 = vmatpush3.msra.mxu0 %v14501_v20  ;;  %v7071_v59 = vpop.xlane.xlu0 %7070  ;;  %9552 = vmatprep.mubr.msk.f32.mxu0 %vm11115_vm3, %v15386_v41 }
0x1b43   : > { %11012 = vrcp.f32 %v7071_v59  ;;  %v7068_v49 = vpop.xlane.xlu1 %7067  ;;  %9555 = vmatprep.subr.mxu0 %v15386_v41  ;;  %v8659_v59 = vld [vmem:[#allocation5 + $0xc0] sm:$0xff] }
0x1b44   : > { %11014 = vrcp.f32 %v7068_v49  ;;  %v9770_v49 = vpack.c.bf16 %v8642_v1, %v8641_v10  ;;  %v9782_v10 = vpack.c.bf16 %v8648_v17, %v8647_v62 }
0x1b45   : > { %v11009_v38 = vpop.eup %11008  ;;  %9553 = vmatmul.mubr.msk.f32.vlgmr.msra.gmra.mrb[38].mxu0 %vm6957_vm2, %v7105_v32  ;;  %v8660_v32 = vld [vmem:[#allocation5 + $0xc8] sm:$0xff] }
0x1b46   : > { %v7109_v24 = vmul.f32 %v11009_v38, %v14687_v44  ;;  %9556 = vmatpush3.msra.mxu0 %v14507_v33  ;;  %9557 = vmatprep.mubr.msk.f32.mxu0 %vm11115_vm3, %v15386_v41  ;;  %v9772_v38 = vpack.c.bf16 %v8660_v32, %v8659_v59 }
0x1b47   : > { %v7077_v20 = vpop.xlane.xlu0 %7076  ;;  %9565 = vmatprep.subr.mxu0 %v15386_v41 }
0x1b48   : > { %11016 = vrcp.f32 %v7077_v20  ;;  %v7074_v40 = vpop.xlane.xlu1 %7073  ;;  %9563 = vmatmul.mubr.msk.f32.vlgmr.msra.gmra.mrb[28].mxu1 %vm6957_vm2, %v7109_v24  ;;  %v8643_v24 = vld [vmem:[#allocation5 + $0x40] sm:$0xff]  ;;  %v8644_v20 = vld [vmem:[#allocation5 + $0x48] sm:$0xff] }
0x1b49   : > { %v11011_v4 = vpop.eup %11010  ;;  %11018 = vrcp.f32 %v7074_v40  ;;  %9571 = vmatpush3.msra.mxu1 %v14522_v28  ;;  %9572 = vmatprep.mubr.msk.f32.mxu1 %vm11115_vm3, %v15386_v41  ;;  %v8661_v40 = vld [vmem:[#allocation5 + $0xd0] sm:$0xff] }
0x1b4a   : > { %v7107_v44 = vmul.f32 %v11011_v4, %v14693_v31  ;;  %9580 = vmatprep.subr.mxu1 %v15386_v41  ;;  %v8662_v4 = vld [vmem:[#allocation5 + $0xd8] sm:$0xff] }
0x1b4b   : > { %v7083_v33 = vpop.xlane.xlu0 %7082 }
0x1b4c   : > { %11020 = vrcp.f32 %v7083_v33  ;;  %v7080_v3 = vpop.xlane.xlu1 %7079  ;;  %9558 = vmatmul.mubr.msk.f32.vlgmr.msra.gmra.mrb[40].mxu0 %vm6957_vm2, %v7107_v44  ;;  %v9774_v44 = vpack.c.bf16 %v8644_v20, %v8643_v24  ;;  %v9776_v33 = vpack.c.bf16 %v8662_v4, %v8661_v40  ;;  %v8665_v24 = vld [vmem:[#allocation5 + $0xf0] sm:$0xff]  ;;  %v8666_v20 = vld [vmem:[#allocation5 + $0xf8] sm:$0xff] }
0x1b4d   : > { %v11013_v54 = vpop.eup %11012  ;;  %11022 = vrcp.f32 %v7080_v3  ;;  %9566 = vmatpush3.msra.mxu0 %v14517_v48  ;;  %9567 = vmatprep.mubr.msk.f32.mxu0 %vm11115_vm3, %v15386_v41  ;;  %v8645_v3 = vld [vmem:[#allocation5 + $0x50] sm:$0xff] }
0x1b4e   : > { %v11015_v28 = vpop.eup %11014  ;;  %v7113_v36 = vmul.f32 %v11013_v54, %v14699_v21  ;;  %9575 = vmatprep.subr.mxu0 %v15386_v41  ;;  %v8646_v54 = vld [vmem:[#allocation5 + $0x58] sm:$0xff] }
0x1b4f   : > { %v7111_v31 = vmul.f32 %v11015_v28, %v14702_v14  ;;  %v7089_v55 = vpop.xlane.xlu0 %7088  ;;  %v9778_v28 = vpack.c.bf16 %v8646_v54, %v8645_v3  ;;  %v8649_v54 = vld [vmem:[#allocation5 + $0x70] sm:$0xff] }
0x1b50   : > { %11024 = vrcp.f32 %v7089_v55  ;;  %v7086_v7 = vpop.xlane.xlu1 %7085  ;;  %9573 = vmatmul.mubr.msk.f32.vlgmr.msra.gmra.mrb[30].mxu1 %vm6957_vm2, %v7113_v36  ;;  %v11116_v55 = vmov 1983009808  }
0x1b51   : > { %11026 = vrcp.f32 %v7086_v7  ;;  %9581 = vmatpush3.msra.mxu1 %v14532_v47  ;;  %9568 = vmatmul.mubr.msk.f32.vlgmr.msra.gmra.mrb[42].mxu0 %vm6957_vm2, %v7111_v31  ;;  %v8305_v7 = vunpack.c.l.s4 %v11116_v55  ;;  %v9784_v55 = vpack.c.bf16 %v8666_v20, %v8665_v24 }
0x1b52   : > { %v11017_v48 = vpop.eup %11016  ;;  %9576 = vmatpush3.msra.mxu0 %v14527_v34  ;;  %9582 = vmatprep.mubr.msk.f32.mxu1 %vm11115_vm3, %v15386_v41 }
0x1b53   : > { %v11019_v21 = vpop.eup %11018  ;;  %v7117_v58 = vmul.f32 %v11017_v48, %v14710_v43  ;;  %v7095_v14 = vpop.xlane.xlu0 %7094  ;;  %9590 = vmatprep.subr.mxu1 %v15386_v41  ;;  %9577 = vmatprep.mubr.msk.f32.mxu0 %vm11115_vm3, %v15386_v41  ;;  %v8307_v48 = vlaneseq }
0x1b54   : > { %v7115_v35 = vmul.f32 %v11019_v21, %v14712_v27  ;;  %11028 = vrcp.f32 %v7095_v14  ;;  %v7092_v47 = vpop.xlane.xlu1 %7091  ;;  %9585 = vmatprep.subr.mxu0 %v15386_v41  ;;  %v8306_v14 = vunpack.c.0.s8 %v8305_v7 }
0x1b55   : > { %11030 = vrcp.f32 %v7092_v47  ;;  %9583 = vmatmul.mubr.msk.f32.vlgmr.msra.gmra.mrb[32].mxu1 %vm6957_vm2, %v7117_v58 }
0x1b56   : > { %v11021_v34 = vpop.eup %11020  ;;  %9591 = vmatpush3.msra.mxu1 %v14541_v9  ;;  %9578 = vmatmul.mubr.msk.f32.vlgmr.msra.gmra.mrb[44].mxu0 %vm6957_vm2, %v7115_v35  ;;  %v8308_v35 = vshrl.u32 %v8307_v48, 7 }
0x1b57   : > { %v11023_v43 = vpop.eup %11022  ;;  %v7121_v42 = vmul.f32 %v11021_v34, %v14718_v8  ;;  %9586 = vmatpush3.msra.mxu0 %v14536_v11  ;;  %9592 = vmatprep.mubr.msk.f32.mxu1 %vm11115_vm3, %v15386_v41 }
0x1b58   : > { %v7119_v27 = vmul.f32 %v11023_v43, %v14720_v50  ;;  %9600 = vmatprep.subr.mxu1 %v15386_v41  ;;  %9587 = vmatprep.mubr.msk.f32.mxu0 %vm11115_vm3, %v15386_v41 }
0x1b59   : > { %9593 = vmatmul.mubr.msk.f32.vlgmr.msra.gmra.mrb[34].mxu1 %vm6957_vm2, %v7121_v42  ;;  %9595 = vmatprep.subr.mxu0 %v15386_v41 }
0x1b5a   : > { %v11025_v9 = vpop.eup %11024  ;;  %9601 = vmatpush3.msra.mxu1 %v14550_v39  ;;  %9588 = vmatmul.mubr.msk.f32.vlgmr.msra.gmra.mrb[46].mxu0 %vm6957_vm2, %v7119_v27  ;;  %v7101_v11 = vpop.xlane.xlu0 %7100  ;;  %v14842_v27 = vsub.s32 %v8306_v14, %v8308_v35 }
0x1b5b   : > { %v11027_v8 = vpop.eup %11026  ;;  %v7125_v52 = vmul.f32 %v11025_v9, %v14728_v56  ;;  %9596 = vmatpush3.msra.mxu0 %v14545_v45  ;;  %11032 = vrcp.f32 %v7101_v11  ;;  %v7098_v50 = vpop.xlane.xlu1 %7097  ;;  %9602 = vmatprep.mubr.msk.f32.mxu1 %vm11115_vm3, %v15386_v41  ;;  %v8652_v56 = vld [vmem:[#allocation5 + $0x88] sm:$0xff] }
0x1b5c   : > { %v7123_v15 = vmul.f32 %v11027_v8, %v14730_v57  ;;  %11034 = vrcp.f32 %v7098_v50  ;;  %9610 = vmatprep.subr.mxu1 %v15386_v41  ;;  %9597 = vmatprep.mubr.msk.f32.mxu0 %vm11115_vm3, %v15386_v41  ;;  %v8636_v57 = vld [vmem:[#allocation5 + $0x8] sm:$0xff] }
0x1b5d   : > { %9603 = vmatmul.mubr.msk.f32.vlgmr.msra.gmra.mrb[36].mxu1 %vm6957_vm2, %v7125_v52  ;;  %9605 = vmatprep.subr.mxu0 %v15386_v41 }
0x1b5e   : > { %v11029_v39 = vpop.eup %11028  ;;  %9611 = vmatpush3.msra.mxu1 %v14559_v25  ;;  %9598 = vmatmul.mubr.msk.f32.vlgmr.msra.gmra.mrb[48].mxu0 %vm6957_vm2, %v7123_v15 }
0x1b5f   : > { %v11031_v45 = vpop.eup %11030  ;;  %v7129_v2 = vmul.f32 %v11029_v39, %v14738_v19  ;;  %9606 = vmatpush3.msra.mxu0 %v14554_v18  ;;  %9612 = vmatprep.mubr.msk.f32.mxu1 %vm11115_vm3, %v15386_v41  ;;  %v9758_v19 = vpack.c.bf16 %v8636_v57, %v8635_v30 }
0x1b60   : > { %v7127_v26 = vmul.f32 %v11031_v45, %v14742_v0  ;;  %9620 = vmatprep.subr.mxu1 %v15386_v41  ;;  %9607 = vmatprep.mubr.msk.f32.mxu0 %vm11115_vm3, %v15386_v41  ;;  %v9760_v0 = vpack.c.bf16 %v8654_v23, %v8653_v16 }
0x1b61   : > { %9613 = vmatmul.mubr.msk.f32.vlgmr.msra.gmra.mrb[38].mxu1 %vm6957_vm2, %v7129_v2  ;;  %9615 = vmatprep.subr.mxu0 %v15386_v41  ;;  %v11117_v2 = vmov 1934713408  }
0x1b62   : > { %9621 = vmatpush3.msra.mxu1 %v14567_v5  ;;  %9608 = vmatmul.mubr.msk.f32.vlgmr.msra.gmra.mrb[50].mxu0 %vm6957_vm2, %v7127_v26  ;;  %v8651_v5 = vld [vmem:[#allocation5 + $0x80] sm:$0xff]  ;;  %v8369_v26 = vunpack.c.l.s4 %v11117_v2 }
0x1b63   : > { %9616 = vmatpush3.msra.mxu0 %v14563_v29  ;;  %9622 = vmatprep.mubr.msk.f32.mxu1 %vm11115_vm3, %v15386_v41  ;;  %v9756_v29 = vpack.c.bf16 %v8652_v56, %v8651_v5 }
0x1b64   : > { %9617 = vmatprep.mubr.msk.f32.mxu0 %vm11115_vm3, %v15386_v41  ;;  %v8637_v41 = vld [vmem:[#allocation5 + $0x10] sm:$0xff]  ;;  %v8370_v57 = vunpack.c.0.s8 %v8369_v26 }
0x1b65   : > { %v11033_v18 = vpop.eup %11032  ;;  %9757 = vmatprep.subr.bf16.mxu0 %v9756_v29 }
0x1b66   : > { %v11035_v25 = vpop.eup %11034  ;;  %v7133_v51 = vmul.f32 %v11033_v18, %v14748_v13  ;;  %v8656_v13 = vld [vmem:[#allocation5 + $0xa8] sm:$0xff]  ;;  %v14848_v12 = vsub.s32 %v8370_v57, %v8308_v35 }
0x1b67   : > { %v7131_v6 = vmul.f32 %v11035_v25, %v14750_v61  ;;  %v9762_v61 = vpack.c.bf16 %v8638_v46, %v8637_v41  ;;  %v9764_v60 = vpack.c.bf16 %v8656_v13, %v8655_v37  ;;  %v8663_v46 = vld [vmem:[#allocation5 + $0xe0] sm:$0xff]  ;;  %v8664_v37 = vld [vmem:[#allocation5 + $0xe8] sm:$0xff] }
0x1b68   : > { %9623 = vmatmul.mubr.msk.f32.vlgmr.msra.gmra.mrb[40].mxu1 %vm6957_vm2, %v7133_v51  ;;  %v9780_v53 = vpack.c.bf16 %v8664_v37, %v8663_v46 }
0x1b69   : > { %9618 = vmatmul.mubr.msk.f32.vlgmr.msra.gmra.mrb[52].mxu0 %vm6957_vm2, %v7131_v6 }
0x1b6a   : > { %9759 = vmatpush3.bf16.msra.mxu0 %v9758_v19 }
0x1b6b   : > { %9761 = vmatprep.subr.bf16.mxu0 %v9760_v0 }
0x1b6e   : > { %9763 = vmatpush3.bf16.msra.mxu0 %v9762_v61 }
0x1b6f   : > { %9765 = vmatprep.subr.bf16.mxu0 %v9764_v60 }
0x1b72   : > { %9767 = vmatpush3.bf16.msra.mxu0 %v9766_v63 }
0x1b73   : > { %9769 = vmatprep.subr.bf16.mxu0 %v9768_v22 }
0x1b76   : > { %9771 = vmatpush3.bf16.msra.mxu0 %v9770_v49 }
0x1b77   : > { %9773 = vmatprep.subr.bf16.mxu0 %v9772_v38 }
0x1b7a   : > { %9775 = vmatpush3.bf16.msra.mxu0 %v9774_v44 }
0x1b7b   : > { %9777 = vmatprep.subr.bf16.mxu0 %v9776_v33 }
0x1b7e   : > { %9779 = vmatpush3.bf16.msra.mxu0 %v9778_v28  ;;  %v8650_v28 = vld [vmem:[#allocation5 + $0x78] sm:$0xff] }
0x1b7f   : > { %9781 = vmatprep.subr.bf16.mxu0 %v9780_v53  ;;  %v9786_v7 = vpack.c.bf16 %v8650_v28, %v8649_v54 }
0x1b82   : > { %9783 = vmatpush3.bf16.msra.mxu0 %v9782_v10 }
0x1b83   : > { %9785 = vmatprep.subr.bf16.mxu0 %v9784_v55 }
0x1b86   : > { %9787 = vmatpush3.bf16.msra.mxu0 %v9786_v7 }
0x1c14   : > { %v7203_v36 = vpop.f32.mrb[36].mxu0 }
0x1c15   : > { %v9549_v31 = vpop.f32.mrb[37].mxu0 }
0x1c18   : > { %v7276_v21 = vpop.f32.mrb[38].mxu0 }
0x1c19   : > { %v9554_v58 = vpop.f32.mrb[39].mxu0 }
0x1c1b   : > { %v7422_v47 = vpop.f32.mrb[28].mxu1 }
0x1c1c   : > { %v8318_v34 = vcombine.low %v7276_v21, %v7422_v47  ;;  %v8319_v43 = vcombine.high %v7276_v21, %v7422_v47  ;;  %v9564_v42 = vpop.f32.mrb[29].mxu1 }
0x1c1e   : > { %v8326_v50 = vrot.slane %v8318_v34, %v14842_v27  ;;  %v8333_v15 = vrot.slane %v8319_v43, %v14842_v27 }
0x1c1f   : > { %v7349_v9 = vpop.f32.mrb[40].mxu0 }
0x1c20   : > { %v8302_v11 = vcombine.low %v7203_v36, %v7349_v9  ;;  %v8303_v8 = vcombine.high %v7203_v36, %v7349_v9  ;;  %v9559_v52 = vpop.f32.mrb[41].mxu0 }
0x1c22   : > { %v8310_v39 = vrot.slane %v8302_v11, %v14842_v27  ;;  %v8317_v45 = vrot.slane %v8303_v8, %v14842_v27 }
0x1c23   : > { %v7568_v18 = vpop.f32.mrb[30].mxu1 }
0x1c24   : > { %v8366_v25 = vcombine.low %v8310_v39, %v8326_v50  ;;  %v8367_v51 = vcombine.high %v8310_v39, %v8326_v50  ;;  %v8382_v6 = vcombine.low %v8317_v45, %v8333_v15  ;;  %v8383_v5 = vcombine.high %v8317_v45, %v8333_v15  ;;  %v7495_v56 = vpop.f32.mrb[42].mxu0  ;;  %v9574_v30 = vpop.f32.mrb[31].mxu1 }
0x1c25   : > { %v9569_v29 = vpop.f32.mrb[43].mxu0 }
0x1c26   : > { %v14855_v36 = vrot.slane %v8366_v25, %v14848_v12  ;;  %v14858_v31 = vrot.slane %v8382_v6, %v14848_v12  ;;  %v8381_v47 = vrot.slane %v8367_v51, %v14848_v12  ;;  %v8397_v34 = vrot.slane %v8383_v5, %v14848_v12 }
0x1c28   : > { %v7714_v16 = vpop.f32.mrb[32].mxu1 }
0x1c29   : > { %v8350_v23 = vcombine.low %v7568_v18, %v7714_v16  ;;  %v8351_v19 = vcombine.high %v7568_v18, %v7714_v16  ;;  %v7641_v0 = vpop.f32.mrb[44].mxu0  ;;  %v9584_v41 = vpop.f32.mrb[33].mxu1 }
0x1c2a   : > { %v8334_v13 = vcombine.low %v7495_v56, %v7641_v0  ;;  %v8335_v61 = vcombine.high %v7495_v56, %v7641_v0  ;;  %v9579_v60 = vpop.f32.mrb[45].mxu0 }
0x1c2b   : > { %v8358_v63 = vrot.slane %v8350_v23, %v14842_v27  ;;  %v8365_v22 = vrot.slane %v8351_v19, %v14842_v27 }
0x1c2c   : > { %v8342_v1 = vrot.slane %v8334_v13, %v14842_v27  ;;  %v8349_v59 = vrot.slane %v8335_v61, %v14842_v27  ;;  %v7860_v32 = vpop.f32.mrb[34].mxu1 }
0x1c2d   : > { %v7787_v49 = vpop.f32.mrb[46].mxu0  ;;  %v9594_v38 = vpop.f32.mrb[35].mxu1 }
0x1c2e   : > { %v8398_v40 = vcombine.low %v8342_v1, %v8358_v63  ;;  %v8399_v4 = vcombine.high %v8342_v1, %v8358_v63  ;;  %v8414_v44 = vcombine.low %v8349_v59, %v8365_v22  ;;  %v8415_v33 = vcombine.high %v8349_v59, %v8365_v22  ;;  %v9589_v3 = vpop.f32.mrb[47].mxu0 }
0x1c30   : > { %v14861_v48 = vrot.slane %v8398_v40, %v14848_v12  ;;  %v8413_v21 = vrot.slane %v8399_v4, %v14848_v12  ;;  %v14865_v58 = vrot.slane %v8414_v44, %v14848_v12  ;;  %v8429_v14 = vrot.slane %v8415_v33, %v14848_v12  ;;  %v8006_v35 = vpop.f32.mrb[36].mxu1 }
0x1c31   : > { %v8454_v43 = vcombine.low %v7860_v32, %v8006_v35  ;;  %v8455_v42 = vcombine.high %v7860_v32, %v8006_v35  ;;  %v7933_v9 = vpop.f32.mrb[48].mxu0  ;;  %v9604_v11 = vpop.f32.mrb[37].mxu1 }
0x1c32   : > { %v8430_v8 = vcombine.low %v14855_v36, %v14861_v48  ;;  %v8434_v52 = vcombine.low %v14858_v31, %v14865_v58  ;;  %v8438_v50 = vcombine.low %v7787_v49, %v7933_v9  ;;  %v8439_v15 = vcombine.high %v7787_v49, %v7933_v9  ;;  %v9599_v39 = vpop.f32.mrb[49].mxu0 }
0x1c33   : > { %v8462_v45 = vrot.slane %v8454_v43, %v14842_v27  ;;  %v8469_v2 = vrot.slane %v8455_v42, %v14842_v27  ;;  %v8432_v26 = vcombine.low %v8381_v47, %v8413_v21  ;;  %v8436_v18 = vcombine.low %v8397_v34, %v8429_v14  ;;  %v8750_v43 = vld [vmem:[%s15000_s10 + $0x8] sm:$0xff]  ;;  %v8751_v42 = vld [vmem:[%s15000_s10 + $0x10] sm:$0xff] }
0x1c34   : > { %v8446_v25 = vrot.slane %v8438_v50, %v14842_v27  ;;  %v8453_v51 = vrot.slane %v8439_v15, %v14842_v27  ;;  %v8152_v6 = vpop.f32.mrb[38].mxu1  ;;  %v8431_v5 = vcombine.high %v14855_v36, %v14861_v48  ;;  %v8435_v56 = vcombine.high %v14858_v31, %v14865_v58  ;;  %v8752_v15 = vld [vmem:[%s15000_s10 + $0x18] sm:$0xff] }
0x1c35   : > { %v8079_v30 = vpop.f32.mrb[50].mxu0  ;;  %v9614_v29 = vpop.f32.mrb[39].mxu1  ;;  %v9891_v57 = vpack.i.bf16 %v8432_v26, %v8436_v18  ;;  %v8433_v16 = vcombine.high %v8381_v47, %v8413_v21  ;;  %v8437_v23 = vcombine.high %v8397_v34, %v8429_v14  ;;  %v8749_v34 = vld [vmem:[%s15000_s10] sm:$0xff] }
0x1c36   : > { %v8502_v19 = vcombine.low %v8446_v25, %v8462_v45  ;;  %v8503_v0 = vcombine.high %v8446_v25, %v8462_v45  ;;  %v8518_v41 = vcombine.low %v8453_v51, %v8469_v2  ;;  %v8519_v46 = vcombine.high %v8453_v51, %v8469_v2  ;;  %v9609_v37 = vpop.f32.mrb[51].mxu0 }
0x1c37   : > { %9892 = vrot.lane.b32.xlu0 %v9891_v57, %s11113_s27  ;;  %v9886_v13 = vpack.i.bf16 %v8431_v5, %v8435_v56  ;;  %v9896_v61 = vpack.i.bf16 %v8433_v16, %v8437_v23  ;;  %v9788_v45 = vpack.c.bf16 %v8750_v43, %v8749_v34  ;;  %v9792_v2 = vpack.c.bf16 %v8752_v15, %v8751_v42 }
0x1c38   : > { %v8510_v44 = vrot.slane %v8502_v19, %v14848_v12  ;;  %v8517_v33 = vrot.slane %v8503_v0, %v14848_v12  ;;  %v8526_v3 = vrot.slane %v8518_v41, %v14848_v12  ;;  %v8533_v54 = vrot.slane %v8519_v46, %v14848_v12 }
0x1c39   : > { %9887 = vrot.lane.b32.xlu1 %v9886_v13, %s11114_s14  ;;  %9789 = vmatprep.subr.bf16.mxu1 %v9788_v45 }
0x1c3a   : > { %9791 = vmatpush3.bf16.msra.mxu1 %v9788_v45 }
0x1c3b   : > { %v8298_v60 = vpop.f32.mrb[40].mxu1  ;;  %9793 = vmatprep.subr.bf16.mxu1 %v9792_v2 }
0x1c3c   : > { %v8486_v53 = vcombine.low %v8152_v6, %v8298_v60  ;;  %v8487_v62 = vcombine.high %v8152_v6, %v8298_v60  ;;  %v8225_v17 = vpop.f32.mrb[52].mxu0  ;;  %v9624_v63 = vpop.f32.mrb[41].mxu1 }
0x1c3d   : > { %9897 = vrot.lane.b32.xlu1 %v9896_v61, %s11118_s23  ;;  %v8470_v22 = vcombine.low %v8079_v30, %v8225_v17  ;;  %v8471_v10 = vcombine.high %v8079_v30, %v8225_v17  ;;  %v9619_v1 = vpop.f32.mrb[53].mxu0 }
0x1c3e   : > { %v8494_v59 = vrot.slane %v8486_v53, %v14842_v27  ;;  %v8501_v32 = vrot.slane %v8487_v62, %v14842_v27  ;;  %9795 = vmatpush3.bf16.msra.mxu1 %v9792_v2  ;;  %v8753_v1 = vld [vmem:[%s15000_s10 + $0x20] sm:$0xff] }
0x1c3f   : > { %v8478_v49 = vrot.slane %v8470_v22, %v14842_v27  ;;  %v8485_v38 = vrot.slane %v8471_v10, %v14842_v27 }
0x1c41   : > { %v8534_v24 = vcombine.low %v8478_v49, %v8494_v59  ;;  %v8535_v20 = vcombine.high %v8478_v49, %v8494_v59  ;;  %v8550_v40 = vcombine.low %v8485_v38, %v8501_v32  ;;  %v8551_v4 = vcombine.high %v8485_v38, %v8501_v32  ;;  %v8754_v59 = vld [vmem:[%s15000_s10 + $0x28] sm:$0xff]  ;;  %v8755_v49 = vld [vmem:[%s15000_s10 + $0x30] sm:$0xff]  ;;  %v8756_v38 = vld [vmem:[%s15000_s10 + $0x38] sm:$0xff] }
0x1c42   : > { %v9796_v32 = vpack.c.bf16 %v8754_v59, %v8753_v1 }
0x1c43   : > { %v8542_v28 = vrot.slane %v8534_v24, %v14848_v12  ;;  %v8549_v55 = vrot.slane %v8535_v20, %v14848_v12  ;;  %v8558_v7 = vrot.slane %v8550_v40, %v14848_v12  ;;  %v8565_v27 = vrot.slane %v8551_v4, %v14848_v12  ;;  %v8757_v20 = vld [vmem:[%s15000_s10 + $0x40] sm:$0xff]  ;;  %v8758_v40 = vld [vmem:[%s15000_s10 + $0x48] sm:$0xff]  ;;  %v8759_v4 = vld [vmem:[%s15000_s10 + $0x50] sm:$0xff] }
0x1c44   : > { %9797 = vmatprep.subr.bf16.mxu1 %v9796_v32  ;;  %v9800_v24 = vpack.c.bf16 %v8756_v38, %v8755_v49 }
0x1c45   : > { %v8566_v21 = vcombine.low %v8510_v44, %v8542_v28  ;;  %v8570_v14 = vcombine.low %v8526_v3, %v8558_v7  ;;  %v8568_v35 = vcombine.low %v8517_v33, %v8549_v55  ;;  %v8572_v47 = vcombine.low %v8533_v54, %v8565_v27  ;;  %9799 = vmatpush3.bf16.msra.mxu1 %v9796_v32 }
0x1c46   : > { %v8567_v9 = vcombine.high %v8510_v44, %v8542_v28  ;;  %v8571_v11 = vcombine.high %v8526_v3, %v8558_v7  ;;  %v8569_v50 = vcombine.high %v8517_v33, %v8549_v55  ;;  %v8573_v12 = vcombine.high %v8533_v54, %v8565_v27  ;;  %9801 = vmatprep.subr.bf16.mxu1 %v9800_v24  ;;  %v8760_v33 = vld [vmem:[%s15000_s10 + $0x58] sm:$0xff]  ;;  %v8761_v54 = vld [vmem:[%s15000_s10 + $0x60] sm:$0xff]  ;;  %v8762_v28 = vld [vmem:[%s15000_s10 + $0x68] sm:$0xff] }
0x1c47   : > { %v9906_v39 = vpack.i.bf16 %v8568_v35, %v8572_v47  ;;  %v9804_v44 = vpack.c.bf16 %v8758_v40, %v8757_v20  ;;  %v9808_v3 = vpack.c.bf16 %v8760_v33, %v8759_v4  ;;  %v9812_v55 = vpack.c.bf16 %v8762_v28, %v8761_v54  ;;  %v8763_v7 = vld [vmem:[%s15000_s10 + $0x70] sm:$0xff]  ;;  %v8764_v27 = vld [vmem:[%s15000_s10 + $0x78] sm:$0xff]  ;;  %v9148_v35 = vld [vmem:[%s14999_s9] ss:$0 sm:$0xff] }
0x1c48   : > { %v9901_v26 = vpack.i.bf16 %v8567_v9, %v8571_v11  ;;  %v9911_v18 = vpack.i.bf16 %v8569_v50, %v8573_v12  ;;  %v9149_v12 = vld [vmem:[%s15001_s11] ss:$0 sm:$0xff] }
0x1c49   : > { %9907 = vrot.lane.b32.xlu0 %v9906_v39, %s11113_s27  ;;  %9803 = vmatpush3.bf16.msra.mxu1 %v9800_v24 }
0x1c4a   : > { %9902 = vrot.lane.b32.xlu1 %v9901_v26, %s11114_s14  ;;  %9805 = vmatprep.subr.bf16.mxu1 %v9804_v44 }
0x1c4d   : > { %9807 = vmatpush3.bf16.msra.mxu1 %v9804_v44 }
0x1c4e   : > { %9912 = vrot.lane.b32.xlu1 %v9911_v18, %s11118_s23  ;;  %9809 = vmatprep.subr.bf16.mxu1 %v9808_v3 }
0x1c51   : > { %9811 = vmatpush3.bf16.msra.mxu1 %v9808_v3 }
0x1c52   : > { %9813 = vmatprep.subr.bf16.mxu1 %v9812_v55 }
0x1c55   : > { %9815 = vmatpush3.bf16.msra.mxu1 %v9812_v55 }
0x1ca9   : > { %v9893_v25 = vpop.permute.xlu0 %9892 }
0x1caa   : > { %v9895_v56 = vunpack.i.h.bf16 %v9893_v25  ;;  %v9894_v30 = vunpack.i.l.bf16 %v9893_v25 }
0x1cab   : > { %v9888_v51 = vpop.permute.xlu1 %9887 }
0x1cac   : > { %v9890_v6 = vunpack.i.h.bf16 %v9888_v51  ;;  %v9889_v5 = vunpack.i.l.bf16 %v9888_v51 }
0x1cae   : > { %v8622_v29 = vsel %vm500_vm0, %v8430_v8, %v9890_v6  ;;  %v8629_v57 = vsel %vm500_vm0, %v8434_v52, %v9889_v5 }
0x1caf   : > { %v9898_v16 = vpop.permute.xlu1 %9897  ;;  %v8631_v0 = vsel %vm6251_vm1, %v8629_v57, %v9894_v30  ;;  %v8624_v41 = vsel %vm6251_vm1, %v8622_v29, %v9895_v56 }
0x1cb0   : > { %v9900_v23 = vunpack.i.h.bf16 %v9898_v16  ;;  %v9899_v19 = vunpack.i.l.bf16 %v9898_v16 }
0x1cb2   : > { %v8633_v46 = vsel %vm8626_vm4, %v8631_v0, %v9899_v19  ;;  %v8627_v37 = vsel %vm8626_vm4, %v8624_v41, %v9900_v23 }
0x1cb3   : > { %8738 = vmatprep.mubr.f32.mxu0 %v8633_v46 }
0x1cb4   : > { %8739 = vmatmul.mubr.f32.vlgmr.msra.gmra.mrb[54].mxu0 %v8627_v37 }
0x1cbb   : > { %v9908_v36 = vpop.permute.xlu0 %9907 }
0x1cbc   : > { %v9903_v48 = vpop.permute.xlu1 %9902  ;;  %v9910_v58 = vunpack.i.h.bf16 %v9908_v36  ;;  %v9909_v52 = vunpack.i.l.bf16 %v9908_v36 }
0x1cbd   : > { %v9905_v8 = vunpack.i.h.bf16 %v9903_v48  ;;  %v9904_v31 = vunpack.i.l.bf16 %v9903_v48 }
0x1cbf   : > { %v8630_v13 = vsel %vm500_vm0, %v8570_v14, %v9904_v31  ;;  %v8623_v61 = vsel %vm500_vm0, %v8566_v21, %v9905_v8  ;;  %v9816_v21 = vpack.c.bf16 %v8764_v27, %v8763_v7  ;;  %vm8849_vm0 = vcmask 15360  }
0x1cc0   : > { %v9913_v60 = vpop.permute.xlu1 %9912  ;;  %v8632_v17 = vsel %vm6251_vm1, %v8630_v13, %v9909_v52  ;;  %v8625_v63 = vsel %vm6251_vm1, %v8623_v61, %v9910_v58 }
0x1cc1   : > { %v9915_v53 = vunpack.i.h.bf16 %v9913_v60  ;;  %v9914_v62 = vunpack.i.l.bf16 %v9913_v60  ;;  %9817 = vmatprep.subr.bf16.mxu1 %v9816_v21 }
0x1cc2   : > { %9819 = vmatpush3.bf16.msra.mxu1 %v9816_v21 }
0x1cc3   : > { %v8634_v22 = vsel %vm8626_vm4, %v8632_v17, %v9914_v62  ;;  %v8628_v10 = vsel %vm8626_vm4, %v8625_v63, %v9915_v53 }
0x1cc4   : > { %8743 = vmatprep.mubr.f32.mxu0 %v8634_v22 }
0x1cc5   : > { %8744 = vmatmul.mubr.f32.gmra.mrb[56].mxu0 %v8628_v10 }
0x1d87   : > { %v9329_v14 = vpop.f32.mrb[54].mxu0 }
0x1d88   : > { %v9330_v47 = vpop.f32.mrb[55].mxu0 }
0x1d89   : > { %v9331_v34 = vadd.f32 %v9330_v47, %v9329_v14 }
0x1d8b   : > { %v8741_v43 = vadd.f32 %v9331_v34, %v9148_v35 }
0x1d8d   : > { %9657 = vmatprep.mubr.f32.mxu1 %v8741_v43 }
0x1d98   : > { %v9332_v42 = vpop.f32.mrb[56].mxu0 }
0x1d99   : > { %v9333_v9 = vpop.f32.mrb[57].mxu0 }
0x1d9a   : > { %v9334_v11 = vadd.f32 %v9333_v9, %v9332_v42 }
0x1d9c   : > { %v8746_v50 = vadd.f32 %v9334_v11, %v9148_v35 }
0x1d9e   : > { %9658 = vmatmul.mubr.f32.vlgmr.msra.gmra.mrb[42].mxu1 %v8746_v50 }
0x1e71   : > { %v9659_v15 = vpop.f32.mrb[42].mxu1 }
0x1e72   : > { %v8844_v39 = vadd.f32 %v9659_v15, %v9149_v12  ;;  %v8838_v45 = vpop.f32.mrb[43].mxu1 }
0x1e73   : > { %v8839_v2 = vadd.f32 %v9149_v12, %v8838_v45 }
0x1e75   : > { %v8847_v26 = vadd.f32 %v8844_v39, %v8839_v2 }
0x1e77   : > { %v8848_v18 = vmul.f32 0.5, %v8847_v26 }
0x1e79   : > { %8850 = vst.msk [vmem:[%s472_s21] sm:$0xff] %vm8849_vm0, %v8848_v18 }
0x1e7a PF: > { %s15390_s24 = sld [smem:[#allocation13_spill]]  ;;  %s15391_s26 = sld [smem:[#allocation12_spill]] }
0x1e7b   : > { %s15392_s23 = sld [smem:[#allocation14_spill]]  ;;  %s15393_s21 = smov %s11094_s22 }
0x1e80   : > { %p23_p0 = scmp.ge.s32.totalorder %s15390_s24, 4   ;;  %s15394_s22 = smov %s15391_s26 }
0x1e82   :  { %25 = sbr.rel (!%p23_p0) target bundleno = 6 (0x6), region = 117 }
0x1e89   :  { %8870 = vsyncpa [#allocation4], 1 }
0x1e8a   :  { %8872 = vsyncpa [#allocation4 + $0x1], 1 }
0x1e8b   :  { %8873 = vsyncpa [#allocation6], 1 }

</bundles_post_ra>
